<compile_context>
chip_gen: v7x
topology: tpu7x:2x2x1
jax: 0.10.0
libtpu: 0.0.40
codegen_flags: <defaults>
</compile_context>

<pallas_src>
import jax
import jax.numpy as jnp
from jax import lax
from jax.experimental import pallas as pl
from jax.experimental.pallas import tpu as pltpu

F32 = jnp.float32

# ----- model / problem sizes (small, consistent with the module) -----
HIDDEN = 16          # config.hidden_size
EMBED = 16           # config.embed_size
VOCAB = 32           # len(vocab)
SEQ = 8              # source seq_len
BATCH = 2
YLEN = 6             # target length
MAX_OOV = 3          # == int(max(len_oovs)); static (JAX needs static shapes)
EPS = 1e-12          # config.eps
LAMBDA = 1.0         # config.LAMBDA
UNK_ID = 1           # id used by replace_oovs


def _vmem():
    return pl.BlockSpec(memory_space=pltpu.MemorySpace.VMEM)


# =====================================================================
# The single fused Pallas kernel
# =====================================================================

def _pgn_kernel(
    # data
    enc_emb_ref,   # (S*B, E)  time-major flattened encoder embeddings
    dec_emb_ref,   # (T*B, E)  time-major flattened decoder-input embeddings
    x_ref,         # (B, S)    int32 source ids (with OOV ids >= VOCAB)
    y_ref,         # (B, YLEN) int32 target ids
    # encoder bi-LSTM weights (pre-transposed for x @ W.T; bias = b_ih+b_hh)
    wih_f_ref, whh_f_ref, b_f_ref, wih_b_ref, whh_b_ref, b_b_ref,
    # decoder LSTM weights
    dwih_ref, dwhh_ref, db_ref,
    # attention weights (Wh / Ws split along the concat axis)
    wh_f_ref, wh_b_ref, ws_h_ref, ws_c_ref, ws_b_ref, wc_row_ref, v_row_ref,
    # output head (W1 split along the concat axis, W2)
    w1a_ref, w1b_ref, b1_ref, w2_ref, b2_ref,
    # pointer head (w_gen split into column pieces)
    wg_ctx_ref, wg_h_ref, wg_c_ref, wg_emb_ref, bg_ref,
    # output
    loss_ref,      # (1, 1) f32
    # VMEM scratch
    enc_out_scr,   # (B, S, 2H) encoder output, resident for all decoder steps
    enc_feat_scr,  # (B, S, 2H) Wh @ encoder output (hoisted out of the loop)
):
    B, S = x_ref.shape
    T = y_ref.shape[1] - 1
    H = dwhh_ref.shape[0]
    H2 = 2 * H
    V = w2_ref.shape[1]
    VEXT = V + MAX_OOV

    def dot(a, b):
        return jnp.dot(a, b, preferred_element_type=F32)

    def lstm_step(pre_gates, h, whh, c):
        # PyTorch gate order i, f, g, o.  pre_gates already holds x@Wih + bias.
        g = pre_gates + dot(h, whh)
        i = jax.nn.sigmoid(g[:, 0:H])
        f = jax.nn.sigmoid(g[:, H:2 * H])
        gg = jnp.tanh(g[:, 2 * H:3 * H])
        o = jax.nn.sigmoid(g[:, 3 * H:4 * H])
        c_new = f * c + i * gg
        h_new = o * jnp.tanh(c_new)
        return h_new, c_new

    # ---------------- Encoder (both directions, one launch) ----------------
    enc_emb = enc_emb_ref[...]                                    # (S*B, E)
    xw_f = dot(enc_emb, wih_f_ref[...]) + b_f_ref[...]            # (S*B, 4H)
    xw_b = dot(enc_emb, wih_b_ref[...]) + b_b_ref[...]            # (S*B, 4H)

    whh_f = whh_f_ref[...]
    whh_b = whh_b_ref[...]
    h_f = jnp.zeros((B, H), F32)
    c_f = jnp.zeros((B, H), F32)
    h_b = jnp.zeros((B, H), F32)
    c_b = jnp.zeros((B, H), F32)
    outs_f = [None] * S
    outs_b = [None] * S
    for t in range(S):                     # fwd/bwd interleaved for ILP
        h_f, c_f = lstm_step(xw_f[t * B:(t + 1) * B, :], h_f, whh_f, c_f)
        outs_f[t] = h_f
        tb = S - 1 - t
        h_b, c_b = lstm_step(xw_b[tb * B:(tb + 1) * B, :], h_b, whh_b, c_b)
        outs_b[tb] = h_b

    # Stash encoder output and its loop-invariant Wh projection in VMEM.
    wh_f = wh_f_ref[...]
    wh_b = wh_b_ref[...]
    for t in range(S):
        enc_out_scr[:, t:t + 1, 0:H] = outs_f[t][:, None, :]
        enc_out_scr[:, t:t + 1, H:H2] = outs_b[t][:, None, :]
        ef = dot(outs_f[t], wh_f) + dot(outs_b[t], wh_b)          # (B, 2H)
        enc_feat_scr[:, t:t + 1, :] = ef[:, None, :]

    enc_out = enc_out_scr[...]                                    # (B, S, 2H)
    enc_feat = enc_feat_scr[...]                                  # (B, S, 2H)

    # ReduceState: sum over directions.
    h_dec = h_f + h_b
    c_dec = c_f + c_b

    # ---------------- Decoder-loop-invariant prep ----------------
    dec_emb = dec_emb_ref[...]                                    # (T*B, E)
    dxw = dot(dec_emb, dwih_ref[...]) + db_ref[...]               # (T*B, 4H)

    x_ids = x_ref[...]
    y_ids = y_ref[...]
    pad_mask = (x_ids != 0).astype(F32)                           # (B, S)
    x_onehot = (x_ids[:, :, None] ==
                lax.broadcasted_iota(jnp.int32, (B, S, VEXT), 2)).astype(F32)
    tgt_iota = lax.broadcasted_iota(jnp.int32, (B, VEXT), 1)

    ws_h = ws_h_ref[...]
    ws_c = ws_c_ref[...]
    ws_bias = ws_b_ref[...]
    wc3 = wc_row_ref[...][:, None, :]                             # (1, 1, 2H)
    v3 = v_row_ref[...][:, None, :]                               # (1, 1, 2H)
    dwhh = dwhh_ref[...]
    w1a = w1a_ref[...]
    w1b = w1b_ref[...]
    b1 = b1_ref[...]
    w2 = w2_ref[...]
    b2 = b2_ref[...]
    wg_ctx = wg_ctx_ref[...]
    wg_h = wg_h_ref[...]
    wg_c = wg_c_ref[...]
    wg_e = wg_emb_ref[...]
    bg = bg_ref[...]

    coverage = jnp.zeros((B, S), F32)
    sample_loss = jnp.zeros((B, 1), F32)

    for t in range(T):                       # teacher forcing, unrolled
        # ---- attention (Wh*enc hoisted; Ws on (B,2H), not (B*S,2H)) ----
        dec_feat = dot(h_dec, ws_h) + dot(c_dec, ws_c) + ws_bias      # (B, 2H)
        att = jnp.tanh(enc_feat + dec_feat[:, None, :]
                       + coverage[:, :, None] * wc3)                  # (B,S,2H)
        score = jnp.sum(att * v3, axis=2)                             # (B, S)
        m = jnp.max(score, axis=1, keepdims=True)
        e = jnp.exp(score - m)
        attn = e / jnp.sum(e, axis=1, keepdims=True)
        attn = attn * pad_mask
        # EPS guards all-padded rows; for non-degenerate rows it is a no-op in f32.
        attn = attn / (jnp.sum(attn, axis=1, keepdims=True) + EPS)
        context = jnp.sum(attn[:, :, None] * enc_out, axis=1)         # (B, 2H)
        coverage = coverage + attn
        # NOTE: the reference module takes min against the *updated* coverage
        # (as returned by Attention.forward); kept for fidelity.
        cov_loss = jnp.sum(jnp.minimum(attn, coverage), axis=1, keepdims=True)

        # ---- decoder LSTM step (input projection precomputed) ----
        emb_t = dec_emb[t * B:(t + 1) * B, :]                         # (B, E)
        h_dec, c_dec = lstm_step(dxw[t * B:(t + 1) * B, :], h_dec, dwhh, c_dec)

        # ---- vocabulary distribution ----
        ff1 = dot(h_dec, w1a) + dot(context, w1b) + b1                # (B, H)
        ff2 = dot(ff1, w2) + b2                                       # (B, V)
        mv = jnp.max(ff2, axis=1, keepdims=True)
        ev = jnp.exp(ff2 - mv)
        p_vocab = ev / jnp.sum(ev, axis=1, keepdims=True)             # (B, V)

        # ---- p_gen on the MXU (split w_gen columns, no XLU reduces) ----
        pg = jax.nn.sigmoid(dot(context, wg_ctx) + dot(h_dec, wg_h)
                            + dot(c_dec, wg_c) + dot(emb_t, wg_e) + bg)
        pg = jnp.clip(pg, 0.001, 0.999)                               # (B, 1)

        # ---- pointer mixture, evaluated only at the target id ----
        attn_w = (1.0 - pg) * attn                                    # (B, S)
        scatter = jnp.sum(attn_w[:, :, None] * x_onehot, axis=1)      # (B, VEXT)
        tgt = y_ids[:, t + 1:t + 2]                                   # (B, 1)
        tgt_oh = (tgt == tgt_iota).astype(F32)                        # (B, VEXT)
        tprob = (jnp.sum(scatter * tgt_oh, axis=1, keepdims=True)
                 + pg * jnp.sum(p_vocab * tgt_oh[:, 0:V], axis=1, keepdims=True))

        step_mask = (tgt != 0).astype(F32)
        sample_loss = sample_loss + (-jnp.log(tprob + EPS)
                                     + LAMBDA * cov_loss) * step_mask

    seq_len = jnp.sum((y_ids != 0).astype(F32), axis=1, keepdims=True)  # (B, 1)
    loss_ref[...] = jnp.mean(sample_loss / seq_len, axis=0, keepdims=True)


# =====================================================================
# Wrapper (embedding gathers + the pallas_call; everything else is fused)
# =====================================================================

_WEIGHT_KEYS = (
    'enc_wih_f_t', 'enc_whh_f_t', 'enc_b_f',
    'enc_wih_b_t', 'enc_whh_b_t', 'enc_b_b',
    'dec_wih_t', 'dec_whh_t', 'dec_b',
    'wh_f_t', 'wh_b_t', 'ws_h_t', 'ws_c_t', 'ws_b', 'wc_row', 'v_row',
    'w1a_t', 'w1b_t', 'b1', 'w2_t', 'b2',
    'wg_ctx_c', 'wg_h_c', 'wg_c_c', 'wg_emb_c', 'bg',
)


def replace_oovs(tok):
    return jnp.where(tok >= VOCAB, jnp.int32(UNK_ID), tok)


def pgn_forward(params, x, y, len_oovs):
    """Mirror of PGN.forward (teacher_forcing=True). Returns the scalar batch loss."""
    del len_oovs  # TODO(synk): max_oov is taken as the static MAX_OOV (== int(max(len_oovs)))
    B, S = x.shape
    T = y.shape[1] - 1
    H = HIDDEN

    # Embedding gathers stay in XLA (data-dependent gather); everything else
    # runs inside the single fused Pallas kernel.
    x_copy = replace_oovs(x)
    enc_emb = jnp.take(params['emb_enc'], x_copy, axis=0)             # (B,S,E)
    enc_emb_tm = jnp.swapaxes(enc_emb, 0, 1).reshape(S * B, EMBED)    # time-major
    dec_in = replace_oovs(y[:, :T])
    dec_emb = jnp.take(params['emb_dec'], dec_in, axis=0)             # (B,T,E)
    dec_emb_tm = jnp.swapaxes(dec_emb, 0, 1).reshape(T * B, EMBED)

    weights = [params[k] for k in _WEIGHT_KEYS]
    n_in = 4 + len(weights)

    out = pl.pallas_call(
        _pgn_kernel,
        out_shape=jax.ShapeDtypeStruct((1, 1), F32),
        in_specs=[_vmem() for _ in range(n_in)],
        out_specs=_vmem(),
        scratch_shapes=[pltpu.VMEM((B, S, 2 * H), F32),
                        pltpu.VMEM((B, S, 2 * H), F32)],
    )(enc_emb_tm, dec_emb_tm, x, y, *weights)
    return out[0, 0]


# =====================================================================
# Deterministic parameter init (shapes match the PyTorch __init__)
# =====================================================================

def init_params(key):
    H, E, V = HIDDEN, EMBED, VOCAB
    ks = jax.random.split(key, 24)

    def w(k, shape, scale=0.1):
        return (scale * jax.random.normal(k, shape)).astype(F32)

    p = {}
    # embeddings
    p['emb_enc'] = w(ks[0], (V, E))
    p['emb_dec'] = w(ks[1], (V, E))
    # encoder bi-LSTM (weights stored pre-transposed for x @ W.T; b = b_ih + b_hh)
    p['enc_wih_f_t'] = w(ks[2], (4 * H, E)).T
    p['enc_whh_f_t'] = w(ks[3], (4 * H, H)).T
    p['enc_b_f'] = w(ks[4], (1, 4 * H))
    p['enc_wih_b_t'] = w(ks[5], (4 * H, E)).T
    p['enc_whh_b_t'] = w(ks[6], (4 * H, H)).T
    p['enc_b_b'] = w(ks[7], (1, 4 * H))
    # decoder LSTM
    p['dec_wih_t'] = w(ks[8], (4 * H, E)).T
    p['dec_whh_t'] = w(ks[9], (4 * H, H)).T
    p['dec_b'] = w(ks[10], (1, 4 * H))
    # attention: Wh (2H,2H no bias), Ws (2H,2H + bias), wc (2H,1 no bias), v (1,2H)
    wh_t = w(ks[11], (2 * H, 2 * H)).T          # acts on [h_fwd, h_bwd]
    p['wh_f_t'] = wh_t[:H, :]
    p['wh_b_t'] = wh_t[H:, :]
    ws_t = w(ks[12], (2 * H, 2 * H)).T          # acts on [h_dec, c_dec]
    p['ws_h_t'] = ws_t[:H, :]
    p['ws_c_t'] = ws_t[H:, :]
    p['ws_b'] = w(ks[13], (1, 2 * H))
    p['wc_row'] = w(ks[14], (2 * H, 1)).T       # (1, 2H)
    p['v_row'] = w(ks[15], (1, 2 * H))
    # decoder output: W1 (H, 3H), W2 (V, H)
    W1 = w(ks[16], (H, 3 * H))
    p['w1a_t'] = W1[:, :H].T                    # acts on decoder_output
    p['w1b_t'] = W1[:, H:].T                    # acts on context_vector
    p['b1'] = w(ks[17], (1, H))
    p['w2_t'] = w(ks[18], (V, H)).T
    p['b2'] = w(ks[19], (1, V))
    # pointer head: w_gen (1, 4H + E), stored as column pieces
    wg_t = w(ks[20], (1, 4 * H + E)).T          # (4H+E, 1)
    p['wg_ctx_c'] = wg_t[0:2 * H, :]
    p['wg_h_c'] = wg_t[2 * H:3 * H, :]
    p['wg_c_c'] = wg_t[3 * H:4 * H, :]
    p['wg_emb_c'] = wg_t[4 * H:, :]
    p['bg'] = w(ks[21], (1, 1))
    return p


if __name__ == "__main__":
    key = jax.random.PRNGKey(0)
    pkey, xkey, ykey = jax.random.split(key, 3)
    params = init_params(pkey)

    # source sequence with a couple of OOV ids (>= VOCAB) and trailing padding
    x = jax.random.randint(xkey, (BATCH, SEQ), 1, VOCAB + MAX_OOV, dtype=jnp.int32)
    x = x.at[1, -2:].set(0)
    # target sequence, in-vocab, with one pad at the end of row 1
    y = jax.random.randint(ykey, (BATCH, YLEN), 1, VOCAB, dtype=jnp.int32)
    y = y.at[1, -1].set(0)
    len_oovs = jnp.array([2, MAX_OOV], dtype=jnp.int32)

    loss = jax.jit(pgn_forward)(params, x, y, len_oovs)
    jax.block_until_ready(loss)
    assert loss.shape == () and jnp.isfinite(loss)
    print("KERNEL_OK")
</pallas_src>

<mosaic_0001>
module attributes {stable_mosaic.version = 11 : i64} {
  func.func @_pgn_kernel(%arg0: memref<16x16xf32, #tpu.memory_space<vmem>>, %arg1: memref<10x16xf32, #tpu.memory_space<vmem>>, %arg2: memref<2x8xi32, #tpu.memory_space<vmem>>, %arg3: memref<2x6xi32, #tpu.memory_space<vmem>>, %arg4: memref<16x64xf32, #tpu.memory_space<vmem>>, %arg5: memref<16x64xf32, #tpu.memory_space<vmem>>, %arg6: memref<1x64xf32, #tpu.memory_space<vmem>>, %arg7: memref<16x64xf32, #tpu.memory_space<vmem>>, %arg8: memref<16x64xf32, #tpu.memory_space<vmem>>, %arg9: memref<1x64xf32, #tpu.memory_space<vmem>>, %arg10: memref<16x64xf32, #tpu.memory_space<vmem>>, %arg11: memref<16x64xf32, #tpu.memory_space<vmem>>, %arg12: memref<1x64xf32, #tpu.memory_space<vmem>>, %arg13: memref<16x32xf32, #tpu.memory_space<vmem>>, %arg14: memref<16x32xf32, #tpu.memory_space<vmem>>, %arg15: memref<16x32xf32, #tpu.memory_space<vmem>>, %arg16: memref<16x32xf32, #tpu.memory_space<vmem>>, %arg17: memref<1x32xf32, #tpu.memory_space<vmem>>, %arg18: memref<1x32xf32, #tpu.memory_space<vmem>>, %arg19: memref<1x32xf32, #tpu.memory_space<vmem>>, %arg20: memref<16x16xf32, #tpu.memory_space<vmem>>, %arg21: memref<32x16xf32, #tpu.memory_space<vmem>>, %arg22: memref<1x16xf32, #tpu.memory_space<vmem>>, %arg23: memref<16x32xf32, #tpu.memory_space<vmem>>, %arg24: memref<1x32xf32, #tpu.memory_space<vmem>>, %arg25: memref<32x1xf32, #tpu.memory_space<vmem>>, %arg26: memref<16x1xf32, #tpu.memory_space<vmem>>, %arg27: memref<16x1xf32, #tpu.memory_space<vmem>>, %arg28: memref<16x1xf32, #tpu.memory_space<vmem>>, %arg29: memref<1x1xf32, #tpu.memory_space<vmem>>, %arg30: memref<1x1xf32, #tpu.memory_space<vmem>>, %arg31: memref<2x8x32xf32, #tpu.memory_space<vmem>>, %arg32: memref<2x8x32xf32, #tpu.memory_space<vmem>>) attributes {dimension_semantics = [], scalar_prefetch = 0 : i64, scratch_operands = 2 : i64, tpu.core_type = #tpu.core_type<tc>} {
    %c0 = arith.constant 0 : index
    %c0_0 = arith.constant 0 : index
    %0 = vector.load %arg0[%c0, %c0_0] : memref<16x16xf32, #tpu.memory_space<vmem>>, vector<16x16xf32>
    %c0_1 = arith.constant 0 : index
    %c0_2 = arith.constant 0 : index
    %1 = vector.load %arg4[%c0_1, %c0_2] : memref<16x64xf32, #tpu.memory_space<vmem>>, vector<16x64xf32>
    %cst = arith.constant dense<0.000000e+00> : vector<16x64xf32>
    %2 = tpu.matmul %0, %1, %cst {dimension_numbers = #tpu.dot_dimension_numbers<[1], [0], [0], [1], [0, 0, 1, 1], [], []>} : vector<16x16xf32>, vector<16x64xf32>, vector<16x64xf32> -> vector<16x64xf32>
    %c0_3 = arith.constant 0 : index
    %c0_4 = arith.constant 0 : index
    %3 = vector.load %arg6[%c0_3, %c0_4] : memref<1x64xf32, #tpu.memory_space<vmem>>, vector<1x64xf32>
    %4 = vector.broadcast %3 : vector<1x64xf32> to vector<16x64xf32>
    %5 = arith.addf %2, %4 : vector<16x64xf32>
    %c0_5 = arith.constant 0 : index
    %c0_6 = arith.constant 0 : index
    %6 = vector.load %arg7[%c0_5, %c0_6] : memref<16x64xf32, #tpu.memory_space<vmem>>, vector<16x64xf32>
    %cst_7 = arith.constant dense<0.000000e+00> : vector<16x64xf32>
    %7 = tpu.matmul %0, %6, %cst_7 {dimension_numbers = #tpu.dot_dimension_numbers<[1], [0], [0], [1], [0, 0, 1, 1], [], []>} : vector<16x16xf32>, vector<16x64xf32>, vector<16x64xf32> -> vector<16x64xf32>
    %c0_8 = arith.constant 0 : index
    %c0_9 = arith.constant 0 : index
    %8 = vector.load %arg9[%c0_8, %c0_9] : memref<1x64xf32, #tpu.memory_space<vmem>>, vector<1x64xf32>
    %9 = vector.broadcast %8 : vector<1x64xf32> to vector<16x64xf32>
    %10 = arith.addf %7, %9 : vector<16x64xf32>
    %c0_10 = arith.constant 0 : index
    %c0_11 = arith.constant 0 : index
    %11 = vector.load %arg5[%c0_10, %c0_11] : memref<16x64xf32, #tpu.memory_space<vmem>>, vector<16x64xf32>
    %c0_12 = arith.constant 0 : index
    %c0_13 = arith.constant 0 : index
    %12 = vector.load %arg8[%c0_12, %c0_13] : memref<16x64xf32, #tpu.memory_space<vmem>>, vector<16x64xf32>
    %cst_14 = arith.constant 0.000000e+00 : f32
    %13 = vector.broadcast %cst_14 : f32 to vector<2x16xf32>
    %cst_15 = arith.constant 0.000000e+00 : f32
    %14 = vector.broadcast %cst_15 : f32 to vector<2x16xf32>
    %cst_16 = arith.constant 0.000000e+00 : f32
    %15 = vector.broadcast %cst_16 : f32 to vector<2x16xf32>
    %cst_17 = arith.constant 0.000000e+00 : f32
    %16 = vector.broadcast %cst_17 : f32 to vector<2x16xf32>
    %17 = vector.extract_strided_slice %5 {offsets = [0, 0], sizes = [2, 64], strides = [1, 1]} : vector<16x64xf32> to vector<2x64xf32>
    %cst_18 = arith.constant dense<0.000000e+00> : vector<2x64xf32>
    %18 = tpu.matmul %13, %11, %cst_18 {dimension_numbers = #tpu.dot_dimension_numbers<[1], [0], [0], [1], [0, 0, 1, 1], [], []>} : vector<2x16xf32>, vector<16x64xf32>, vector<2x64xf32> -> vector<2x64xf32>
    %19 = arith.addf %17, %18 : vector<2x64xf32>
    %20 = vector.extract_strided_slice %19 {offsets = [0, 0], sizes = [2, 16], strides = [1, 1]} : vector<2x64xf32> to vector<2x16xf32>
    %21 = arith.negf %20 : vector<2x16xf32>
    %22 = math.exp %21 : vector<2x16xf32>
    %cst_19 = arith.constant 1.000000e+00 : f32
    %23 = vector.broadcast %cst_19 : f32 to vector<2x16xf32>
    %24 = arith.addf %23, %22 : vector<2x16xf32>
    %25 = arith.divf %23, %24 : vector<2x16xf32>
    %26 = vector.extract_strided_slice %19 {offsets = [0, 16], sizes = [2, 16], strides = [1, 1]} : vector<2x64xf32> to vector<2x16xf32>
    %27 = arith.negf %26 : vector<2x16xf32>
    %28 = math.exp %27 : vector<2x16xf32>
    %cst_20 = arith.constant 1.000000e+00 : f32
    %29 = vector.broadcast %cst_20 : f32 to vector<2x16xf32>
    %30 = arith.addf %29, %28 : vector<2x16xf32>
    %31 = arith.divf %29, %30 : vector<2x16xf32>
    %32 = vector.extract_strided_slice %19 {offsets = [0, 32], sizes = [2, 16], strides = [1, 1]} : vector<2x64xf32> to vector<2x16xf32>
    %33 = math.tanh %32 : vector<2x16xf32>
    %34 = vector.extract_strided_slice %19 {offsets = [0, 48], sizes = [2, 16], strides = [1, 1]} : vector<2x64xf32> to vector<2x16xf32>
    %35 = arith.negf %34 : vector<2x16xf32>
    %36 = math.exp %35 : vector<2x16xf32>
    %cst_21 = arith.constant 1.000000e+00 : f32
    %37 = vector.broadcast %cst_21 : f32 to vector<2x16xf32>
    %38 = arith.addf %37, %36 : vector<2x16xf32>
    %39 = arith.divf %37, %38 : vector<2x16xf32>
    %40 = arith.mulf %31, %14 : vector<2x16xf32>
    %41 = arith.mulf %25, %33 : vector<2x16xf32>
    %42 = arith.addf %40, %41 : vector<2x16xf32>
    %43 = math.tanh %42 : vector<2x16xf32>
    %44 = arith.mulf %39, %43 : vector<2x16xf32>
    %45 = vector.extract_strided_slice %10 {offsets = [14, 0], sizes = [2, 64], strides = [1, 1]} : vector<16x64xf32> to vector<2x64xf32>
    %cst_22 = arith.constant dense<0.000000e+00> : vector<2x64xf32>
    %46 = tpu.matmul %15, %12, %cst_22 {dimension_numbers = #tpu.dot_dimension_numbers<[1], [0], [0], [1], [0, 0, 1, 1], [], []>} : vector<2x16xf32>, vector<16x64xf32>, vector<2x64xf32> -> vector<2x64xf32>
    %47 = arith.addf %45, %46 : vector<2x64xf32>
    %48 = vector.extract_strided_slice %47 {offsets = [0, 0], sizes = [2, 16], strides = [1, 1]} : vector<2x64xf32> to vector<2x16xf32>
    %49 = arith.negf %48 : vector<2x16xf32>
    %50 = math.exp %49 : vector<2x16xf32>
    %cst_23 = arith.constant 1.000000e+00 : f32
    %51 = vector.broadcast %cst_23 : f32 to vector<2x16xf32>
    %52 = arith.addf %51, %50 : vector<2x16xf32>
    %53 = arith.divf %51, %52 : vector<2x16xf32>
    %54 = vector.extract_strided_slice %47 {offsets = [0, 16], sizes = [2, 16], strides = [1, 1]} : vector<2x64xf32> to vector<2x16xf32>
    %55 = arith.negf %54 : vector<2x16xf32>
    %56 = math.exp %55 : vector<2x16xf32>
    %cst_24 = arith.constant 1.000000e+00 : f32
    %57 = vector.broadcast %cst_24 : f32 to vector<2x16xf32>
    %58 = arith.addf %57, %56 : vector<2x16xf32>
    %59 = arith.divf %57, %58 : vector<2x16xf32>
    %60 = vector.extract_strided_slice %47 {offsets = [0, 32], sizes = [2, 16], strides = [1, 1]} : vector<2x64xf32> to vector<2x16xf32>
    %61 = math.tanh %60 : vector<2x16xf32>
    %62 = vector.extract_strided_slice %47 {offsets = [0, 48], sizes = [2, 16], strides = [1, 1]} : vector<2x64xf32> to vector<2x16xf32>
    %63 = arith.negf %62 : vector<2x16xf32>
    %64 = math.exp %63 : vector<2x16xf32>
    %cst_25 = arith.constant 1.000000e+00 : f32
    %65 = vector.broadcast %cst_25 : f32 to vector<2x16xf32>
    %66 = arith.addf %65, %64 : vector<2x16xf32>
    %67 = arith.divf %65, %66 : vector<2x16xf32>
    %68 = arith.mulf %59, %16 : vector<2x16xf32>
    %69 = arith.mulf %53, %61 : vector<2x16xf32>
    %70 = arith.addf %68, %69 : vector<2x16xf32>
    %71 = math.tanh %70 : vector<2x16xf32>
    %72 = arith.mulf %67, %71 : vector<2x16xf32>
    %73 = vector.extract_strided_slice %5 {offsets = [2, 0], sizes = [2, 64], strides = [1, 1]} : vector<16x64xf32> to vector<2x64xf32>
    %cst_26 = arith.constant dense<0.000000e+00> : vector<2x64xf32>
    %74 = tpu.matmul %44, %11, %cst_26 {dimension_numbers = #tpu.dot_dimension_numbers<[1], [0], [0], [1], [0, 0, 1, 1], [], []>} : vector<2x16xf32>, vector<16x64xf32>, vector<2x64xf32> -> vector<2x64xf32>
    %75 = arith.addf %73, %74 : vector<2x64xf32>
    %76 = vector.extract_strided_slice %75 {offsets = [0, 0], sizes = [2, 16], strides = [1, 1]} : vector<2x64xf32> to vector<2x16xf32>
    %77 = arith.negf %76 : vector<2x16xf32>
    %78 = math.exp %77 : vector<2x16xf32>
    %cst_27 = arith.constant 1.000000e+00 : f32
    %79 = vector.broadcast %cst_27 : f32 to vector<2x16xf32>
    %80 = arith.addf %79, %78 : vector<2x16xf32>
    %81 = arith.divf %79, %80 : vector<2x16xf32>
    %82 = vector.extract_strided_slice %75 {offsets = [0, 16], sizes = [2, 16], strides = [1, 1]} : vector<2x64xf32> to vector<2x16xf32>
    %83 = arith.negf %82 : vector<2x16xf32>
    %84 = math.exp %83 : vector<2x16xf32>
    %cst_28 = arith.constant 1.000000e+00 : f32
    %85 = vector.broadcast %cst_28 : f32 to vector<2x16xf32>
    %86 = arith.addf %85, %84 : vector<2x16xf32>
    %87 = arith.divf %85, %86 : vector<2x16xf32>
    %88 = vector.extract_strided_slice %75 {offsets = [0, 32], sizes = [2, 16], strides = [1, 1]} : vector<2x64xf32> to vector<2x16xf32>
    %89 = math.tanh %88 : vector<2x16xf32>
    %90 = vector.extract_strided_slice %75 {offsets = [0, 48], sizes = [2, 16], strides = [1, 1]} : vector<2x64xf32> to vector<2x16xf32>
    %91 = arith.negf %90 : vector<2x16xf32>
    %92 = math.exp %91 : vector<2x16xf32>
    %cst_29 = arith.constant 1.000000e+00 : f32
    %93 = vector.broadcast %cst_29 : f32 to vector<2x16xf32>
    %94 = arith.addf %93, %92 : vector<2x16xf32>
    %95 = arith.divf %93, %94 : vector<2x16xf32>
    %96 = arith.mulf %87, %42 : vector<2x16xf32>
    %97 = arith.mulf %81, %89 : vector<2x16xf32>
    %98 = arith.addf %96, %97 : vector<2x16xf32>
    %99 = math.tanh %98 : vector<2x16xf32>
    %100 = arith.mulf %95, %99 : vector<2x16xf32>
    %101 = vector.extract_strided_slice %10 {offsets = [12, 0], sizes = [2, 64], strides = [1, 1]} : vector<16x64xf32> to vector<2x64xf32>
    %cst_30 = arith.constant dense<0.000000e+00> : vector<2x64xf32>
    %102 = tpu.matmul %72, %12, %cst_30 {dimension_numbers = #tpu.dot_dimension_numbers<[1], [0], [0], [1], [0, 0, 1, 1], [], []>} : vector<2x16xf32>, vector<16x64xf32>, vector<2x64xf32> -> vector<2x64xf32>
    %103 = arith.addf %101, %102 : vector<2x64xf32>
    %104 = vector.extract_strided_slice %103 {offsets = [0, 0], sizes = [2, 16], strides = [1, 1]} : vector<2x64xf32> to vector<2x16xf32>
    %105 = arith.negf %104 : vector<2x16xf32>
    %106 = math.exp %105 : vector<2x16xf32>
    %cst_31 = arith.constant 1.000000e+00 : f32
    %107 = vector.broadcast %cst_31 : f32 to vector<2x16xf32>
    %108 = arith.addf %107, %106 : vector<2x16xf32>
    %109 = arith.divf %107, %108 : vector<2x16xf32>
    %110 = vector.extract_strided_slice %103 {offsets = [0, 16], sizes = [2, 16], strides = [1, 1]} : vector<2x64xf32> to vector<2x16xf32>
    %111 = arith.negf %110 : vector<2x16xf32>
    %112 = math.exp %111 : vector<2x16xf32>
    %cst_32 = arith.constant 1.000000e+00 : f32
    %113 = vector.broadcast %cst_32 : f32 to vector<2x16xf32>
    %114 = arith.addf %113, %112 : vector<2x16xf32>
    %115 = arith.divf %113, %114 : vector<2x16xf32>
    %116 = vector.extract_strided_slice %103 {offsets = [0, 32], sizes = [2, 16], strides = [1, 1]} : vector<2x64xf32> to vector<2x16xf32>
    %117 = math.tanh %116 : vector<2x16xf32>
    %118 = vector.extract_strided_slice %103 {offsets = [0, 48], sizes = [2, 16], strides = [1, 1]} : vector<2x64xf32> to vector<2x16xf32>
    %119 = arith.negf %118 : vector<2x16xf32>
    %120 = math.exp %119 : vector<2x16xf32>
    %cst_33 = arith.constant 1.000000e+00 : f32
    %121 = vector.broadcast %cst_33 : f32 to vector<2x16xf32>
    %122 = arith.addf %121, %120 : vector<2x16xf32>
    %123 = arith.divf %121, %122 : vector<2x16xf32>
    %124 = arith.mulf %115, %70 : vector<2x16xf32>
    %125 = arith.mulf %109, %117 : vector<2x16xf32>
    %126 = arith.addf %124, %125 : vector<2x16xf32>
    %127 = math.tanh %126 : vector<2x16xf32>
    %128 = arith.mulf %123, %127 : vector<2x16xf32>
    %129 = vector.extract_strided_slice %5 {offsets = [4, 0], sizes = [2, 64], strides = [1, 1]} : vector<16x64xf32> to vector<2x64xf32>
    %cst_34 = arith.constant dense<0.000000e+00> : vector<2x64xf32>
    %130 = tpu.matmul %100, %11, %cst_34 {dimension_numbers = #tpu.dot_dimension_numbers<[1], [0], [0], [1], [0, 0, 1, 1], [], []>} : vector<2x16xf32>, vector<16x64xf32>, vector<2x64xf32> -> vector<2x64xf32>
    %131 = arith.addf %129, %130 : vector<2x64xf32>
    %132 = vector.extract_strided_slice %131 {offsets = [0, 0], sizes = [2, 16], strides = [1, 1]} : vector<2x64xf32> to vector<2x16xf32>
    %133 = arith.negf %132 : vector<2x16xf32>
    %134 = math.exp %133 : vector<2x16xf32>
    %cst_35 = arith.constant 1.000000e+00 : f32
    %135 = vector.broadcast %cst_35 : f32 to vector<2x16xf32>
    %136 = arith.addf %135, %134 : vector<2x16xf32>
    %137 = arith.divf %135, %136 : vector<2x16xf32>
    %138 = vector.extract_strided_slice %131 {offsets = [0, 16], sizes = [2, 16], strides = [1, 1]} : vector<2x64xf32> to vector<2x16xf32>
    %139 = arith.negf %138 : vector<2x16xf32>
    %140 = math.exp %139 : vector<2x16xf32>
    %cst_36 = arith.constant 1.000000e+00 : f32
    %141 = vector.broadcast %cst_36 : f32 to vector<2x16xf32>
    %142 = arith.addf %141, %140 : vector<2x16xf32>
    %143 = arith.divf %141, %142 : vector<2x16xf32>
    %144 = vector.extract_strided_slice %131 {offsets = [0, 32], sizes = [2, 16], strides = [1, 1]} : vector<2x64xf32> to vector<2x16xf32>
    %145 = math.tanh %144 : vector<2x16xf32>
    %146 = vector.extract_strided_slice %131 {offsets = [0, 48], sizes = [2, 16], strides = [1, 1]} : vector<2x64xf32> to vector<2x16xf32>
    %147 = arith.negf %146 : vector<2x16xf32>
    %148 = math.exp %147 : vector<2x16xf32>
    %cst_37 = arith.constant 1.000000e+00 : f32
    %149 = vector.broadcast %cst_37 : f32 to vector<2x16xf32>
    %150 = arith.addf %149, %148 : vector<2x16xf32>
    %151 = arith.divf %149, %150 : vector<2x16xf32>
    %152 = arith.mulf %143, %98 : vector<2x16xf32>
    %153 = arith.mulf %137, %145 : vector<2x16xf32>
    %154 = arith.addf %152, %153 : vector<2x16xf32>
    %155 = math.tanh %154 : vector<2x16xf32>
    %156 = arith.mulf %151, %155 : vector<2x16xf32>
    %157 = vector.extract_strided_slice %10 {offsets = [10, 0], sizes = [2, 64], strides = [1, 1]} : vector<16x64xf32> to vector<2x64xf32>
    %cst_38 = arith.constant dense<0.000000e+00> : vector<2x64xf32>
    %158 = tpu.matmul %128, %12, %cst_38 {dimension_numbers = #tpu.dot_dimension_numbers<[1], [0], [0], [1], [0, 0, 1, 1], [], []>} : vector<2x16xf32>, vector<16x64xf32>, vector<2x64xf32> -> vector<2x64xf32>
    %159 = arith.addf %157, %158 : vector<2x64xf32>
    %160 = vector.extract_strided_slice %159 {offsets = [0, 0], sizes = [2, 16], strides = [1, 1]} : vector<2x64xf32> to vector<2x16xf32>
    %161 = arith.negf %160 : vector<2x16xf32>
    %162 = math.exp %161 : vector<2x16xf32>
    %cst_39 = arith.constant 1.000000e+00 : f32
    %163 = vector.broadcast %cst_39 : f32 to vector<2x16xf32>
    %164 = arith.addf %163, %162 : vector<2x16xf32>
    %165 = arith.divf %163, %164 : vector<2x16xf32>
    %166 = vector.extract_strided_slice %159 {offsets = [0, 16], sizes = [2, 16], strides = [1, 1]} : vector<2x64xf32> to vector<2x16xf32>
    %167 = arith.negf %166 : vector<2x16xf32>
    %168 = math.exp %167 : vector<2x16xf32>
    %cst_40 = arith.constant 1.000000e+00 : f32
    %169 = vector.broadcast %cst_40 : f32 to vector<2x16xf32>
    %170 = arith.addf %169, %168 : vector<2x16xf32>
    %171 = arith.divf %169, %170 : vector<2x16xf32>
    %172 = vector.extract_strided_slice %159 {offsets = [0, 32], sizes = [2, 16], strides = [1, 1]} : vector<2x64xf32> to vector<2x16xf32>
    %173 = math.tanh %172 : vector<2x16xf32>
    %174 = vector.extract_strided_slice %159 {offsets = [0, 48], sizes = [2, 16], strides = [1, 1]} : vector<2x64xf32> to vector<2x16xf32>
    %175 = arith.negf %174 : vector<2x16xf32>
    %176 = math.exp %175 : vector<2x16xf32>
    %cst_41 = arith.constant 1.000000e+00 : f32
    %177 = vector.broadcast %cst_41 : f32 to vector<2x16xf32>
    %178 = arith.addf %177, %176 : vector<2x16xf32>
    %179 = arith.divf %177, %178 : vector<2x16xf32>
    %180 = arith.mulf %171, %126 : vector<2x16xf32>
    %181 = arith.mulf %165, %173 : vector<2x16xf32>
    %182 = arith.addf %180, %181 : vector<2x16xf32>
    %183 = math.tanh %182 : vector<2x16xf32>
    %184 = arith.mulf %179, %183 : vector<2x16xf32>
    %185 = vector.extract_strided_slice %5 {offsets = [6, 0], sizes = [2, 64], strides = [1, 1]} : vector<16x64xf32> to vector<2x64xf32>
    %cst_42 = arith.constant dense<0.000000e+00> : vector<2x64xf32>
    %186 = tpu.matmul %156, %11, %cst_42 {dimension_numbers = #tpu.dot_dimension_numbers<[1], [0], [0], [1], [0, 0, 1, 1], [], []>} : vector<2x16xf32>, vector<16x64xf32>, vector<2x64xf32> -> vector<2x64xf32>
    %187 = arith.addf %185, %186 : vector<2x64xf32>
    %188 = vector.extract_strided_slice %187 {offsets = [0, 0], sizes = [2, 16], strides = [1, 1]} : vector<2x64xf32> to vector<2x16xf32>
    %189 = arith.negf %188 : vector<2x16xf32>
    %190 = math.exp %189 : vector<2x16xf32>
    %cst_43 = arith.constant 1.000000e+00 : f32
    %191 = vector.broadcast %cst_43 : f32 to vector<2x16xf32>
    %192 = arith.addf %191, %190 : vector<2x16xf32>
    %193 = arith.divf %191, %192 : vector<2x16xf32>
    %194 = vector.extract_strided_slice %187 {offsets = [0, 16], sizes = [2, 16], strides = [1, 1]} : vector<2x64xf32> to vector<2x16xf32>
    %195 = arith.negf %194 : vector<2x16xf32>
    %196 = math.exp %195 : vector<2x16xf32>
    %cst_44 = arith.constant 1.000000e+00 : f32
    %197 = vector.broadcast %cst_44 : f32 to vector<2x16xf32>
    %198 = arith.addf %197, %196 : vector<2x16xf32>
    %199 = arith.divf %197, %198 : vector<2x16xf32>
    %200 = vector.extract_strided_slice %187 {offsets = [0, 32], sizes = [2, 16], strides = [1, 1]} : vector<2x64xf32> to vector<2x16xf32>
    %201 = math.tanh %200 : vector<2x16xf32>
    %202 = vector.extract_strided_slice %187 {offsets = [0, 48], sizes = [2, 16], strides = [1, 1]} : vector<2x64xf32> to vector<2x16xf32>
    %203 = arith.negf %202 : vector<2x16xf32>
    %204 = math.exp %203 : vector<2x16xf32>
    %cst_45 = arith.constant 1.000000e+00 : f32
    %205 = vector.broadcast %cst_45 : f32 to vector<2x16xf32>
    %206 = arith.addf %205, %204 : vector<2x16xf32>
    %207 = arith.divf %205, %206 : vector<2x16xf32>
    %208 = arith.mulf %199, %154 : vector<2x16xf32>
    %209 = arith.mulf %193, %201 : vector<2x16xf32>
    %210 = arith.addf %208, %209 : vector<2x16xf32>
    %211 = math.tanh %210 : vector<2x16xf32>
    %212 = arith.mulf %207, %211 : vector<2x16xf32>
    %213 = vector.extract_strided_slice %10 {offsets = [8, 0], sizes = [2, 64], strides = [1, 1]} : vector<16x64xf32> to vector<2x64xf32>
    %cst_46 = arith.constant dense<0.000000e+00> : vector<2x64xf32>
    %214 = tpu.matmul %184, %12, %cst_46 {dimension_numbers = #tpu.dot_dimension_numbers<[1], [0], [0], [1], [0, 0, 1, 1], [], []>} : vector<2x16xf32>, vector<16x64xf32>, vector<2x64xf32> -> vector<2x64xf32>
    %215 = arith.addf %213, %214 : vector<2x64xf32>
    %216 = vector.extract_strided_slice %215 {offsets = [0, 0], sizes = [2, 16], strides = [1, 1]} : vector<2x64xf32> to vector<2x16xf32>
    %217 = arith.negf %216 : vector<2x16xf32>
    %218 = math.exp %217 : vector<2x16xf32>
    %cst_47 = arith.constant 1.000000e+00 : f32
    %219 = vector.broadcast %cst_47 : f32 to vector<2x16xf32>
    %220 = arith.addf %219, %218 : vector<2x16xf32>
    %221 = arith.divf %219, %220 : vector<2x16xf32>
    %222 = vector.extract_strided_slice %215 {offsets = [0, 16], sizes = [2, 16], strides = [1, 1]} : vector<2x64xf32> to vector<2x16xf32>
    %223 = arith.negf %222 : vector<2x16xf32>
    %224 = math.exp %223 : vector<2x16xf32>
    %cst_48 = arith.constant 1.000000e+00 : f32
    %225 = vector.broadcast %cst_48 : f32 to vector<2x16xf32>
    %226 = arith.addf %225, %224 : vector<2x16xf32>
    %227 = arith.divf %225, %226 : vector<2x16xf32>
    %228 = vector.extract_strided_slice %215 {offsets = [0, 32], sizes = [2, 16], strides = [1, 1]} : vector<2x64xf32> to vector<2x16xf32>
    %229 = math.tanh %228 : vector<2x16xf32>
    %230 = vector.extract_strided_slice %215 {offsets = [0, 48], sizes = [2, 16], strides = [1, 1]} : vector<2x64xf32> to vector<2x16xf32>
    %231 = arith.negf %230 : vector<2x16xf32>
    %232 = math.exp %231 : vector<2x16xf32>
    %cst_49 = arith.constant 1.000000e+00 : f32
    %233 = vector.broadcast %cst_49 : f32 to vector<2x16xf32>
    %234 = arith.addf %233, %232 : vector<2x16xf32>
    %235 = arith.divf %233, %234 : vector<2x16xf32>
    %236 = arith.mulf %227, %182 : vector<2x16xf32>
    %237 = arith.mulf %221, %229 : vector<2x16xf32>
    %238 = arith.addf %236, %237 : vector<2x16xf32>
    %239 = math.tanh %238 : vector<2x16xf32>
    %240 = arith.mulf %235, %239 : vector<2x16xf32>
    %241 = vector.extract_strided_slice %5 {offsets = [8, 0], sizes = [2, 64], strides = [1, 1]} : vector<16x64xf32> to vector<2x64xf32>
    %cst_50 = arith.constant dense<0.000000e+00> : vector<2x64xf32>
    %242 = tpu.matmul %212, %11, %cst_50 {dimension_numbers = #tpu.dot_dimension_numbers<[1], [0], [0], [1], [0, 0, 1, 1], [], []>} : vector<2x16xf32>, vector<16x64xf32>, vector<2x64xf32> -> vector<2x64xf32>
    %243 = arith.addf %241, %242 : vector<2x64xf32>
    %244 = vector.extract_strided_slice %243 {offsets = [0, 0], sizes = [2, 16], strides = [1, 1]} : vector<2x64xf32> to vector<2x16xf32>
    %245 = arith.negf %244 : vector<2x16xf32>
    %246 = math.exp %245 : vector<2x16xf32>
    %cst_51 = arith.constant 1.000000e+00 : f32
    %247 = vector.broadcast %cst_51 : f32 to vector<2x16xf32>
    %248 = arith.addf %247, %246 : vector<2x16xf32>
    %249 = arith.divf %247, %248 : vector<2x16xf32>
    %250 = vector.extract_strided_slice %243 {offsets = [0, 16], sizes = [2, 16], strides = [1, 1]} : vector<2x64xf32> to vector<2x16xf32>
    %251 = arith.negf %250 : vector<2x16xf32>
    %252 = math.exp %251 : vector<2x16xf32>
    %cst_52 = arith.constant 1.000000e+00 : f32
    %253 = vector.broadcast %cst_52 : f32 to vector<2x16xf32>
    %254 = arith.addf %253, %252 : vector<2x16xf32>
    %255 = arith.divf %253, %254 : vector<2x16xf32>
    %256 = vector.extract_strided_slice %243 {offsets = [0, 32], sizes = [2, 16], strides = [1, 1]} : vector<2x64xf32> to vector<2x16xf32>
    %257 = math.tanh %256 : vector<2x16xf32>
    %258 = vector.extract_strided_slice %243 {offsets = [0, 48], sizes = [2, 16], strides = [1, 1]} : vector<2x64xf32> to vector<2x16xf32>
    %259 = arith.negf %258 : vector<2x16xf32>
    %260 = math.exp %259 : vector<2x16xf32>
    %cst_53 = arith.constant 1.000000e+00 : f32
    %261 = vector.broadcast %cst_53 : f32 to vector<2x16xf32>
    %262 = arith.addf %261, %260 : vector<2x16xf32>
    %263 = arith.divf %261, %262 : vector<2x16xf32>
    %264 = arith.mulf %255, %210 : vector<2x16xf32>
    %265 = arith.mulf %249, %257 : vector<2x16xf32>
    %266 = arith.addf %264, %265 : vector<2x16xf32>
    %267 = math.tanh %266 : vector<2x16xf32>
    %268 = arith.mulf %263, %267 : vector<2x16xf32>
    %269 = vector.extract_strided_slice %10 {offsets = [6, 0], sizes = [2, 64], strides = [1, 1]} : vector<16x64xf32> to vector<2x64xf32>
    %cst_54 = arith.constant dense<0.000000e+00> : vector<2x64xf32>
    %270 = tpu.matmul %240, %12, %cst_54 {dimension_numbers = #tpu.dot_dimension_numbers<[1], [0], [0], [1], [0, 0, 1, 1], [], []>} : vector<2x16xf32>, vector<16x64xf32>, vector<2x64xf32> -> vector<2x64xf32>
    %271 = arith.addf %269, %270 : vector<2x64xf32>
    %272 = vector.extract_strided_slice %271 {offsets = [0, 0], sizes = [2, 16], strides = [1, 1]} : vector<2x64xf32> to vector<2x16xf32>
    %273 = arith.negf %272 : vector<2x16xf32>
    %274 = math.exp %273 : vector<2x16xf32>
    %cst_55 = arith.constant 1.000000e+00 : f32
    %275 = vector.broadcast %cst_55 : f32 to vector<2x16xf32>
    %276 = arith.addf %275, %274 : vector<2x16xf32>
    %277 = arith.divf %275, %276 : vector<2x16xf32>
    %278 = vector.extract_strided_slice %271 {offsets = [0, 16], sizes = [2, 16], strides = [1, 1]} : vector<2x64xf32> to vector<2x16xf32>
    %279 = arith.negf %278 : vector<2x16xf32>
    %280 = math.exp %279 : vector<2x16xf32>
    %cst_56 = arith.constant 1.000000e+00 : f32
    %281 = vector.broadcast %cst_56 : f32 to vector<2x16xf32>
    %282 = arith.addf %281, %280 : vector<2x16xf32>
    %283 = arith.divf %281, %282 : vector<2x16xf32>
    %284 = vector.extract_strided_slice %271 {offsets = [0, 32], sizes = [2, 16], strides = [1, 1]} : vector<2x64xf32> to vector<2x16xf32>
    %285 = math.tanh %284 : vector<2x16xf32>
    %286 = vector.extract_strided_slice %271 {offsets = [0, 48], sizes = [2, 16], strides = [1, 1]} : vector<2x64xf32> to vector<2x16xf32>
    %287 = arith.negf %286 : vector<2x16xf32>
    %288 = math.exp %287 : vector<2x16xf32>
    %cst_57 = arith.constant 1.000000e+00 : f32
    %289 = vector.broadcast %cst_57 : f32 to vector<2x16xf32>
    %290 = arith.addf %289, %288 : vector<2x16xf32>
    %291 = arith.divf %289, %290 : vector<2x16xf32>
    %292 = arith.mulf %283, %238 : vector<2x16xf32>
    %293 = arith.mulf %277, %285 : vector<2x16xf32>
    %294 = arith.addf %292, %293 : vector<2x16xf32>
    %295 = math.tanh %294 : vector<2x16xf32>
    %296 = arith.mulf %291, %295 : vector<2x16xf32>
    %297 = vector.extract_strided_slice %5 {offsets = [10, 0], sizes = [2, 64], strides = [1, 1]} : vector<16x64xf32> to vector<2x64xf32>
    %cst_58 = arith.constant dense<0.000000e+00> : vector<2x64xf32>
    %298 = tpu.matmul %268, %11, %cst_58 {dimension_numbers = #tpu.dot_dimension_numbers<[1], [0], [0], [1], [0, 0, 1, 1], [], []>} : vector<2x16xf32>, vector<16x64xf32>, vector<2x64xf32> -> vector<2x64xf32>
    %299 = arith.addf %297, %298 : vector<2x64xf32>
    %300 = vector.extract_strided_slice %299 {offsets = [0, 0], sizes = [2, 16], strides = [1, 1]} : vector<2x64xf32> to vector<2x16xf32>
    %301 = arith.negf %300 : vector<2x16xf32>
    %302 = math.exp %301 : vector<2x16xf32>
    %cst_59 = arith.constant 1.000000e+00 : f32
    %303 = vector.broadcast %cst_59 : f32 to vector<2x16xf32>
    %304 = arith.addf %303, %302 : vector<2x16xf32>
    %305 = arith.divf %303, %304 : vector<2x16xf32>
    %306 = vector.extract_strided_slice %299 {offsets = [0, 16], sizes = [2, 16], strides = [1, 1]} : vector<2x64xf32> to vector<2x16xf32>
    %307 = arith.negf %306 : vector<2x16xf32>
    %308 = math.exp %307 : vector<2x16xf32>
    %cst_60 = arith.constant 1.000000e+00 : f32
    %309 = vector.broadcast %cst_60 : f32 to vector<2x16xf32>
    %310 = arith.addf %309, %308 : vector<2x16xf32>
    %311 = arith.divf %309, %310 : vector<2x16xf32>
    %312 = vector.extract_strided_slice %299 {offsets = [0, 32], sizes = [2, 16], strides = [1, 1]} : vector<2x64xf32> to vector<2x16xf32>
    %313 = math.tanh %312 : vector<2x16xf32>
    %314 = vector.extract_strided_slice %299 {offsets = [0, 48], sizes = [2, 16], strides = [1, 1]} : vector<2x64xf32> to vector<2x16xf32>
    %315 = arith.negf %314 : vector<2x16xf32>
    %316 = math.exp %315 : vector<2x16xf32>
    %cst_61 = arith.constant 1.000000e+00 : f32
    %317 = vector.broadcast %cst_61 : f32 to vector<2x16xf32>
    %318 = arith.addf %317, %316 : vector<2x16xf32>
    %319 = arith.divf %317, %318 : vector<2x16xf32>
    %320 = arith.mulf %311, %266 : vector<2x16xf32>
    %321 = arith.mulf %305, %313 : vector<2x16xf32>
    %322 = arith.addf %320, %321 : vector<2x16xf32>
    %323 = math.tanh %322 : vector<2x16xf32>
    %324 = arith.mulf %319, %323 : vector<2x16xf32>
    %325 = vector.extract_strided_slice %10 {offsets = [4, 0], sizes = [2, 64], strides = [1, 1]} : vector<16x64xf32> to vector<2x64xf32>
    %cst_62 = arith.constant dense<0.000000e+00> : vector<2x64xf32>
    %326 = tpu.matmul %296, %12, %cst_62 {dimension_numbers = #tpu.dot_dimension_numbers<[1], [0], [0], [1], [0, 0, 1, 1], [], []>} : vector<2x16xf32>, vector<16x64xf32>, vector<2x64xf32> -> vector<2x64xf32>
    %327 = arith.addf %325, %326 : vector<2x64xf32>
    %328 = vector.extract_strided_slice %327 {offsets = [0, 0], sizes = [2, 16], strides = [1, 1]} : vector<2x64xf32> to vector<2x16xf32>
    %329 = arith.negf %328 : vector<2x16xf32>
    %330 = math.exp %329 : vector<2x16xf32>
    %cst_63 = arith.constant 1.000000e+00 : f32
    %331 = vector.broadcast %cst_63 : f32 to vector<2x16xf32>
    %332 = arith.addf %331, %330 : vector<2x16xf32>
    %333 = arith.divf %331, %332 : vector<2x16xf32>
    %334 = vector.extract_strided_slice %327 {offsets = [0, 16], sizes = [2, 16], strides = [1, 1]} : vector<2x64xf32> to vector<2x16xf32>
    %335 = arith.negf %334 : vector<2x16xf32>
    %336 = math.exp %335 : vector<2x16xf32>
    %cst_64 = arith.constant 1.000000e+00 : f32
    %337 = vector.broadcast %cst_64 : f32 to vector<2x16xf32>
    %338 = arith.addf %337, %336 : vector<2x16xf32>
    %339 = arith.divf %337, %338 : vector<2x16xf32>
    %340 = vector.extract_strided_slice %327 {offsets = [0, 32], sizes = [2, 16], strides = [1, 1]} : vector<2x64xf32> to vector<2x16xf32>
    %341 = math.tanh %340 : vector<2x16xf32>
    %342 = vector.extract_strided_slice %327 {offsets = [0, 48], sizes = [2, 16], strides = [1, 1]} : vector<2x64xf32> to vector<2x16xf32>
    %343 = arith.negf %342 : vector<2x16xf32>
    %344 = math.exp %343 : vector<2x16xf32>
    %cst_65 = arith.constant 1.000000e+00 : f32
    %345 = vector.broadcast %cst_65 : f32 to vector<2x16xf32>
    %346 = arith.addf %345, %344 : vector<2x16xf32>
    %347 = arith.divf %345, %346 : vector<2x16xf32>
    %348 = arith.mulf %339, %294 : vector<2x16xf32>
    %349 = arith.mulf %333, %341 : vector<2x16xf32>
    %350 = arith.addf %348, %349 : vector<2x16xf32>
    %351 = math.tanh %350 : vector<2x16xf32>
    %352 = arith.mulf %347, %351 : vector<2x16xf32>
    %353 = vector.extract_strided_slice %5 {offsets = [12, 0], sizes = [2, 64], strides = [1, 1]} : vector<16x64xf32> to vector<2x64xf32>
    %cst_66 = arith.constant dense<0.000000e+00> : vector<2x64xf32>
    %354 = tpu.matmul %324, %11, %cst_66 {dimension_numbers = #tpu.dot_dimension_numbers<[1], [0], [0], [1], [0, 0, 1, 1], [], []>} : vector<2x16xf32>, vector<16x64xf32>, vector<2x64xf32> -> vector<2x64xf32>
    %355 = arith.addf %353, %354 : vector<2x64xf32>
    %356 = vector.extract_strided_slice %355 {offsets = [0, 0], sizes = [2, 16], strides = [1, 1]} : vector<2x64xf32> to vector<2x16xf32>
    %357 = arith.negf %356 : vector<2x16xf32>
    %358 = math.exp %357 : vector<2x16xf32>
    %cst_67 = arith.constant 1.000000e+00 : f32
    %359 = vector.broadcast %cst_67 : f32 to vector<2x16xf32>
    %360 = arith.addf %359, %358 : vector<2x16xf32>
    %361 = arith.divf %359, %360 : vector<2x16xf32>
    %362 = vector.extract_strided_slice %355 {offsets = [0, 16], sizes = [2, 16], strides = [1, 1]} : vector<2x64xf32> to vector<2x16xf32>
    %363 = arith.negf %362 : vector<2x16xf32>
    %364 = math.exp %363 : vector<2x16xf32>
    %cst_68 = arith.constant 1.000000e+00 : f32
    %365 = vector.broadcast %cst_68 : f32 to vector<2x16xf32>
    %366 = arith.addf %365, %364 : vector<2x16xf32>
    %367 = arith.divf %365, %366 : vector<2x16xf32>
    %368 = vector.extract_strided_slice %355 {offsets = [0, 32], sizes = [2, 16], strides = [1, 1]} : vector<2x64xf32> to vector<2x16xf32>
    %369 = math.tanh %368 : vector<2x16xf32>
    %370 = vector.extract_strided_slice %355 {offsets = [0, 48], sizes = [2, 16], strides = [1, 1]} : vector<2x64xf32> to vector<2x16xf32>
    %371 = arith.negf %370 : vector<2x16xf32>
    %372 = math.exp %371 : vector<2x16xf32>
    %cst_69 = arith.constant 1.000000e+00 : f32
    %373 = vector.broadcast %cst_69 : f32 to vector<2x16xf32>
    %374 = arith.addf %373, %372 : vector<2x16xf32>
    %375 = arith.divf %373, %374 : vector<2x16xf32>
    %376 = arith.mulf %367, %322 : vector<2x16xf32>
    %377 = arith.mulf %361, %369 : vector<2x16xf32>
    %378 = arith.addf %376, %377 : vector<2x16xf32>
    %379 = math.tanh %378 : vector<2x16xf32>
    %380 = arith.mulf %375, %379 : vector<2x16xf32>
    %381 = vector.extract_strided_slice %10 {offsets = [2, 0], sizes = [2, 64], strides = [1, 1]} : vector<16x64xf32> to vector<2x64xf32>
    %cst_70 = arith.constant dense<0.000000e+00> : vector<2x64xf32>
    %382 = tpu.matmul %352, %12, %cst_70 {dimension_numbers = #tpu.dot_dimension_numbers<[1], [0], [0], [1], [0, 0, 1, 1], [], []>} : vector<2x16xf32>, vector<16x64xf32>, vector<2x64xf32> -> vector<2x64xf32>
    %383 = arith.addf %381, %382 : vector<2x64xf32>
    %384 = vector.extract_strided_slice %383 {offsets = [0, 0], sizes = [2, 16], strides = [1, 1]} : vector<2x64xf32> to vector<2x16xf32>
    %385 = arith.negf %384 : vector<2x16xf32>
    %386 = math.exp %385 : vector<2x16xf32>
    %cst_71 = arith.constant 1.000000e+00 : f32
    %387 = vector.broadcast %cst_71 : f32 to vector<2x16xf32>
    %388 = arith.addf %387, %386 : vector<2x16xf32>
    %389 = arith.divf %387, %388 : vector<2x16xf32>
    %390 = vector.extract_strided_slice %383 {offsets = [0, 16], sizes = [2, 16], strides = [1, 1]} : vector<2x64xf32> to vector<2x16xf32>
    %391 = arith.negf %390 : vector<2x16xf32>
    %392 = math.exp %391 : vector<2x16xf32>
    %cst_72 = arith.constant 1.000000e+00 : f32
    %393 = vector.broadcast %cst_72 : f32 to vector<2x16xf32>
    %394 = arith.addf %393, %392 : vector<2x16xf32>
    %395 = arith.divf %393, %394 : vector<2x16xf32>
    %396 = vector.extract_strided_slice %383 {offsets = [0, 32], sizes = [2, 16], strides = [1, 1]} : vector<2x64xf32> to vector<2x16xf32>
    %397 = math.tanh %396 : vector<2x16xf32>
    %398 = vector.extract_strided_slice %383 {offsets = [0, 48], sizes = [2, 16], strides = [1, 1]} : vector<2x64xf32> to vector<2x16xf32>
    %399 = arith.negf %398 : vector<2x16xf32>
    %400 = math.exp %399 : vector<2x16xf32>
    %cst_73 = arith.constant 1.000000e+00 : f32
    %401 = vector.broadcast %cst_73 : f32 to vector<2x16xf32>
    %402 = arith.addf %401, %400 : vector<2x16xf32>
    %403 = arith.divf %401, %402 : vector<2x16xf32>
    %404 = arith.mulf %395, %350 : vector<2x16xf32>
    %405 = arith.mulf %389, %397 : vector<2x16xf32>
    %406 = arith.addf %404, %405 : vector<2x16xf32>
    %407 = math.tanh %406 : vector<2x16xf32>
    %408 = arith.mulf %403, %407 : vector<2x16xf32>
    %409 = vector.extract_strided_slice %5 {offsets = [14, 0], sizes = [2, 64], strides = [1, 1]} : vector<16x64xf32> to vector<2x64xf32>
    %cst_74 = arith.constant dense<0.000000e+00> : vector<2x64xf32>
    %410 = tpu.matmul %380, %11, %cst_74 {dimension_numbers = #tpu.dot_dimension_numbers<[1], [0], [0], [1], [0, 0, 1, 1], [], []>} : vector<2x16xf32>, vector<16x64xf32>, vector<2x64xf32> -> vector<2x64xf32>
    %411 = arith.addf %409, %410 : vector<2x64xf32>
    %412 = vector.extract_strided_slice %411 {offsets = [0, 0], sizes = [2, 16], strides = [1, 1]} : vector<2x64xf32> to vector<2x16xf32>
    %413 = arith.negf %412 : vector<2x16xf32>
    %414 = math.exp %413 : vector<2x16xf32>
    %cst_75 = arith.constant 1.000000e+00 : f32
    %415 = vector.broadcast %cst_75 : f32 to vector<2x16xf32>
    %416 = arith.addf %415, %414 : vector<2x16xf32>
    %417 = arith.divf %415, %416 : vector<2x16xf32>
    %418 = vector.extract_strided_slice %411 {offsets = [0, 16], sizes = [2, 16], strides = [1, 1]} : vector<2x64xf32> to vector<2x16xf32>
    %419 = arith.negf %418 : vector<2x16xf32>
    %420 = math.exp %419 : vector<2x16xf32>
    %cst_76 = arith.constant 1.000000e+00 : f32
    %421 = vector.broadcast %cst_76 : f32 to vector<2x16xf32>
    %422 = arith.addf %421, %420 : vector<2x16xf32>
    %423 = arith.divf %421, %422 : vector<2x16xf32>
    %424 = vector.extract_strided_slice %411 {offsets = [0, 32], sizes = [2, 16], strides = [1, 1]} : vector<2x64xf32> to vector<2x16xf32>
    %425 = math.tanh %424 : vector<2x16xf32>
    %426 = vector.extract_strided_slice %411 {offsets = [0, 48], sizes = [2, 16], strides = [1, 1]} : vector<2x64xf32> to vector<2x16xf32>
    %427 = arith.negf %426 : vector<2x16xf32>
    %428 = math.exp %427 : vector<2x16xf32>
    %cst_77 = arith.constant 1.000000e+00 : f32
    %429 = vector.broadcast %cst_77 : f32 to vector<2x16xf32>
    %430 = arith.addf %429, %428 : vector<2x16xf32>
    %431 = arith.divf %429, %430 : vector<2x16xf32>
    %432 = arith.mulf %423, %378 : vector<2x16xf32>
    %433 = arith.mulf %417, %425 : vector<2x16xf32>
    %434 = arith.addf %432, %433 : vector<2x16xf32>
    %435 = math.tanh %434 : vector<2x16xf32>
    %436 = arith.mulf %431, %435 : vector<2x16xf32>
    %437 = vector.extract_strided_slice %10 {offsets = [0, 0], sizes = [2, 64], strides = [1, 1]} : vector<16x64xf32> to vector<2x64xf32>
    %cst_78 = arith.constant dense<0.000000e+00> : vector<2x64xf32>
    %438 = tpu.matmul %408, %12, %cst_78 {dimension_numbers = #tpu.dot_dimension_numbers<[1], [0], [0], [1], [0, 0, 1, 1], [], []>} : vector<2x16xf32>, vector<16x64xf32>, vector<2x64xf32> -> vector<2x64xf32>
    %439 = arith.addf %437, %438 : vector<2x64xf32>
    %440 = vector.extract_strided_slice %439 {offsets = [0, 0], sizes = [2, 16], strides = [1, 1]} : vector<2x64xf32> to vector<2x16xf32>
    %441 = arith.negf %440 : vector<2x16xf32>
    %442 = math.exp %441 : vector<2x16xf32>
    %cst_79 = arith.constant 1.000000e+00 : f32
    %443 = vector.broadcast %cst_79 : f32 to vector<2x16xf32>
    %444 = arith.addf %443, %442 : vector<2x16xf32>
    %445 = arith.divf %443, %444 : vector<2x16xf32>
    %446 = vector.extract_strided_slice %439 {offsets = [0, 16], sizes = [2, 16], strides = [1, 1]} : vector<2x64xf32> to vector<2x16xf32>
    %447 = arith.negf %446 : vector<2x16xf32>
    %448 = math.exp %447 : vector<2x16xf32>
    %cst_80 = arith.constant 1.000000e+00 : f32
    %449 = vector.broadcast %cst_80 : f32 to vector<2x16xf32>
    %450 = arith.addf %449, %448 : vector<2x16xf32>
    %451 = arith.divf %449, %450 : vector<2x16xf32>
    %452 = vector.extract_strided_slice %439 {offsets = [0, 32], sizes = [2, 16], strides = [1, 1]} : vector<2x64xf32> to vector<2x16xf32>
    %453 = math.tanh %452 : vector<2x16xf32>
    %454 = vector.extract_strided_slice %439 {offsets = [0, 48], sizes = [2, 16], strides = [1, 1]} : vector<2x64xf32> to vector<2x16xf32>
    %455 = arith.negf %454 : vector<2x16xf32>
    %456 = math.exp %455 : vector<2x16xf32>
    %cst_81 = arith.constant 1.000000e+00 : f32
    %457 = vector.broadcast %cst_81 : f32 to vector<2x16xf32>
    %458 = arith.addf %457, %456 : vector<2x16xf32>
    %459 = arith.divf %457, %458 : vector<2x16xf32>
    %460 = arith.mulf %451, %406 : vector<2x16xf32>
    %461 = arith.mulf %445, %453 : vector<2x16xf32>
    %462 = arith.addf %460, %461 : vector<2x16xf32>
    %463 = math.tanh %462 : vector<2x16xf32>
    %464 = arith.mulf %459, %463 : vector<2x16xf32>
    %c0_82 = arith.constant 0 : index
    %c0_83 = arith.constant 0 : index
    %465 = vector.load %arg13[%c0_82, %c0_83] : memref<16x32xf32, #tpu.memory_space<vmem>>, vector<16x32xf32>
    %c0_84 = arith.constant 0 : index
    %c0_85 = arith.constant 0 : index
    %466 = vector.load %arg14[%c0_84, %c0_85] : memref<16x32xf32, #tpu.memory_space<vmem>>, vector<16x32xf32>
    %467 = vector.shape_cast %44 : vector<2x16xf32> to vector<2x1x16xf32>
    %c0_86 = arith.constant 0 : index
    %c0_87 = arith.constant 0 : index
    %c0_88 = arith.constant 0 : index
    %468 = vector.load %arg31[%c0_86, %c0_87, %c0_88] : memref<2x8x32xf32, #tpu.memory_space<vmem>>, vector<2x1x16xf32>
    tpu.vector_store %arg31[%c0_86, %c0_87, %c0_88], %467 {strides = array<i32>} : memref<2x8x32xf32, #tpu.memory_space<vmem>>, vector<2x1x16xf32>,
    %469 = vector.shape_cast %464 : vector<2x16xf32> to vector<2x1x16xf32>
    %c0_89 = arith.constant 0 : index
    %c0_90 = arith.constant 0 : index
    %c16 = arith.constant 16 : index
    %470 = vector.load %arg31[%c0_89, %c0_90, %c16] : memref<2x8x32xf32, #tpu.memory_space<vmem>>, vector<2x1x16xf32>
    tpu.vector_store %arg31[%c0_89, %c0_90, %c16], %469 {strides = array<i32>} : memref<2x8x32xf32, #tpu.memory_space<vmem>>, vector<2x1x16xf32>,
    %cst_91 = arith.constant dense<0.000000e+00> : vector<2x32xf32>
    %471 = tpu.matmul %44, %465, %cst_91 {dimension_numbers = #tpu.dot_dimension_numbers<[1], [0], [0], [1], [0, 0, 1, 1], [], []>} : vector<2x16xf32>, vector<16x32xf32>, vector<2x32xf32> -> vector<2x32xf32>
    %cst_92 = arith.constant dense<0.000000e+00> : vector<2x32xf32>
    %472 = tpu.matmul %464, %466, %cst_92 {dimension_numbers = #tpu.dot_dimension_numbers<[1], [0], [0], [1], [0, 0, 1, 1], [], []>} : vector<2x16xf32>, vector<16x32xf32>, vector<2x32xf32> -> vector<2x32xf32>
    %473 = arith.addf %471, %472 : vector<2x32xf32>
    %474 = vector.shape_cast %473 : vector<2x32xf32> to vector<2x1x32xf32>
    %c0_93 = arith.constant 0 : index
    %c0_94 = arith.constant 0 : index
    %c0_95 = arith.constant 0 : index
    %475 = vector.load %arg32[%c0_93, %c0_94, %c0_95] : memref<2x8x32xf32, #tpu.memory_space<vmem>>, vector<2x1x32xf32>
    tpu.vector_store %arg32[%c0_93, %c0_94, %c0_95], %474 {strides = array<i32>} : memref<2x8x32xf32, #tpu.memory_space<vmem>>, vector<2x1x32xf32>,
    %476 = vector.shape_cast %100 : vector<2x16xf32> to vector<2x1x16xf32>
    %c0_96 = arith.constant 0 : index
    %c1 = arith.constant 1 : index
    %c0_97 = arith.constant 0 : index
    %477 = vector.load %arg31[%c0_96, %c1, %c0_97] : memref<2x8x32xf32, #tpu.memory_space<vmem>>, vector<2x1x16xf32>
    tpu.vector_store %arg31[%c0_96, %c1, %c0_97], %476 {strides = array<i32>} : memref<2x8x32xf32, #tpu.memory_space<vmem>>, vector<2x1x16xf32>,
    %478 = vector.shape_cast %408 : vector<2x16xf32> to vector<2x1x16xf32>
    %c0_98 = arith.constant 0 : index
    %c1_99 = arith.constant 1 : index
    %c16_100 = arith.constant 16 : index
    %479 = vector.load %arg31[%c0_98, %c1_99, %c16_100] : memref<2x8x32xf32, #tpu.memory_space<vmem>>, vector<2x1x16xf32>
    tpu.vector_store %arg31[%c0_98, %c1_99, %c16_100], %478 {strides = array<i32>} : memref<2x8x32xf32, #tpu.memory_space<vmem>>, vector<2x1x16xf32>,
    %cst_101 = arith.constant dense<0.000000e+00> : vector<2x32xf32>
    %480 = tpu.matmul %100, %465, %cst_101 {dimension_numbers = #tpu.dot_dimension_numbers<[1], [0], [0], [1], [0, 0, 1, 1], [], []>} : vector<2x16xf32>, vector<16x32xf32>, vector<2x32xf32> -> vector<2x32xf32>
    %cst_102 = arith.constant dense<0.000000e+00> : vector<2x32xf32>
    %481 = tpu.matmul %408, %466, %cst_102 {dimension_numbers = #tpu.dot_dimension_numbers<[1], [0], [0], [1], [0, 0, 1, 1], [], []>} : vector<2x16xf32>, vector<16x32xf32>, vector<2x32xf32> -> vector<2x32xf32>
    %482 = arith.addf %480, %481 : vector<2x32xf32>
    %483 = vector.shape_cast %482 : vector<2x32xf32> to vector<2x1x32xf32>
    %c0_103 = arith.constant 0 : index
    %c1_104 = arith.constant 1 : index
    %c0_105 = arith.constant 0 : index
    %484 = vector.load %arg32[%c0_103, %c1_104, %c0_105] : memref<2x8x32xf32, #tpu.memory_space<vmem>>, vector<2x1x32xf32>
    tpu.vector_store %arg32[%c0_103, %c1_104, %c0_105], %483 {strides = array<i32>} : memref<2x8x32xf32, #tpu.memory_space<vmem>>, vector<2x1x32xf32>,
    %485 = vector.shape_cast %156 : vector<2x16xf32> to vector<2x1x16xf32>
    %c0_106 = arith.constant 0 : index
    %c2 = arith.constant 2 : index
    %c0_107 = arith.constant 0 : index
    %486 = vector.load %arg31[%c0_106, %c2, %c0_107] : memref<2x8x32xf32, #tpu.memory_space<vmem>>, vector<2x1x16xf32>
    tpu.vector_store %arg31[%c0_106, %c2, %c0_107], %485 {strides = array<i32>} : memref<2x8x32xf32, #tpu.memory_space<vmem>>, vector<2x1x16xf32>,
    %487 = vector.shape_cast %352 : vector<2x16xf32> to vector<2x1x16xf32>
    %c0_108 = arith.constant 0 : index
    %c2_109 = arith.constant 2 : index
    %c16_110 = arith.constant 16 : index
    %488 = vector.load %arg31[%c0_108, %c2_109, %c16_110] : memref<2x8x32xf32, #tpu.memory_space<vmem>>, vector<2x1x16xf32>
    tpu.vector_store %arg31[%c0_108, %c2_109, %c16_110], %487 {strides = array<i32>} : memref<2x8x32xf32, #tpu.memory_space<vmem>>, vector<2x1x16xf32>,
    %cst_111 = arith.constant dense<0.000000e+00> : vector<2x32xf32>
    %489 = tpu.matmul %156, %465, %cst_111 {dimension_numbers = #tpu.dot_dimension_numbers<[1], [0], [0], [1], [0, 0, 1, 1], [], []>} : vector<2x16xf32>, vector<16x32xf32>, vector<2x32xf32> -> vector<2x32xf32>
    %cst_112 = arith.constant dense<0.000000e+00> : vector<2x32xf32>
    %490 = tpu.matmul %352, %466, %cst_112 {dimension_numbers = #tpu.dot_dimension_numbers<[1], [0], [0], [1], [0, 0, 1, 1], [], []>} : vector<2x16xf32>, vector<16x32xf32>, vector<2x32xf32> -> vector<2x32xf32>
    %491 = arith.addf %489, %490 : vector<2x32xf32>
    %492 = vector.shape_cast %491 : vector<2x32xf32> to vector<2x1x32xf32>
    %c0_113 = arith.constant 0 : index
    %c2_114 = arith.constant 2 : index
    %c0_115 = arith.constant 0 : index
    %493 = vector.load %arg32[%c0_113, %c2_114, %c0_115] : memref<2x8x32xf32, #tpu.memory_space<vmem>>, vector<2x1x32xf32>
    tpu.vector_store %arg32[%c0_113, %c2_114, %c0_115], %492 {strides = array<i32>} : memref<2x8x32xf32, #tpu.memory_space<vmem>>, vector<2x1x32xf32>,
    %494 = vector.shape_cast %212 : vector<2x16xf32> to vector<2x1x16xf32>
    %c0_116 = arith.constant 0 : index
    %c3 = arith.constant 3 : index
    %c0_117 = arith.constant 0 : index
    %495 = vector.load %arg31[%c0_116, %c3, %c0_117] : memref<2x8x32xf32, #tpu.memory_space<vmem>>, vector<2x1x16xf32>
    tpu.vector_store %arg31[%c0_116, %c3, %c0_117], %494 {strides = array<i32>} : memref<2x8x32xf32, #tpu.memory_space<vmem>>, vector<2x1x16xf32>,
    %496 = vector.shape_cast %296 : vector<2x16xf32> to vector<2x1x16xf32>
    %c0_118 = arith.constant 0 : index
    %c3_119 = arith.constant 3 : index
    %c16_120 = arith.constant 16 : index
    %497 = vector.load %arg31[%c0_118, %c3_119, %c16_120] : memref<2x8x32xf32, #tpu.memory_space<vmem>>, vector<2x1x16xf32>
    tpu.vector_store %arg31[%c0_118, %c3_119, %c16_120], %496 {strides = array<i32>} : memref<2x8x32xf32, #tpu.memory_space<vmem>>, vector<2x1x16xf32>,
    %cst_121 = arith.constant dense<0.000000e+00> : vector<2x32xf32>
    %498 = tpu.matmul %212, %465, %cst_121 {dimension_numbers = #tpu.dot_dimension_numbers<[1], [0], [0], [1], [0, 0, 1, 1], [], []>} : vector<2x16xf32>, vector<16x32xf32>, vector<2x32xf32> -> vector<2x32xf32>
    %cst_122 = arith.constant dense<0.000000e+00> : vector<2x32xf32>
    %499 = tpu.matmul %296, %466, %cst_122 {dimension_numbers = #tpu.dot_dimension_numbers<[1], [0], [0], [1], [0, 0, 1, 1], [], []>} : vector<2x16xf32>, vector<16x32xf32>, vector<2x32xf32> -> vector<2x32xf32>
    %500 = arith.addf %498, %499 : vector<2x32xf32>
    %501 = vector.shape_cast %500 : vector<2x32xf32> to vector<2x1x32xf32>
    %c0_123 = arith.constant 0 : index
    %c3_124 = arith.constant 3 : index
    %c0_125 = arith.constant 0 : index
    %502 = vector.load %arg32[%c0_123, %c3_124, %c0_125] : memref<2x8x32xf32, #tpu.memory_space<vmem>>, vector<2x1x32xf32>
    tpu.vector_store %arg32[%c0_123, %c3_124, %c0_125], %501 {strides = array<i32>} : memref<2x8x32xf32, #tpu.memory_space<vmem>>, vector<2x1x32xf32>,
    %503 = vector.shape_cast %268 : vector<2x16xf32> to vector<2x1x16xf32>
    %c0_126 = arith.constant 0 : index
    %c4 = arith.constant 4 : index
    %c0_127 = arith.constant 0 : index
    %504 = vector.load %arg31[%c0_126, %c4, %c0_127] : memref<2x8x32xf32, #tpu.memory_space<vmem>>, vector<2x1x16xf32>
    tpu.vector_store %arg31[%c0_126, %c4, %c0_127], %503 {strides = array<i32>} : memref<2x8x32xf32, #tpu.memory_space<vmem>>, vector<2x1x16xf32>,
    %505 = vector.shape_cast %240 : vector<2x16xf32> to vector<2x1x16xf32>
    %c0_128 = arith.constant 0 : index
    %c4_129 = arith.constant 4 : index
    %c16_130 = arith.constant 16 : index
    %506 = vector.load %arg31[%c0_128, %c4_129, %c16_130] : memref<2x8x32xf32, #tpu.memory_space<vmem>>, vector<2x1x16xf32>
    tpu.vector_store %arg31[%c0_128, %c4_129, %c16_130], %505 {strides = array<i32>} : memref<2x8x32xf32, #tpu.memory_space<vmem>>, vector<2x1x16xf32>,
    %cst_131 = arith.constant dense<0.000000e+00> : vector<2x32xf32>
    %507 = tpu.matmul %268, %465, %cst_131 {dimension_numbers = #tpu.dot_dimension_numbers<[1], [0], [0], [1], [0, 0, 1, 1], [], []>} : vector<2x16xf32>, vector<16x32xf32>, vector<2x32xf32> -> vector<2x32xf32>
    %cst_132 = arith.constant dense<0.000000e+00> : vector<2x32xf32>
    %508 = tpu.matmul %240, %466, %cst_132 {dimension_numbers = #tpu.dot_dimension_numbers<[1], [0], [0], [1], [0, 0, 1, 1], [], []>} : vector<2x16xf32>, vector<16x32xf32>, vector<2x32xf32> -> vector<2x32xf32>
    %509 = arith.addf %507, %508 : vector<2x32xf32>
    %510 = vector.shape_cast %509 : vector<2x32xf32> to vector<2x1x32xf32>
    %c0_133 = arith.constant 0 : index
    %c4_134 = arith.constant 4 : index
    %c0_135 = arith.constant 0 : index
    %511 = vector.load %arg32[%c0_133, %c4_134, %c0_135] : memref<2x8x32xf32, #tpu.memory_space<vmem>>, vector<2x1x32xf32>
    tpu.vector_store %arg32[%c0_133, %c4_134, %c0_135], %510 {strides = array<i32>} : memref<2x8x32xf32, #tpu.memory_space<vmem>>, vector<2x1x32xf32>,
    %512 = vector.shape_cast %324 : vector<2x16xf32> to vector<2x1x16xf32>
    %c0_136 = arith.constant 0 : index
    %c5 = arith.constant 5 : index
    %c0_137 = arith.constant 0 : index
    %513 = vector.load %arg31[%c0_136, %c5, %c0_137] : memref<2x8x32xf32, #tpu.memory_space<vmem>>, vector<2x1x16xf32>
    tpu.vector_store %arg31[%c0_136, %c5, %c0_137], %512 {strides = array<i32>} : memref<2x8x32xf32, #tpu.memory_space<vmem>>, vector<2x1x16xf32>,
    %514 = vector.shape_cast %184 : vector<2x16xf32> to vector<2x1x16xf32>
    %c0_138 = arith.constant 0 : index
    %c5_139 = arith.constant 5 : index
    %c16_140 = arith.constant 16 : index
    %515 = vector.load %arg31[%c0_138, %c5_139, %c16_140] : memref<2x8x32xf32, #tpu.memory_space<vmem>>, vector<2x1x16xf32>
    tpu.vector_store %arg31[%c0_138, %c5_139, %c16_140], %514 {strides = array<i32>} : memref<2x8x32xf32, #tpu.memory_space<vmem>>, vector<2x1x16xf32>,
    %cst_141 = arith.constant dense<0.000000e+00> : vector<2x32xf32>
    %516 = tpu.matmul %324, %465, %cst_141 {dimension_numbers = #tpu.dot_dimension_numbers<[1], [0], [0], [1], [0, 0, 1, 1], [], []>} : vector<2x16xf32>, vector<16x32xf32>, vector<2x32xf32> -> vector<2x32xf32>
    %cst_142 = arith.constant dense<0.000000e+00> : vector<2x32xf32>
    %517 = tpu.matmul %184, %466, %cst_142 {dimension_numbers = #tpu.dot_dimension_numbers<[1], [0], [0], [1], [0, 0, 1, 1], [], []>} : vector<2x16xf32>, vector<16x32xf32>, vector<2x32xf32> -> vector<2x32xf32>
    %518 = arith.addf %516, %517 : vector<2x32xf32>
    %519 = vector.shape_cast %518 : vector<2x32xf32> to vector<2x1x32xf32>
    %c0_143 = arith.constant 0 : index
    %c5_144 = arith.constant 5 : index
    %c0_145 = arith.constant 0 : index
    %520 = vector.load %arg32[%c0_143, %c5_144, %c0_145] : memref<2x8x32xf32, #tpu.memory_space<vmem>>, vector<2x1x32xf32>
    tpu.vector_store %arg32[%c0_143, %c5_144, %c0_145], %519 {strides = array<i32>} : memref<2x8x32xf32, #tpu.memory_space<vmem>>, vector<2x1x32xf32>,
    %521 = vector.shape_cast %380 : vector<2x16xf32> to vector<2x1x16xf32>
    %c0_146 = arith.constant 0 : index
    %c6 = arith.constant 6 : index
    %c0_147 = arith.constant 0 : index
    %522 = vector.load %arg31[%c0_146, %c6, %c0_147] : memref<2x8x32xf32, #tpu.memory_space<vmem>>, vector<2x1x16xf32>
    tpu.vector_store %arg31[%c0_146, %c6, %c0_147], %521 {strides = array<i32>} : memref<2x8x32xf32, #tpu.memory_space<vmem>>, vector<2x1x16xf32>,
    %523 = vector.shape_cast %128 : vector<2x16xf32> to vector<2x1x16xf32>
    %c0_148 = arith.constant 0 : index
    %c6_149 = arith.constant 6 : index
    %c16_150 = arith.constant 16 : index
    %524 = vector.load %arg31[%c0_148, %c6_149, %c16_150] : memref<2x8x32xf32, #tpu.memory_space<vmem>>, vector<2x1x16xf32>
    tpu.vector_store %arg31[%c0_148, %c6_149, %c16_150], %523 {strides = array<i32>} : memref<2x8x32xf32, #tpu.memory_space<vmem>>, vector<2x1x16xf32>,
    %cst_151 = arith.constant dense<0.000000e+00> : vector<2x32xf32>
    %525 = tpu.matmul %380, %465, %cst_151 {dimension_numbers = #tpu.dot_dimension_numbers<[1], [0], [0], [1], [0, 0, 1, 1], [], []>} : vector<2x16xf32>, vector<16x32xf32>, vector<2x32xf32> -> vector<2x32xf32>
    %cst_152 = arith.constant dense<0.000000e+00> : vector<2x32xf32>
    %526 = tpu.matmul %128, %466, %cst_152 {dimension_numbers = #tpu.dot_dimension_numbers<[1], [0], [0], [1], [0, 0, 1, 1], [], []>} : vector<2x16xf32>, vector<16x32xf32>, vector<2x32xf32> -> vector<2x32xf32>
    %527 = arith.addf %525, %526 : vector<2x32xf32>
    %528 = vector.shape_cast %527 : vector<2x32xf32> to vector<2x1x32xf32>
    %c0_153 = arith.constant 0 : index
    %c6_154 = arith.constant 6 : index
    %c0_155 = arith.constant 0 : index
    %529 = vector.load %arg32[%c0_153, %c6_154, %c0_155] : memref<2x8x32xf32, #tpu.memory_space<vmem>>, vector<2x1x32xf32>
    tpu.vector_store %arg32[%c0_153, %c6_154, %c0_155], %528 {strides = array<i32>} : memref<2x8x32xf32, #tpu.memory_space<vmem>>, vector<2x1x32xf32>,
    %530 = vector.shape_cast %436 : vector<2x16xf32> to vector<2x1x16xf32>
    %c0_156 = arith.constant 0 : index
    %c7 = arith.constant 7 : index
    %c0_157 = arith.constant 0 : index
    %531 = vector.load %arg31[%c0_156, %c7, %c0_157] : memref<2x8x32xf32, #tpu.memory_space<vmem>>, vector<2x1x16xf32>
    tpu.vector_store %arg31[%c0_156, %c7, %c0_157], %530 {strides = array<i32>} : memref<2x8x32xf32, #tpu.memory_space<vmem>>, vector<2x1x16xf32>,
    %532 = vector.shape_cast %72 : vector<2x16xf32> to vector<2x1x16xf32>
    %c0_158 = arith.constant 0 : index
    %c7_159 = arith.constant 7 : index
    %c16_160 = arith.constant 16 : index
    %533 = vector.load %arg31[%c0_158, %c7_159, %c16_160] : memref<2x8x32xf32, #tpu.memory_space<vmem>>, vector<2x1x16xf32>
    tpu.vector_store %arg31[%c0_158, %c7_159, %c16_160], %532 {strides = array<i32>} : memref<2x8x32xf32, #tpu.memory_space<vmem>>, vector<2x1x16xf32>,
    %cst_161 = arith.constant dense<0.000000e+00> : vector<2x32xf32>
    %534 = tpu.matmul %436, %465, %cst_161 {dimension_numbers = #tpu.dot_dimension_numbers<[1], [0], [0], [1], [0, 0, 1, 1], [], []>} : vector<2x16xf32>, vector<16x32xf32>, vector<2x32xf32> -> vector<2x32xf32>
    %cst_162 = arith.constant dense<0.000000e+00> : vector<2x32xf32>
    %535 = tpu.matmul %72, %466, %cst_162 {dimension_numbers = #tpu.dot_dimension_numbers<[1], [0], [0], [1], [0, 0, 1, 1], [], []>} : vector<2x16xf32>, vector<16x32xf32>, vector<2x32xf32> -> vector<2x32xf32>
    %536 = arith.addf %534, %535 : vector<2x32xf32>
    %537 = vector.shape_cast %536 : vector<2x32xf32> to vector<2x1x32xf32>
    %c0_163 = arith.constant 0 : index
    %c7_164 = arith.constant 7 : index
    %c0_165 = arith.constant 0 : index
    %538 = vector.load %arg32[%c0_163, %c7_164, %c0_165] : memref<2x8x32xf32, #tpu.memory_space<vmem>>, vector<2x1x32xf32>
    tpu.vector_store %arg32[%c0_163, %c7_164, %c0_165], %537 {strides = array<i32>} : memref<2x8x32xf32, #tpu.memory_space<vmem>>, vector<2x1x32xf32>,
    %c0_166 = arith.constant 0 : index
    %c0_167 = arith.constant 0 : index
    %c0_168 = arith.constant 0 : index
    %539 = vector.load %arg31[%c0_166, %c0_167, %c0_168] : memref<2x8x32xf32, #tpu.memory_space<vmem>>, vector<2x8x32xf32>
    %c0_169 = arith.constant 0 : index
    %c0_170 = arith.constant 0 : index
    %c0_171 = arith.constant 0 : index
    %540 = vector.load %arg32[%c0_169, %c0_170, %c0_171] : memref<2x8x32xf32, #tpu.memory_space<vmem>>, vector<2x8x32xf32>
    %541 = arith.addf %436, %464 : vector<2x16xf32>
    %542 = arith.addf %434, %462 : vector<2x16xf32>
    %c0_172 = arith.constant 0 : index
    %c0_173 = arith.constant 0 : index
    %543 = vector.load %arg1[%c0_172, %c0_173] : memref<10x16xf32, #tpu.memory_space<vmem>>, vector<10x16xf32>
    %c0_174 = arith.constant 0 : index
    %c0_175 = arith.constant 0 : index
    %544 = vector.load %arg10[%c0_174, %c0_175] : memref<16x64xf32, #tpu.memory_space<vmem>>, vector<16x64xf32>
    %cst_176 = arith.constant dense<0.000000e+00> : vector<10x64xf32>
    %545 = tpu.matmul %543, %544, %cst_176 {dimension_numbers = #tpu.dot_dimension_numbers<[1], [0], [0], [1], [0, 0, 1, 1], [], []>} : vector<10x16xf32>, vector<16x64xf32>, vector<10x64xf32> -> vector<10x64xf32>
    %c0_177 = arith.constant 0 : index
    %c0_178 = arith.constant 0 : index
    %546 = vector.load %arg12[%c0_177, %c0_178] : memref<1x64xf32, #tpu.memory_space<vmem>>, vector<1x64xf32>
    %547 = vector.broadcast %546 : vector<1x64xf32> to vector<10x64xf32>
    %548 = arith.addf %545, %547 : vector<10x64xf32>
    %c0_179 = arith.constant 0 : index
    %c0_180 = arith.constant 0 : index
    %549 = vector.load %arg2[%c0_179, %c0_180] : memref<2x8xi32, #tpu.memory_space<vmem>>, vector<2x8xi32>
    %c0_181 = arith.constant 0 : index
    %c0_182 = arith.constant 0 : index
    %550 = vector.load %arg3[%c0_181, %c0_182] : memref<2x6xi32, #tpu.memory_space<vmem>>, vector<2x6xi32>
    %c0_i32 = arith.constant 0 : i32
    %551 = vector.broadcast %c0_i32 : i32 to vector<2x8xi32>
    %552 = arith.cmpi ne, %549, %551 : vector<2x8xi32>
    %553 = arith.extui %552 : vector<2x8xi1> to vector<2x8xi32>
    %554 = arith.sitofp %553 : vector<2x8xi32> to vector<2x8xf32>
    %555 = vector.shape_cast %549 : vector<2x8xi32> to vector<2x8x1xi32>
    %556 = tpu.iota {dimensions = array<i32: 2>} : vector<2x8x35xi32>
    %557 = vector.broadcast %555 : vector<2x8x1xi32> to vector<2x8x35xi32>
    %558 = arith.cmpi eq, %557, %556 : vector<2x8x35xi32>
    %559 = arith.extui %558 : vector<2x8x35xi1> to vector<2x8x35xi32>
    %560 = arith.sitofp %559 : vector<2x8x35xi32> to vector<2x8x35xf32>
    %561 = tpu.iota {dimensions = array<i32: 1>} : vector<2x35xi32>
    %c0_183 = arith.constant 0 : index
    %c0_184 = arith.constant 0 : index
    %562 = vector.load %arg15[%c0_183, %c0_184] : memref<16x32xf32, #tpu.memory_space<vmem>>, vector<16x32xf32>
    %c0_185 = arith.constant 0 : index
    %c0_186 = arith.constant 0 : index
    %563 = vector.load %arg16[%c0_185, %c0_186] : memref<16x32xf32, #tpu.memory_space<vmem>>, vector<16x32xf32>
    %c0_187 = arith.constant 0 : index
    %c0_188 = arith.constant 0 : index
    %564 = vector.load %arg17[%c0_187, %c0_188] : memref<1x32xf32, #tpu.memory_space<vmem>>, vector<1x32xf32>
    %c0_189 = arith.constant 0 : index
    %c0_190 = arith.constant 0 : index
    %565 = vector.load %arg18[%c0_189, %c0_190] : memref<1x32xf32, #tpu.memory_space<vmem>>, vector<1x32xf32>
    %566 = vector.shape_cast %565 : vector<1x32xf32> to vector<1x1x32xf32>
    %c0_191 = arith.constant 0 : index
    %c0_192 = arith.constant 0 : index
    %567 = vector.load %arg19[%c0_191, %c0_192] : memref<1x32xf32, #tpu.memory_space<vmem>>, vector<1x32xf32>
    %568 = vector.shape_cast %567 : vector<1x32xf32> to vector<1x1x32xf32>
    %c0_193 = arith.constant 0 : index
    %c0_194 = arith.constant 0 : index
    %569 = vector.load %arg11[%c0_193, %c0_194] : memref<16x64xf32, #tpu.memory_space<vmem>>, vector<16x64xf32>
    %c0_195 = arith.constant 0 : index
    %c0_196 = arith.constant 0 : index
    %570 = vector.load %arg20[%c0_195, %c0_196] : memref<16x16xf32, #tpu.memory_space<vmem>>, vector<16x16xf32>
    %c0_197 = arith.constant 0 : index
    %c0_198 = arith.constant 0 : index
    %571 = vector.load %arg21[%c0_197, %c0_198] : memref<32x16xf32, #tpu.memory_space<vmem>>, vector<32x16xf32>
    %c0_199 = arith.constant 0 : index
    %c0_200 = arith.constant 0 : index
    %572 = vector.load %arg22[%c0_199, %c0_200] : memref<1x16xf32, #tpu.memory_space<vmem>>, vector<1x16xf32>
    %c0_201 = arith.constant 0 : index
    %c0_202 = arith.constant 0 : index
    %573 = vector.load %arg23[%c0_201, %c0_202] : memref<16x32xf32, #tpu.memory_space<vmem>>, vector<16x32xf32>
    %c0_203 = arith.constant 0 : index
    %c0_204 = arith.constant 0 : index
    %574 = vector.load %arg24[%c0_203, %c0_204] : memref<1x32xf32, #tpu.memory_space<vmem>>, vector<1x32xf32>
    %c0_205 = arith.constant 0 : index
    %c0_206 = arith.constant 0 : index
    %575 = vector.load %arg25[%c0_205, %c0_206] : memref<32x1xf32, #tpu.memory_space<vmem>>, vector<32x1xf32>
    %c0_207 = arith.constant 0 : index
    %c0_208 = arith.constant 0 : index
    %576 = vector.load %arg26[%c0_207, %c0_208] : memref<16x1xf32, #tpu.memory_space<vmem>>, vector<16x1xf32>
    %c0_209 = arith.constant 0 : index
    %c0_210 = arith.constant 0 : index
    %577 = vector.load %arg27[%c0_209, %c0_210] : memref<16x1xf32, #tpu.memory_space<vmem>>, vector<16x1xf32>
    %c0_211 = arith.constant 0 : index
    %c0_212 = arith.constant 0 : index
    %578 = vector.load %arg28[%c0_211, %c0_212] : memref<16x1xf32, #tpu.memory_space<vmem>>, vector<16x1xf32>
    %c0_213 = arith.constant 0 : index
    %c0_214 = arith.constant 0 : index
    %579 = vector.load %arg29[%c0_213, %c0_214] : memref<1x1xf32, #tpu.memory_space<vmem>>, vector<1x1xf32>
    %cst_215 = arith.constant 0.000000e+00 : f32
    %580 = vector.broadcast %cst_215 : f32 to vector<2x8xf32>
    %cst_216 = arith.constant 0.000000e+00 : f32
    %581 = vector.broadcast %cst_216 : f32 to vector<2x1xf32>
    %cst_217 = arith.constant dense<0.000000e+00> : vector<2x32xf32>
    %582 = tpu.matmul %541, %562, %cst_217 {dimension_numbers = #tpu.dot_dimension_numbers<[1], [0], [0], [1], [0, 0, 1, 1], [], []>} : vector<2x16xf32>, vector<16x32xf32>, vector<2x32xf32> -> vector<2x32xf32>
    %cst_218 = arith.constant dense<0.000000e+00> : vector<2x32xf32>
    %583 = tpu.matmul %542, %563, %cst_218 {dimension_numbers = #tpu.dot_dimension_numbers<[1], [0], [0], [1], [0, 0, 1, 1], [], []>} : vector<2x16xf32>, vector<16x32xf32>, vector<2x32xf32> -> vector<2x32xf32>
    %584 = arith.addf %582, %583 : vector<2x32xf32>
    %585 = vector.broadcast %564 : vector<1x32xf32> to vector<2x32xf32>
    %586 = arith.addf %584, %585 : vector<2x32xf32>
    %587 = vector.shape_cast %586 : vector<2x32xf32> to vector<2x1x32xf32>
    %588 = vector.broadcast %587 : vector<2x1x32xf32> to vector<2x8x32xf32>
    %589 = arith.addf %540, %588 : vector<2x8x32xf32>
    %590 = vector.shape_cast %580 : vector<2x8xf32> to vector<2x8x1xf32>
    %591 = vector.broadcast %590 : vector<2x8x1xf32> to vector<2x8x32xf32>
    %592 = vector.broadcast %566 : vector<1x1x32xf32> to vector<2x8x32xf32>
    %593 = arith.mulf %591, %592 : vector<2x8x32xf32>
    %594 = arith.addf %589, %593 : vector<2x8x32xf32>
    %595 = math.tanh %594 : vector<2x8x32xf32>
    %596 = vector.broadcast %568 : vector<1x1x32xf32> to vector<2x8x32xf32>
    %597 = arith.mulf %595, %596 : vector<2x8x32xf32>
    %cst_219 = arith.constant dense<0.000000e+00> : vector<2x8xf32>
    %598 = vector.multi_reduction <add>, %597, %cst_219 [2] : vector<2x8x32xf32> to vector<2x8xf32>
    %cst_220 = arith.constant dense<0xFF800000> : vector<2xf32>
    %599 = vector.multi_reduction <maximumf>, %598, %cst_220 [1] : vector<2x8xf32> to vector<2xf32>
    %600 = vector.shape_cast %599 : vector<2xf32> to vector<2x1xf32>
    %601 = vector.broadcast %600 : vector<2x1xf32> to vector<2x8xf32>
    %602 = arith.subf %598, %601 : vector<2x8xf32>
    %603 = math.exp %602 : vector<2x8xf32>
    %cst_221 = arith.constant dense<0.000000e+00> : vector<2xf32>
    %604 = vector.multi_reduction <add>, %603, %cst_221 [1] : vector<2x8xf32> to vector<2xf32>
    %605 = vector.shape_cast %604 : vector<2xf32> to vector<2x1xf32>
    %606 = vector.broadcast %605 : vector<2x1xf32> to vector<2x8xf32>
    %607 = arith.divf %603, %606 : vector<2x8xf32>
    %608 = arith.mulf %607, %554 : vector<2x8xf32>
    %cst_222 = arith.constant dense<0.000000e+00> : vector<2xf32>
    %609 = vector.multi_reduction <add>, %608, %cst_222 [1] : vector<2x8xf32> to vector<2xf32>
    %610 = vector.shape_cast %609 : vector<2xf32> to vector<2x1xf32>
    %cst_223 = arith.constant 9.99999996E-13 : f32
    %611 = vector.broadcast %cst_223 : f32 to vector<2x1xf32>
    %612 = arith.addf %610, %611 : vector<2x1xf32>
    %613 = vector.broadcast %612 : vector<2x1xf32> to vector<2x8xf32>
    %614 = arith.divf %608, %613 : vector<2x8xf32>
    %615 = vector.shape_cast %614 : vector<2x8xf32> to vector<2x8x1xf32>
    %616 = vector.broadcast %615 : vector<2x8x1xf32> to vector<2x8x32xf32>
    %617 = arith.mulf %616, %539 : vector<2x8x32xf32>
    %cst_224 = arith.constant dense<0.000000e+00> : vector<2x32xf32>
    %618 = vector.multi_reduction <add>, %617, %cst_224 [1] : vector<2x8x32xf32> to vector<2x32xf32>
    %619 = arith.addf %580, %614 : vector<2x8xf32>
    %620 = arith.minimumf %614, %619 : vector<2x8xf32>
    %cst_225 = arith.constant dense<0.000000e+00> : vector<2xf32>
    %621 = vector.multi_reduction <add>, %620, %cst_225 [1] : vector<2x8xf32> to vector<2xf32>
    %622 = vector.shape_cast %621 : vector<2xf32> to vector<2x1xf32>
    %623 = vector.extract_strided_slice %543 {offsets = [0, 0], sizes = [2, 16], strides = [1, 1]} : vector<10x16xf32> to vector<2x16xf32>
    %624 = vector.extract_strided_slice %548 {offsets = [0, 0], sizes = [2, 64], strides = [1, 1]} : vector<10x64xf32> to vector<2x64xf32>
    %cst_226 = arith.constant dense<0.000000e+00> : vector<2x64xf32>
    %625 = tpu.matmul %541, %569, %cst_226 {dimension_numbers = #tpu.dot_dimension_numbers<[1], [0], [0], [1], [0, 0, 1, 1], [], []>} : vector<2x16xf32>, vector<16x64xf32>, vector<2x64xf32> -> vector<2x64xf32>
    %626 = arith.addf %624, %625 : vector<2x64xf32>
    %627 = vector.extract_strided_slice %626 {offsets = [0, 0], sizes = [2, 16], strides = [1, 1]} : vector<2x64xf32> to vector<2x16xf32>
    %628 = arith.negf %627 : vector<2x16xf32>
    %629 = math.exp %628 : vector<2x16xf32>
    %cst_227 = arith.constant 1.000000e+00 : f32
    %630 = vector.broadcast %cst_227 : f32 to vector<2x16xf32>
    %631 = arith.addf %630, %629 : vector<2x16xf32>
    %632 = arith.divf %630, %631 : vector<2x16xf32>
    %633 = vector.extract_strided_slice %626 {offsets = [0, 16], sizes = [2, 16], strides = [1, 1]} : vector<2x64xf32> to vector<2x16xf32>
    %634 = arith.negf %633 : vector<2x16xf32>
    %635 = math.exp %634 : vector<2x16xf32>
    %cst_228 = arith.constant 1.000000e+00 : f32
    %636 = vector.broadcast %cst_228 : f32 to vector<2x16xf32>
    %637 = arith.addf %636, %635 : vector<2x16xf32>
    %638 = arith.divf %636, %637 : vector<2x16xf32>
    %639 = vector.extract_strided_slice %626 {offsets = [0, 32], sizes = [2, 16], strides = [1, 1]} : vector<2x64xf32> to vector<2x16xf32>
    %640 = math.tanh %639 : vector<2x16xf32>
    %641 = vector.extract_strided_slice %626 {offsets = [0, 48], sizes = [2, 16], strides = [1, 1]} : vector<2x64xf32> to vector<2x16xf32>
    %642 = arith.negf %641 : vector<2x16xf32>
    %643 = math.exp %642 : vector<2x16xf32>
    %cst_229 = arith.constant 1.000000e+00 : f32
    %644 = vector.broadcast %cst_229 : f32 to vector<2x16xf32>
    %645 = arith.addf %644, %643 : vector<2x16xf32>
    %646 = arith.divf %644, %645 : vector<2x16xf32>
    %647 = arith.mulf %638, %542 : vector<2x16xf32>
    %648 = arith.mulf %632, %640 : vector<2x16xf32>
    %649 = arith.addf %647, %648 : vector<2x16xf32>
    %650 = math.tanh %649 : vector<2x16xf32>
    %651 = arith.mulf %646, %650 : vector<2x16xf32>
    %cst_230 = arith.constant dense<0.000000e+00> : vector<2x16xf32>
    %652 = tpu.matmul %651, %570, %cst_230 {dimension_numbers = #tpu.dot_dimension_numbers<[1], [0], [0], [1], [0, 0, 1, 1], [], []>} : vector<2x16xf32>, vector<16x16xf32>, vector<2x16xf32> -> vector<2x16xf32>
    %cst_231 = arith.constant dense<0.000000e+00> : vector<2x16xf32>
    %653 = tpu.matmul %618, %571, %cst_231 {dimension_numbers = #tpu.dot_dimension_numbers<[1], [0], [0], [1], [0, 0, 1, 1], [], []>} : vector<2x32xf32>, vector<32x16xf32>, vector<2x16xf32> -> vector<2x16xf32>
    %654 = arith.addf %652, %653 : vector<2x16xf32>
    %655 = vector.broadcast %572 : vector<1x16xf32> to vector<2x16xf32>
    %656 = arith.addf %654, %655 : vector<2x16xf32>
    %cst_232 = arith.constant dense<0.000000e+00> : vector<2x32xf32>
    %657 = tpu.matmul %656, %573, %cst_232 {dimension_numbers = #tpu.dot_dimension_numbers<[1], [0], [0], [1], [0, 0, 1, 1], [], []>} : vector<2x16xf32>, vector<16x32xf32>, vector<2x32xf32> -> vector<2x32xf32>
    %658 = vector.broadcast %574 : vector<1x32xf32> to vector<2x32xf32>
    %659 = arith.addf %657, %658 : vector<2x32xf32>
    %cst_233 = arith.constant dense<0xFF800000> : vector<2xf32>
    %660 = vector.multi_reduction <maximumf>, %659, %cst_233 [1] : vector<2x32xf32> to vector<2xf32>
    %661 = vector.shape_cast %660 : vector<2xf32> to vector<2x1xf32>
    %662 = vector.broadcast %661 : vector<2x1xf32> to vector<2x32xf32>
    %663 = arith.subf %659, %662 : vector<2x32xf32>
    %664 = math.exp %663 : vector<2x32xf32>
    %cst_234 = arith.constant dense<0.000000e+00> : vector<2xf32>
    %665 = vector.multi_reduction <add>, %664, %cst_234 [1] : vector<2x32xf32> to vector<2xf32>
    %666 = vector.shape_cast %665 : vector<2xf32> to vector<2x1xf32>
    %667 = vector.broadcast %666 : vector<2x1xf32> to vector<2x32xf32>
    %668 = arith.divf %664, %667 : vector<2x32xf32>
    %cst_235 = arith.constant dense<0.000000e+00> : vector<2x1xf32>
    %669 = tpu.matmul %618, %575, %cst_235 {dimension_numbers = #tpu.dot_dimension_numbers<[1], [0], [0], [1], [0, 0, 1, 1], [], []>} : vector<2x32xf32>, vector<32x1xf32>, vector<2x1xf32> -> vector<2x1xf32>
    %cst_236 = arith.constant dense<0.000000e+00> : vector<2x1xf32>
    %670 = tpu.matmul %651, %576, %cst_236 {dimension_numbers = #tpu.dot_dimension_numbers<[1], [0], [0], [1], [0, 0, 1, 1], [], []>} : vector<2x16xf32>, vector<16x1xf32>, vector<2x1xf32> -> vector<2x1xf32>
    %671 = arith.addf %669, %670 : vector<2x1xf32>
    %cst_237 = arith.constant dense<0.000000e+00> : vector<2x1xf32>
    %672 = tpu.matmul %649, %577, %cst_237 {dimension_numbers = #tpu.dot_dimension_numbers<[1], [0], [0], [1], [0, 0, 1, 1], [], []>} : vector<2x16xf32>, vector<16x1xf32>, vector<2x1xf32> -> vector<2x1xf32>
    %673 = arith.addf %671, %672 : vector<2x1xf32>
    %cst_238 = arith.constant dense<0.000000e+00> : vector<2x1xf32>
    %674 = tpu.matmul %623, %578, %cst_238 {dimension_numbers = #tpu.dot_dimension_numbers<[1], [0], [0], [1], [0, 0, 1, 1], [], []>} : vector<2x16xf32>, vector<16x1xf32>, vector<2x1xf32> -> vector<2x1xf32>
    %675 = arith.addf %673, %674 : vector<2x1xf32>
    %676 = vector.broadcast %579 : vector<1x1xf32> to vector<2x1xf32>
    %677 = arith.addf %675, %676 : vector<2x1xf32>
    %678 = arith.negf %677 : vector<2x1xf32>
    %679 = math.exp %678 : vector<2x1xf32>
    %cst_239 = arith.constant 1.000000e+00 : f32
    %680 = vector.broadcast %cst_239 : f32 to vector<2x1xf32>
    %681 = arith.addf %680, %679 : vector<2x1xf32>
    %682 = arith.divf %680, %681 : vector<2x1xf32>
    %cst_240 = arith.constant 1.000000e-03 : f32
    %cst_241 = arith.constant 9.990000e-01 : f32
    %683 = vector.broadcast %cst_240 : f32 to vector<2x1xf32>
    %684 = arith.maximumf %683, %682 : vector<2x1xf32>
    %685 = vector.broadcast %cst_241 : f32 to vector<2x1xf32>
    %686 = arith.minimumf %685, %684 : vector<2x1xf32>
    %cst_242 = arith.constant 1.000000e+00 : f32
    %687 = vector.broadcast %cst_242 : f32 to vector<2x1xf32>
    %688 = arith.subf %687, %686 : vector<2x1xf32>
    %689 = vector.broadcast %688 : vector<2x1xf32> to vector<2x8xf32>
    %690 = arith.mulf %689, %614 : vector<2x8xf32>
    %691 = vector.shape_cast %690 : vector<2x8xf32> to vector<2x8x1xf32>
    %692 = vector.broadcast %691 : vector<2x8x1xf32> to vector<2x8x35xf32>
    %693 = arith.mulf %692, %560 : vector<2x8x35xf32>
    %cst_243 = arith.constant dense<0.000000e+00> : vector<2x35xf32>
    %694 = vector.multi_reduction <add>, %693, %cst_243 [1] : vector<2x8x35xf32> to vector<2x35xf32>
    %695 = vector.extract_strided_slice %550 {offsets = [0, 1], sizes = [2, 1], strides = [1, 1]} : vector<2x6xi32> to vector<2x1xi32>
    %696 = vector.broadcast %695 : vector<2x1xi32> to vector<2x35xi32>
    %697 = arith.cmpi eq, %696, %561 : vector<2x35xi32>
    %698 = arith.extui %697 : vector<2x35xi1> to vector<2x35xi32>
    %699 = arith.sitofp %698 : vector<2x35xi32> to vector<2x35xf32>
    %700 = arith.mulf %694, %699 : vector<2x35xf32>
    %cst_244 = arith.constant dense<0.000000e+00> : vector<2xf32>
    %701 = vector.multi_reduction <add>, %700, %cst_244 [1] : vector<2x35xf32> to vector<2xf32>
    %702 = vector.shape_cast %701 : vector<2xf32> to vector<2x1xf32>
    %703 = vector.extract_strided_slice %699 {offsets = [0, 0], sizes = [2, 32], strides = [1, 1]} : vector<2x35xf32> to vector<2x32xf32>
    %704 = arith.mulf %668, %703 : vector<2x32xf32>
    %cst_245 = arith.constant dense<0.000000e+00> : vector<2xf32>
    %705 = vector.multi_reduction <add>, %704, %cst_245 [1] : vector<2x32xf32> to vector<2xf32>
    %706 = vector.shape_cast %705 : vector<2xf32> to vector<2x1xf32>
    %707 = arith.mulf %686, %706 : vector<2x1xf32>
    %708 = arith.addf %702, %707 : vector<2x1xf32>
    %c0_i32_246 = arith.constant 0 : i32
    %709 = vector.broadcast %c0_i32_246 : i32 to vector<2x1xi32>
    %710 = arith.cmpi ne, %695, %709 : vector<2x1xi32>
    %711 = arith.extui %710 : vector<2x1xi1> to vector<2x1xi32>
    %712 = arith.sitofp %711 : vector<2x1xi32> to vector<2x1xf32>
    %cst_247 = arith.constant 9.99999996E-13 : f32
    %713 = vector.broadcast %cst_247 : f32 to vector<2x1xf32>
    %714 = arith.addf %708, %713 : vector<2x1xf32>
    %715 = math.log %714 : vector<2x1xf32>
    %cst_248 = arith.constant 0.000000e+00 : f32
    %716 = vector.broadcast %cst_248 : f32 to vector<2x1xf32>
    %717 = arith.subf %716, %715 : vector<2x1xf32>
    %cst_249 = arith.constant 1.000000e+00 : f32
    %718 = vector.broadcast %cst_249 : f32 to vector<2x1xf32>
    %719 = arith.mulf %718, %622 : vector<2x1xf32>
    %720 = arith.addf %717, %719 : vector<2x1xf32>
    %721 = arith.mulf %720, %712 : vector<2x1xf32>
    %722 = arith.addf %581, %721 : vector<2x1xf32>
    %cst_250 = arith.constant dense<0.000000e+00> : vector<2x32xf32>
    %723 = tpu.matmul %651, %562, %cst_250 {dimension_numbers = #tpu.dot_dimension_numbers<[1], [0], [0], [1], [0, 0, 1, 1], [], []>} : vector<2x16xf32>, vector<16x32xf32>, vector<2x32xf32> -> vector<2x32xf32>
    %cst_251 = arith.constant dense<0.000000e+00> : vector<2x32xf32>
    %724 = tpu.matmul %649, %563, %cst_251 {dimension_numbers = #tpu.dot_dimension_numbers<[1], [0], [0], [1], [0, 0, 1, 1], [], []>} : vector<2x16xf32>, vector<16x32xf32>, vector<2x32xf32> -> vector<2x32xf32>
    %725 = arith.addf %723, %724 : vector<2x32xf32>
    %726 = vector.broadcast %564 : vector<1x32xf32> to vector<2x32xf32>
    %727 = arith.addf %725, %726 : vector<2x32xf32>
    %728 = vector.shape_cast %727 : vector<2x32xf32> to vector<2x1x32xf32>
    %729 = vector.broadcast %728 : vector<2x1x32xf32> to vector<2x8x32xf32>
    %730 = arith.addf %540, %729 : vector<2x8x32xf32>
    %731 = vector.shape_cast %619 : vector<2x8xf32> to vector<2x8x1xf32>
    %732 = vector.broadcast %731 : vector<2x8x1xf32> to vector<2x8x32xf32>
    %733 = vector.broadcast %566 : vector<1x1x32xf32> to vector<2x8x32xf32>
    %734 = arith.mulf %732, %733 : vector<2x8x32xf32>
    %735 = arith.addf %730, %734 : vector<2x8x32xf32>
    %736 = math.tanh %735 : vector<2x8x32xf32>
    %737 = vector.broadcast %568 : vector<1x1x32xf32> to vector<2x8x32xf32>
    %738 = arith.mulf %736, %737 : vector<2x8x32xf32>
    %cst_252 = arith.constant dense<0.000000e+00> : vector<2x8xf32>
    %739 = vector.multi_reduction <add>, %738, %cst_252 [2] : vector<2x8x32xf32> to vector<2x8xf32>
    %cst_253 = arith.constant dense<0xFF800000> : vector<2xf32>
    %740 = vector.multi_reduction <maximumf>, %739, %cst_253 [1] : vector<2x8xf32> to vector<2xf32>
    %741 = vector.shape_cast %740 : vector<2xf32> to vector<2x1xf32>
    %742 = vector.broadcast %741 : vector<2x1xf32> to vector<2x8xf32>
    %743 = arith.subf %739, %742 : vector<2x8xf32>
    %744 = math.exp %743 : vector<2x8xf32>
    %cst_254 = arith.constant dense<0.000000e+00> : vector<2xf32>
    %745 = vector.multi_reduction <add>, %744, %cst_254 [1] : vector<2x8xf32> to vector<2xf32>
    %746 = vector.shape_cast %745 : vector<2xf32> to vector<2x1xf32>
    %747 = vector.broadcast %746 : vector<2x1xf32> to vector<2x8xf32>
    %748 = arith.divf %744, %747 : vector<2x8xf32>
    %749 = arith.mulf %748, %554 : vector<2x8xf32>
    %cst_255 = arith.constant dense<0.000000e+00> : vector<2xf32>
    %750 = vector.multi_reduction <add>, %749, %cst_255 [1] : vector<2x8xf32> to vector<2xf32>
    %751 = vector.shape_cast %750 : vector<2xf32> to vector<2x1xf32>
    %cst_256 = arith.constant 9.99999996E-13 : f32
    %752 = vector.broadcast %cst_256 : f32 to vector<2x1xf32>
    %753 = arith.addf %751, %752 : vector<2x1xf32>
    %754 = vector.broadcast %753 : vector<2x1xf32> to vector<2x8xf32>
    %755 = arith.divf %749, %754 : vector<2x8xf32>
    %756 = vector.shape_cast %755 : vector<2x8xf32> to vector<2x8x1xf32>
    %757 = vector.broadcast %756 : vector<2x8x1xf32> to vector<2x8x32xf32>
    %758 = arith.mulf %757, %539 : vector<2x8x32xf32>
    %cst_257 = arith.constant dense<0.000000e+00> : vector<2x32xf32>
    %759 = vector.multi_reduction <add>, %758, %cst_257 [1] : vector<2x8x32xf32> to vector<2x32xf32>
    %760 = arith.addf %619, %755 : vector<2x8xf32>
    %761 = arith.minimumf %755, %760 : vector<2x8xf32>
    %cst_258 = arith.constant dense<0.000000e+00> : vector<2xf32>
    %762 = vector.multi_reduction <add>, %761, %cst_258 [1] : vector<2x8xf32> to vector<2xf32>
    %763 = vector.shape_cast %762 : vector<2xf32> to vector<2x1xf32>
    %764 = vector.extract_strided_slice %543 {offsets = [2, 0], sizes = [2, 16], strides = [1, 1]} : vector<10x16xf32> to vector<2x16xf32>
    %765 = vector.extract_strided_slice %548 {offsets = [2, 0], sizes = [2, 64], strides = [1, 1]} : vector<10x64xf32> to vector<2x64xf32>
    %cst_259 = arith.constant dense<0.000000e+00> : vector<2x64xf32>
    %766 = tpu.matmul %651, %569, %cst_259 {dimension_numbers = #tpu.dot_dimension_numbers<[1], [0], [0], [1], [0, 0, 1, 1], [], []>} : vector<2x16xf32>, vector<16x64xf32>, vector<2x64xf32> -> vector<2x64xf32>
    %767 = arith.addf %765, %766 : vector<2x64xf32>
    %768 = vector.extract_strided_slice %767 {offsets = [0, 0], sizes = [2, 16], strides = [1, 1]} : vector<2x64xf32> to vector<2x16xf32>
    %769 = arith.negf %768 : vector<2x16xf32>
    %770 = math.exp %769 : vector<2x16xf32>
    %cst_260 = arith.constant 1.000000e+00 : f32
    %771 = vector.broadcast %cst_260 : f32 to vector<2x16xf32>
    %772 = arith.addf %771, %770 : vector<2x16xf32>
    %773 = arith.divf %771, %772 : vector<2x16xf32>
    %774 = vector.extract_strided_slice %767 {offsets = [0, 16], sizes = [2, 16], strides = [1, 1]} : vector<2x64xf32> to vector<2x16xf32>
    %775 = arith.negf %774 : vector<2x16xf32>
    %776 = math.exp %775 : vector<2x16xf32>
    %cst_261 = arith.constant 1.000000e+00 : f32
    %777 = vector.broadcast %cst_261 : f32 to vector<2x16xf32>
    %778 = arith.addf %777, %776 : vector<2x16xf32>
    %779 = arith.divf %777, %778 : vector<2x16xf32>
    %780 = vector.extract_strided_slice %767 {offsets = [0, 32], sizes = [2, 16], strides = [1, 1]} : vector<2x64xf32> to vector<2x16xf32>
    %781 = math.tanh %780 : vector<2x16xf32>
    %782 = vector.extract_strided_slice %767 {offsets = [0, 48], sizes = [2, 16], strides = [1, 1]} : vector<2x64xf32> to vector<2x16xf32>
    %783 = arith.negf %782 : vector<2x16xf32>
    %784 = math.exp %783 : vector<2x16xf32>
    %cst_262 = arith.constant 1.000000e+00 : f32
    %785 = vector.broadcast %cst_262 : f32 to vector<2x16xf32>
    %786 = arith.addf %785, %784 : vector<2x16xf32>
    %787 = arith.divf %785, %786 : vector<2x16xf32>
    %788 = arith.mulf %779, %649 : vector<2x16xf32>
    %789 = arith.mulf %773, %781 : vector<2x16xf32>
    %790 = arith.addf %788, %789 : vector<2x16xf32>
    %791 = math.tanh %790 : vector<2x16xf32>
    %792 = arith.mulf %787, %791 : vector<2x16xf32>
    %cst_263 = arith.constant dense<0.000000e+00> : vector<2x16xf32>
    %793 = tpu.matmul %792, %570, %cst_263 {dimension_numbers = #tpu.dot_dimension_numbers<[1], [0], [0], [1], [0, 0, 1, 1], [], []>} : vector<2x16xf32>, vector<16x16xf32>, vector<2x16xf32> -> vector<2x16xf32>
    %cst_264 = arith.constant dense<0.000000e+00> : vector<2x16xf32>
    %794 = tpu.matmul %759, %571, %cst_264 {dimension_numbers = #tpu.dot_dimension_numbers<[1], [0], [0], [1], [0, 0, 1, 1], [], []>} : vector<2x32xf32>, vector<32x16xf32>, vector<2x16xf32> -> vector<2x16xf32>
    %795 = arith.addf %793, %794 : vector<2x16xf32>
    %796 = vector.broadcast %572 : vector<1x16xf32> to vector<2x16xf32>
    %797 = arith.addf %795, %796 : vector<2x16xf32>
    %cst_265 = arith.constant dense<0.000000e+00> : vector<2x32xf32>
    %798 = tpu.matmul %797, %573, %cst_265 {dimension_numbers = #tpu.dot_dimension_numbers<[1], [0], [0], [1], [0, 0, 1, 1], [], []>} : vector<2x16xf32>, vector<16x32xf32>, vector<2x32xf32> -> vector<2x32xf32>
    %799 = vector.broadcast %574 : vector<1x32xf32> to vector<2x32xf32>
    %800 = arith.addf %798, %799 : vector<2x32xf32>
    %cst_266 = arith.constant dense<0xFF800000> : vector<2xf32>
    %801 = vector.multi_reduction <maximumf>, %800, %cst_266 [1] : vector<2x32xf32> to vector<2xf32>
    %802 = vector.shape_cast %801 : vector<2xf32> to vector<2x1xf32>
    %803 = vector.broadcast %802 : vector<2x1xf32> to vector<2x32xf32>
    %804 = arith.subf %800, %803 : vector<2x32xf32>
    %805 = math.exp %804 : vector<2x32xf32>
    %cst_267 = arith.constant dense<0.000000e+00> : vector<2xf32>
    %806 = vector.multi_reduction <add>, %805, %cst_267 [1] : vector<2x32xf32> to vector<2xf32>
    %807 = vector.shape_cast %806 : vector<2xf32> to vector<2x1xf32>
    %808 = vector.broadcast %807 : vector<2x1xf32> to vector<2x32xf32>
    %809 = arith.divf %805, %808 : vector<2x32xf32>
    %cst_268 = arith.constant dense<0.000000e+00> : vector<2x1xf32>
    %810 = tpu.matmul %759, %575, %cst_268 {dimension_numbers = #tpu.dot_dimension_numbers<[1], [0], [0], [1], [0, 0, 1, 1], [], []>} : vector<2x32xf32>, vector<32x1xf32>, vector<2x1xf32> -> vector<2x1xf32>
    %cst_269 = arith.constant dense<0.000000e+00> : vector<2x1xf32>
    %811 = tpu.matmul %792, %576, %cst_269 {dimension_numbers = #tpu.dot_dimension_numbers<[1], [0], [0], [1], [0, 0, 1, 1], [], []>} : vector<2x16xf32>, vector<16x1xf32>, vector<2x1xf32> -> vector<2x1xf32>
    %812 = arith.addf %810, %811 : vector<2x1xf32>
    %cst_270 = arith.constant dense<0.000000e+00> : vector<2x1xf32>
    %813 = tpu.matmul %790, %577, %cst_270 {dimension_numbers = #tpu.dot_dimension_numbers<[1], [0], [0], [1], [0, 0, 1, 1], [], []>} : vector<2x16xf32>, vector<16x1xf32>, vector<2x1xf32> -> vector<2x1xf32>
    %814 = arith.addf %812, %813 : vector<2x1xf32>
    %cst_271 = arith.constant dense<0.000000e+00> : vector<2x1xf32>
    %815 = tpu.matmul %764, %578, %cst_271 {dimension_numbers = #tpu.dot_dimension_numbers<[1], [0], [0], [1], [0, 0, 1, 1], [], []>} : vector<2x16xf32>, vector<16x1xf32>, vector<2x1xf32> -> vector<2x1xf32>
    %816 = arith.addf %814, %815 : vector<2x1xf32>
    %817 = vector.broadcast %579 : vector<1x1xf32> to vector<2x1xf32>
    %818 = arith.addf %816, %817 : vector<2x1xf32>
    %819 = arith.negf %818 : vector<2x1xf32>
    %820 = math.exp %819 : vector<2x1xf32>
    %cst_272 = arith.constant 1.000000e+00 : f32
    %821 = vector.broadcast %cst_272 : f32 to vector<2x1xf32>
    %822 = arith.addf %821, %820 : vector<2x1xf32>
    %823 = arith.divf %821, %822 : vector<2x1xf32>
    %cst_273 = arith.constant 1.000000e-03 : f32
    %cst_274 = arith.constant 9.990000e-01 : f32
    %824 = vector.broadcast %cst_273 : f32 to vector<2x1xf32>
    %825 = arith.maximumf %824, %823 : vector<2x1xf32>
    %826 = vector.broadcast %cst_274 : f32 to vector<2x1xf32>
    %827 = arith.minimumf %826, %825 : vector<2x1xf32>
    %cst_275 = arith.constant 1.000000e+00 : f32
    %828 = vector.broadcast %cst_275 : f32 to vector<2x1xf32>
    %829 = arith.subf %828, %827 : vector<2x1xf32>
    %830 = vector.broadcast %829 : vector<2x1xf32> to vector<2x8xf32>
    %831 = arith.mulf %830, %755 : vector<2x8xf32>
    %832 = vector.shape_cast %831 : vector<2x8xf32> to vector<2x8x1xf32>
    %833 = vector.broadcast %832 : vector<2x8x1xf32> to vector<2x8x35xf32>
    %834 = arith.mulf %833, %560 : vector<2x8x35xf32>
    %cst_276 = arith.constant dense<0.000000e+00> : vector<2x35xf32>
    %835 = vector.multi_reduction <add>, %834, %cst_276 [1] : vector<2x8x35xf32> to vector<2x35xf32>
    %836 = vector.extract_strided_slice %550 {offsets = [0, 2], sizes = [2, 1], strides = [1, 1]} : vector<2x6xi32> to vector<2x1xi32>
    %837 = vector.broadcast %836 : vector<2x1xi32> to vector<2x35xi32>
    %838 = arith.cmpi eq, %837, %561 : vector<2x35xi32>
    %839 = arith.extui %838 : vector<2x35xi1> to vector<2x35xi32>
    %840 = arith.sitofp %839 : vector<2x35xi32> to vector<2x35xf32>
    %841 = arith.mulf %835, %840 : vector<2x35xf32>
    %cst_277 = arith.constant dense<0.000000e+00> : vector<2xf32>
    %842 = vector.multi_reduction <add>, %841, %cst_277 [1] : vector<2x35xf32> to vector<2xf32>
    %843 = vector.shape_cast %842 : vector<2xf32> to vector<2x1xf32>
    %844 = vector.extract_strided_slice %840 {offsets = [0, 0], sizes = [2, 32], strides = [1, 1]} : vector<2x35xf32> to vector<2x32xf32>
    %845 = arith.mulf %809, %844 : vector<2x32xf32>
    %cst_278 = arith.constant dense<0.000000e+00> : vector<2xf32>
    %846 = vector.multi_reduction <add>, %845, %cst_278 [1] : vector<2x32xf32> to vector<2xf32>
    %847 = vector.shape_cast %846 : vector<2xf32> to vector<2x1xf32>
    %848 = arith.mulf %827, %847 : vector<2x1xf32>
    %849 = arith.addf %843, %848 : vector<2x1xf32>
    %c0_i32_279 = arith.constant 0 : i32
    %850 = vector.broadcast %c0_i32_279 : i32 to vector<2x1xi32>
    %851 = arith.cmpi ne, %836, %850 : vector<2x1xi32>
    %852 = arith.extui %851 : vector<2x1xi1> to vector<2x1xi32>
    %853 = arith.sitofp %852 : vector<2x1xi32> to vector<2x1xf32>
    %cst_280 = arith.constant 9.99999996E-13 : f32
    %854 = vector.broadcast %cst_280 : f32 to vector<2x1xf32>
    %855 = arith.addf %849, %854 : vector<2x1xf32>
    %856 = math.log %855 : vector<2x1xf32>
    %cst_281 = arith.constant 0.000000e+00 : f32
    %857 = vector.broadcast %cst_281 : f32 to vector<2x1xf32>
    %858 = arith.subf %857, %856 : vector<2x1xf32>
    %cst_282 = arith.constant 1.000000e+00 : f32
    %859 = vector.broadcast %cst_282 : f32 to vector<2x1xf32>
    %860 = arith.mulf %859, %763 : vector<2x1xf32>
    %861 = arith.addf %858, %860 : vector<2x1xf32>
    %862 = arith.mulf %861, %853 : vector<2x1xf32>
    %863 = arith.addf %722, %862 : vector<2x1xf32>
    %cst_283 = arith.constant dense<0.000000e+00> : vector<2x32xf32>
    %864 = tpu.matmul %792, %562, %cst_283 {dimension_numbers = #tpu.dot_dimension_numbers<[1], [0], [0], [1], [0, 0, 1, 1], [], []>} : vector<2x16xf32>, vector<16x32xf32>, vector<2x32xf32> -> vector<2x32xf32>
    %cst_284 = arith.constant dense<0.000000e+00> : vector<2x32xf32>
    %865 = tpu.matmul %790, %563, %cst_284 {dimension_numbers = #tpu.dot_dimension_numbers<[1], [0], [0], [1], [0, 0, 1, 1], [], []>} : vector<2x16xf32>, vector<16x32xf32>, vector<2x32xf32> -> vector<2x32xf32>
    %866 = arith.addf %864, %865 : vector<2x32xf32>
    %867 = vector.broadcast %564 : vector<1x32xf32> to vector<2x32xf32>
    %868 = arith.addf %866, %867 : vector<2x32xf32>
    %869 = vector.shape_cast %868 : vector<2x32xf32> to vector<2x1x32xf32>
    %870 = vector.broadcast %869 : vector<2x1x32xf32> to vector<2x8x32xf32>
    %871 = arith.addf %540, %870 : vector<2x8x32xf32>
    %872 = vector.shape_cast %760 : vector<2x8xf32> to vector<2x8x1xf32>
    %873 = vector.broadcast %872 : vector<2x8x1xf32> to vector<2x8x32xf32>
    %874 = vector.broadcast %566 : vector<1x1x32xf32> to vector<2x8x32xf32>
    %875 = arith.mulf %873, %874 : vector<2x8x32xf32>
    %876 = arith.addf %871, %875 : vector<2x8x32xf32>
    %877 = math.tanh %876 : vector<2x8x32xf32>
    %878 = vector.broadcast %568 : vector<1x1x32xf32> to vector<2x8x32xf32>
    %879 = arith.mulf %877, %878 : vector<2x8x32xf32>
    %cst_285 = arith.constant dense<0.000000e+00> : vector<2x8xf32>
    %880 = vector.multi_reduction <add>, %879, %cst_285 [2] : vector<2x8x32xf32> to vector<2x8xf32>
    %cst_286 = arith.constant dense<0xFF800000> : vector<2xf32>
    %881 = vector.multi_reduction <maximumf>, %880, %cst_286 [1] : vector<2x8xf32> to vector<2xf32>
    %882 = vector.shape_cast %881 : vector<2xf32> to vector<2x1xf32>
    %883 = vector.broadcast %882 : vector<2x1xf32> to vector<2x8xf32>
    %884 = arith.subf %880, %883 : vector<2x8xf32>
    %885 = math.exp %884 : vector<2x8xf32>
    %cst_287 = arith.constant dense<0.000000e+00> : vector<2xf32>
    %886 = vector.multi_reduction <add>, %885, %cst_287 [1] : vector<2x8xf32> to vector<2xf32>
    %887 = vector.shape_cast %886 : vector<2xf32> to vector<2x1xf32>
    %888 = vector.broadcast %887 : vector<2x1xf32> to vector<2x8xf32>
    %889 = arith.divf %885, %888 : vector<2x8xf32>
    %890 = arith.mulf %889, %554 : vector<2x8xf32>
    %cst_288 = arith.constant dense<0.000000e+00> : vector<2xf32>
    %891 = vector.multi_reduction <add>, %890, %cst_288 [1] : vector<2x8xf32> to vector<2xf32>
    %892 = vector.shape_cast %891 : vector<2xf32> to vector<2x1xf32>
    %cst_289 = arith.constant 9.99999996E-13 : f32
    %893 = vector.broadcast %cst_289 : f32 to vector<2x1xf32>
    %894 = arith.addf %892, %893 : vector<2x1xf32>
    %895 = vector.broadcast %894 : vector<2x1xf32> to vector<2x8xf32>
    %896 = arith.divf %890, %895 : vector<2x8xf32>
    %897 = vector.shape_cast %896 : vector<2x8xf32> to vector<2x8x1xf32>
    %898 = vector.broadcast %897 : vector<2x8x1xf32> to vector<2x8x32xf32>
    %899 = arith.mulf %898, %539 : vector<2x8x32xf32>
    %cst_290 = arith.constant dense<0.000000e+00> : vector<2x32xf32>
    %900 = vector.multi_reduction <add>, %899, %cst_290 [1] : vector<2x8x32xf32> to vector<2x32xf32>
    %901 = arith.addf %760, %896 : vector<2x8xf32>
    %902 = arith.minimumf %896, %901 : vector<2x8xf32>
    %cst_291 = arith.constant dense<0.000000e+00> : vector<2xf32>
    %903 = vector.multi_reduction <add>, %902, %cst_291 [1] : vector<2x8xf32> to vector<2xf32>
    %904 = vector.shape_cast %903 : vector<2xf32> to vector<2x1xf32>
    %905 = vector.extract_strided_slice %543 {offsets = [4, 0], sizes = [2, 16], strides = [1, 1]} : vector<10x16xf32> to vector<2x16xf32>
    %906 = vector.extract_strided_slice %548 {offsets = [4, 0], sizes = [2, 64], strides = [1, 1]} : vector<10x64xf32> to vector<2x64xf32>
    %cst_292 = arith.constant dense<0.000000e+00> : vector<2x64xf32>
    %907 = tpu.matmul %792, %569, %cst_292 {dimension_numbers = #tpu.dot_dimension_numbers<[1], [0], [0], [1], [0, 0, 1, 1], [], []>} : vector<2x16xf32>, vector<16x64xf32>, vector<2x64xf32> -> vector<2x64xf32>
    %908 = arith.addf %906, %907 : vector<2x64xf32>
    %909 = vector.extract_strided_slice %908 {offsets = [0, 0], sizes = [2, 16], strides = [1, 1]} : vector<2x64xf32> to vector<2x16xf32>
    %910 = arith.negf %909 : vector<2x16xf32>
    %911 = math.exp %910 : vector<2x16xf32>
    %cst_293 = arith.constant 1.000000e+00 : f32
    %912 = vector.broadcast %cst_293 : f32 to vector<2x16xf32>
    %913 = arith.addf %912, %911 : vector<2x16xf32>
    %914 = arith.divf %912, %913 : vector<2x16xf32>
    %915 = vector.extract_strided_slice %908 {offsets = [0, 16], sizes = [2, 16], strides = [1, 1]} : vector<2x64xf32> to vector<2x16xf32>
    %916 = arith.negf %915 : vector<2x16xf32>
    %917 = math.exp %916 : vector<2x16xf32>
    %cst_294 = arith.constant 1.000000e+00 : f32
    %918 = vector.broadcast %cst_294 : f32 to vector<2x16xf32>
    %919 = arith.addf %918, %917 : vector<2x16xf32>
    %920 = arith.divf %918, %919 : vector<2x16xf32>
    %921 = vector.extract_strided_slice %908 {offsets = [0, 32], sizes = [2, 16], strides = [1, 1]} : vector<2x64xf32> to vector<2x16xf32>
    %922 = math.tanh %921 : vector<2x16xf32>
    %923 = vector.extract_strided_slice %908 {offsets = [0, 48], sizes = [2, 16], strides = [1, 1]} : vector<2x64xf32> to vector<2x16xf32>
    %924 = arith.negf %923 : vector<2x16xf32>
    %925 = math.exp %924 : vector<2x16xf32>
    %cst_295 = arith.constant 1.000000e+00 : f32
    %926 = vector.broadcast %cst_295 : f32 to vector<2x16xf32>
    %927 = arith.addf %926, %925 : vector<2x16xf32>
    %928 = arith.divf %926, %927 : vector<2x16xf32>
    %929 = arith.mulf %920, %790 : vector<2x16xf32>
    %930 = arith.mulf %914, %922 : vector<2x16xf32>
    %931 = arith.addf %929, %930 : vector<2x16xf32>
    %932 = math.tanh %931 : vector<2x16xf32>
    %933 = arith.mulf %928, %932 : vector<2x16xf32>
    %cst_296 = arith.constant dense<0.000000e+00> : vector<2x16xf32>
    %934 = tpu.matmul %933, %570, %cst_296 {dimension_numbers = #tpu.dot_dimension_numbers<[1], [0], [0], [1], [0, 0, 1, 1], [], []>} : vector<2x16xf32>, vector<16x16xf32>, vector<2x16xf32> -> vector<2x16xf32>
    %cst_297 = arith.constant dense<0.000000e+00> : vector<2x16xf32>
    %935 = tpu.matmul %900, %571, %cst_297 {dimension_numbers = #tpu.dot_dimension_numbers<[1], [0], [0], [1], [0, 0, 1, 1], [], []>} : vector<2x32xf32>, vector<32x16xf32>, vector<2x16xf32> -> vector<2x16xf32>
    %936 = arith.addf %934, %935 : vector<2x16xf32>
    %937 = vector.broadcast %572 : vector<1x16xf32> to vector<2x16xf32>
    %938 = arith.addf %936, %937 : vector<2x16xf32>
    %cst_298 = arith.constant dense<0.000000e+00> : vector<2x32xf32>
    %939 = tpu.matmul %938, %573, %cst_298 {dimension_numbers = #tpu.dot_dimension_numbers<[1], [0], [0], [1], [0, 0, 1, 1], [], []>} : vector<2x16xf32>, vector<16x32xf32>, vector<2x32xf32> -> vector<2x32xf32>
    %940 = vector.broadcast %574 : vector<1x32xf32> to vector<2x32xf32>
    %941 = arith.addf %939, %940 : vector<2x32xf32>
    %cst_299 = arith.constant dense<0xFF800000> : vector<2xf32>
    %942 = vector.multi_reduction <maximumf>, %941, %cst_299 [1] : vector<2x32xf32> to vector<2xf32>
    %943 = vector.shape_cast %942 : vector<2xf32> to vector<2x1xf32>
    %944 = vector.broadcast %943 : vector<2x1xf32> to vector<2x32xf32>
    %945 = arith.subf %941, %944 : vector<2x32xf32>
    %946 = math.exp %945 : vector<2x32xf32>
    %cst_300 = arith.constant dense<0.000000e+00> : vector<2xf32>
    %947 = vector.multi_reduction <add>, %946, %cst_300 [1] : vector<2x32xf32> to vector<2xf32>
    %948 = vector.shape_cast %947 : vector<2xf32> to vector<2x1xf32>
    %949 = vector.broadcast %948 : vector<2x1xf32> to vector<2x32xf32>
    %950 = arith.divf %946, %949 : vector<2x32xf32>
    %cst_301 = arith.constant dense<0.000000e+00> : vector<2x1xf32>
    %951 = tpu.matmul %900, %575, %cst_301 {dimension_numbers = #tpu.dot_dimension_numbers<[1], [0], [0], [1], [0, 0, 1, 1], [], []>} : vector<2x32xf32>, vector<32x1xf32>, vector<2x1xf32> -> vector<2x1xf32>
    %cst_302 = arith.constant dense<0.000000e+00> : vector<2x1xf32>
    %952 = tpu.matmul %933, %576, %cst_302 {dimension_numbers = #tpu.dot_dimension_numbers<[1], [0], [0], [1], [0, 0, 1, 1], [], []>} : vector<2x16xf32>, vector<16x1xf32>, vector<2x1xf32> -> vector<2x1xf32>
    %953 = arith.addf %951, %952 : vector<2x1xf32>
    %cst_303 = arith.constant dense<0.000000e+00> : vector<2x1xf32>
    %954 = tpu.matmul %931, %577, %cst_303 {dimension_numbers = #tpu.dot_dimension_numbers<[1], [0], [0], [1], [0, 0, 1, 1], [], []>} : vector<2x16xf32>, vector<16x1xf32>, vector<2x1xf32> -> vector<2x1xf32>
    %955 = arith.addf %953, %954 : vector<2x1xf32>
    %cst_304 = arith.constant dense<0.000000e+00> : vector<2x1xf32>
    %956 = tpu.matmul %905, %578, %cst_304 {dimension_numbers = #tpu.dot_dimension_numbers<[1], [0], [0], [1], [0, 0, 1, 1], [], []>} : vector<2x16xf32>, vector<16x1xf32>, vector<2x1xf32> -> vector<2x1xf32>
    %957 = arith.addf %955, %956 : vector<2x1xf32>
    %958 = vector.broadcast %579 : vector<1x1xf32> to vector<2x1xf32>
    %959 = arith.addf %957, %958 : vector<2x1xf32>
    %960 = arith.negf %959 : vector<2x1xf32>
    %961 = math.exp %960 : vector<2x1xf32>
    %cst_305 = arith.constant 1.000000e+00 : f32
    %962 = vector.broadcast %cst_305 : f32 to vector<2x1xf32>
    %963 = arith.addf %962, %961 : vector<2x1xf32>
    %964 = arith.divf %962, %963 : vector<2x1xf32>
    %cst_306 = arith.constant 1.000000e-03 : f32
    %cst_307 = arith.constant 9.990000e-01 : f32
    %965 = vector.broadcast %cst_306 : f32 to vector<2x1xf32>
    %966 = arith.maximumf %965, %964 : vector<2x1xf32>
    %967 = vector.broadcast %cst_307 : f32 to vector<2x1xf32>
    %968 = arith.minimumf %967, %966 : vector<2x1xf32>
    %cst_308 = arith.constant 1.000000e+00 : f32
    %969 = vector.broadcast %cst_308 : f32 to vector<2x1xf32>
    %970 = arith.subf %969, %968 : vector<2x1xf32>
    %971 = vector.broadcast %970 : vector<2x1xf32> to vector<2x8xf32>
    %972 = arith.mulf %971, %896 : vector<2x8xf32>
    %973 = vector.shape_cast %972 : vector<2x8xf32> to vector<2x8x1xf32>
    %974 = vector.broadcast %973 : vector<2x8x1xf32> to vector<2x8x35xf32>
    %975 = arith.mulf %974, %560 : vector<2x8x35xf32>
    %cst_309 = arith.constant dense<0.000000e+00> : vector<2x35xf32>
    %976 = vector.multi_reduction <add>, %975, %cst_309 [1] : vector<2x8x35xf32> to vector<2x35xf32>
    %977 = vector.extract_strided_slice %550 {offsets = [0, 3], sizes = [2, 1], strides = [1, 1]} : vector<2x6xi32> to vector<2x1xi32>
    %978 = vector.broadcast %977 : vector<2x1xi32> to vector<2x35xi32>
    %979 = arith.cmpi eq, %978, %561 : vector<2x35xi32>
    %980 = arith.extui %979 : vector<2x35xi1> to vector<2x35xi32>
    %981 = arith.sitofp %980 : vector<2x35xi32> to vector<2x35xf32>
    %982 = arith.mulf %976, %981 : vector<2x35xf32>
    %cst_310 = arith.constant dense<0.000000e+00> : vector<2xf32>
    %983 = vector.multi_reduction <add>, %982, %cst_310 [1] : vector<2x35xf32> to vector<2xf32>
    %984 = vector.shape_cast %983 : vector<2xf32> to vector<2x1xf32>
    %985 = vector.extract_strided_slice %981 {offsets = [0, 0], sizes = [2, 32], strides = [1, 1]} : vector<2x35xf32> to vector<2x32xf32>
    %986 = arith.mulf %950, %985 : vector<2x32xf32>
    %cst_311 = arith.constant dense<0.000000e+00> : vector<2xf32>
    %987 = vector.multi_reduction <add>, %986, %cst_311 [1] : vector<2x32xf32> to vector<2xf32>
    %988 = vector.shape_cast %987 : vector<2xf32> to vector<2x1xf32>
    %989 = arith.mulf %968, %988 : vector<2x1xf32>
    %990 = arith.addf %984, %989 : vector<2x1xf32>
    %c0_i32_312 = arith.constant 0 : i32
    %991 = vector.broadcast %c0_i32_312 : i32 to vector<2x1xi32>
    %992 = arith.cmpi ne, %977, %991 : vector<2x1xi32>
    %993 = arith.extui %992 : vector<2x1xi1> to vector<2x1xi32>
    %994 = arith.sitofp %993 : vector<2x1xi32> to vector<2x1xf32>
    %cst_313 = arith.constant 9.99999996E-13 : f32
    %995 = vector.broadcast %cst_313 : f32 to vector<2x1xf32>
    %996 = arith.addf %990, %995 : vector<2x1xf32>
    %997 = math.log %996 : vector<2x1xf32>
    %cst_314 = arith.constant 0.000000e+00 : f32
    %998 = vector.broadcast %cst_314 : f32 to vector<2x1xf32>
    %999 = arith.subf %998, %997 : vector<2x1xf32>
    %cst_315 = arith.constant 1.000000e+00 : f32
    %1000 = vector.broadcast %cst_315 : f32 to vector<2x1xf32>
    %1001 = arith.mulf %1000, %904 : vector<2x1xf32>
    %1002 = arith.addf %999, %1001 : vector<2x1xf32>
    %1003 = arith.mulf %1002, %994 : vector<2x1xf32>
    %1004 = arith.addf %863, %1003 : vector<2x1xf32>
    %cst_316 = arith.constant dense<0.000000e+00> : vector<2x32xf32>
    %1005 = tpu.matmul %933, %562, %cst_316 {dimension_numbers = #tpu.dot_dimension_numbers<[1], [0], [0], [1], [0, 0, 1, 1], [], []>} : vector<2x16xf32>, vector<16x32xf32>, vector<2x32xf32> -> vector<2x32xf32>
    %cst_317 = arith.constant dense<0.000000e+00> : vector<2x32xf32>
    %1006 = tpu.matmul %931, %563, %cst_317 {dimension_numbers = #tpu.dot_dimension_numbers<[1], [0], [0], [1], [0, 0, 1, 1], [], []>} : vector<2x16xf32>, vector<16x32xf32>, vector<2x32xf32> -> vector<2x32xf32>
    %1007 = arith.addf %1005, %1006 : vector<2x32xf32>
    %1008 = vector.broadcast %564 : vector<1x32xf32> to vector<2x32xf32>
    %1009 = arith.addf %1007, %1008 : vector<2x32xf32>
    %1010 = vector.shape_cast %1009 : vector<2x32xf32> to vector<2x1x32xf32>
    %1011 = vector.broadcast %1010 : vector<2x1x32xf32> to vector<2x8x32xf32>
    %1012 = arith.addf %540, %1011 : vector<2x8x32xf32>
    %1013 = vector.shape_cast %901 : vector<2x8xf32> to vector<2x8x1xf32>
    %1014 = vector.broadcast %1013 : vector<2x8x1xf32> to vector<2x8x32xf32>
    %1015 = vector.broadcast %566 : vector<1x1x32xf32> to vector<2x8x32xf32>
    %1016 = arith.mulf %1014, %1015 : vector<2x8x32xf32>
    %1017 = arith.addf %1012, %1016 : vector<2x8x32xf32>
    %1018 = math.tanh %1017 : vector<2x8x32xf32>
    %1019 = vector.broadcast %568 : vector<1x1x32xf32> to vector<2x8x32xf32>
    %1020 = arith.mulf %1018, %1019 : vector<2x8x32xf32>
    %cst_318 = arith.constant dense<0.000000e+00> : vector<2x8xf32>
    %1021 = vector.multi_reduction <add>, %1020, %cst_318 [2] : vector<2x8x32xf32> to vector<2x8xf32>
    %cst_319 = arith.constant dense<0xFF800000> : vector<2xf32>
    %1022 = vector.multi_reduction <maximumf>, %1021, %cst_319 [1] : vector<2x8xf32> to vector<2xf32>
    %1023 = vector.shape_cast %1022 : vector<2xf32> to vector<2x1xf32>
    %1024 = vector.broadcast %1023 : vector<2x1xf32> to vector<2x8xf32>
    %1025 = arith.subf %1021, %1024 : vector<2x8xf32>
    %1026 = math.exp %1025 : vector<2x8xf32>
    %cst_320 = arith.constant dense<0.000000e+00> : vector<2xf32>
    %1027 = vector.multi_reduction <add>, %1026, %cst_320 [1] : vector<2x8xf32> to vector<2xf32>
    %1028 = vector.shape_cast %1027 : vector<2xf32> to vector<2x1xf32>
    %1029 = vector.broadcast %1028 : vector<2x1xf32> to vector<2x8xf32>
    %1030 = arith.divf %1026, %1029 : vector<2x8xf32>
    %1031 = arith.mulf %1030, %554 : vector<2x8xf32>
    %cst_321 = arith.constant dense<0.000000e+00> : vector<2xf32>
    %1032 = vector.multi_reduction <add>, %1031, %cst_321 [1] : vector<2x8xf32> to vector<2xf32>
    %1033 = vector.shape_cast %1032 : vector<2xf32> to vector<2x1xf32>
    %cst_322 = arith.constant 9.99999996E-13 : f32
    %1034 = vector.broadcast %cst_322 : f32 to vector<2x1xf32>
    %1035 = arith.addf %1033, %1034 : vector<2x1xf32>
    %1036 = vector.broadcast %1035 : vector<2x1xf32> to vector<2x8xf32>
    %1037 = arith.divf %1031, %1036 : vector<2x8xf32>
    %1038 = vector.shape_cast %1037 : vector<2x8xf32> to vector<2x8x1xf32>
    %1039 = vector.broadcast %1038 : vector<2x8x1xf32> to vector<2x8x32xf32>
    %1040 = arith.mulf %1039, %539 : vector<2x8x32xf32>
    %cst_323 = arith.constant dense<0.000000e+00> : vector<2x32xf32>
    %1041 = vector.multi_reduction <add>, %1040, %cst_323 [1] : vector<2x8x32xf32> to vector<2x32xf32>
    %1042 = arith.addf %901, %1037 : vector<2x8xf32>
    %1043 = arith.minimumf %1037, %1042 : vector<2x8xf32>
    %cst_324 = arith.constant dense<0.000000e+00> : vector<2xf32>
    %1044 = vector.multi_reduction <add>, %1043, %cst_324 [1] : vector<2x8xf32> to vector<2xf32>
    %1045 = vector.shape_cast %1044 : vector<2xf32> to vector<2x1xf32>
    %1046 = vector.extract_strided_slice %543 {offsets = [6, 0], sizes = [2, 16], strides = [1, 1]} : vector<10x16xf32> to vector<2x16xf32>
    %1047 = vector.extract_strided_slice %548 {offsets = [6, 0], sizes = [2, 64], strides = [1, 1]} : vector<10x64xf32> to vector<2x64xf32>
    %cst_325 = arith.constant dense<0.000000e+00> : vector<2x64xf32>
    %1048 = tpu.matmul %933, %569, %cst_325 {dimension_numbers = #tpu.dot_dimension_numbers<[1], [0], [0], [1], [0, 0, 1, 1], [], []>} : vector<2x16xf32>, vector<16x64xf32>, vector<2x64xf32> -> vector<2x64xf32>
    %1049 = arith.addf %1047, %1048 : vector<2x64xf32>
    %1050 = vector.extract_strided_slice %1049 {offsets = [0, 0], sizes = [2, 16], strides = [1, 1]} : vector<2x64xf32> to vector<2x16xf32>
    %1051 = arith.negf %1050 : vector<2x16xf32>
    %1052 = math.exp %1051 : vector<2x16xf32>
    %cst_326 = arith.constant 1.000000e+00 : f32
    %1053 = vector.broadcast %cst_326 : f32 to vector<2x16xf32>
    %1054 = arith.addf %1053, %1052 : vector<2x16xf32>
    %1055 = arith.divf %1053, %1054 : vector<2x16xf32>
    %1056 = vector.extract_strided_slice %1049 {offsets = [0, 16], sizes = [2, 16], strides = [1, 1]} : vector<2x64xf32> to vector<2x16xf32>
    %1057 = arith.negf %1056 : vector<2x16xf32>
    %1058 = math.exp %1057 : vector<2x16xf32>
    %cst_327 = arith.constant 1.000000e+00 : f32
    %1059 = vector.broadcast %cst_327 : f32 to vector<2x16xf32>
    %1060 = arith.addf %1059, %1058 : vector<2x16xf32>
    %1061 = arith.divf %1059, %1060 : vector<2x16xf32>
    %1062 = vector.extract_strided_slice %1049 {offsets = [0, 32], sizes = [2, 16], strides = [1, 1]} : vector<2x64xf32> to vector<2x16xf32>
    %1063 = math.tanh %1062 : vector<2x16xf32>
    %1064 = vector.extract_strided_slice %1049 {offsets = [0, 48], sizes = [2, 16], strides = [1, 1]} : vector<2x64xf32> to vector<2x16xf32>
    %1065 = arith.negf %1064 : vector<2x16xf32>
    %1066 = math.exp %1065 : vector<2x16xf32>
    %cst_328 = arith.constant 1.000000e+00 : f32
    %1067 = vector.broadcast %cst_328 : f32 to vector<2x16xf32>
    %1068 = arith.addf %1067, %1066 : vector<2x16xf32>
    %1069 = arith.divf %1067, %1068 : vector<2x16xf32>
    %1070 = arith.mulf %1061, %931 : vector<2x16xf32>
    %1071 = arith.mulf %1055, %1063 : vector<2x16xf32>
    %1072 = arith.addf %1070, %1071 : vector<2x16xf32>
    %1073 = math.tanh %1072 : vector<2x16xf32>
    %1074 = arith.mulf %1069, %1073 : vector<2x16xf32>
    %cst_329 = arith.constant dense<0.000000e+00> : vector<2x16xf32>
    %1075 = tpu.matmul %1074, %570, %cst_329 {dimension_numbers = #tpu.dot_dimension_numbers<[1], [0], [0], [1], [0, 0, 1, 1], [], []>} : vector<2x16xf32>, vector<16x16xf32>, vector<2x16xf32> -> vector<2x16xf32>
    %cst_330 = arith.constant dense<0.000000e+00> : vector<2x16xf32>
    %1076 = tpu.matmul %1041, %571, %cst_330 {dimension_numbers = #tpu.dot_dimension_numbers<[1], [0], [0], [1], [0, 0, 1, 1], [], []>} : vector<2x32xf32>, vector<32x16xf32>, vector<2x16xf32> -> vector<2x16xf32>
    %1077 = arith.addf %1075, %1076 : vector<2x16xf32>
    %1078 = vector.broadcast %572 : vector<1x16xf32> to vector<2x16xf32>
    %1079 = arith.addf %1077, %1078 : vector<2x16xf32>
    %cst_331 = arith.constant dense<0.000000e+00> : vector<2x32xf32>
    %1080 = tpu.matmul %1079, %573, %cst_331 {dimension_numbers = #tpu.dot_dimension_numbers<[1], [0], [0], [1], [0, 0, 1, 1], [], []>} : vector<2x16xf32>, vector<16x32xf32>, vector<2x32xf32> -> vector<2x32xf32>
    %1081 = vector.broadcast %574 : vector<1x32xf32> to vector<2x32xf32>
    %1082 = arith.addf %1080, %1081 : vector<2x32xf32>
    %cst_332 = arith.constant dense<0xFF800000> : vector<2xf32>
    %1083 = vector.multi_reduction <maximumf>, %1082, %cst_332 [1] : vector<2x32xf32> to vector<2xf32>
    %1084 = vector.shape_cast %1083 : vector<2xf32> to vector<2x1xf32>
    %1085 = vector.broadcast %1084 : vector<2x1xf32> to vector<2x32xf32>
    %1086 = arith.subf %1082, %1085 : vector<2x32xf32>
    %1087 = math.exp %1086 : vector<2x32xf32>
    %cst_333 = arith.constant dense<0.000000e+00> : vector<2xf32>
    %1088 = vector.multi_reduction <add>, %1087, %cst_333 [1] : vector<2x32xf32> to vector<2xf32>
    %1089 = vector.shape_cast %1088 : vector<2xf32> to vector<2x1xf32>
    %1090 = vector.broadcast %1089 : vector<2x1xf32> to vector<2x32xf32>
    %1091 = arith.divf %1087, %1090 : vector<2x32xf32>
    %cst_334 = arith.constant dense<0.000000e+00> : vector<2x1xf32>
    %1092 = tpu.matmul %1041, %575, %cst_334 {dimension_numbers = #tpu.dot_dimension_numbers<[1], [0], [0], [1], [0, 0, 1, 1], [], []>} : vector<2x32xf32>, vector<32x1xf32>, vector<2x1xf32> -> vector<2x1xf32>
    %cst_335 = arith.constant dense<0.000000e+00> : vector<2x1xf32>
    %1093 = tpu.matmul %1074, %576, %cst_335 {dimension_numbers = #tpu.dot_dimension_numbers<[1], [0], [0], [1], [0, 0, 1, 1], [], []>} : vector<2x16xf32>, vector<16x1xf32>, vector<2x1xf32> -> vector<2x1xf32>
    %1094 = arith.addf %1092, %1093 : vector<2x1xf32>
    %cst_336 = arith.constant dense<0.000000e+00> : vector<2x1xf32>
    %1095 = tpu.matmul %1072, %577, %cst_336 {dimension_numbers = #tpu.dot_dimension_numbers<[1], [0], [0], [1], [0, 0, 1, 1], [], []>} : vector<2x16xf32>, vector<16x1xf32>, vector<2x1xf32> -> vector<2x1xf32>
    %1096 = arith.addf %1094, %1095 : vector<2x1xf32>
    %cst_337 = arith.constant dense<0.000000e+00> : vector<2x1xf32>
    %1097 = tpu.matmul %1046, %578, %cst_337 {dimension_numbers = #tpu.dot_dimension_numbers<[1], [0], [0], [1], [0, 0, 1, 1], [], []>} : vector<2x16xf32>, vector<16x1xf32>, vector<2x1xf32> -> vector<2x1xf32>
    %1098 = arith.addf %1096, %1097 : vector<2x1xf32>
    %1099 = vector.broadcast %579 : vector<1x1xf32> to vector<2x1xf32>
    %1100 = arith.addf %1098, %1099 : vector<2x1xf32>
    %1101 = arith.negf %1100 : vector<2x1xf32>
    %1102 = math.exp %1101 : vector<2x1xf32>
    %cst_338 = arith.constant 1.000000e+00 : f32
    %1103 = vector.broadcast %cst_338 : f32 to vector<2x1xf32>
    %1104 = arith.addf %1103, %1102 : vector<2x1xf32>
    %1105 = arith.divf %1103, %1104 : vector<2x1xf32>
    %cst_339 = arith.constant 1.000000e-03 : f32
    %cst_340 = arith.constant 9.990000e-01 : f32
    %1106 = vector.broadcast %cst_339 : f32 to vector<2x1xf32>
    %1107 = arith.maximumf %1106, %1105 : vector<2x1xf32>
    %1108 = vector.broadcast %cst_340 : f32 to vector<2x1xf32>
    %1109 = arith.minimumf %1108, %1107 : vector<2x1xf32>
    %cst_341 = arith.constant 1.000000e+00 : f32
    %1110 = vector.broadcast %cst_341 : f32 to vector<2x1xf32>
    %1111 = arith.subf %1110, %1109 : vector<2x1xf32>
    %1112 = vector.broadcast %1111 : vector<2x1xf32> to vector<2x8xf32>
    %1113 = arith.mulf %1112, %1037 : vector<2x8xf32>
    %1114 = vector.shape_cast %1113 : vector<2x8xf32> to vector<2x8x1xf32>
    %1115 = vector.broadcast %1114 : vector<2x8x1xf32> to vector<2x8x35xf32>
    %1116 = arith.mulf %1115, %560 : vector<2x8x35xf32>
    %cst_342 = arith.constant dense<0.000000e+00> : vector<2x35xf32>
    %1117 = vector.multi_reduction <add>, %1116, %cst_342 [1] : vector<2x8x35xf32> to vector<2x35xf32>
    %1118 = vector.extract_strided_slice %550 {offsets = [0, 4], sizes = [2, 1], strides = [1, 1]} : vector<2x6xi32> to vector<2x1xi32>
    %1119 = vector.broadcast %1118 : vector<2x1xi32> to vector<2x35xi32>
    %1120 = arith.cmpi eq, %1119, %561 : vector<2x35xi32>
    %1121 = arith.extui %1120 : vector<2x35xi1> to vector<2x35xi32>
    %1122 = arith.sitofp %1121 : vector<2x35xi32> to vector<2x35xf32>
    %1123 = arith.mulf %1117, %1122 : vector<2x35xf32>
    %cst_343 = arith.constant dense<0.000000e+00> : vector<2xf32>
    %1124 = vector.multi_reduction <add>, %1123, %cst_343 [1] : vector<2x35xf32> to vector<2xf32>
    %1125 = vector.shape_cast %1124 : vector<2xf32> to vector<2x1xf32>
    %1126 = vector.extract_strided_slice %1122 {offsets = [0, 0], sizes = [2, 32], strides = [1, 1]} : vector<2x35xf32> to vector<2x32xf32>
    %1127 = arith.mulf %1091, %1126 : vector<2x32xf32>
    %cst_344 = arith.constant dense<0.000000e+00> : vector<2xf32>
    %1128 = vector.multi_reduction <add>, %1127, %cst_344 [1] : vector<2x32xf32> to vector<2xf32>
    %1129 = vector.shape_cast %1128 : vector<2xf32> to vector<2x1xf32>
    %1130 = arith.mulf %1109, %1129 : vector<2x1xf32>
    %1131 = arith.addf %1125, %1130 : vector<2x1xf32>
    %c0_i32_345 = arith.constant 0 : i32
    %1132 = vector.broadcast %c0_i32_345 : i32 to vector<2x1xi32>
    %1133 = arith.cmpi ne, %1118, %1132 : vector<2x1xi32>
    %1134 = arith.extui %1133 : vector<2x1xi1> to vector<2x1xi32>
    %1135 = arith.sitofp %1134 : vector<2x1xi32> to vector<2x1xf32>
    %cst_346 = arith.constant 9.99999996E-13 : f32
    %1136 = vector.broadcast %cst_346 : f32 to vector<2x1xf32>
    %1137 = arith.addf %1131, %1136 : vector<2x1xf32>
    %1138 = math.log %1137 : vector<2x1xf32>
    %cst_347 = arith.constant 0.000000e+00 : f32
    %1139 = vector.broadcast %cst_347 : f32 to vector<2x1xf32>
    %1140 = arith.subf %1139, %1138 : vector<2x1xf32>
    %cst_348 = arith.constant 1.000000e+00 : f32
    %1141 = vector.broadcast %cst_348 : f32 to vector<2x1xf32>
    %1142 = arith.mulf %1141, %1045 : vector<2x1xf32>
    %1143 = arith.addf %1140, %1142 : vector<2x1xf32>
    %1144 = arith.mulf %1143, %1135 : vector<2x1xf32>
    %1145 = arith.addf %1004, %1144 : vector<2x1xf32>
    %cst_349 = arith.constant dense<0.000000e+00> : vector<2x32xf32>
    %1146 = tpu.matmul %1074, %562, %cst_349 {dimension_numbers = #tpu.dot_dimension_numbers<[1], [0], [0], [1], [0, 0, 1, 1], [], []>} : vector<2x16xf32>, vector<16x32xf32>, vector<2x32xf32> -> vector<2x32xf32>
    %cst_350 = arith.constant dense<0.000000e+00> : vector<2x32xf32>
    %1147 = tpu.matmul %1072, %563, %cst_350 {dimension_numbers = #tpu.dot_dimension_numbers<[1], [0], [0], [1], [0, 0, 1, 1], [], []>} : vector<2x16xf32>, vector<16x32xf32>, vector<2x32xf32> -> vector<2x32xf32>
    %1148 = arith.addf %1146, %1147 : vector<2x32xf32>
    %1149 = vector.broadcast %564 : vector<1x32xf32> to vector<2x32xf32>
    %1150 = arith.addf %1148, %1149 : vector<2x32xf32>
    %1151 = vector.shape_cast %1150 : vector<2x32xf32> to vector<2x1x32xf32>
    %1152 = vector.broadcast %1151 : vector<2x1x32xf32> to vector<2x8x32xf32>
    %1153 = arith.addf %540, %1152 : vector<2x8x32xf32>
    %1154 = vector.shape_cast %1042 : vector<2x8xf32> to vector<2x8x1xf32>
    %1155 = vector.broadcast %1154 : vector<2x8x1xf32> to vector<2x8x32xf32>
    %1156 = vector.broadcast %566 : vector<1x1x32xf32> to vector<2x8x32xf32>
    %1157 = arith.mulf %1155, %1156 : vector<2x8x32xf32>
    %1158 = arith.addf %1153, %1157 : vector<2x8x32xf32>
    %1159 = math.tanh %1158 : vector<2x8x32xf32>
    %1160 = vector.broadcast %568 : vector<1x1x32xf32> to vector<2x8x32xf32>
    %1161 = arith.mulf %1159, %1160 : vector<2x8x32xf32>
    %cst_351 = arith.constant dense<0.000000e+00> : vector<2x8xf32>
    %1162 = vector.multi_reduction <add>, %1161, %cst_351 [2] : vector<2x8x32xf32> to vector<2x8xf32>
    %cst_352 = arith.constant dense<0xFF800000> : vector<2xf32>
    %1163 = vector.multi_reduction <maximumf>, %1162, %cst_352 [1] : vector<2x8xf32> to vector<2xf32>
    %1164 = vector.shape_cast %1163 : vector<2xf32> to vector<2x1xf32>
    %1165 = vector.broadcast %1164 : vector<2x1xf32> to vector<2x8xf32>
    %1166 = arith.subf %1162, %1165 : vector<2x8xf32>
    %1167 = math.exp %1166 : vector<2x8xf32>
    %cst_353 = arith.constant dense<0.000000e+00> : vector<2xf32>
    %1168 = vector.multi_reduction <add>, %1167, %cst_353 [1] : vector<2x8xf32> to vector<2xf32>
    %1169 = vector.shape_cast %1168 : vector<2xf32> to vector<2x1xf32>
    %1170 = vector.broadcast %1169 : vector<2x1xf32> to vector<2x8xf32>
    %1171 = arith.divf %1167, %1170 : vector<2x8xf32>
    %1172 = arith.mulf %1171, %554 : vector<2x8xf32>
    %cst_354 = arith.constant dense<0.000000e+00> : vector<2xf32>
    %1173 = vector.multi_reduction <add>, %1172, %cst_354 [1] : vector<2x8xf32> to vector<2xf32>
    %1174 = vector.shape_cast %1173 : vector<2xf32> to vector<2x1xf32>
    %cst_355 = arith.constant 9.99999996E-13 : f32
    %1175 = vector.broadcast %cst_355 : f32 to vector<2x1xf32>
    %1176 = arith.addf %1174, %1175 : vector<2x1xf32>
    %1177 = vector.broadcast %1176 : vector<2x1xf32> to vector<2x8xf32>
    %1178 = arith.divf %1172, %1177 : vector<2x8xf32>
    %1179 = vector.shape_cast %1178 : vector<2x8xf32> to vector<2x8x1xf32>
    %1180 = vector.broadcast %1179 : vector<2x8x1xf32> to vector<2x8x32xf32>
    %1181 = arith.mulf %1180, %539 : vector<2x8x32xf32>
    %cst_356 = arith.constant dense<0.000000e+00> : vector<2x32xf32>
    %1182 = vector.multi_reduction <add>, %1181, %cst_356 [1] : vector<2x8x32xf32> to vector<2x32xf32>
    %1183 = arith.addf %1042, %1178 : vector<2x8xf32>
    %1184 = arith.minimumf %1178, %1183 : vector<2x8xf32>
    %cst_357 = arith.constant dense<0.000000e+00> : vector<2xf32>
    %1185 = vector.multi_reduction <add>, %1184, %cst_357 [1] : vector<2x8xf32> to vector<2xf32>
    %1186 = vector.shape_cast %1185 : vector<2xf32> to vector<2x1xf32>
    %1187 = vector.extract_strided_slice %543 {offsets = [8, 0], sizes = [2, 16], strides = [1, 1]} : vector<10x16xf32> to vector<2x16xf32>
    %1188 = vector.extract_strided_slice %548 {offsets = [8, 0], sizes = [2, 64], strides = [1, 1]} : vector<10x64xf32> to vector<2x64xf32>
    %cst_358 = arith.constant dense<0.000000e+00> : vector<2x64xf32>
    %1189 = tpu.matmul %1074, %569, %cst_358 {dimension_numbers = #tpu.dot_dimension_numbers<[1], [0], [0], [1], [0, 0, 1, 1], [], []>} : vector<2x16xf32>, vector<16x64xf32>, vector<2x64xf32> -> vector<2x64xf32>
    %1190 = arith.addf %1188, %1189 : vector<2x64xf32>
    %1191 = vector.extract_strided_slice %1190 {offsets = [0, 0], sizes = [2, 16], strides = [1, 1]} : vector<2x64xf32> to vector<2x16xf32>
    %1192 = arith.negf %1191 : vector<2x16xf32>
    %1193 = math.exp %1192 : vector<2x16xf32>
    %cst_359 = arith.constant 1.000000e+00 : f32
    %1194 = vector.broadcast %cst_359 : f32 to vector<2x16xf32>
    %1195 = arith.addf %1194, %1193 : vector<2x16xf32>
    %1196 = arith.divf %1194, %1195 : vector<2x16xf32>
    %1197 = vector.extract_strided_slice %1190 {offsets = [0, 16], sizes = [2, 16], strides = [1, 1]} : vector<2x64xf32> to vector<2x16xf32>
    %1198 = arith.negf %1197 : vector<2x16xf32>
    %1199 = math.exp %1198 : vector<2x16xf32>
    %cst_360 = arith.constant 1.000000e+00 : f32
    %1200 = vector.broadcast %cst_360 : f32 to vector<2x16xf32>
    %1201 = arith.addf %1200, %1199 : vector<2x16xf32>
    %1202 = arith.divf %1200, %1201 : vector<2x16xf32>
    %1203 = vector.extract_strided_slice %1190 {offsets = [0, 32], sizes = [2, 16], strides = [1, 1]} : vector<2x64xf32> to vector<2x16xf32>
    %1204 = math.tanh %1203 : vector<2x16xf32>
    %1205 = vector.extract_strided_slice %1190 {offsets = [0, 48], sizes = [2, 16], strides = [1, 1]} : vector<2x64xf32> to vector<2x16xf32>
    %1206 = arith.negf %1205 : vector<2x16xf32>
    %1207 = math.exp %1206 : vector<2x16xf32>
    %cst_361 = arith.constant 1.000000e+00 : f32
    %1208 = vector.broadcast %cst_361 : f32 to vector<2x16xf32>
    %1209 = arith.addf %1208, %1207 : vector<2x16xf32>
    %1210 = arith.divf %1208, %1209 : vector<2x16xf32>
    %1211 = arith.mulf %1202, %1072 : vector<2x16xf32>
    %1212 = arith.mulf %1196, %1204 : vector<2x16xf32>
    %1213 = arith.addf %1211, %1212 : vector<2x16xf32>
    %1214 = math.tanh %1213 : vector<2x16xf32>
    %1215 = arith.mulf %1210, %1214 : vector<2x16xf32>
    %cst_362 = arith.constant dense<0.000000e+00> : vector<2x16xf32>
    %1216 = tpu.matmul %1215, %570, %cst_362 {dimension_numbers = #tpu.dot_dimension_numbers<[1], [0], [0], [1], [0, 0, 1, 1], [], []>} : vector<2x16xf32>, vector<16x16xf32>, vector<2x16xf32> -> vector<2x16xf32>
    %cst_363 = arith.constant dense<0.000000e+00> : vector<2x16xf32>
    %1217 = tpu.matmul %1182, %571, %cst_363 {dimension_numbers = #tpu.dot_dimension_numbers<[1], [0], [0], [1], [0, 0, 1, 1], [], []>} : vector<2x32xf32>, vector<32x16xf32>, vector<2x16xf32> -> vector<2x16xf32>
    %1218 = arith.addf %1216, %1217 : vector<2x16xf32>
    %1219 = vector.broadcast %572 : vector<1x16xf32> to vector<2x16xf32>
    %1220 = arith.addf %1218, %1219 : vector<2x16xf32>
    %cst_364 = arith.constant dense<0.000000e+00> : vector<2x32xf32>
    %1221 = tpu.matmul %1220, %573, %cst_364 {dimension_numbers = #tpu.dot_dimension_numbers<[1], [0], [0], [1], [0, 0, 1, 1], [], []>} : vector<2x16xf32>, vector<16x32xf32>, vector<2x32xf32> -> vector<2x32xf32>
    %1222 = vector.broadcast %574 : vector<1x32xf32> to vector<2x32xf32>
    %1223 = arith.addf %1221, %1222 : vector<2x32xf32>
    %cst_365 = arith.constant dense<0xFF800000> : vector<2xf32>
    %1224 = vector.multi_reduction <maximumf>, %1223, %cst_365 [1] : vector<2x32xf32> to vector<2xf32>
    %1225 = vector.shape_cast %1224 : vector<2xf32> to vector<2x1xf32>
    %1226 = vector.broadcast %1225 : vector<2x1xf32> to vector<2x32xf32>
    %1227 = arith.subf %1223, %1226 : vector<2x32xf32>
    %1228 = math.exp %1227 : vector<2x32xf32>
    %cst_366 = arith.constant dense<0.000000e+00> : vector<2xf32>
    %1229 = vector.multi_reduction <add>, %1228, %cst_366 [1] : vector<2x32xf32> to vector<2xf32>
    %1230 = vector.shape_cast %1229 : vector<2xf32> to vector<2x1xf32>
    %1231 = vector.broadcast %1230 : vector<2x1xf32> to vector<2x32xf32>
    %1232 = arith.divf %1228, %1231 : vector<2x32xf32>
    %cst_367 = arith.constant dense<0.000000e+00> : vector<2x1xf32>
    %1233 = tpu.matmul %1182, %575, %cst_367 {dimension_numbers = #tpu.dot_dimension_numbers<[1], [0], [0], [1], [0, 0, 1, 1], [], []>} : vector<2x32xf32>, vector<32x1xf32>, vector<2x1xf32> -> vector<2x1xf32>
    %cst_368 = arith.constant dense<0.000000e+00> : vector<2x1xf32>
    %1234 = tpu.matmul %1215, %576, %cst_368 {dimension_numbers = #tpu.dot_dimension_numbers<[1], [0], [0], [1], [0, 0, 1, 1], [], []>} : vector<2x16xf32>, vector<16x1xf32>, vector<2x1xf32> -> vector<2x1xf32>
    %1235 = arith.addf %1233, %1234 : vector<2x1xf32>
    %cst_369 = arith.constant dense<0.000000e+00> : vector<2x1xf32>
    %1236 = tpu.matmul %1213, %577, %cst_369 {dimension_numbers = #tpu.dot_dimension_numbers<[1], [0], [0], [1], [0, 0, 1, 1], [], []>} : vector<2x16xf32>, vector<16x1xf32>, vector<2x1xf32> -> vector<2x1xf32>
    %1237 = arith.addf %1235, %1236 : vector<2x1xf32>
    %cst_370 = arith.constant dense<0.000000e+00> : vector<2x1xf32>
    %1238 = tpu.matmul %1187, %578, %cst_370 {dimension_numbers = #tpu.dot_dimension_numbers<[1], [0], [0], [1], [0, 0, 1, 1], [], []>} : vector<2x16xf32>, vector<16x1xf32>, vector<2x1xf32> -> vector<2x1xf32>
    %1239 = arith.addf %1237, %1238 : vector<2x1xf32>
    %1240 = vector.broadcast %579 : vector<1x1xf32> to vector<2x1xf32>
    %1241 = arith.addf %1239, %1240 : vector<2x1xf32>
    %1242 = arith.negf %1241 : vector<2x1xf32>
    %1243 = math.exp %1242 : vector<2x1xf32>
    %cst_371 = arith.constant 1.000000e+00 : f32
    %1244 = vector.broadcast %cst_371 : f32 to vector<2x1xf32>
    %1245 = arith.addf %1244, %1243 : vector<2x1xf32>
    %1246 = arith.divf %1244, %1245 : vector<2x1xf32>
    %cst_372 = arith.constant 1.000000e-03 : f32
    %cst_373 = arith.constant 9.990000e-01 : f32
    %1247 = vector.broadcast %cst_372 : f32 to vector<2x1xf32>
    %1248 = arith.maximumf %1247, %1246 : vector<2x1xf32>
    %1249 = vector.broadcast %cst_373 : f32 to vector<2x1xf32>
    %1250 = arith.minimumf %1249, %1248 : vector<2x1xf32>
    %cst_374 = arith.constant 1.000000e+00 : f32
    %1251 = vector.broadcast %cst_374 : f32 to vector<2x1xf32>
    %1252 = arith.subf %1251, %1250 : vector<2x1xf32>
    %1253 = vector.broadcast %1252 : vector<2x1xf32> to vector<2x8xf32>
    %1254 = arith.mulf %1253, %1178 : vector<2x8xf32>
    %1255 = vector.shape_cast %1254 : vector<2x8xf32> to vector<2x8x1xf32>
    %1256 = vector.broadcast %1255 : vector<2x8x1xf32> to vector<2x8x35xf32>
    %1257 = arith.mulf %1256, %560 : vector<2x8x35xf32>
    %cst_375 = arith.constant dense<0.000000e+00> : vector<2x35xf32>
    %1258 = vector.multi_reduction <add>, %1257, %cst_375 [1] : vector<2x8x35xf32> to vector<2x35xf32>
    %1259 = vector.extract_strided_slice %550 {offsets = [0, 5], sizes = [2, 1], strides = [1, 1]} : vector<2x6xi32> to vector<2x1xi32>
    %1260 = vector.broadcast %1259 : vector<2x1xi32> to vector<2x35xi32>
    %1261 = arith.cmpi eq, %1260, %561 : vector<2x35xi32>
    %1262 = arith.extui %1261 : vector<2x35xi1> to vector<2x35xi32>
    %1263 = arith.sitofp %1262 : vector<2x35xi32> to vector<2x35xf32>
    %1264 = arith.mulf %1258, %1263 : vector<2x35xf32>
    %cst_376 = arith.constant dense<0.000000e+00> : vector<2xf32>
    %1265 = vector.multi_reduction <add>, %1264, %cst_376 [1] : vector<2x35xf32> to vector<2xf32>
    %1266 = vector.shape_cast %1265 : vector<2xf32> to vector<2x1xf32>
    %1267 = vector.extract_strided_slice %1263 {offsets = [0, 0], sizes = [2, 32], strides = [1, 1]} : vector<2x35xf32> to vector<2x32xf32>
    %1268 = arith.mulf %1232, %1267 : vector<2x32xf32>
    %cst_377 = arith.constant dense<0.000000e+00> : vector<2xf32>
    %1269 = vector.multi_reduction <add>, %1268, %cst_377 [1] : vector<2x32xf32> to vector<2xf32>
    %1270 = vector.shape_cast %1269 : vector<2xf32> to vector<2x1xf32>
    %1271 = arith.mulf %1250, %1270 : vector<2x1xf32>
    %1272 = arith.addf %1266, %1271 : vector<2x1xf32>
    %c0_i32_378 = arith.constant 0 : i32
    %1273 = vector.broadcast %c0_i32_378 : i32 to vector<2x1xi32>
    %1274 = arith.cmpi ne, %1259, %1273 : vector<2x1xi32>
    %1275 = arith.extui %1274 : vector<2x1xi1> to vector<2x1xi32>
    %1276 = arith.sitofp %1275 : vector<2x1xi32> to vector<2x1xf32>
    %cst_379 = arith.constant 9.99999996E-13 : f32
    %1277 = vector.broadcast %cst_379 : f32 to vector<2x1xf32>
    %1278 = arith.addf %1272, %1277 : vector<2x1xf32>
    %1279 = math.log %1278 : vector<2x1xf32>
    %cst_380 = arith.constant 0.000000e+00 : f32
    %1280 = vector.broadcast %cst_380 : f32 to vector<2x1xf32>
    %1281 = arith.subf %1280, %1279 : vector<2x1xf32>
    %cst_381 = arith.constant 1.000000e+00 : f32
    %1282 = vector.broadcast %cst_381 : f32 to vector<2x1xf32>
    %1283 = arith.mulf %1282, %1186 : vector<2x1xf32>
    %1284 = arith.addf %1281, %1283 : vector<2x1xf32>
    %1285 = arith.mulf %1284, %1276 : vector<2x1xf32>
    %1286 = arith.addf %1145, %1285 : vector<2x1xf32>
    %c0_i32_382 = arith.constant 0 : i32
    %1287 = vector.broadcast %c0_i32_382 : i32 to vector<2x6xi32>
    %1288 = arith.cmpi ne, %550, %1287 : vector<2x6xi32>
    %1289 = arith.extui %1288 : vector<2x6xi1> to vector<2x6xi32>
    %1290 = arith.sitofp %1289 : vector<2x6xi32> to vector<2x6xf32>
    %cst_383 = arith.constant dense<0.000000e+00> : vector<2xf32>
    %1291 = vector.multi_reduction <add>, %1290, %cst_383 [1] : vector<2x6xf32> to vector<2xf32>
    %1292 = vector.shape_cast %1291 : vector<2xf32> to vector<2x1xf32>
    %1293 = arith.divf %1286, %1292 : vector<2x1xf32>
    %cst_384 = arith.constant dense<0.000000e+00> : vector<1xf32>
    %1294 = vector.multi_reduction <add>, %1293, %cst_384 [0] : vector<2x1xf32> to vector<1xf32>
    %1295 = vector.shape_cast %1294 : vector<1xf32> to vector<1x1xf32>
    %cst_385 = arith.constant 2.000000e+00 : f32
    %1296 = vector.broadcast %cst_385 : f32 to vector<1x1xf32>
    %1297 = arith.divf %1295, %1296 : vector<1x1xf32>
    %c0_386 = arith.constant 0 : index
    %c0_387 = arith.constant 0 : index
    %1298 = vector.load %arg30[%c0_386, %c0_387] : memref<1x1xf32, #tpu.memory_space<vmem>>, vector<1x1xf32>
    tpu.vector_store %arg30[%c0_386, %c0_387], %1297 {strides = array<i32>} : memref<1x1xf32, #tpu.memory_space<vmem>>, vector<1x1xf32>,
    return
  }
}

</mosaic_0001>

<bundles_post_ra>
// kernel: pgn_forward.1
= control target key start
LH: loop header
LB: loop body
LE: loop exit
PB: predicated region body
PF: predicated region fallthrough
CT: control target
= control target key end

     0   :  { %s11376_s6 = smov 1   ;;  %s11377_s10 = smov 2   ;;  %s13299_s0 = inlined_call_operand.smem [shape: u32[31], index: -1, kind: input, shape index: {}] }
   0x1   :  { %s11435_s5 = sld [smem:[%s13299_s0]]   ;;  %s11378_s14 = smov 3  }
   0x2   :  { %s11440_s9 = sld [smem:[%s13299_s0 + %s11376_s6]]   ;;  %s11379_s18 = smov 4  }
   0x3   :  { %s11445_s13 = sld [smem:[%s13299_s0 + %s11377_s10]]   ;;  %s11380_s22 = smov 5  }
   0x4   :  { %s11450_s17 = sld [smem:[%s13299_s0 + %s11378_s14]]   ;;  %s11381_s26 = smov 6  }
   0x5   :  { %s11455_s21 = sld [smem:[%s13299_s0 + %s11379_s18]]   ;;  %s11382_s30 = smov 7  }
   0x6   :  { %s11460_s25 = sld [smem:[%s13299_s0 + %s11380_s22]]   ;;  %s11383_s4 = smov 8  }
   0x7   :  { %s11465_s29 = sld [smem:[%s13299_s0 + %s11381_s26]]   ;;  %s11384_s10 = smov 9  }
   0x8   :  { %s11470_s3 = sld [smem:[%s13299_s0 + %s11382_s30]]   ;;  %s11385_s15 = smov 10  }
   0x9   :  { %13327 = sst [smem:[#allocation8_spill]] %s11445_s13  ;;  %s11386_s20 = smov 11  }
   0xa   :  { %13328 = sst [smem:[#allocation9_spill]] %s11450_s17  ;;  %s11387_s26 = smov 12  }
   0xb   :  { %s11475_s8 = sld [smem:[%s13299_s0 + %s11383_s4]]   ;;  %s11388_s1 = smov 13  }
   0xc   :  { %s11480_s14 = sld [smem:[%s13299_s0 + %s11384_s10]]   ;;  %s11389_s7 = smov 14  }
   0xd   :  { %s11485_s19 = sld [smem:[%s13299_s0 + %s11385_s15]]   ;;  %s11390_s15 = smov 15  }
   0xe   :  { %s11490_s24 = sld [smem:[%s13299_s0 + %s11386_s20]]   ;;  %s11391_s22 = smov 16  }
   0xf   :  { %s11495_s30 = sld [smem:[%s13299_s0 + %s11387_s26]]   ;;  %s11392_s28 = smov 17  }
  0x10   :  { %s11500_s6 = sld [smem:[%s13299_s0 + %s11388_s1]]   ;;  %s11405_s10 = smov 30  }
  0x11   :  { %s11505_s12 = sld [smem:[%s13299_s0 + %s11389_s7]]   ;;  %s11393_s7 = smov 18  }
  0x12   :  { %s11510_s20 = sld [smem:[%s13299_s0 + %s11390_s15]]   ;;  %s11394_s15 = smov 19  }
  0x13   :  { %s11515_s27 = sld [smem:[%s13299_s0 + %s11391_s22]]   ;;  %s11395_s22 = smov 20  }
  0x14   :  { %s11520_s4 = sld [smem:[%s13299_s0 + %s11392_s28]]   ;;  %s11396_s28 = smov 21  }
  0x15   :  { %13329 = sst [smem:[#allocation10_spill]] %s11495_s30 }
  0x16   :  { %s11525_s17 = sld [smem:[%s13299_s0 + %s11393_s7]]   ;;  %s11397_s7 = smov 22  }
  0x17   :  { %s11530_s13 = sld [smem:[%s13299_s0 + %s11394_s15]]   ;;  %s11398_s15 = smov 23  }
  0x18   :  { %s11535_s30 = sld [smem:[%s13299_s0 + %s11395_s22]]   ;;  %s11399_s22 = smov 24  }
  0x1a   :  { %13330 = sst [smem:[#allocation11_spill]] %s11520_s4 }
  0x1b   :  { %s11540_s4 = sld [smem:[%s13299_s0 + %s11396_s28]]   ;;  %s11400_s28 = smov 25  }
  0x1c   :  { %13331 = sst [smem:[#allocation12_spill]] %s11525_s17 }
  0x1d   :  { %13332 = sst [smem:[#allocation13_spill]] %s11530_s13 }
  0x1e   :  { %13333 = sst [smem:[#allocation14_spill]] %s11535_s30 }
  0x1f   :  { %s11545_s17 = sld [smem:[%s13299_s0 + %s11397_s7]]   ;;  %s11401_s7 = smov 26  }
  0x20   :  { %s11550_s13 = sld [smem:[%s13299_s0 + %s11398_s15]]   ;;  %s11402_s15 = smov 27  }
  0x21   :  { %13334 = sst [smem:[#allocation15_spill]] %s11540_s4 }
  0x22   :  { %s11555_s30 = sld [smem:[%s13299_s0 + %s11399_s22]]   ;;  %s11403_s22 = smov 28  }
  0x23   :  { %s11560_s4 = sld [smem:[%s13299_s0 + %s11400_s28]]   ;;  %s11404_s28 = smov 29  }
  0x25   :  { %13335 = sst [smem:[#allocation16_spill]] %s11545_s17 }
  0x26   :  { %13336 = sst [smem:[#allocation17_spill]] %s11550_s13 }
  0x27   :  { %s11565_s17 = sld [smem:[%s13299_s0 + %s11401_s7]]  }
  0x28   :  { %13337 = sst [smem:[#allocation18_spill]] %s11555_s30 }
  0x29   :  { %13338 = sst [smem:[#allocation19_spill]] %s11560_s4 }
  0x2a   :  { %s11570_s13 = sld [smem:[%s13299_s0 + %s11402_s15]]  }
  0x2b   :  { %s11575_s30 = sld [smem:[%s13299_s0 + %s11403_s22]]  }
  0x2c   :  { %s9629_s4 = sld [smem:[%s13299_s0 + %s11404_s28]]  }
  0x2d   :  { %13339 = sst [smem:[#allocation20_spill]] %s11565_s17 }
  0x2e   :  { %s11583_s17 = sld [smem:[%s13299_s0 + %s11405_s10]]  }
  0x32   :  { %v66_v0 = vstv %s9629_s4 }
  0x33   :  { %67 = vst [vmem:[#allocation4] sm:$0x1] %v66_v0 }
  0x34   :  { %v222_v1 = vld [vmem:[%s11470_s3] sm:$0xff]  ;;  %v223_v2 = vld [vmem:[%s11470_s3 + $0x8] sm:$0xff]  ;;  %vm140_vm0 = vcmask 130048  }
  0x35   :  { %v129_v3 = vld [vmem:[%s11435_s5] sm:$0xff]  ;;  %v10678_v4 = vpack.c.bf16 %v223_v2, %v222_v1  ;;  %v309_v6 = vld [vmem:[%s11475_s8 + $0x8] sm:$0xff] }
  0x36   :  { %10050 = vmatprep.mubr.msk.f32.mxu1 %vm140_vm0, %v129_v3  ;;  %v308_v5 = vld [vmem:[%s11475_s8] sm:$0xff]  ;;  %10043 = vmatprep.mubr.msk.f32.mxu0 %vm140_vm0, %v129_v3  ;;  %v132_v8 = vld [vmem:[%s11455_s21 + $0x8] sm:$0xff] }
  0x37   :  { %v131_v7 = vld [vmem:[%s11455_s21] sm:$0xff]  ;;  %10679 = vmatprep.subr.bf16.mxu1 %v10678_v4  ;;  %v307_v11 = vld [vmem:[%s11460_s25 + $0x8] sm:$0xff] }
  0x38   :  { %v10674_v9 = vpack.c.bf16 %v132_v8, %v131_v7  ;;  %v306_v10 = vld [vmem:[%s11460_s25] sm:$0xff] }
  0x39   :  { %68 = vsyncpa [#allocation6], 0  ;;  %10681 = vmatpush3.bf16.msra.mxu1 %v10678_v4  ;;  %v130_v12 = vld [vmem:[%s11435_s5 + $0x8] sm:$0xff]  ;;  %v11597_v13 = vpack.c.bf16 %v309_v6, %v308_v5  ;;  %v13318_v14 = vmov 0.0|0.0   ;;  %v11600_v15 = vpack.c.bf16 %v307_v11, %v306_v10  ;;  %vm11407_vm1 = vmmov 0   ;;  %s11409_s0 = smov 96  }
  0x3a   :  { %10685 = vmatprep.subr.bf16.mxu1 %v13318_v14  ;;  %10675 = vmatprep.subr.bf16.mxu0 %v10674_v9  ;;  %v13315_v16 = vmov 0.0   ;;  %v9634_v17 = vld [vmem:[%s11480_s14] ss:$0 sm:$0xff]  ;;  %s11410_s5 = smov 16   ;;  %s11411_s21 = smov 32   ;;  %vm2244_vm2 = vcmask 253952  }
  0x3b   :  { %10677 = vmatpush3.bf16.msra.mxu0 %v10674_v9  ;;  %v9631_v20 = vld [vmem:[%s11465_s29] ss:$0 sm:$0xff]  ;;  %s11412_s25 = smov 80   ;;  %s11414_s29 = smov 112   ;;  %vm4351_vm3 = vcmask 261120   ;;  %vm4368_vm4 = vcmask 1041409  }
  0x3c   :  { %10051 = vmatmul.mubr.msk.f32.vlgmr.msra.gmra.mrb[0].mxu1 %vm140_vm0, %v130_v12  ;;  %10682 = vmatprep.subr.bf16.mxu0 %v13318_v14  ;;  %s13340_s3 = sld [smem:[#allocation10_spill]]  ;;  %s13341_s8 = sld [smem:[#allocation11_spill]]  ;;  %vm4371_vm5 = vcmask 58368   ;;  %vm2032_vm7 = vcmask 122880   ;;  %vm2072_vm8 = vcmask 254080   ;;  %vm4867_vm9 = vcmask 254976  }
  0x3d   :  { %10687 = vmatpush3.bf16.msra.mxu1 %v11597_v13  ;;  %10064 = vmatprep.mubr.msk.f32.mxu1 %vm11407_vm1, %v13315_v16  ;;  %s13342_s14 = sld [smem:[#allocation12_spill]]  ;;  %s13364_s4 = sld [smem:[#allocation18_spill]]  ;;  %vm5214_vm12 = vcmask 285696   ;;  %vm5246_vm14 = vcmask 279552  }
  0x3e   :  { %10044 = vmatmul.mubr.msk.f32.vlgmr.msra.gmra.mrb[0].mxu0 %vm140_vm0, %v130_v12  ;;  %10691 = vmatprep.subr.bf16.mxu1 %v13318_v14  ;;  %s13365_s15 = sld [smem:[#allocation9_spill]]  ;;  %s11419_s16 = smov 126  }
  0x3f   :  { %10684 = vmatpush3.bf16.msra.mxu0 %v11600_v15  ;;  %10057 = vmatprep.mubr.msk.f32.mxu0 %vm11407_vm1, %v13315_v16  ;;  %s11421_s18 = smov 125   ;;  %s11423_s22 = smov 124  }
  0x40   :  { %10065 = vmatmul.mubr.f32.vlgmr.msra.gmra.mrb[2].mxu1 %v13315_v16  ;;  %10688 = vmatprep.subr.bf16.mxu0 %v13318_v14  ;;  %s11425_s23 = smov 123   ;;  %s11426_s26 = smov [#allocation5]  }
  0x41   :  { %10693 = vmatpush3.bf16.msra.mxu1 %v11597_v13  ;;  %10078 = vmatprep.mubr.msk.f32.mxu1 %vm11407_vm1, %v13315_v16  ;;  %s9593_s28 = sshll.u32 %s11426_s26, 4  ;;  %s9594_s28 = int_to_ptr.vmem [resolvable:$true] %s9593_s28 }
  0x42   :  { %10058 = vmatmul.mubr.f32.vlgmr.msra.gmra.mrb[2].mxu0 %v13315_v16  ;;  %10697 = vmatprep.subr.bf16.mxu1 %v13318_v14  ;;  %s11352_s1 = scalar_lea.vmem %s9594_s28, 16  ;;  %s11356_s2 = scalar_lea.vmem %s9594_s28, 32 }
  0x43   :  { %10690 = vmatpush3.bf16.msra.mxu0 %v11600_v15  ;;  %10071 = vmatprep.mubr.msk.f32.mxu0 %vm11407_vm1, %v13315_v16  ;;  %p11353_p0 = scmp.ne.s32.totalorder %s9594_s28, %s11352_s1  ;;  %p11357_p1 = scmp.lt.s32.totalorder %s9594_s28, %s9594_s28 }
  0x44   :  { %10694 = vmatprep.subr.bf16.mxu0 %v13318_v14  ;;  %p11358_p2 = scmp.lt.s32.totalorder %s11356_s2, %s11352_s1 }
  0x46   :  { %p11359_p3 = por %p11358_p2, %p11357_p1 }
  0x48   :  { %p11360_p4 = pnand %p11359_p3, %p11353_p0 }
 0x10f   :  { %v10052_v18 = vpop.f32.mrb[0].mxu1 }
 0x110   :  { %v297_v19 = vpop.f32.mrb[1].mxu1  ;;  %v11631_v27 = vadd.f32 %v10052_v18, %v9634_v17 }
 0x111   :  { %v11625_v21 = vadd.f32 %v9634_v17, %v297_v19  ;;  %v10045_v22 = vpop.f32.mrb[0].mxu0 }
 0x112   :  { %v11627_v23 = vadd.f32 %v10045_v22, %v9631_v20  ;;  %v213_v24 = vpop.f32.mrb[1].mxu0 }
 0x113   :  { %v474_v25 = vpop.f32.mrb[2].mxu1  ;;  %v11629_v26 = vadd.f32 %v9631_v20, %v213_v24 }
 0x114   :  { %v479_v28 = vrot.slane %v474_v25, 2  ;;  %v10066_v29 = vpop.f32.mrb[3].mxu1 }
 0x115   :  { %v379_v30 = vpop.f32.mrb[2].mxu0 }
 0x116   :  { %v481_v31 = vadd.f32 %v479_v28, %v11631_v27  ;;  %v383_v32 = vadd.f32 %v379_v30, %v11629_v26  ;;  %v10059_v33 = vpop.f32.mrb[3].mxu0 }
 0x118   :  { %11041 = vtanh.f32 %v481_v31  ;;  %v9638_v36 = vmul.f32 -1.442695, %v481_v31  ;;  %v9637_v37 = vmul.f32 -1.442695, %v383_v32 }
 0x119   :  { %11043 = vtanh.f32 %v383_v32 }
 0x11a   :  { %11045 = vpow2.f32 %v9638_v36 }
 0x11b   :  { %11047 = vpow2.f32 %v9637_v37 }
 0x122   :  { %v11042_v34 = vpop.eup %11041 }
 0x123   :  { %491 = vrot.lane.b32.xlu0 %v11042_v34, %s11409_s0  ;;  %v11044_v35 = vpop.eup %11043 }
 0x124   :  { %v11046_v38 = vpop.eup %11045 }
 0x125   :  { %v485_v39 = vadd.f32 1.0, %v11046_v38  ;;  %v11048_v40 = vpop.eup %11047 }
 0x126   :  { %v387_v41 = vadd.f32 1.0, %v11048_v40 }
 0x127   :  { %393 = vrot.lane.b32.xlu0 %v11044_v35, %s11409_s0  ;;  %11049 = vrcp.f32 %v485_v39 }
 0x128   :  { %11051 = vrcp.f32 %v387_v41 }
 0x131   :  { %v11050_v42 = vpop.eup %11049 }
 0x132   :  { %v11052_v45 = vpop.eup %11051  ;;  %v489_v48 = vmul.f32 0.0, %v11050_v42 }
 0x133   :  { %v391_v51 = vmul.f32 0.0, %v11052_v45 }
 0x195   :  { %v492_v43 = vpop.permute.xlu0 %491 }
 0x196   :  { %v494_v44 = vmul.f32 %v11050_v42, %v492_v43 }
 0x198   :  { %496 = vrot.lane.b32.xlu1 %v494_v44, %s11410_s5 }
 0x199   :  { %v394_v46 = vpop.permute.xlu0 %393 }
 0x19a   :  { %v396_v47 = vmul.f32 %v11052_v45, %v394_v46 }
 0x19c   :  { %398 = vrot.lane.b32.xlu1 %v396_v47, %s11410_s5 }
 0x20a   :  { %v497_v49 = vpop.permute.xlu1 %496 }
 0x20b   :  { %v11639_v50 = vadd.f32 %v497_v49, %v489_v48 }
 0x20d   :  { %11053 = vtanh.f32 %v11639_v50  ;;  %v700_v29 = vrot.slane %v11639_v50, 2 }
 0x20e   :  { %v399_v52 = vpop.permute.xlu1 %398 }
 0x20f   :  { %v11642_v53 = vadd.f32 %v399_v52, %v391_v51 }
 0x211   :  { %11055 = vtanh.f32 %v11642_v53  ;;  %v593_v31 = vrot.slane %v11642_v53, 6 }
 0x217   :  { %v11054_v54 = vpop.eup %11053 }
 0x218   :  { %502 = vrot.lane.b32.xlu0 %v11054_v54, %s11411_s21 }
 0x21b   :  { %v11056_v55 = vpop.eup %11055 }
 0x21c   :  { %404 = vrot.lane.b32.xlu1 %v11056_v55, %s11411_s21 }
 0x28a   :  { %v503_v56 = vpop.permute.xlu0 %502 }
 0x28b   :  { %v11647_v57 = vmul.f32 %v11050_v42, %v503_v56 }
 0x28d   :  { %v613_v58 = vrot.slane %v11647_v57, 6 }
 0x28e   :  { %v405_v59 = vpop.permute.xlu1 %404 }
 0x28f   :  { %v11650_v60 = vmul.f32 %v11052_v45, %v405_v59  ;;  %614 = vrot.lane.b32.xlu0 %v613_v58, %s11412_s25 }
 0x291   :  { %507 = vrot.lane.b32.xlu1 %v11650_v60, %s11412_s25 }
 0x301   :  { %v11655_v61 = vpop.permute.xlu0 %614 }
 0x302   :  { %10079 = vmatmul.mubr.msk.f32.vlgmr.msra.gmra.mrb[4].mxu1 %vm140_vm0, %v11655_v61 }
 0x303   :  { %v11659_v62 = vpop.permute.xlu1 %507  ;;  %10699 = vmatpush3.bf16.msra.mxu1 %v11597_v13  ;;  %10092 = vmatprep.mubr.msk.f32.mxu1 %vm11407_vm1, %v13315_v16 }
 0x304   :  { %10072 = vmatmul.mubr.msk.f32.vlgmr.msra.gmra.mrb[4].mxu0 %vm140_vm0, %v11659_v62  ;;  %10703 = vmatprep.subr.bf16.mxu1 %v13318_v14 }
 0x305   :  { %10696 = vmatpush3.bf16.msra.mxu0 %v11600_v15  ;;  %10085 = vmatprep.mubr.msk.f32.mxu0 %vm11407_vm1, %v13315_v16 }
 0x306   :  { %10700 = vmatprep.subr.bf16.mxu0 %v13318_v14 }
 0x3d5   :  { %v684_v63 = vpop.f32.mrb[4].mxu1 }
 0x3d6   :  { %v689_v0 = vrot.slane %v684_v63, 4  ;;  %v10080_v1 = vpop.f32.mrb[5].mxu1 }
 0x3d7   :  { %v577_v2 = vpop.f32.mrb[4].mxu0 }
 0x3d8   :  { %v691_v3 = vadd.f32 %v689_v0, %v11631_v27  ;;  %v582_v4 = vrot.slane %v577_v2, 6  ;;  %v10073_v5 = vpop.f32.mrb[5].mxu0 }
 0x3da   :  { %11057 = vtanh.f32 %v691_v3  ;;  %v584_v6 = vadd.f32 %v582_v4, %v11629_v26  ;;  %v9642_v9 = vmul.f32 -1.442695, %v691_v3 }
 0x3dc   :  { %11059 = vtanh.f32 %v584_v6  ;;  %v9640_v10 = vmul.f32 -1.442695, %v584_v6 }
 0x3dd   :  { %11061 = vpow2.f32 %v9642_v9 }
 0x3de   :  { %11063 = vpow2.f32 %v9640_v10 }
 0x3e4   :  { %v11058_v7 = vpop.eup %11057 }
 0x3e5   :  { %704 = vrot.lane.b32.xlu0 %v11058_v7, %s11409_s0 }
 0x3e6   :  { %v11060_v8 = vpop.eup %11059 }
 0x3e7   :  { %597 = vrot.lane.b32.xlu1 %v11060_v8, %s11409_s0  ;;  %v11062_v11 = vpop.eup %11061 }
 0x3e8   :  { %v11064_v12 = vpop.eup %11063  ;;  %v695_v17 = vadd.f32 1.0, %v11062_v11 }
 0x3e9   :  { %v588_v18 = vadd.f32 1.0, %v11064_v12 }
 0x3ea   :  { %11065 = vrcp.f32 %v695_v17 }
 0x3eb   :  { %11067 = vrcp.f32 %v588_v18 }
 0x3f4   :  { %v11066_v19 = vpop.eup %11065 }
 0x3f5   :  { %v11068_v24 = vpop.eup %11067  ;;  %v702_v30 = vmul.f32 %v11066_v19, %v700_v29 }
 0x3f6   :  { %v595_v34 = vmul.f32 %v11068_v24, %v593_v31 }
 0x457   :  { %v705_v20 = vpop.permute.xlu0 %704 }
 0x458   :  { %v707_v22 = vmul.f32 %v11066_v19, %v705_v20 }
 0x459   :  { %v598_v25 = vpop.permute.xlu1 %597 }
 0x45a   :  { %709 = vrot.lane.b32.xlu0 %v707_v22, %s11410_s5  ;;  %v600_v28 = vmul.f32 %v11068_v24, %v598_v25 }
 0x45c   :  { %602 = vrot.lane.b32.xlu1 %v600_v28, %s11410_s5 }
 0x4cc   :  { %v710_v32 = vpop.permute.xlu0 %709 }
 0x4cd   :  { %v712_v33 = vadd.f32 %v710_v32, %v702_v30 }
 0x4ce   :  { %v603_v35 = vpop.permute.xlu1 %602 }
 0x4cf   :  { %11069 = vtanh.f32 %v712_v33  ;;  %v605_v36 = vadd.f32 %v603_v35, %v595_v34  ;;  %v914_v9 = vrot.slane %v712_v33, 2 }
 0x4d1   :  { %11071 = vtanh.f32 %v605_v36  ;;  %v807_v11 = vrot.slane %v605_v36, 6 }
 0x4d9   :  { %v11070_v37 = vpop.eup %11069 }
 0x4da   :  { %715 = vrot.lane.b32.xlu0 %v11070_v37, %s11411_s21 }
 0x4db   :  { %v11072_v38 = vpop.eup %11071 }
 0x4dc   :  { %608 = vrot.lane.b32.xlu1 %v11072_v38, %s11411_s21 }
 0x54c   :  { %v716_v39 = vpop.permute.xlu0 %715 }
 0x54d   :  { %v11681_v40 = vmul.f32 %v11066_v19, %v716_v39 }
 0x54e   :  { %v609_v42 = vpop.permute.xlu1 %608 }
 0x54f   :  { %v827_v41 = vrot.slane %v11681_v40, 4  ;;  %v11684_v43 = vmul.f32 %v11068_v24, %v609_v42 }
 0x551   :  { %828 = vrot.lane.b32.xlu0 %v827_v41, %s11412_s25  ;;  %v720_v44 = vrot.slane %v11684_v43, 2 }
 0x553   :  { %721 = vrot.lane.b32.xlu1 %v720_v44, %s11412_s25 }
 0x5c3   :  { %v11689_v45 = vpop.permute.xlu0 %828 }
 0x5c4   :  { %10093 = vmatmul.mubr.msk.f32.vlgmr.msra.gmra.mrb[6].mxu1 %vm140_vm0, %v11689_v45 }
 0x5c5   :  { %10705 = vmatpush3.bf16.msra.mxu1 %v11597_v13  ;;  %10106 = vmatprep.mubr.msk.f32.mxu1 %vm11407_vm1, %v13315_v16  ;;  %v11696_v46 = vpop.permute.xlu1 %721 }
 0x5c6   :  { %10709 = vmatprep.subr.bf16.mxu1 %v13318_v14  ;;  %10086 = vmatmul.mubr.msk.f32.vlgmr.msra.gmra.mrb[6].mxu0 %vm140_vm0, %v11696_v46 }
 0x5c7   :  { %10702 = vmatpush3.bf16.msra.mxu0 %v11600_v15  ;;  %10099 = vmatprep.mubr.msk.f32.mxu0 %vm11407_vm1, %v13315_v16 }
 0x5c8   :  { %10706 = vmatprep.subr.bf16.mxu0 %v13318_v14 }
 0x697   :  { %v898_v47 = vpop.f32.mrb[6].mxu1 }
 0x698   :  { %v903_v48 = vrot.slane %v898_v47, 6  ;;  %v10094_v49 = vpop.f32.mrb[7].mxu1 }
 0x699   :  { %v791_v51 = vpop.f32.mrb[6].mxu0 }
 0x69a   :  { %v905_v50 = vadd.f32 %v903_v48, %v11631_v27  ;;  %v796_v52 = vrot.slane %v791_v51, 4  ;;  %v10087_v53 = vpop.f32.mrb[7].mxu0 }
 0x69c   :  { %11073 = vtanh.f32 %v905_v50  ;;  %v798_v54 = vadd.f32 %v796_v52, %v11629_v26  ;;  %v9646_v58 = vmul.f32 -1.442695, %v905_v50 }
 0x69e   :  { %11075 = vtanh.f32 %v798_v54  ;;  %v9644_v59 = vmul.f32 -1.442695, %v798_v54 }
 0x69f   :  { %11077 = vpow2.f32 %v9646_v58 }
 0x6a0   :  { %11079 = vpow2.f32 %v9644_v59 }
 0x6a6   :  { %v11074_v55 = vpop.eup %11073 }
 0x6a7   :  { %918 = vrot.lane.b32.xlu0 %v11074_v55, %s11409_s0 }
 0x6a8   :  { %v11076_v56 = vpop.eup %11075 }
 0x6a9   :  { %811 = vrot.lane.b32.xlu1 %v11076_v56, %s11409_s0  ;;  %v11078_v63 = vpop.eup %11077 }
 0x6aa   :  { %v11080_v0 = vpop.eup %11079  ;;  %v909_v1 = vadd.f32 1.0, %v11078_v63 }
 0x6ab   :  { %v802_v2 = vadd.f32 1.0, %v11080_v0 }
 0x6ac   :  { %11081 = vrcp.f32 %v909_v1 }
 0x6ad   :  { %11083 = vrcp.f32 %v802_v2 }
 0x6b6   :  { %v11082_v3 = vpop.eup %11081 }
 0x6b7   :  { %v11084_v6 = vpop.eup %11083  ;;  %v916_v10 = vmul.f32 %v11082_v3, %v914_v9 }
 0x6b8   :  { %v809_v18 = vmul.f32 %v11084_v6, %v807_v11 }
 0x719   :  { %v919_v4 = vpop.permute.xlu0 %918 }
 0x71a   :  { %v921_v5 = vmul.f32 %v11082_v3, %v919_v4 }
 0x71b   :  { %v812_v7 = vpop.permute.xlu1 %811 }
 0x71c   :  { %923 = vrot.lane.b32.xlu0 %v921_v5, %s11410_s5  ;;  %v814_v8 = vmul.f32 %v11084_v6, %v812_v7 }
 0x71e   :  { %816 = vrot.lane.b32.xlu1 %v814_v8, %s11410_s5 }
 0x78e   :  { %v924_v12 = vpop.permute.xlu0 %923 }
 0x78f   :  { %v926_v17 = vadd.f32 %v924_v12, %v916_v10 }
 0x790   :  { %v817_v19 = vpop.permute.xlu1 %816 }
 0x791   :  { %11085 = vtanh.f32 %v926_v17  ;;  %v819_v20 = vadd.f32 %v817_v19, %v809_v18  ;;  %v1125_v59 = vrot.slane %v926_v17, 2 }
 0x793   :  { %11087 = vtanh.f32 %v819_v20  ;;  %v1021_v2 = vrot.slane %v819_v20, 6 }
 0x79b   :  { %v11086_v22 = vpop.eup %11085 }
 0x79c   :  { %929 = vrot.lane.b32.xlu0 %v11086_v22, %s11411_s21 }
 0x79d   :  { %v11088_v24 = vpop.eup %11087 }
 0x79e   :  { %822 = vrot.lane.b32.xlu1 %v11088_v24, %s11411_s21 }
 0x80e   :  { %v930_v25 = vpop.permute.xlu0 %929 }
 0x80f   :  { %v11713_v28 = vmul.f32 %v11082_v3, %v930_v25 }
 0x810   :  { %v823_v30 = vpop.permute.xlu1 %822 }
 0x811   :  { %v1041_v29 = vrot.slane %v11713_v28, 2  ;;  %v11716_v31 = vmul.f32 %v11084_v6, %v823_v30 }
 0x813   :  { %1042 = vrot.lane.b32.xlu0 %v1041_v29, %s11412_s25  ;;  %v934_v32 = vrot.slane %v11716_v31, 4 }
 0x815   :  { %935 = vrot.lane.b32.xlu1 %v934_v32, %s11412_s25 }
 0x885   :  { %v11721_v33 = vpop.permute.xlu0 %1042 }
 0x886   :  { %10107 = vmatmul.mubr.msk.f32.vlgmr.msra.gmra.mrb[8].mxu1 %vm140_vm0, %v11721_v33 }
 0x887   :  { %10711 = vmatpush3.bf16.msra.mxu1 %v11597_v13  ;;  %10120 = vmatprep.mubr.msk.f32.mxu1 %vm11407_vm1, %v13315_v16  ;;  %v11728_v34 = vpop.permute.xlu1 %935 }
 0x888   :  { %10715 = vmatprep.subr.bf16.mxu1 %v13318_v14  ;;  %10100 = vmatmul.mubr.msk.f32.vlgmr.msra.gmra.mrb[8].mxu0 %vm140_vm0, %v11728_v34 }
 0x889   :  { %10708 = vmatpush3.bf16.msra.mxu0 %v11600_v15  ;;  %10113 = vmatprep.mubr.msk.f32.mxu0 %vm11407_vm1, %v13315_v16 }
 0x88a   :  { %10712 = vmatprep.subr.bf16.mxu0 %v13318_v14 }
 0x959   :  { %v1112_v35 = vpop.f32.mrb[8].mxu1 }
 0x95a   :  { %v1116_v36 = vadd.f32 %v1112_v35, %v11631_v27  ;;  %v10108_v37 = vpop.f32.mrb[9].mxu1 }
 0x95b   :  { %v1005_v38 = vpop.f32.mrb[8].mxu0 }
 0x95c   :  { %11089 = vtanh.f32 %v1116_v36  ;;  %v1010_v39 = vrot.slane %v1005_v38, 2  ;;  %v10101_v41 = vpop.f32.mrb[9].mxu0  ;;  %v9650_v48 = vmul.f32 -1.442695, %v1116_v36 }
 0x95e   :  { %v1012_v42 = vadd.f32 %v1010_v39, %v11629_v26 }
 0x960   :  { %11091 = vtanh.f32 %v1012_v42  ;;  %v9648_v49 = vmul.f32 -1.442695, %v1012_v42 }
 0x961   :  { %11093 = vpow2.f32 %v9650_v48 }
 0x962   :  { %11095 = vpow2.f32 %v9648_v49 }
 0x966   :  { %v11090_v44 = vpop.eup %11089 }
 0x967   :  { %1129 = vrot.lane.b32.xlu0 %v11090_v44, %s11409_s0 }
 0x96a   :  { %v11092_v47 = vpop.eup %11091 }
 0x96b   :  { %1025 = vrot.lane.b32.xlu1 %v11092_v47, %s11409_s0  ;;  %v11094_v50 = vpop.eup %11093 }
 0x96c   :  { %v1120_v27 = vadd.f32 1.0, %v11094_v50  ;;  %v11096_v51 = vpop.eup %11095 }
 0x96d   :  { %v1016_v52 = vadd.f32 1.0, %v11096_v51 }
 0x96e   :  { %11097 = vrcp.f32 %v1120_v27 }
 0x96f   :  { %11099 = vrcp.f32 %v1016_v52 }
 0x978   :  { %v11098_v53 = vpop.eup %11097 }
 0x979   :  { %v11100_v55 = vpop.eup %11099  ;;  %v1127_v63 = vmul.f32 %v11098_v53, %v1125_v59 }
 0x97a   :  { %v1023_v3 = vmul.f32 %v11100_v55, %v1021_v2 }
 0x9d9   :  { %v1130_v54 = vpop.permute.xlu0 %1129 }
 0x9da   :  { %v1132_v26 = vmul.f32 %v11098_v53, %v1130_v54 }
 0x9dc   :  { %1134 = vrot.lane.b32.xlu0 %v1132_v26, %s11410_s5 }
 0x9dd   :  { %v1026_v56 = vpop.permute.xlu1 %1025 }
 0x9de   :  { %v1028_v58 = vmul.f32 %v11100_v55, %v1026_v56 }
 0x9e0   :  { %1030 = vrot.lane.b32.xlu1 %v1028_v58, %s11410_s5 }
 0xa4e   :  { %v1135_v0 = vpop.permute.xlu0 %1134 }
 0xa4f   :  { %v1137_v1 = vadd.f32 %v1135_v0, %v1127_v63 }
 0xa51   :  { %11101 = vtanh.f32 %v1137_v1  ;;  %v1335_v51 = vrot.slane %v1137_v1, 2 }
 0xa52   :  { %v1031_v4 = vpop.permute.xlu1 %1030 }
 0xa53   :  { %v1033_v5 = vadd.f32 %v1031_v4, %v1023_v3 }
 0xa55   :  { %11103 = vtanh.f32 %v1033_v5  ;;  %v1229_v26 = vrot.slane %v1033_v5, 6 }
 0xa5b   :  { %v11102_v6 = vpop.eup %11101 }
 0xa5c   :  { %1140 = vrot.lane.b32.xlu0 %v11102_v6, %s11411_s21 }
 0xa5f   :  { %v11104_v7 = vpop.eup %11103 }
 0xa60   :  { %1036 = vrot.lane.b32.xlu1 %v11104_v7, %s11411_s21 }
 0xace   :  { %v1141_v8 = vpop.permute.xlu0 %1140 }
 0xacf   :  { %v11745_v9 = vmul.f32 %v11098_v53, %v1141_v8 }
 0xad1   :  { %1249 = vrot.lane.b32.xlu0 %v11745_v9, %s11412_s25 }
 0xad2   :  { %v1037_v10 = vpop.permute.xlu1 %1036 }
 0xad3   :  { %v11749_v11 = vmul.f32 %v11100_v55, %v1037_v10 }
 0xad5   :  { %v1145_v12 = vrot.slane %v11749_v11, 6 }
 0xad7   :  { %1146 = vrot.lane.b32.xlu1 %v1145_v12, %s11412_s25 }
 0xb43   :  { %v11753_v17 = vpop.permute.xlu0 %1249 }
 0xb44   :  { %10121 = vmatmul.mubr.msk.f32.vlgmr.msra.gmra.mrb[10].mxu1 %vm140_vm0, %v11753_v17 }
 0xb45   :  { %10717 = vmatpush3.bf16.msra.mxu1 %v11597_v13  ;;  %10134 = vmatprep.mubr.msk.f32.mxu1 %vm11407_vm1, %v13315_v16 }
 0xb46   :  { %10721 = vmatprep.subr.bf16.mxu1 %v13318_v14 }
 0xb49   :  { %v11761_v18 = vpop.permute.xlu1 %1146 }
 0xb4a   :  { %10114 = vmatmul.mubr.msk.f32.vlgmr.msra.gmra.mrb[10].mxu0 %vm140_vm0, %v11761_v18 }
 0xb4b   :  { %10714 = vmatpush3.bf16.msra.mxu0 %v11600_v15  ;;  %10127 = vmatprep.mubr.msk.f32.mxu0 %vm11407_vm1, %v13315_v16 }
 0xb4c   :  { %10718 = vmatprep.subr.bf16.mxu0 %v13318_v14 }
 0xc17   :  { %v1319_v19 = vpop.f32.mrb[10].mxu1 }
 0xc18   :  { %v1324_v20 = vrot.slane %v1319_v19, 2  ;;  %v10122_v22 = vpop.f32.mrb[11].mxu1 }
 0xc1a   :  { %v1326_v24 = vadd.f32 %v1324_v20, %v11625_v21 }
 0xc1c   :  { %11105 = vtanh.f32 %v1326_v24  ;;  %v9654_v36 = vmul.f32 -1.442695, %v1326_v24 }
 0xc1d   :  { %v1216_v25 = vpop.f32.mrb[10].mxu0 }
 0xc1e   :  { %v1220_v29 = vadd.f32 %v1216_v25, %v11627_v23  ;;  %v10115_v30 = vpop.f32.mrb[11].mxu0 }
 0xc20   :  { %11107 = vtanh.f32 %v1220_v29  ;;  %v9652_v37 = vmul.f32 -1.442695, %v1220_v29 }
 0xc21   :  { %11109 = vpow2.f32 %v9654_v36 }
 0xc22   :  { %11111 = vpow2.f32 %v9652_v37 }
 0xc26   :  { %v11106_v32 = vpop.eup %11105 }
 0xc27   :  { %1339 = vrot.lane.b32.xlu0 %v11106_v32, %s11409_s0 }
 0xc2a   :  { %v11108_v35 = vpop.eup %11107 }
 0xc2b   :  { %1233 = vrot.lane.b32.xlu1 %v11108_v35, %s11409_s0  ;;  %v11110_v38 = vpop.eup %11109 }
 0xc2c   :  { %v1330_v39 = vadd.f32 1.0, %v11110_v38  ;;  %v11112_v41 = vpop.eup %11111 }
 0xc2d   :  { %v1224_v42 = vadd.f32 1.0, %v11112_v41 }
 0xc2e   :  { %11113 = vrcp.f32 %v1330_v39 }
 0xc2f   :  { %11115 = vrcp.f32 %v1224_v42 }
 0xc38   :  { %v11114_v44 = vpop.eup %11113 }
 0xc39   :  { %v11116_v49 = vpop.eup %11115  ;;  %v1337_v52 = vmul.f32 %v11114_v44, %v1335_v51 }
 0xc3a   :  { %v1231_v55 = vmul.f32 %v11116_v49, %v1229_v26 }
 0xc99   :  { %v1340_v47 = vpop.permute.xlu0 %1339 }
 0xc9a   :  { %v1342_v48 = vmul.f32 %v11114_v44, %v1340_v47 }
 0xc9c   :  { %1344 = vrot.lane.b32.xlu0 %v1342_v48, %s11410_s5 }
 0xc9d   :  { %v1234_v50 = vpop.permute.xlu1 %1233 }
 0xc9e   :  { %v1236_v27 = vmul.f32 %v11116_v49, %v1234_v50 }
 0xca0   :  { %1238 = vrot.lane.b32.xlu1 %v1236_v27, %s11410_s5 }
 0xd0e   :  { %v1345_v53 = vpop.permute.xlu0 %1344 }
 0xd0f   :  { %v1347_v54 = vadd.f32 %v1345_v53, %v1337_v52 }
 0xd11   :  { %11117 = vtanh.f32 %v1347_v54 }
 0xd12   :  { %v1239_v56 = vpop.permute.xlu1 %1238 }
 0xd13   :  { %v1241_v58 = vadd.f32 %v1239_v56, %v1231_v55 }
 0xd15   :  { %11119 = vtanh.f32 %v1241_v58  ;;  %v1441_v27 = vrot.slane %v1241_v58, 6 }
 0xd1b   :  { %v11118_v59 = vpop.eup %11117 }
 0xd1c   :  { %1350 = vrot.lane.b32.xlu0 %v11118_v59, %s11411_s21 }
 0xd1f   :  { %v11120_v63 = vpop.eup %11119 }
 0xd20   :  { %1244 = vrot.lane.b32.xlu1 %v11120_v63, %s11411_s21 }
 0xd8e   :  { %v1351_v0 = vpop.permute.xlu0 %1350 }
 0xd8f   :  { %v11777_v2 = vmul.f32 %v11114_v44, %v1351_v0 }
 0xd91   :  { %v1461_v1 = vrot.slane %v11777_v2, 6 }
 0xd92   :  { %v1245_v3 = vpop.permute.xlu1 %1244 }
 0xd93   :  { %1462 = vrot.lane.b32.xlu0 %v1461_v1, %s11412_s25  ;;  %v11781_v4 = vmul.f32 %v11116_v49, %v1245_v3  ;;  %v1548_v49 = vrot.slane %v1347_v54, 2 }
 0xd95   :  { %1355 = vrot.lane.b32.xlu1 %v11781_v4, %s11412_s25 }
 0xe05   :  { %v11785_v5 = vpop.permute.xlu0 %1462 }
 0xe06   :  { %10135 = vmatmul.mubr.msk.f32.vlgmr.msra.gmra.mrb[12].mxu1 %vm140_vm0, %v11785_v5 }
 0xe07   :  { %10723 = vmatpush3.bf16.msra.mxu1 %v11597_v13  ;;  %10148 = vmatprep.mubr.msk.f32.mxu1 %vm11407_vm1, %v13315_v16  ;;  %v11792_v6 = vpop.permute.xlu1 %1355 }
 0xe08   :  { %10727 = vmatprep.subr.bf16.mxu1 %v13318_v14  ;;  %10128 = vmatmul.mubr.msk.f32.vlgmr.msra.gmra.mrb[12].mxu0 %vm140_vm0, %v11792_v6 }
 0xe09   :  { %10720 = vmatpush3.bf16.msra.mxu0 %v11600_v15  ;;  %10141 = vmatprep.mubr.msk.f32.mxu0 %vm11407_vm1, %v13315_v16 }
 0xe0a   :  { %10724 = vmatprep.subr.bf16.mxu0 %v13318_v14 }
 0xed9   :  { %v1532_v7 = vpop.f32.mrb[12].mxu1 }
 0xeda   :  { %v1537_v8 = vrot.slane %v1532_v7, 4  ;;  %v10136_v10 = vpop.f32.mrb[13].mxu1 }
 0xedb   :  { %v1425_v19 = vpop.f32.mrb[12].mxu0 }
 0xedc   :  { %v1539_v12 = vadd.f32 %v1537_v8, %v11625_v21  ;;  %v1430_v20 = vrot.slane %v1425_v19, 6  ;;  %v10129_v22 = vpop.f32.mrb[13].mxu0 }
 0xede   :  { %11121 = vtanh.f32 %v1539_v12  ;;  %v1432_v24 = vadd.f32 %v1430_v20, %v11627_v23  ;;  %v9658_v30 = vmul.f32 -1.442695, %v1539_v12 }
 0xee0   :  { %11123 = vtanh.f32 %v1432_v24  ;;  %v9656_v32 = vmul.f32 -1.442695, %v1432_v24 }
 0xee1   :  { %11125 = vpow2.f32 %v9658_v30 }
 0xee2   :  { %11127 = vpow2.f32 %v9656_v32 }
 0xee8   :  { %v11122_v25 = vpop.eup %11121 }
 0xee9   :  { %1552 = vrot.lane.b32.xlu0 %v11122_v25, %s11409_s0 }
 0xeea   :  { %v11124_v29 = vpop.eup %11123 }
 0xeeb   :  { %1445 = vrot.lane.b32.xlu1 %v11124_v29, %s11409_s0  ;;  %v11126_v35 = vpop.eup %11125 }
 0xeec   :  { %v11128_v36 = vpop.eup %11127  ;;  %v1543_v37 = vadd.f32 1.0, %v11126_v35 }
 0xeed   :  { %v1436_v38 = vadd.f32 1.0, %v11128_v36 }
 0xeee   :  { %11129 = vrcp.f32 %v1543_v37 }
 0xeef   :  { %11131 = vrcp.f32 %v1436_v38 }
 0xef8   :  { %v11130_v39 = vpop.eup %11129 }
 0xef9   :  { %v11132_v44 = vpop.eup %11131  ;;  %v1550_v50 = vmul.f32 %v11130_v39, %v1548_v49 }
 0xefa   :  { %v1443_v53 = vmul.f32 %v11132_v44, %v1441_v27 }
 0xf5b   :  { %v1553_v41 = vpop.permute.xlu0 %1552 }
 0xf5c   :  { %v1555_v42 = vmul.f32 %v11130_v39, %v1553_v41 }
 0xf5d   :  { %v1446_v47 = vpop.permute.xlu1 %1445 }
 0xf5e   :  { %1557 = vrot.lane.b32.xlu0 %v1555_v42, %s11410_s5  ;;  %v1448_v48 = vmul.f32 %v11132_v44, %v1446_v47 }
 0xf60   :  { %1450 = vrot.lane.b32.xlu1 %v1448_v48, %s11410_s5 }
 0xfd0   :  { %v1558_v51 = vpop.permute.xlu0 %1557 }
 0xfd1   :  { %v1560_v52 = vadd.f32 %v1558_v51, %v1550_v50 }
 0xfd2   :  { %v1451_v26 = vpop.permute.xlu1 %1450 }
 0xfd3   :  { %11133 = vtanh.f32 %v1560_v52  ;;  %v1453_v55 = vadd.f32 %v1451_v26, %v1443_v53  ;;  %v1762_v49 = vrot.slane %v1560_v52, 2 }
 0xfd5   :  { %11135 = vtanh.f32 %v1453_v55  ;;  %v1655_v27 = vrot.slane %v1453_v55, 6 }
 0xfdd   :  { %v11134_v56 = vpop.eup %11133 }
 0xfde   :  { %1563 = vrot.lane.b32.xlu0 %v11134_v56, %s11411_s21 }
 0xfdf   :  { %v11136_v59 = vpop.eup %11135 }
 0xfe0   :  { %1456 = vrot.lane.b32.xlu1 %v11136_v59, %s11411_s21 }
0x1050   :  { %v1564_v63 = vpop.permute.xlu0 %1563 }
0x1051   :  { %v11809_v0 = vmul.f32 %v11130_v39, %v1564_v63 }
0x1052   :  { %v1457_v1 = vpop.permute.xlu1 %1456 }
0x1053   :  { %v1675_v54 = vrot.slane %v11809_v0, 4  ;;  %v11812_v58 = vmul.f32 %v11132_v44, %v1457_v1 }
0x1055   :  { %1676 = vrot.lane.b32.xlu0 %v1675_v54, %s11412_s25  ;;  %v1568_v3 = vrot.slane %v11812_v58, 2 }
0x1057   :  { %1569 = vrot.lane.b32.xlu1 %v1568_v3, %s11412_s25 }
0x10c7   :  { %v11817_v7 = vpop.permute.xlu0 %1676 }
0x10c8   :  { %10149 = vmatmul.mubr.msk.f32.vlgmr.msra.gmra.mrb[14].mxu1 %vm140_vm0, %v11817_v7 }
0x10c9   :  { %10729 = vmatpush3.bf16.msra.mxu1 %v11597_v13  ;;  %10162 = vmatprep.mubr.msk.f32.mxu1 %vm11407_vm1, %v13315_v16  ;;  %v11824_v8 = vpop.permute.xlu1 %1569 }
0x10ca   :  { %10736 = vmatprep.subr.bf16.mxu1 %v13318_v14  ;;  %10142 = vmatmul.mubr.msk.f32.vlgmr.msra.gmra.mrb[14].mxu0 %vm140_vm0, %v11824_v8 }
0x10cb   :  { %10726 = vmatpush3.bf16.msra.mxu0 %v11600_v15  ;;  %10155 = vmatprep.mubr.msk.f32.mxu0 %vm11407_vm1, %v13315_v16 }
0x10cc   :  { %10730 = vmatprep.subr.bf16.mxu0 %v13318_v14 }
0x119b   :  { %v1746_v10 = vpop.f32.mrb[14].mxu1 }
0x119c   :  { %v1751_v12 = vrot.slane %v1746_v10, 6  ;;  %v10150_v13 = vpop.f32.mrb[15].mxu1 }
0x119d   :  { %v1639_v20 = vpop.f32.mrb[14].mxu0  ;;  %v1994_v13 = vld [vmem:[%s11505_s12] sm:$0xff] }
0x119e   :  { %v1753_v19 = vadd.f32 %v1751_v12, %v11625_v21  ;;  %v1644_v22 = vrot.slane %v1639_v20, 4  ;;  %v10143_v24 = vpop.f32.mrb[15].mxu0 }
0x119f   :  { %v1993_v24 = vld [vmem:[%s11500_s6 + $0x8] sm:$0xff] }
0x11a0   :  { %11137 = vtanh.f32 %v1753_v19  ;;  %v1646_v25 = vadd.f32 %v1644_v22, %v11627_v23  ;;  %v9662_v30 = vmul.f32 -1.442695, %v1753_v19  ;;  %v1995_v19 = vld [vmem:[%s11505_s12 + $0x8] sm:$0xff]  ;;  %v1992_v22 = vld [vmem:[%s11500_s6] sm:$0xff]  ;;  %s13345_s6 = sld [smem:[#allocation14_spill]]  ;;  %s13346_s12 = sld [smem:[#allocation15_spill]] }
0x11a1   :  { %v11857_v20 = vpack.c.bf16 %v1995_v19, %v1994_v13 }
0x11a2   :  { %11139 = vtanh.f32 %v1646_v25  ;;  %v9660_v32 = vmul.f32 -1.442695, %v1646_v25 }
0x11a3   :  { %11141 = vpow2.f32 %v9662_v30  ;;  %v1999_v30 = vlaneseq }
0x11a4   :  { %11143 = vpow2.f32 %v9660_v32 }
0x11aa   :  { %v11138_v29 = vpop.eup %11137 }
0x11ab   :  { %1766 = vrot.lane.b32.xlu0 %v11138_v29, %s11409_s0  ;;  %v11865_v29 = vpack.c.bf16 %v1993_v24, %v1992_v22 }
0x11ac   :  { %v11140_v15 = vpop.eup %11139 }
0x11ad   :  { %1659 = vrot.lane.b32.xlu1 %v11140_v15, %s11409_s0  ;;  %v11142_v35 = vpop.eup %11141 }
0x11ae   :  { %v11144_v36 = vpop.eup %11143  ;;  %v1757_v37 = vadd.f32 1.0, %v11142_v35 }
0x11af   :  { %v1650_v38 = vadd.f32 1.0, %v11144_v36 }
0x11b0   :  { %11145 = vrcp.f32 %v1757_v37 }
0x11b1   :  { %11147 = vrcp.f32 %v1650_v38  ;;  %v11920_v38 = vshrl.u32 %v1999_v30, 7 }
0x11ba   :  { %v11146_v39 = vpop.eup %11145 }
0x11bb   :  { %v11148_v44 = vpop.eup %11147  ;;  %v1764_v50 = vmul.f32 %v11146_v39, %v1762_v49 }
0x11bc   :  { %v1657_v26 = vmul.f32 %v11148_v44, %v1655_v27 }
0x121d   :  { %v1767_v41 = vpop.permute.xlu0 %1766 }
0x121e   :  { %v1769_v42 = vmul.f32 %v11146_v39, %v1767_v41 }
0x121f   :  { %v1660_v47 = vpop.permute.xlu1 %1659 }
0x1220   :  { %1771 = vrot.lane.b32.xlu0 %v1769_v42, %s11410_s5  ;;  %v1662_v48 = vmul.f32 %v11148_v44, %v1660_v47 }
0x1222   :  { %1664 = vrot.lane.b32.xlu1 %v1662_v48, %s11410_s5 }
0x1292   :  { %v1772_v51 = vpop.permute.xlu0 %1771 }
0x1293   :  { %v11839_v53 = vadd.f32 %v1772_v51, %v1764_v50 }
0x1294   :  { %v1665_v56 = vpop.permute.xlu1 %1664 }
0x1295   :  { %11149 = vtanh.f32 %v11839_v53  ;;  %v11842_v59 = vadd.f32 %v1665_v56, %v1657_v26 }
0x1297   :  { %11151 = vtanh.f32 %v11842_v59 }
0x129f   :  { %v11150_v63 = vpop.eup %11149 }
0x12a0   :  { %1777 = vrot.lane.b32.xlu0 %v11150_v63, %s11411_s21 }
0x12a1   :  { %v11152_v52 = vpop.eup %11151 }
0x12a2   :  { %1670 = vrot.lane.b32.xlu1 %v11152_v52, %s11411_s21 }
0x1312   :  { %v1778_v55 = vpop.permute.xlu0 %1777 }
0x1313   :  { %v11847_v54 = vmul.f32 %v11146_v39, %v1778_v55 }
0x1314   :  { %v1671_v3 = vpop.permute.xlu1 %1670 }
0x1315   :  { %v1889_v1 = vrot.slane %v11847_v54, 2  ;;  %v11850_v10 = vmul.f32 %v11148_v44, %v1671_v3 }
0x1317   :  { %1890 = vrot.lane.b32.xlu0 %v1889_v1, %s11412_s25  ;;  %v1782_v12 = vrot.slane %v11850_v10, 4 }
0x1319   :  { %1783 = vrot.lane.b32.xlu1 %v1782_v12, %s11412_s25 }
0x1389   :  { %v1891_v25 = vpop.permute.xlu0 %1890 }
0x138a   :  { %10163 = vmatmul.mubr.msk.f32.vlgmr.msra.gmra.mrb[16].mxu1 %vm140_vm0, %v1891_v25 }
0x138b   :  { %10738 = vmatpush3.bf16.msra.mxu1 %v11857_v20  ;;  %10183 = vmatprep.mubr.msk.f32.mxu1 %vm11407_vm1, %v13315_v16  ;;  %v11867_v15 = vpop.permute.xlu1 %1783 }
0x138c   :  { %10739 = vmatprep.subr.bf16.mxu1 %v13318_v14  ;;  %10156 = vmatmul.mubr.msk.f32.vlgmr.msra.gmra.mrb[16].mxu0 %vm140_vm0, %v11867_v15 }
0x138d   :  { %10732 = vmatpush3.bf16.msra.mxu0 %v11857_v20  ;;  %10169 = vmatprep.mubr.msk.f32.mxu0 %vm11407_vm1, %v13315_v16 }
0x138e   :  { %10184 = vmatmul.mubr.msk.f32.vlgmr.msra.gmra.mrb[18].mxu1 %vm140_vm0, %v1891_v25  ;;  %10733 = vmatprep.subr.bf16.mxu0 %v13318_v14 }
0x138f   :  { %10741 = vmatpush3.bf16.msra.mxu1 %v11865_v29  ;;  %10190 = vmatprep.mubr.msk.f32.mxu1 %vm11407_vm1, %v13315_v16 }
0x1390   :  { %10748 = vmatprep.subr.bf16.mxu1 %v13318_v14 }
0x1396   :  { %10191 = vmatmul.mubr.msk.f32.vlgmr.msra.gmra.mrb[18].mxu1 %vm140_vm0, %v11696_v46 }
0x1397   :  { %10750 = vmatpush3.bf16.msra.mxu1 %v11857_v20  ;;  %10211 = vmatprep.mubr.msk.f32.mxu1 %vm11407_vm1, %v13315_v16 }
0x1398   :  { %10751 = vmatprep.subr.bf16.mxu1 %v13318_v14 }
0x139a   :  { %10212 = vmatmul.mubr.msk.f32.vlgmr.msra.gmra.mrb[20].mxu1 %vm140_vm0, %v11785_v5  ;;  %v11413_v5 = vmov 1966171168  }
0x139b   :  { %10753 = vmatpush3.bf16.msra.mxu1 %v11865_v29  ;;  %10218 = vmatprep.mubr.msk.f32.mxu1 %vm11407_vm1, %v13315_v16 }
0x139c   :  { %10760 = vmatprep.subr.bf16.mxu1 %v13318_v14 }
0x13a2   :  { %10219 = vmatmul.mubr.msk.f32.vlgmr.msra.gmra.mrb[20].mxu1 %vm140_vm0, %v11761_v18 }
0x13a3   :  { %10762 = vmatpush3.bf16.msra.mxu1 %v11857_v20  ;;  %10239 = vmatprep.mubr.msk.f32.mxu1 %vm11407_vm1, %v13315_v16 }
0x13a4   :  { %10763 = vmatprep.subr.bf16.mxu1 %v13318_v14 }
0x13a6   :  { %10240 = vmatmul.mubr.msk.f32.vlgmr.msra.gmra.mrb[22].mxu1 %vm140_vm0, %v11721_v33 }
0x13a7   :  { %10765 = vmatpush3.bf16.msra.mxu1 %v11865_v29  ;;  %10246 = vmatprep.mubr.msk.f32.mxu1 %vm11407_vm1, %v13315_v16 }
0x13a8   :  { %10772 = vmatprep.subr.bf16.mxu1 %v13318_v14 }
0x13ae   :  { %10247 = vmatmul.mubr.msk.f32.vlgmr.msra.gmra.mrb[22].mxu1 %vm140_vm0, %v11824_v8  ;;  %v1997_v8 = vunpack.c.l.s4 %v11413_v5 }
0x13af   :  { %10774 = vmatpush3.bf16.msra.mxu1 %v11857_v20  ;;  %10267 = vmatprep.mubr.msk.f32.mxu1 %vm11407_vm1, %v13315_v16 }
0x13b0   :  { %10775 = vmatprep.subr.bf16.mxu1 %v13318_v14  ;;  %v1998_v37 = vunpack.c.0.s8 %v1997_v8 }
0x13b2   :  { %10268 = vmatmul.mubr.msk.f32.vlgmr.msra.gmra.mrb[24].mxu1 %vm140_vm0, %v11655_v61  ;;  %v11923_v39 = vsub.s32 %v1998_v37, %v11920_v38 }
0x13b3   :  { %10777 = vmatpush3.bf16.msra.mxu1 %v11865_v29  ;;  %10274 = vmatprep.mubr.msk.f32.mxu1 %vm11407_vm1, %v13315_v16 }
0x13b4   :  { %10782 = vmatprep.subr.bf16.mxu1 %v13318_v14 }
0x145d   :  { %v1960_v46 = vpop.f32.mrb[16].mxu1 }
0x145e   :  { %v1964_v33 = vadd.f32 %v1960_v46, %v11625_v21  ;;  %v10164_v18 = vpop.f32.mrb[17].mxu1 }
0x145f   :  { %v1853_v32 = vpop.f32.mrb[16].mxu0 }
0x1460   :  { %11153 = vtanh.f32 %v1964_v33  ;;  %v1858_v35 = vrot.slane %v1853_v32, 2  ;;  %v10157_v36 = vpop.f32.mrb[17].mxu0  ;;  %v9666_v19 = vmul.f32 -1.442695, %v1964_v33  ;;  %v1973_v33 = vrot.slane %v11839_v53, 2 }
0x1462   :  { %v1860_v61 = vadd.f32 %v1858_v35, %v11627_v23 }
0x1464   :  { %11155 = vtanh.f32 %v1860_v61  ;;  %v9664_v22 = vmul.f32 -1.442695, %v1860_v61 }
0x1465   :  { %11157 = vpow2.f32 %v9666_v19 }
0x1466   :  { %11159 = vpow2.f32 %v9664_v22  ;;  %v4115_v22 = vld [vmem:[%s11490_s24] sm:$0xff] }
0x1469   :  { %v2463_v41 = vpop.f32.mrb[18].mxu1 }
0x146a   :  { %v11154_v21 = vpop.eup %11153  ;;  %v2474_v42 = vrot.slane %v2463_v41, %v11923_v39  ;;  %v10192_v44 = vpop.f32.mrb[19].mxu1 }
0x146b   :  { %1977 = vrot.lane.b32.xlu0 %v11154_v21, %s11409_s0 }
0x146c   :  { %v2475_v47 = vcombine.high %v2474_v42, %v2474_v42  ;;  %v2482_v48 = vrot.slane %v2474_v42, %v11923_v39  ;;  %v1869_v42 = vrot.slane %v11842_v59, 6 }
0x146e   :  { %v2489_v23 = vrot.slane %v2475_v47, %v11923_v39  ;;  %2492 = vst.msk [vmem:[#allocation3 + $0x1] sm:$0x1] %vm2244_vm2, %v2482_v48  ;;  %v11156_v49 = vpop.eup %11155 }
0x146f   :  { %1873 = vrot.lane.b32.xlu1 %v11156_v49, %s11409_s0  ;;  %v11158_v24 = vpop.eup %11157 }
0x1470   :  { %2493 = vst.msk [vmem:[#allocation3 + $0x9] sm:$0x1] %vm2244_vm2, %v2489_v23  ;;  %v1968_v25 = vadd.f32 1.0, %v11158_v24  ;;  %v11160_v46 = vpop.eup %11159  ;;  %v4116_v24 = vld [vmem:[%s11490_s24 + $0x8] sm:$0xff]  ;;  %s13344_s24 = sld [smem:[#allocation8_spill]] }
0x1471   :  { %v1864_v18 = vadd.f32 1.0, %v11160_v46  ;;  %v11980_v46 = vpack.c.bf16 %v4116_v24, %v4115_v22 }
0x1472   :  { %11161 = vrcp.f32 %v1968_v25 }
0x1473   :  { %11163 = vrcp.f32 %v1864_v18 }
0x1475   :  { %v2957_v50 = vpop.f32.mrb[20].mxu1 }
0x1476   :  { %v2968_v27 = vrot.slane %v2957_v50, %v11923_v39  ;;  %v10220_v51 = vpop.f32.mrb[21].mxu1 }
0x1478   :  { %v2969_v26 = vcombine.high %v2968_v27, %v2968_v27  ;;  %v2976_v56 = vrot.slane %v2968_v27, %v11923_v39 }
0x147a   :  { %v2983_v63 = vrot.slane %v2969_v26, %v11923_v39  ;;  %2986 = vst.msk [vmem:[#allocation3 + $0x3] sm:$0x1] %vm2244_vm2, %v2976_v56 }
0x147c   :  { %2987 = vst.msk [vmem:[#allocation3 + $0xb] sm:$0x1] %vm2244_vm2, %v2983_v63  ;;  %v11162_v5 = vpop.eup %11161 }
0x147d   :  { %v11164_v35 = vpop.eup %11163  ;;  %v1975_v61 = vmul.f32 %v11162_v5, %v1973_v33 }
0x147e   :  { %v1871_v44 = vmul.f32 %v11164_v35, %v1869_v42 }
0x1481   :  { %v3447_v52 = vpop.f32.mrb[22].mxu1 }
0x1482   :  { %v3458_v55 = vrot.slane %v3447_v52, %v11923_v39  ;;  %v10248_v1 = vpop.f32.mrb[23].mxu1 }
0x1484   :  { %v3459_v3 = vcombine.high %v3458_v55, %v3458_v55  ;;  %v3466_v12 = vrot.slane %v3458_v55, %v11923_v39 }
0x1486   :  { %v3473_v13 = vrot.slane %v3459_v3, %v11923_v39  ;;  %3476 = vst.msk [vmem:[#allocation3 + $0x5] sm:$0x1] %vm2244_vm2, %v3466_v12  ;;  %v4110_v12 = vld [vmem:[%s11515_s27] sm:$0xff] }
0x1488   :  { %3477 = vst.msk [vmem:[#allocation3 + $0xd] sm:$0x1] %vm2244_vm2, %v3473_v13  ;;  %v4111_v13 = vld [vmem:[%s11515_s27 + $0x8] sm:$0xff]  ;;  %s13350_s27 = sld [smem:[#allocation16_spill]] }
0x1489   :  { %v11972_v19 = vpack.c.bf16 %v4111_v13, %v4110_v12 }
0x14dd   :  { %v1978_v8 = vpop.permute.xlu0 %1977 }
0x14de   :  { %v1980_v32 = vmul.f32 %v11162_v5, %v1978_v8  ;;  %v4109_v8 = vld [vmem:[%s11510_s20 + $0x8] sm:$0xff] }
0x14e0   :  { %1982 = vrot.lane.b32.xlu0 %v1980_v32, %s11410_s5 }
0x14e1   :  { %v1874_v36 = vpop.permute.xlu1 %1873 }
0x14e2   :  { %v1876_v37 = vmul.f32 %v11164_v35, %v1874_v36 }
0x14e4   :  { %1878 = vrot.lane.b32.xlu1 %v1876_v37, %s11410_s5 }
0x1552   :  { %v1983_v41 = vpop.permute.xlu0 %1982 }
0x1553   :  { %v1985_v21 = vadd.f32 %v1983_v41, %v1975_v61 }
0x1555   :  { %11165 = vtanh.f32 %v1985_v21  ;;  %v3986_v48 = vrot.slane %v1985_v21, 2 }
0x1556   :  { %v1879_v47 = vpop.permute.xlu1 %1878 }
0x1557   :  { %v1881_v23 = vadd.f32 %v1879_v47, %v1871_v44 }
0x1559   :  { %11167 = vtanh.f32 %v1881_v23  ;;  %v11946_v49 = vadd.f32 %v3986_v48, %v1881_v23 }
0x155b   :  { %v4139_v26 = vrot.slane %v11946_v49, 6 }
0x155f   :  { %v11166_v50 = vpop.eup %11165 }
0x1560   :  { %1988 = vrot.lane.b32.xlu0 %v11166_v50, %s11411_s21 }
0x1563   :  { %v11168_v27 = vpop.eup %11167 }
0x1564   :  { %1884 = vrot.lane.b32.xlu1 %v11168_v27, %s11411_s21 }
0x15d2   :  { %v1989_v53 = vpop.permute.xlu0 %1988 }
0x15d3   :  { %v11950_v51 = vmul.f32 %v11162_v5, %v1989_v53  ;;  %v12029_v5 = vld [vmem:[%s11440_s9] sm:$0xff] }
0x15d5   :  { %2075 = vrot.lane.b32.xlu0 %v11950_v51, %s11412_s25  ;;  %v3982_v56 = vrot.slane %v11950_v51, 2 }
0x15d6   :  { %v1885_v59 = vpop.permute.xlu1 %1884 }
0x15d7   :  { %v11956_v63 = vmul.f32 %v11164_v35, %v1885_v59 }
0x15d9   :  { %4140 = vrot.lane.b32.xlu0 %v4139_v26, %s11414_s29  ;;  %v3876_v52 = vrot.slane %v11956_v63, 6  ;;  %v3984_v55 = vadd.f32 %v3982_v56, %v11956_v63 }
0x15db   :  { %3877 = vrot.lane.b32.xlu1 %v3876_v52, %s11412_s25  ;;  %v4215_v1 = vrot.slane %v3984_v55, 6 }
0x15df   :  { %4216 = vrot.lane.b32.xlu1 %v4215_v1, %s11412_s25 }
0x1647   :  { %v2076_v3 = vpop.permute.xlu0 %2075 }
0x1648   :  { %10170 = vmatmul.mubr.msk.f32.vlgmr.msra.gmra.mrb[18].mxu0 %vm140_vm0, %v2076_v3 }
0x1649   :  { %10735 = vmatpush3.bf16.msra.mxu0 %v11865_v29  ;;  %10176 = vmatprep.mubr.msk.f32.mxu0 %vm11407_vm1, %v13315_v16 }
0x164a   :  { %10742 = vmatprep.subr.bf16.mxu0 %v13318_v14 }
0x164b   :  { %v4141_v18 = vpop.permute.xlu0 %4140 }
0x164d   :  { %v3878_v25 = vpop.permute.xlu1 %3877 }
0x164e   :  { %10275 = vmatmul.mubr.msk.f32.vlgmr.msra.gmra.mrb[24].mxu1 %vm140_vm0, %v3878_v25 }
0x164f   :  { %10784 = vmatpush3.bf16.msra.mxu1 %v11972_v19  ;;  %10288 = vmatprep.mubr.msk.f32.mxu1 %vm11407_vm1, %v13315_v16 }
0x1650   :  { %10177 = vmatmul.mubr.msk.f32.vlgmr.msra.gmra.mrb[18].mxu0 %vm140_vm0, %v11659_v62  ;;  %10788 = vmatprep.subr.bf16.mxu1 %v13318_v14 }
0x1651   :  { %10744 = vmatpush3.bf16.msra.mxu0 %v11857_v20  ;;  %10197 = vmatprep.mubr.msk.f32.mxu0 %vm11407_vm1, %v13315_v16  ;;  %v4217_v62 = vpop.permute.xlu1 %4216 }
0x1652   :  { %10289 = vmatmul.mubr.msk.f32.vlgmr.msra.gmra.mrb[26].mxu1 %vm140_vm0, %v4141_v18  ;;  %10745 = vmatprep.subr.bf16.mxu0 %v13318_v14 }
0x1653   :  { %10790 = vmatpush3.bf16.msra.mxu1 %v11980_v46  ;;  %10302 = vmatprep.mubr.msk.f32.mxu1 %vm11407_vm1, %v13315_v16 }
0x1654   :  { %10198 = vmatmul.mubr.msk.f32.vlgmr.msra.gmra.mrb[20].mxu0 %vm140_vm0, %v11817_v7  ;;  %10797 = vmatprep.subr.bf16.mxu1 %v13318_v14  ;;  %v3992_v7 = vld [vmem:[%s11485_s19 + $0x8] sm:$0xff] }
0x1655   :  { %10747 = vmatpush3.bf16.msra.mxu0 %v11865_v29  ;;  %10204 = vmatprep.mubr.msk.f32.mxu0 %vm11407_vm1, %v13315_v16 }
0x1656   :  { %10754 = vmatprep.subr.bf16.mxu0 %v13318_v14  ;;  %10303 = vmatmul.mubr.msk.f32.vlgmr.msra.gmra.mrb[28].mxu1 %vm140_vm0, %v4217_v62 }
0x1657   :  { %10320 = vmatprep.mubr.msk.f32.mxu1 %vm11407_vm1, %v13315_v16 }
0x165c   :  { %10205 = vmatmul.mubr.msk.f32.vlgmr.msra.gmra.mrb[20].mxu0 %vm140_vm0, %v11728_v34  ;;  %v3991_v34 = vld [vmem:[%s11485_s19] sm:$0xff]  ;;  %s13343_s19 = sld [smem:[#allocation13_spill]] }
0x165d   :  { %10756 = vmatpush3.bf16.msra.mxu0 %v11857_v20  ;;  %10225 = vmatprep.mubr.msk.f32.mxu0 %vm11407_vm1, %v13315_v16 }
0x165e   :  { %10757 = vmatprep.subr.bf16.mxu0 %v13318_v14 }
0x1660   :  { %10226 = vmatmul.mubr.msk.f32.vlgmr.msra.gmra.mrb[22].mxu0 %vm140_vm0, %v11753_v17  ;;  %v10778_v17 = vpack.c.bf16 %v3992_v7, %v3991_v34  ;;  %v12073_v34 = vld [vmem:[%s13340_s3] ss:$0 sm:$0xff] }
0x1661   :  { %10759 = vmatpush3.bf16.msra.mxu0 %v11865_v29  ;;  %10232 = vmatprep.mubr.msk.f32.mxu0 %vm11407_vm1, %v13315_v16 }
0x1662   :  { %10766 = vmatprep.subr.bf16.mxu0 %v13318_v14 }
0x1668   :  { %10233 = vmatmul.mubr.msk.f32.vlgmr.msra.gmra.mrb[22].mxu0 %vm140_vm0, %v11792_v6  ;;  %v4108_v6 = vld [vmem:[%s11510_s20] sm:$0xff]  ;;  %s13347_s20 = sld [smem:[#allocation20_spill]] }
0x1669   :  { %10768 = vmatpush3.bf16.msra.mxu0 %v11857_v20  ;;  %10253 = vmatprep.mubr.msk.f32.mxu0 %vm11407_vm1, %v13315_v16  ;;  %v3990_v20 = vld [vmem:[%s11440_s9 + $0x8] sm:$0x3]  ;;  %v12038_v32 = vpack.c.bf16 %v4109_v8, %v4108_v6 }
0x166a   :  { %10769 = vmatprep.subr.bf16.mxu0 %v13318_v14 }
0x166c   :  { %10254 = vmatmul.mubr.msk.f32.vlgmr.msra.gmra.mrb[24].mxu0 %vm140_vm0, %v11689_v45 }
0x166d   :  { %10771 = vmatpush3.bf16.msra.mxu0 %v11865_v29  ;;  %10260 = vmatprep.mubr.msk.f32.mxu0 %vm11407_vm1, %v13315_v16 }
0x166e   :  { %10779 = vmatprep.subr.bf16.mxu0 %v10778_v17 }
0x1674   :  { %10261 = vmatmul.mubr.msk.f32.vlgmr.msra.gmra.mrb[24].mxu0 %vm140_vm0, %v11867_v15 }
0x1675   :  { %10781 = vmatpush3.bf16.msra.mxu0 %v10778_v17  ;;  %10281 = vmatprep.mubr.msk.f32.mxu0 %vm140_vm0, %v12029_v5 }
0x1676   :  { %10785 = vmatprep.subr.bf16.mxu0 %v13318_v14 }
0x1678   :  { %10282 = vmatmul.mubr.msk.f32.vlgmr.msra.gmra.mrb[26].mxu0 %vm140_vm0, %v3990_v20 }
0x1679   :  { %10787 = vmatpush3.bf16.msra.mxu0 %v12038_v32  ;;  %10295 = vmatprep.mubr.msk.f32.mxu0 %vm11407_vm1, %v13315_v16 }
0x167a   :  { %10791 = vmatprep.subr.bf16.mxu0 %v13318_v14 }
0x167c   :  { %10296 = vmatmul.mubr.msk.f32.vlgmr.msra.gmra.mrb[28].mxu0 %vm140_vm0, %v4217_v62 }
0x167d   :  { %10313 = vmatprep.mubr.msk.f32.mxu0 %vm11407_vm1, %v13315_v16 }
0x1721   :  { %v3947_v45 = vpop.f32.mrb[24].mxu1 }
0x1722   :  { %v3958_v29 = vrot.slane %v3947_v45, %v11923_v39  ;;  %v10276_v15 = vpop.f32.mrb[25].mxu1 }
0x1723   :  { %v2215_v35 = vpop.f32.mrb[18].mxu0 }
0x1724   :  { %v2226_v36 = vrot.slane %v2215_v35, %v11923_v39  ;;  %v10178_v37 = vpop.f32.mrb[19].mxu0  ;;  %v3959_v33 = vcombine.high %v3958_v29, %v3958_v29  ;;  %v3966_v61 = vrot.slane %v3958_v29, %v11923_v39  ;;  %v12083_v29 = vld [vmem:[%s13341_s8] ss:$0 sm:$0xff] }
0x1725   :  { %v4210_v42 = vpop.f32.mrb[26].mxu1 }
0x1726   :  { %v2227_v41 = vcombine.high %v2226_v36, %v2226_v36  ;;  %v2234_v21 = vrot.slane %v2226_v36, %v11923_v39  ;;  %v3973_v44 = vrot.slane %v3959_v33, %v11923_v39  ;;  %3976 = vst.msk [vmem:[#allocation3 + $0x7] sm:$0x1] %vm2244_vm2, %v3966_v61  ;;  %v10290_v47 = vpop.f32.mrb[27].mxu1  ;;  %v12088_v61 = vld [vmem:[%s13342_s14] ss:$0 sm:$0xff] }
0x1728   :  { %v2241_v48 = vrot.slane %v2227_v41, %v11923_v39  ;;  %2245 = vst.msk [vmem:[#allocation3] sm:$0x1] %vm2244_vm2, %v2234_v21  ;;  %3977 = vst.msk [vmem:[#allocation3 + $0xf] sm:$0x1] %vm2244_vm2, %v3973_v44  ;;  %v12091_v41 = vsub.s32 0, %v11920_v38 }
0x1729   :  { %v12059_v23 = vpop.f32.mrb[28].mxu1 }
0x172a   :  { %2246 = vst.msk [vmem:[#allocation3 + $0x8] sm:$0x1] %vm2244_vm2, %v2241_v48  ;;  %v10304_v50 = vpop.f32.mrb[29].mxu1 }
0x172f   :  { %v2708_v27 = vpop.f32.mrb[20].mxu0 }
0x1730   :  { %v2719_v53 = vrot.slane %v2708_v27, %v11923_v39  ;;  %v10206_v59 = vpop.f32.mrb[21].mxu0 }
0x1732   :  { %v2720_v56 = vcombine.high %v2719_v53, %v2719_v53  ;;  %v2727_v52 = vrot.slane %v2719_v53, %v11923_v39 }
0x1734   :  { %v2734_v55 = vrot.slane %v2720_v56, %v11923_v39  ;;  %2737 = vst.msk [vmem:[#allocation3 + $0x2] sm:$0x1] %vm2244_vm2, %v2727_v52 }
0x1736   :  { %2738 = vst.msk [vmem:[#allocation3 + $0xa] sm:$0x1] %vm2244_vm2, %v2734_v55 }
0x173b   :  { %v3200_v1 = vpop.f32.mrb[22].mxu0 }
0x173c   :  { %v3211_v3 = vrot.slane %v3200_v1, %v11923_v39  ;;  %v10234_v12 = vpop.f32.mrb[23].mxu0  ;;  %v12105_v1 = vld [vmem:[%s13343_s19] ss:$0 sm:$0xff] }
0x173e   :  { %v3212_v13 = vcombine.high %v3211_v3, %v3211_v3  ;;  %v3219_v22 = vrot.slane %v3211_v3, %v11923_v39 }
0x1740   :  { %v3226_v24 = vrot.slane %v3212_v13, %v11923_v39  ;;  %3229 = vst.msk [vmem:[#allocation3 + $0x4] sm:$0x1] %vm2244_vm2, %v3219_v22 }
0x1742   :  { %3230 = vst.msk [vmem:[#allocation3 + $0xc] sm:$0x1] %vm2244_vm2, %v3226_v24 }
0x1747   :  { %v3692_v25 = vpop.f32.mrb[24].mxu0 }
0x1748   :  { %v3703_v18 = vrot.slane %v3692_v25, %v11923_v39  ;;  %v10262_v62 = vpop.f32.mrb[25].mxu0 }
0x174a   :  { %v3704_v7 = vcombine.high %v3703_v18, %v3703_v18  ;;  %v3711_v17 = vrot.slane %v3703_v18, %v11923_v39  ;;  %v12112_v18 = vand.u32 127, %v1999_v30  ;;  %v13310_v30 = vmov 0  }
0x174b   :  { %v10283_v6 = vpop.f32.mrb[26].mxu0  ;;  %11030 = vset.pattern.permute.xlu1 %v13310_v30  ;;  %11029 = vset.pattern.permute.xlu0 %v13310_v30 }
0x174c   :  { %v3718_v8 = vrot.slane %v3704_v7, %v11923_v39  ;;  %3721 = vst.msk [vmem:[#allocation3 + $0x6] sm:$0x1] %vm2244_vm2, %v3711_v17  ;;  %v12079_v20 = vadd.f32 %v10283_v6, %v12073_v34  ;;  %v4072_v45 = vpop.f32.mrb[27].mxu0  ;;  %v12116_v62 = vsub.s32 %v12112_v18, %v11920_v38 }
0x174e   :  { %3722 = vst.msk [vmem:[#allocation3 + $0xe] sm:$0x1] %vm2244_vm2, %v3718_v8 }
0x174f   :  { %v4286_v15 = vpop.f32.mrb[28].mxu0 }
0x1750   :  { %v4287_v35 = vadd.f32 %v4286_v15, %v4210_v42  ;;  %v10297_v36 = vpop.f32.mrb[29].mxu0  ;;  %v4338_v42 = vmul.f32 0.0, %v12088_v61 }
0x1751   :  { %v12125_v36 = vsub.s32 1, %v11920_v38 }
0x1752   :  { %v4296_v37 = vadd.f32 %v12083_v29, %v4287_v35 }
0x1753   :  { %v12097_v50 = vld [vmem:[#allocation3] sm:$0xff] }
0x1754   :  { %v4304_v33 = vrot.slane %v4296_v37, %v11923_v39 }
0x1755   :  { %v12101_v59 = vld [vmem:[#allocation3 + $0x8] sm:$0xff] }
0x1756   :  { %v4305_v21 = vcombine.high %v4304_v33, %v4304_v33  ;;  %v4312_v44 = vrot.slane %v4304_v33, %v11923_v39 }
0x1758   :  { %v4319_v47 = vrot.slane %v4305_v21, %v11923_v39  ;;  %v4323_v48 = vrot.slane %v4312_v44, %v12091_v41 }
0x175a   :  { %v4327_v27 = vrot.slane %v4319_v47, %v12091_v41  ;;  %v4330_v53 = vadd.f32 %v4323_v48, %v12097_v50 }
0x175c   :  { %v4331_v56 = vadd.f32 %v4327_v27, %v12101_v59  ;;  %v4339_v52 = vadd.f32 %v4338_v42, %v4330_v53  ;;  %v4081_v27 = vld [vmem:[%s13344_s24] sm:$0x3]  ;;  %v12131_v53 = vadd.f32 %v12073_v34, %v4072_v45 }
0x175d   :  { %vm4083_vm6 = vcmp.ne.s32.totalorder %v4081_v27, 0 }
0x175e   :  { %11169 = vtanh.f32 %v4339_v52  ;;  %v4340_v55 = vadd.f32 %v4338_v42, %v4331_v56  ;;  %v4605_v38 = vadd.f32 %v12059_v23, %v12131_v53  ;;  %v9686_v56 = vsel %vm4083_vm6, 1.0, %v13315_v16 }
0x175f   :  { %vm9585_vm6 = vcmask 0  }
0x1760   :  { %11171 = vtanh.f32 %v4340_v55 }
0x1768   :  { %v11170_v3 = vpop.eup %11169 }
0x1769   :  { %v4349_v12 = vmul.f32 %v11170_v3, %v12105_v1  ;;  %v4432_v3 = vrot.slane %v9686_v56, %v12091_v41 }
0x176a   :  { %v11172_v13 = vpop.eup %11171 }
0x176b   :  { %v4352_v22 = vsel %vm4351_vm3, %v4349_v12, 0.0  ;;  %v4350_v24 = vmul.f32 %v11172_v13, %v12105_v1  ;;  %v4439_v12 = vrot.slane %v9686_v56, %v12125_v36 }
0x176c   :  { %4353 = vadd.xlane.f32.xlu0 %v4352_v22 }
0x176d   :  { %v4355_v25 = vsel %vm4351_vm3, %v4350_v24, 0.0 }
0x176e   :  { %4356 = vadd.xlane.f32.xlu1 %v4355_v25 }
0x17f9   :  { %v4354_v7 = vpop.xlane.xlu0 %4353 }
0x17fa   :  { %v4363_v6 = vrot.slane %v4354_v7, %v12116_v62 }
0x17fb   :  { %v4357_v17 = vpop.xlane.xlu1 %4356 }
0x17fc   :  { %v4367_v8 = vrot.slane %v4357_v17, %v12116_v62 }
0x17fe   :  { %v4369_v15 = vsel %vm4368_vm4, %v4367_v8, %v4363_v6 }
0x17ff   :  { %v4372_v35 = vsel %vm4371_vm5, %v4369_v15, -inf }
0x1800   :  { %4373 = vmax.xlane.f32.xlu0 %v4372_v35 }
0x188d   :  { %v4374_v37 = vpop.xlane.xlu0 %4373 }
0x188e   :  { %v4379_v33 = vrot.slane %v4374_v37, %v12091_v41  ;;  %v4383_v21 = vrot.slane %v4374_v37, %v12125_v36 }
0x1890   :  { %v4386_v44 = vsub.f32 %v4354_v7, %v4379_v33  ;;  %v4387_v47 = vsub.f32 %v4357_v17, %v4383_v21  ;;  %v9695_v7 = vmul.f32 -1.442695, %v4605_v38 }
0x1892   :  { %v4388_v48 = vmul.f32 1.442695, %v4386_v44  ;;  %v4390_v42 = vmul.f32 1.442695, %v4387_v47 }
0x1894   :  { %11173 = vpow2.f32 %v4388_v48 }
0x1895   :  { %11175 = vpow2.f32 %v4390_v42 }
0x1896   :  { %11177 = vtanh.f32 %v4605_v38 }
0x1897   :  { %11179 = vpow2.f32 %v9695_v7  ;;  %v2002_v7 = vrot.slane %v11650_v60, %v11923_v39 }
0x189e   :  { %v11174_v52 = vpop.eup %11173 }
0x189f   :  { %v11176_v55 = vpop.eup %11175  ;;  %4395 = vperm.xlu0 %11029, %v11174_v52  }
0x18a0   :  { %4398 = vperm.xlu1 %11030, %v11176_v55   ;;  %v11178_v13 = vpop.eup %11177 }
0x18a1   :  { %v11180_v15 = vpop.eup %11179 }
0x18a2   :  { %v4609_v35 = vadd.f32 1.0, %v11180_v15 }
0x18a3   :  { %4434 = vbcast.lane.b32.xlu0 %v4432_v3, 256 }
0x18a7   :  { %4441 = vbcast.lane.b32.xlu0 %v4439_v12, 256 }
0x18ab   :  { %4616 = vrot.lane.b32.xlu0 %v11178_v13, %s11409_s0 }
0x191e   :  { %v4396_v34 = vpop.permute.xlu0 %4395 }
0x191f   :  { %v4399_v45 = vpop.permute.xlu1 %4398  ;;  %v4403_v23 = vrot.slane %v4396_v34, %v12116_v62 }
0x1920   :  { %v4407_v22 = vrot.slane %v4399_v45, %v12116_v62 }
0x1922   :  { %v4408_v24 = vsel %vm4368_vm4, %v4407_v22, %v4403_v23  ;;  %v12145_v37 = vpop.permute.xlu0 %4434 }
0x1923   :  { %v4410_v25 = vsel %vm4371_vm5, %v4408_v24, 0.0 }
0x1924   :  { %4411 = vadd.xlane.f32.xlu1 %v4410_v25  ;;  %v2494_v25 = vcombine.high %v11716_v31, %v11716_v31 }
0x1926   :  { %v12147_v33 = vpop.permute.xlu0 %4441  ;;  %v2501_v49 = vrot.slane %v2494_v25, %v11923_v39 }
0x1928   :  { %v2502_v15 = vcombine.high %v2501_v49, %v2501_v49 }
0x192a   :  { %v4617_v38 = vpop.permute.xlu0 %4616 }
0x19b1   :  { %v4412_v17 = vpop.xlane.xlu1 %4411 }
0x19b2   :  { %v4417_v6 = vrot.slane %v4412_v17, %v12091_v41  ;;  %v4421_v8 = vrot.slane %v4412_v17, %v12125_v36  ;;  %v2003_v17 = vcombine.high %v2002_v7, %v2002_v7 }
0x19b4   :  { %11181 = vrcp.f32 %v4417_v6  ;;  %v2010_v6 = vrot.slane %v2002_v7, %v11923_v39 }
0x19b5   :  { %11183 = vrcp.f32 %v4421_v8 }
0x19b6   :  { %11185 = vrcp.f32 %v4609_v35  ;;  %v3478_v35 = vcombine.high %v11850_v10, %v11850_v10  ;;  %v2516_v10 = vrot.slane %v2502_v15, %v11923_v39 }
0x19be   :  { %v11182_v21 = vpop.eup %11181 }
0x19bf   :  { %v11184_v44 = vpop.eup %11183  ;;  %v4425_v47 = vmul.f32 %v11182_v21, %v11174_v52  ;;  %v3724_v21 = vcombine.high %v11956_v63, %v11956_v63 }
0x19c0   :  { %v4427_v48 = vmul.f32 %v11184_v44, %v11176_v55  ;;  %v12157_v56 = vpop.eup %11185  ;;  %v2021_v44 = vrot.slane %v2010_v6, %v12091_v41  ;;  %v2780_v6 = vcombine.high %v11777_v2, %v11777_v2 }
0x19c1   :  { %v12150_v42 = vmul.f32 %v12145_v37, %v4425_v47  ;;  %v4619_v3 = vmul.f32 %v12157_v56, %v4617_v38  ;;  %v4614_v34 = vmul.f32 %v12157_v56, %v4139_v26  ;;  %v2253_v26 = vrot.slane %v11684_v43, %v11923_v39 }
0x19c2   :  { %v12153_v27 = vmul.f32 %v12147_v33, %v4427_v48  ;;  %v2017_v43 = vrot.slane %v2003_v17, %v11923_v39  ;;  %v12188_v47 = vrot.slane %v3478_v35, %v11923_v39  ;;  %v12191_v48 = vrot.slane %v3724_v21, %v11923_v39 }
0x19c3   :  { %4450 = vperm.xlu1 %11030, %v12150_v42   ;;  %v2254_v31 = vcombine.high %v2253_v26, %v2253_v26  ;;  %v2261_v60 = vrot.slane %v2253_v26, %v11923_v39  ;;  %v2739_v38 = vcombine.high %v11749_v11, %v11749_v11 }
0x19c4   :  { %4453 = vperm.xlu0 %11029, %v12153_v27  }
0x19c5   :  { %v2268_v63 = vrot.slane %v2254_v31, %v11923_v39 }
0x19c8   :  { %4621 = vrot.lane.b32.xlu0 %v4619_v3, %s11410_s5  ;;  %v2025_v3 = vrot.slane %v2017_v43, %v12091_v41 }
0x1a42   :  { %v4451_v12 = vpop.permute.xlu1 %4450 }
0x1a43   :  { %v4458_v52 = vrot.slane %v4451_v12, %v12116_v62  ;;  %v4454_v55 = vpop.permute.xlu0 %4453  ;;  %v2269_v12 = vcombine.high %v2261_v60, %v2261_v60  ;;  %v12236_v60 = vrot.slane %v2780_v6, %v11923_v39 }
0x1a44   :  { %v4462_v13 = vrot.slane %v4454_v55, %v12116_v62  ;;  %v3493_v55 = vrot.slane %v12188_v47, %v11923_v39 }
0x1a45   :  { %v2274_v11 = vrot.slane %v2269_v12, %v12091_v41 }
0x1a46   :  { %v4463_v45 = vsel %vm4368_vm4, %v4462_v13, %v4458_v52  ;;  %v2524_v52 = vrot.slane %v2516_v10, %v12091_v41  ;;  %v3739_v13 = vrot.slane %v12191_v48, %v11923_v39  ;;  %v3504_v25 = vrot.slane %v3493_v55, %v12091_v41 }
0x1a47   :  { %v4622_v23 = vpop.permute.xlu0 %4621  ;;  %v4465_v22 = vsel %vm4371_vm5, %v4463_v45, 0.0  ;;  %v2746_v45 = vrot.slane %v2739_v38, %v11923_v39  ;;  %v2994_v10 = vrot.slane %v11781_v4, %v11923_v39  ;;  %v3237_v4 = vrot.slane %v11812_v58, %v11923_v39 }
0x1a48   :  { %v12168_v24 = vadd.f32 %v4622_v23, %v4614_v34  ;;  %4466 = vadd.xlane.f32.xlu0 %v4465_v22  ;;  %v2270_v34 = vcombine.high %v2268_v63, %v2268_v63  ;;  %v12210_v23 = vrot.slane %v11847_v54, %v11923_v39  ;;  %v12214_v22 = vrot.slane %v11950_v51, %v11923_v39 }
0x1a49   :  { %v3747_v7 = vcombine.high %v3739_v13, %v3739_v13  ;;  %v2747_v17 = vcombine.high %v2746_v45, %v2746_v45  ;;  %v2509_v54 = vrot.slane %v2501_v49, %v11923_v39  ;;  %v2533_v51 = vcombine.high %v11809_v0, %v11809_v0 }
0x1a4a   :  { %11187 = vtanh.f32 %v12168_v24  ;;  %v2278_v26 = vrot.slane %v2270_v34, %v12091_v41  ;;  %v2301_v15 = vrot.slane %v12210_v23, %v11923_v39  ;;  %v2050_v21 = vrot.slane %v12214_v22, %v11923_v39 }
0x1a4b   :  { %v3752_v35 = vrot.slane %v3747_v7, %v12091_v41  ;;  %v2520_v2 = vrot.slane %v2509_v54, %v12091_v41  ;;  %v2761_v31 = vrot.slane %v2747_v17, %v11923_v39  ;;  %v12239_v0 = vrot.slane %v2533_v51, %v11923_v39 }
0x1a4c   :  { %v2309_v43 = vcombine.high %v2301_v15, %v2301_v15  ;;  %v2995_v55 = vcombine.high %v2994_v10, %v2994_v10  ;;  %v3002_v13 = vrot.slane %v2994_v10, %v11923_v39  ;;  %v3238_v58 = vcombine.high %v3237_v4, %v3237_v4 }
0x1a4d   :  { %v2763_v38 = vcombine.high %v2761_v31, %v2761_v31  ;;  %v2548_v12 = vrot.slane %v12239_v0, %v11923_v39  ;;  %v3245_v17 = vrot.slane %v3237_v4, %v11923_v39  ;;  %v3486_v31 = vcombine.high %v12188_v47, %v12188_v47 }
0x1a4e   :  { %v3009_v6 = vrot.slane %v2995_v55, %v11923_v39  ;;  %v2043_v4 = vcombine.high %v12214_v22, %v12214_v22  ;;  %v2541_v22 = vcombine.high %v12239_v0, %v12239_v0 }
0x1a4f   :  { %v2771_v34 = vrot.slane %v2763_v38, %v12091_v41  ;;  %v3253_v15 = vcombine.high %v3245_v17, %v3245_v17  ;;  %v3500_v47 = vrot.slane %v3486_v31, %v11923_v39 }
0x1a50   :  { %v3017_v51 = vrot.slane %v3009_v6, %v12091_v41  ;;  %v2057_v17 = vrot.slane %v2043_v4, %v11923_v39 }
0x1a52   :  { %v2065_v6 = vrot.slane %v2057_v17, %v12091_v41 }
0x1a54   :  { %v11188_v8 = vpop.eup %11187 }
0x1a55   :  { %4627 = vrot.lane.b32.xlu1 %v11188_v8, %s11411_s21  ;;  %v2754_v8 = vrot.slane %v2746_v45, %v11923_v39  ;;  %v12260_v45 = vrot.slane %v11713_v28, %v11923_v39  ;;  %v3013_v28 = vrot.slane %v3002_v13, %v12091_v41  ;;  %v2294_v13 = vcombine.high %v12210_v23, %v12210_v23 }
0x1a56   :  { %v2788_v23 = vcombine.high %v12236_v60, %v12236_v60 }
0x1a57   :  { %v2762_v49 = vcombine.high %v2754_v8, %v2754_v8  ;;  %v3285_v54 = vrot.slane %v12260_v45, %v11923_v39 }
0x1a59   :  { %2026 = vrot.lane.b32.xlu1 %v2021_v44, %s11412_s25  ;;  %v2061_v44 = vrot.slane %v2050_v21, %v12091_v41  ;;  %v2767_v63 = vrot.slane %v2762_v49, %v12091_v41 }
0x1a5d   :  { %2028 = vrot.lane.b32.xlu1 %v2025_v3, %s11412_s25  ;;  %v2314_v3 = vrot.slane %v2309_v43, %v12091_v41  ;;  %v3258_v43 = vrot.slane %v3253_v15, %v12091_v41 }
0x1a5e   :  { %2527 = vrot.lane.b32.xlu0 %v2524_v52, %s11412_s25  ;;  %v2795_v52 = vrot.slane %v12236_v60, %v11923_v39 }
0x1a60   :  { %v2803_v7 = vcombine.high %v2795_v52, %v2795_v52 }
0x1a61   :  { %2279 = vrot.lane.b32.xlu1 %v2274_v11, %s11412_s25  ;;  %v12264_v11 = vrot.slane %v11745_v9, %v11923_v39  ;;  %v3517_v9 = vcombine.high %v11681_v40, %v11681_v40 }
0x1a62   :  { %3509 = vrot.lane.b32.xlu0 %v3504_v25, %s11412_s25  ;;  %v2559_v25 = vrot.slane %v2548_v12, %v12091_v41 }
0x1a63   :  { %v3040_v8 = vrot.slane %v12264_v11, %v11923_v39  ;;  %v3524_v40 = vrot.slane %v3517_v9, %v11923_v39  ;;  %v2802_v9 = vrot.slane %v2788_v23, %v11923_v39  ;;  %v3033_v60 = vcombine.high %v12264_v11, %v12264_v11 }
0x1a65   :  { %2281 = vrot.lane.b32.xlu1 %v2278_v26, %s11412_s25  ;;  %v3765_v26 = vcombine.high %v11647_v57, %v11647_v57  ;;  %v2808_v57 = vrot.slane %v2803_v7, %v12091_v41  ;;  %v3051_v49 = vrot.slane %v3040_v8, %v12091_v41  ;;  %v3532_v38 = vrot.slane %v3524_v40, %v11923_v39 }
0x1a66   :  { %3757 = vrot.lane.b32.xlu0 %v3752_v35, %s11412_s25  ;;  %v3252_v35 = vrot.slane %v3238_v58, %v11923_v39  ;;  %v2555_v8 = vrot.slane %v2541_v22, %v11923_v39  ;;  %v3525_v31 = vcombine.high %v3524_v40, %v3524_v40 }
0x1a67   :  { %v3772_v21 = vrot.slane %v3765_v26, %v11923_v39  ;;  %v3543_v55 = vrot.slane %v3532_v38, %v12091_v41  ;;  %v2308_v26 = vrot.slane %v2294_v13, %v11923_v39 }
0x1a68   :  { %v3254_v10 = vcombine.high %v3252_v35, %v3252_v35  ;;  %v2563_v0 = vrot.slane %v2555_v8, %v12091_v41  ;;  %v3047_v35 = vrot.slane %v3033_v60, %v11923_v39  ;;  %v4118_v8 = vld [vmem:[%s13345_s6 + $0x8] sm:$0xff] }
0x1a69   :  { %2525 = vrot.lane.b32.xlu1 %v2520_v2, %s11412_s25  ;;  %v3293_v2 = vcombine.high %v3285_v54, %v3285_v54 }
0x1a6a   :  { %2066 = vrot.lane.b32.xlu0 %v2061_v44, %s11409_s0  ;;  %v3732_v44 = vcombine.high %v12191_v48, %v12191_v48  ;;  %v3262_v12 = vrot.slane %v3254_v10, %v12091_v41  ;;  %v3539_v10 = vrot.slane %v3525_v31, %v11923_v39  ;;  %v4121_v31 = vld [vmem:[%s13346_s12 + $0x10] sm:$0xff] }
0x1a6c   :  { %v3746_v52 = vrot.slane %v3732_v44, %v11923_v39 }
0x1a6d   :  { %2772 = vrot.lane.b32.xlu1 %v2767_v63, %s11412_s25  ;;  %v3780_v63 = vrot.slane %v3772_v21, %v11923_v39 }
0x1a6e   :  { %2319 = vrot.lane.b32.xlu0 %v2314_v3, %s11409_s0  ;;  %v3298_v3 = vrot.slane %v3293_v2, %v12091_v41 }
0x1a6f   :  { %v3788_v48 = vcombine.high %v3780_v63, %v3780_v63  ;;  %v3547_v63 = vrot.slane %v3539_v10, %v12091_v41 }
0x1a71   :  { %2774 = vrot.lane.b32.xlu1 %v2771_v34, %s11412_s25  ;;  %v3508_v34 = vrot.slane %v3500_v47, %v12091_v41  ;;  %v3793_v7 = vrot.slane %v3788_v48, %v12091_v41 }
0x1a72   :  { %2564 = vrot.lane.b32.xlu0 %v2559_v25, %s11409_s0  ;;  %v3748_v25 = vcombine.high %v3746_v52, %v3746_v52 }
0x1a74   :  { %v3756_v58 = vrot.slane %v3748_v25, %v12091_v41 }
0x1a75   :  { %3018 = vrot.lane.b32.xlu1 %v3013_v28, %s11412_s25  ;;  %v2310_v28 = vcombine.high %v2308_v26, %v2308_v26 }
0x1a76   :  { %2813 = vrot.lane.b32.xlu0 %v2808_v57, %s11409_s0  ;;  %v3278_v57 = vcombine.high %v12260_v45, %v12260_v45  ;;  %v3055_v45 = vrot.slane %v3047_v35, %v12091_v41 }
0x1a77   :  { %v2318_v54 = vrot.slane %v2310_v28, %v12091_v41 }
0x1a78   :  { %v3292_v15 = vrot.slane %v3278_v57, %v11923_v39 }
0x1a79   :  { %3020 = vrot.lane.b32.xlu1 %v3017_v51, %s11412_s25  ;;  %v2804_v51 = vcombine.high %v2802_v9, %v2802_v9 }
0x1a7a   :  { %3056 = vrot.lane.b32.xlu0 %v3051_v49, %s11409_s0  ;;  %v3773_v49 = vcombine.high %v3772_v21, %v3772_v21  ;;  %v3294_v44 = vcombine.high %v3292_v15, %v3292_v15  ;;  %v4120_v15 = vld [vmem:[%s13346_s12 + $0x8] sm:$0xff] }
0x1a7b   :  { %v2812_v2 = vrot.slane %v2804_v51, %v12091_v41 }
0x1a7c   :  { %v3787_v11 = vrot.slane %v3773_v49, %v11923_v39 }
0x1a7d   :  { %3263 = vrot.lane.b32.xlu1 %v3258_v43, %s11412_s25  ;;  %v3302_v43 = vrot.slane %v3294_v44, %v12091_v41  ;;  %v4122_v44 = vld [vmem:[%s13346_s12 + $0x18] sm:$0xff] }
0x1a7e   :  { %3303 = vrot.lane.b32.xlu0 %v3298_v3, %s11409_s0  ;;  %v3789_v38 = vcombine.high %v3787_v11, %v3787_v11  ;;  %v12395_v11 = vpack.c.bf16 %v4122_v44, %v4121_v31 }
0x1a80   :  { %v3797_v21 = vrot.slane %v3789_v38, %v12091_v41 }
0x1a81   :  { %3265 = vrot.lane.b32.xlu1 %v3262_v12, %s11412_s25 }
0x1a82   :  { %3548 = vrot.lane.b32.xlu0 %v3543_v55, %s11409_s0 }
0x1a85   :  { %3511 = vrot.lane.b32.xlu1 %v3508_v34, %s11412_s25 }
0x1a86   :  { %3798 = vrot.lane.b32.xlu0 %v3793_v7, %s11409_s0 }
0x1a89   :  { %3759 = vrot.lane.b32.xlu1 %v3756_v58, %s11412_s25 }
0x1a8d   :  { %2068 = vrot.lane.b32.xlu1 %v2065_v6, %s11409_s0 }
0x1a91   :  { %2321 = vrot.lane.b32.xlu1 %v2318_v54, %s11409_s0  ;;  %v4117_v54 = vld [vmem:[%s13345_s6] sm:$0xff] }
0x1a92   :  { %v12370_v60 = vpack.c.bf16 %v4118_v8, %v4117_v54 }
0x1a94   :  { %10799 = vmatpush3.bf16.msra.mxu1 %v12370_v60 }
0x1a95   :  { %2566 = vrot.lane.b32.xlu1 %v2563_v0, %s11409_s0  ;;  %10800 = vmatprep.subr.bf16.mxu1 %v13318_v14 }
0x1a99   :  { %2815 = vrot.lane.b32.xlu1 %v2812_v2, %s11409_s0 }
0x1a9d   :  { %3058 = vrot.lane.b32.xlu1 %v3055_v45, %s11409_s0 }
0x1aa1   :  { %3305 = vrot.lane.b32.xlu1 %v3302_v43, %s11409_s0 }
0x1aa5   :  { %3550 = vrot.lane.b32.xlu1 %v3547_v63, %s11409_s0 }
0x1aa9   :  { %3800 = vrot.lane.b32.xlu1 %v3797_v21, %s11409_s0 }
0x1ac7   :  { %v4628_v40 = vpop.permute.xlu1 %4627 }
0x1acb   :  { %v2027_v3 = vpop.permute.xlu1 %2026 }
0x1acc   :  { %2033 = vst.msk [vmem:[#allocation2] sm:$0x1] %vm2032_vm7, %v2027_v3 }
0x1acf   :  { %v2029_v12 = vpop.permute.xlu1 %2028 }
0x1ad0   :  { %2034 = vst.msk [vmem:[#allocation2 + $0x8] sm:$0x1] %vm2032_vm7, %v2029_v12 }
0x1ad3   :  { %v2280_v47 = vpop.permute.xlu1 %2279 }
0x1ad4   :  { %2285 = vst.msk [vmem:[#allocation2 + $0x1] sm:$0x1] %vm2032_vm7, %v2280_v47 }
0x1ad5   :  { %v4467_v52 = vpop.xlane.xlu0 %4466 }
0x1ad6   :  { %v4468_v48 = vadd.f32 1e-12, %v4467_v52 }
0x1ad7   :  { %v2282_v55 = vpop.permute.xlu1 %2281 }
0x1ad8   :  { %v4473_v13 = vrot.slane %v4468_v48, %v12091_v41  ;;  %v4477_v4 = vrot.slane %v4468_v48, %v12125_v36  ;;  %2286 = vst.msk [vmem:[#allocation2 + $0x9] sm:$0x1] %vm2032_vm7, %v2282_v55 }
0x1ad9   :  { %v2528_v34 = vpop.permute.xlu0 %2527 }
0x1ada   :  { %11189 = vrcp.f32 %v4473_v13  ;;  %2532 = vst.msk [vmem:[#allocation2 + $0xa] sm:$0x1] %vm2032_vm7, %v2528_v34 }
0x1adb   :  { %11191 = vrcp.f32 %v4477_v4  ;;  %v2526_v25 = vpop.permute.xlu1 %2525 }
0x1adc   :  { %2531 = vst.msk [vmem:[#allocation2 + $0x2] sm:$0x1] %vm2032_vm7, %v2526_v25 }
0x1add   :  { %v3510_v7 = vpop.permute.xlu0 %3509 }
0x1ade   :  { %3515 = vst.msk [vmem:[#allocation2 + $0x6] sm:$0x1] %vm2032_vm7, %v3510_v7 }
0x1adf   :  { %v2773_v26 = vpop.permute.xlu1 %2772 }
0x1ae0   :  { %2778 = vst.msk [vmem:[#allocation2 + $0x3] sm:$0x1] %vm2032_vm7, %v2773_v26 }
0x1ae1   :  { %v3758_v58 = vpop.permute.xlu0 %3757 }
0x1ae2   :  { %3763 = vst.msk [vmem:[#allocation2 + $0x7] sm:$0x1] %vm2032_vm7, %v3758_v58 }
0x1ae3   :  { %v2775_v17 = vpop.permute.xlu1 %2774 }
0x1ae4   :  { %v11190_v23 = vpop.eup %11189  ;;  %2779 = vst.msk [vmem:[#allocation2 + $0xb] sm:$0x1] %vm2032_vm7, %v2775_v17 }
0x1ae5   :  { %v11192_v22 = vpop.eup %11191  ;;  %v2067_v28 = vpop.permute.xlu0 %2066  ;;  %v12361_v6 = vmul.f32 %v11190_v23, %v12150_v42  ;;  %v4630_v42 = vmul.f32 %v12157_v56, %v4628_v40  ;;  %v4119_v56 = vld [vmem:[%s13346_s12] sm:$0xff] }
0x1ae6   :  { %2073 = vst.msk [vmem:[#allocation2] sm:$0x1] %vm2072_vm8, %v2067_v28  ;;  %v12365_v9 = vmul.f32 %v11192_v22, %v12153_v27  ;;  %v12386_v2 = vpack.c.bf16 %v4120_v15, %v4119_v56 }
0x1ae7   :  { %4486 = vperm.xlu0 %11029, %v12361_v6   ;;  %v3019_v57 = vpop.permute.xlu1 %3018 }
0x1ae8   :  { %4491 = vperm.xlu1 %11030, %v12365_v9   ;;  %3024 = vst.msk [vmem:[#allocation2 + $0x4] sm:$0x1] %vm2032_vm7, %v3019_v57  ;;  %10793 = vmatpush3.bf16.msra.mxu0 %v12386_v2 }
0x1ae9   :  { %v2320_v0 = vpop.permute.xlu0 %2319  ;;  %10794 = vmatprep.subr.bf16.mxu0 %v13318_v14 }
0x1aea   :  { %2325 = vst.msk [vmem:[#allocation2 + $0x1] sm:$0x1] %vm2072_vm8, %v2320_v0 }
0x1aeb   :  { %4707 = vrot.lane.b32.xlu0 %v4630_v42, %s11412_s25  ;;  %v3021_v27 = vpop.permute.xlu1 %3020 }
0x1aec   :  { %5020 = vrot.lane.b32.xlu1 %v12168_v24, %s11414_s29  ;;  %3025 = vst.msk [vmem:[#allocation2 + $0xc] sm:$0x1] %vm2032_vm7, %v3021_v27  ;;  %10796 = vmatpush3.bf16.msra.mxu0 %v12395_v11 }
0x1aed   :  { %v2565_v51 = vpop.permute.xlu0 %2564  ;;  %10803 = vmatprep.subr.bf16.mxu0 %v13318_v14 }
0x1aee   :  { %2570 = vst.msk [vmem:[#allocation2 + $0x2] sm:$0x1] %vm2072_vm8, %v2565_v51 }
0x1aef   :  { %5448 = vperm.xlu0 %11029, %v12361_v6   ;;  %v3264_v35 = vpop.permute.xlu1 %3263 }
0x1af0   :  { %5453 = vperm.xlu1 %11030, %v12365_v9   ;;  %3269 = vst.msk [vmem:[#allocation2 + $0x5] sm:$0x1] %vm2032_vm7, %v3264_v35  ;;  %v4131_v35 = vld [vmem:[%s13347_s20] sm:$0xff] }
0x1af1   :  { %v2814_v49 = vpop.permute.xlu0 %2813 }
0x1af2   :  { %2819 = vst.msk [vmem:[#allocation2 + $0x3] sm:$0x1] %vm2072_vm8, %v2814_v49  ;;  %v4132_v49 = vld [vmem:[%s13347_s20 + $0x8] sm:$0xff] }
0x1af3   :  { %v3266_v45 = vpop.permute.xlu1 %3265 }
0x1af4   :  { %3270 = vst.msk [vmem:[#allocation2 + $0xd] sm:$0x1] %vm2032_vm7, %v3266_v45 }
0x1af5   :  { %v3057_v43 = vpop.permute.xlu0 %3056 }
0x1af6   :  { %3062 = vst.msk [vmem:[#allocation2 + $0x4] sm:$0x1] %vm2072_vm8, %v3057_v43  ;;  %v12436_v43 = vpack.c.bf16 %v4132_v49, %v4131_v35 }
0x1af7   :  { %v3512_v10 = vpop.permute.xlu1 %3511 }
0x1af8   :  { %3516 = vst.msk [vmem:[#allocation2 + $0xe] sm:$0x1] %vm2032_vm7, %v3512_v10  ;;  %v4133_v10 = vld [vmem:[%s11570_s13] sm:$0xff] }
0x1af9   :  { %v3304_v63 = vpop.permute.xlu0 %3303 }
0x1afa   :  { %3309 = vst.msk [vmem:[#allocation2 + $0x5] sm:$0x1] %vm2072_vm8, %v3304_v63  ;;  %v4134_v63 = vld [vmem:[%s11570_s13 + $0x8] sm:$0xff]  ;;  %s13348_s13 = sld [smem:[#allocation17_spill]] }
0x1afb   :  { %v3760_v38 = vpop.permute.xlu1 %3759 }
0x1afc   :  { %3764 = vst.msk [vmem:[#allocation2 + $0xf] sm:$0x1] %vm2032_vm7, %v3760_v38 }
0x1afd   :  { %v3549_v21 = vpop.permute.xlu0 %3548 }
0x1afe   :  { %3554 = vst.msk [vmem:[#allocation2 + $0x6] sm:$0x1] %vm2072_vm8, %v3549_v21  ;;  %v12445_v21 = vpack.c.bf16 %v4134_v63, %v4133_v10 }
0x1aff   :  { %v2069_v40 = vpop.permute.xlu1 %2068 }
0x1b00   :  { %2074 = vst.msk [vmem:[#allocation2 + $0x8] sm:$0x1] %vm2072_vm8, %v2069_v40  ;;  %v4135_v40 = vld [vmem:[%s11575_s30] sm:$0xff] }
0x1b01   :  { %v3799_v3 = vpop.permute.xlu0 %3798 }
0x1b02   :  { %3804 = vst.msk [vmem:[#allocation2 + $0x7] sm:$0x1] %vm2072_vm8, %v3799_v3  ;;  %v4136_v3 = vld [vmem:[%s11575_s30 + $0x8] sm:$0xff]  ;;  %s13349_s30 = sld [smem:[#allocation19_spill]] }
0x1b03   :  { %v2322_v12 = vpop.permute.xlu1 %2321 }
0x1b04   :  { %2326 = vst.msk [vmem:[#allocation2 + $0x9] sm:$0x1] %vm2072_vm8, %v2322_v12  ;;  %v12455_v12 = vpack.c.bf16 %v4136_v3, %v4135_v40 }
0x1b07   :  { %v2567_v47 = vpop.permute.xlu1 %2566 }
0x1b08   :  { %2571 = vst.msk [vmem:[#allocation2 + $0xa] sm:$0x1] %vm2072_vm8, %v2567_v47 }
0x1b09   :  { %v12416_v25 = vld [vmem:[#allocation2] sm:$0xff] }
0x1b0b   :  { %v2816_v52 = vpop.permute.xlu1 %2815 }
0x1b0c   :  { %2820 = vst.msk [vmem:[#allocation2 + $0xb] sm:$0x1] %vm2072_vm8, %v2816_v52  ;;  %v4125_v52 = vld [vmem:[%s13348_s13 + $0x8] sm:$0xff] }
0x1b0f   :  { %v3059_v48 = vpop.permute.xlu1 %3058 }
0x1b10   :  { %3063 = vst.msk [vmem:[#allocation2 + $0xc] sm:$0x1] %vm2072_vm8, %v3059_v48 }
0x1b13   :  { %v3306_v55 = vpop.permute.xlu1 %3305 }
0x1b14   :  { %3310 = vst.msk [vmem:[#allocation2 + $0xd] sm:$0x1] %vm2072_vm8, %v3306_v55 }
0x1b17   :  { %v3551_v13 = vpop.permute.xlu1 %3550 }
0x1b18   :  { %3555 = vst.msk [vmem:[#allocation2 + $0xe] sm:$0x1] %vm2072_vm8, %v3551_v13 }
0x1b1b   :  { %v3801_v4 = vpop.permute.xlu1 %3800 }
0x1b1c   :  { %3805 = vst.msk [vmem:[#allocation2 + $0xf] sm:$0x1] %vm2072_vm8, %v3801_v4  ;;  %v4127_v4 = vld [vmem:[%s13349_s30] sm:$0xff] }
0x1b23   :  { %v12420_v26 = vld [vmem:[#allocation2 + $0x8] sm:$0xff] }
0x1b66   :  { %v12414_v34 = vpop.permute.xlu0 %4486 }
0x1b67   :  { %v4494_v7 = vmul.f32 %v12414_v34, %v12416_v25  ;;  %v12422_v58 = vpop.permute.xlu1 %4491 }
0x1b68   :  { %v4495_v17 = vmul.f32 %v12422_v58, %v12420_v26 }
0x1b69   :  { %v4496_v23 = vsel %vm4351_vm3, %v4494_v7, 0.0  ;;  %v4128_v7 = vld [vmem:[%s13349_s30 + $0x8] sm:$0xff] }
0x1b6a   :  { %v4497_v22 = vrot.slane %v4496_v23, 4  ;;  %v4503_v28 = vsel %vm4351_vm3, %v4495_v17, 0.0  ;;  %v12428_v54 = vpop.permute.xlu0 %4707  ;;  %v12486_v17 = vld [vmem:[%s13350_s27] ss:$0 sm:$0xff] }
0x1b6b   :  { %v4504_v8 = vrot.slane %v4503_v28, 4  ;;  %10321 = vmatmul.mubr.msk.f32.vlgmr.msra.gmra.mrb[30].mxu1 %vm140_vm0, %v12428_v54  ;;  %v5021_v47 = vpop.permute.xlu1 %5020 }
0x1b6c   :  { %v4498_v57 = vadd.f32 %v4497_v22, %v4496_v23  ;;  %10327 = vmatprep.mubr.msk.f32.mxu1 %vm11407_vm1, %v13315_v16 }
0x1b6d   :  { %v4505_v42 = vadd.f32 %v4504_v8, %v4503_v28  ;;  %v12488_v8 = vpack.c.bf16 %v4128_v7, %v4127_v4 }
0x1b6e   :  { %v4499_v0 = vrot.slane %v4498_v57, 2 }
0x1b6f   :  { %v4506_v27 = vrot.slane %v4505_v42, 2 }
0x1b70   :  { %v4500_v51 = vadd.f32 %v4499_v0, %v4498_v57  ;;  %v4130_v0 = vld [vmem:[%s13349_s30 + $0x18] sm:$0xff] }
0x1b71   :  { %v4507_v56 = vadd.f32 %v4506_v27, %v4505_v42  ;;  %v4129_v42 = vld [vmem:[%s13349_s30 + $0x10] sm:$0xff] }
0x1b72   :  { %v4501_v15 = vrot.slane %v4500_v51, 1 }
0x1b73   :  { %v4508_v31 = vrot.slane %v4507_v56, 1 }
0x1b74   :  { %v4502_v44 = vadd.f32 %v4501_v15, %v4500_v51 }
0x1b75   :  { %v4509_v45 = vadd.f32 %v4508_v31, %v4507_v56  ;;  %v12495_v56 = vpack.c.bf16 %v4130_v0, %v4129_v42 }
0x1b77   :  { %v4633_v38 = vsel %vm4368_vm4, %v4509_v45, %v4502_v44 }
0x1b78   :  { %10314 = vmatmul.mubr.msk.f32.vlgmr.msra.gmra.mrb[30].mxu0 %vm4351_vm3, %v4633_v38 }
0x1b79   :  { %10805 = vmatpush3.bf16.msra.mxu0 %v12436_v43  ;;  %10334 = vmatprep.mubr.msk.f32.mxu0 %vm11407_vm1, %v13315_v16 }
0x1b7a   :  { %10812 = vmatprep.subr.bf16.mxu0 %v13318_v14 }
0x1b7c   :  { %10335 = vmatmul.mubr.msk.f32.vlgmr.msra.gmra.mrb[32].mxu0 %vm140_vm0, %v12428_v54 }
0x1b7d   :  { %10814 = vmatpush3.bf16.msra.mxu0 %v12445_v21  ;;  %10352 = vmatprep.mubr.msk.f32.mxu0 %vm11407_vm1, %v13315_v16 }
0x1b7e   :  { %10815 = vmatprep.subr.bf16.mxu0 %v13318_v14 }
0x1b80   :  { %10353 = vmatmul.mubr.msk.f32.vlgmr.msra.gmra.mrb[34].mxu0 %vm140_vm0, %v5021_v47 }
0x1b81   :  { %10817 = vmatpush3.bf16.msra.mxu0 %v12455_v12  ;;  %10359 = vmatprep.mubr.msk.f32.mxu0 %vm11407_vm1, %v13315_v16 }
0x1b82   :  { %10821 = vmatprep.subr.bf16.mxu0 %v13318_v14 }
0x1b84   :  { %10360 = vmatmul.mubr.msk.f32.vlgmr.msra.gmra.mrb[36].mxu0 %vm140_vm0, %v12029_v5  ;;  %v4124_v5 = vld [vmem:[%s13348_s13] sm:$0xff] }
0x1b85   :  { %10823 = vmatpush3.bf16.msra.mxu0 %v12038_v32  ;;  %10373 = vmatprep.mubr.msk.f32.mxu0 %vm11407_vm1, %v13315_v16  ;;  %v12479_v48 = vpack.c.bf16 %v4125_v52, %v4124_v5 }
0x1b86   :  { %10827 = vmatprep.subr.bf16.mxu0 %v13318_v14 }
0x1b87   :  { %10802 = vmatpush3.bf16.msra.mxu1 %v12479_v48 }
0x1b88   :  { %10374 = vmatmul.mubr.msk.f32.vlgmr.msra.gmra.mrb[38].mxu0 %vm140_vm0, %v12428_v54  ;;  %10806 = vmatprep.subr.bf16.mxu1 %v13318_v14 }
0x1b89   :  { %10829 = vmatpush3.bf16.msra.mxu0 %v12386_v2  ;;  %10391 = vmatprep.mubr.msk.f32.mxu0 %vm11407_vm1, %v13315_v16 }
0x1b8a   :  { %10830 = vmatprep.subr.bf16.mxu0 %v13318_v14 }
0x1b8d   :  { %10832 = vmatpush3.bf16.msra.mxu0 %v12395_v11 }
0x1b8e   :  { %10839 = vmatprep.subr.bf16.mxu0 %v13318_v14 }
0x1c3e   :  { %v4777_v55 = vpop.f32.mrb[30].mxu1 }
0x1c3f   :  { %v10322_v13 = vpop.f32.mrb[31].mxu1 }
0x1c4b   :  { %v4702_v23 = vpop.f32.mrb[30].mxu0 }
0x1c4c   :  { %v4778_v22 = vadd.f32 %v4777_v55, %v4702_v23  ;;  %v10315_v28 = vpop.f32.mrb[31].mxu0 }
0x1c4e   :  { %v4787_v57 = vadd.f32 %v12486_v17, %v4778_v22 }
0x1c4f   :  { %v4945_v27 = vpop.f32.mrb[32].mxu0 }
0x1c50   :  { %10328 = vmatmul.mubr.msk.f32.vlgmr.msra.gmra.mrb[32].mxu1 %vm140_vm0, %v4787_v57  ;;  %v10336_v51 = vpop.f32.mrb[33].mxu0  ;;  %v5449_v57 = vpop.permute.xlu0 %5448 }
0x1c51   :  { %10808 = vmatpush3.bf16.msra.mxu1 %v12488_v8  ;;  %10345 = vmatprep.mubr.msk.f32.mxu1 %vm11407_vm1, %v13315_v16  ;;  %v5456_v51 = vmul.f32 %v12088_v61, %v5449_v57 }
0x1c52   :  { %10809 = vmatprep.subr.bf16.mxu1 %v13318_v14 }
0x1c53   :  { %v5090_v15 = vpop.f32.mrb[34].mxu0 }
0x1c54   :  { %v10354_v35 = vpop.f32.mrb[35].mxu0 }
0x1c55   :  { %10811 = vmatpush3.bf16.msra.mxu1 %v12495_v56 }
0x1c56   :  { %10818 = vmatprep.subr.bf16.mxu1 %v13318_v14 }
0x1c57   :  { %v5161_v49 = vpop.f32.mrb[36].mxu0 }
0x1c58   :  { %10346 = vmatmul.mubr.msk.f32.vlgmr.msra.gmra.mrb[34].mxu1 %vm4351_vm3, %v4633_v38  ;;  %v10361_v31 = vpop.f32.mrb[37].mxu0 }
0x1c59   :  { %10820 = vmatpush3.bf16.msra.mxu1 %v11972_v19  ;;  %10366 = vmatprep.mubr.msk.f32.mxu1 %vm11407_vm1, %v13315_v16 }
0x1c5a   :  { %10824 = vmatprep.subr.bf16.mxu1 %v13318_v14 }
0x1c5b   :  { %v5406_v44 = vpop.f32.mrb[38].mxu0 }
0x1c5c   :  { %10367 = vmatmul.mubr.msk.f32.vlgmr.msra.gmra.mrb[36].mxu1 %vm140_vm0, %v5021_v47  ;;  %v10375_v45 = vpop.f32.mrb[39].mxu0 }
0x1c5d   :  { %10826 = vmatpush3.bf16.msra.mxu1 %v11980_v46  ;;  %10380 = vmatprep.mubr.msk.f32.mxu1 %vm11407_vm1, %v13315_v16 }
0x1c5e   :  { %10833 = vmatprep.subr.bf16.mxu1 %v13318_v14 }
0x1c60   :  { %10381 = vmatmul.mubr.msk.f32.vlgmr.msra.gmra.mrb[38].mxu1 %vm140_vm0, %v12428_v54 }
0x1c61   :  { %10835 = vmatpush3.bf16.msra.mxu1 %v12370_v60  ;;  %10398 = vmatprep.mubr.msk.f32.mxu1 %vm11407_vm1, %v13315_v16 }
0x1c62   :  { %10836 = vmatprep.subr.bf16.mxu1 %v13318_v14 }
0x1d23   :  { %v12518_v10 = vpop.f32.mrb[32].mxu1 }
0x1d24   :  { %v10329_v63 = vpop.f32.mrb[33].mxu1 }
0x1d2b   :  { %v5015_v38 = vpop.f32.mrb[34].mxu1 }
0x1d2c   :  { %v5016_v40 = vadd.f32 %v5015_v38, %v4945_v27  ;;  %v10347_v3 = vpop.f32.mrb[35].mxu1  ;;  %v5454_v27 = vpop.permute.xlu1 %5453 }
0x1d2e   :  { %v5094_v47 = vadd.f32 %v5090_v15, %v5016_v40 }
0x1d2f   :  { %v5336_v5 = vpop.f32.mrb[36].mxu1 }
0x1d30   :  { %v12520_v52 = vadd.f32 %v5161_v49, %v5094_v47  ;;  %v5407_v55 = vadd.f32 %v5406_v44, %v5336_v5  ;;  %v10368_v13 = vpop.f32.mrb[37].mxu1 }
0x1d32   :  { %v5410_v54 = vadd.f32 %v12083_v29, %v5407_v55  ;;  %v5457_v29 = vmul.f32 %v12088_v61, %v5454_v27 }
0x1d33   :  { %v5694_v4 = vpop.f32.mrb[38].mxu1 }
0x1d34   :  { %v5418_v7 = vrot.slane %v5410_v54, %v11923_v39  ;;  %v10382_v23 = vpop.f32.mrb[39].mxu1 }
0x1d35   :  { %v5699_v23 = vrot.slane %v5694_v4, 6 }
0x1d36   :  { %v5419_v22 = vcombine.high %v5418_v7, %v5418_v7  ;;  %v5426_v28 = vrot.slane %v5418_v7, %v11923_v39 }
0x1d38   :  { %v5433_v42 = vrot.slane %v5419_v22, %v11923_v39  ;;  %v5437_v0 = vrot.slane %v5426_v28, %v12091_v41 }
0x1d3a   :  { %v5441_v15 = vrot.slane %v5433_v42, %v12091_v41  ;;  %v5444_v35 = vadd.f32 %v5437_v0, %v12097_v50  ;;  %v5701_v0 = vadd.f32 %v5699_v23, %v12131_v53 }
0x1d3c   :  { %v5445_v49 = vadd.f32 %v5441_v15, %v12101_v59  ;;  %v5458_v31 = vadd.f32 %v5456_v51, %v5444_v35 }
0x1d3e   :  { %v5459_v44 = vadd.f32 %v5457_v29, %v5445_v49  ;;  %11193 = vtanh.f32 %v5458_v31 }
0x1d40   :  { %11195 = vtanh.f32 %v5459_v44 }
0x1d48   :  { %v11194_v45 = vpop.eup %11193 }
0x1d49   :  { %v5462_v63 = vmul.f32 %v11194_v45, %v12105_v1  ;;  %v9712_v45 = vmul.f32 -1.442695, %v5701_v0 }
0x1d4a   :  { %v11196_v38 = vpop.eup %11195 }
0x1d4b   :  { %v5464_v40 = vsel %vm4351_vm3, %v5462_v63, 0.0  ;;  %v5463_v3 = vmul.f32 %v11196_v38, %v12105_v1 }
0x1d4c   :  { %5465 = vadd.xlane.f32.xlu0 %v5464_v40 }
0x1d4d   :  { %v5467_v47 = vsel %vm4351_vm3, %v5463_v3, 0.0 }
0x1d4e   :  { %5468 = vadd.xlane.f32.xlu1 %v5467_v47 }
0x1dd9   :  { %v5466_v50 = vpop.xlane.xlu0 %5465 }
0x1dda   :  { %v5475_v59 = vrot.slane %v5466_v50, %v12116_v62 }
0x1ddb   :  { %v5469_v61 = vpop.xlane.xlu1 %5468 }
0x1ddc   :  { %v5479_v5 = vrot.slane %v5469_v61, %v12116_v62 }
0x1dde   :  { %v5480_v55 = vsel %vm4368_vm4, %v5479_v5, %v5475_v59 }
0x1ddf   :  { %v5482_v13 = vsel %vm4371_vm5, %v5480_v55, -inf }
0x1de0   :  { %5483 = vmax.xlane.f32.xlu0 %v5482_v13 }
0x1e6d   :  { %v5484_v54 = vpop.xlane.xlu0 %5483 }
0x1e6e   :  { %v5489_v7 = vrot.slane %v5484_v54, %v12091_v41  ;;  %v5493_v1 = vrot.slane %v5484_v54, %v12125_v36 }
0x1e70   :  { %v5496_v22 = vsub.f32 %v5466_v50, %v5489_v7  ;;  %v5497_v28 = vsub.f32 %v5469_v61, %v5493_v1 }
0x1e72   :  { %v5498_v57 = vmul.f32 1.442695, %v5496_v22  ;;  %v5500_v42 = vmul.f32 1.442695, %v5497_v28 }
0x1e74   :  { %11197 = vpow2.f32 %v5498_v57 }
0x1e75   :  { %11199 = vpow2.f32 %v5500_v42  ;;  %v5709_v42 = vrot.slane %v12168_v24, 6 }
0x1e76   :  { %11201 = vtanh.f32 %v5701_v0 }
0x1e77   :  { %11203 = vpow2.f32 %v9712_v45 }
0x1e7e   :  { %v11198_v27 = vpop.eup %11197 }
0x1e7f   :  { %v11200_v51 = vpop.eup %11199  ;;  %5505 = vperm.xlu0 %11029, %v11198_v27  }
0x1e80   :  { %5508 = vperm.xlu1 %11030, %v11200_v51   ;;  %v11202_v15 = vpop.eup %11201 }
0x1e81   :  { %v11204_v3 = vpop.eup %11203 }
0x1e82   :  { %v5705_v47 = vadd.f32 1.0, %v11204_v3 }
0x1e83   :  { %5713 = vrot.lane.b32.xlu0 %v11202_v15, %s11409_s0 }
0x1efe   :  { %v5506_v35 = vpop.permute.xlu0 %5505 }
0x1eff   :  { %v5509_v29 = vpop.permute.xlu1 %5508  ;;  %v5513_v4 = vrot.slane %v5506_v35, %v12116_v62 }
0x1f00   :  { %v5517_v49 = vrot.slane %v5509_v29, %v12116_v62 }
0x1f02   :  { %v5518_v31 = vsel %vm4368_vm4, %v5517_v49, %v5513_v4  ;;  %v5714_v54 = vpop.permute.xlu0 %5713 }
0x1f03   :  { %v5520_v44 = vsel %vm4371_vm5, %v5518_v31, 0.0 }
0x1f04   :  { %5521 = vadd.xlane.f32.xlu1 %v5520_v44 }
0x1f91   :  { %v5522_v63 = vpop.xlane.xlu1 %5521 }
0x1f92   :  { %v5527_v38 = vrot.slane %v5522_v63, %v12091_v41  ;;  %v5531_v40 = vrot.slane %v5522_v63, %v12125_v36 }
0x1f94   :  { %11205 = vrcp.f32 %v5527_v38 }
0x1f95   :  { %11207 = vrcp.f32 %v5531_v40 }
0x1f96   :  { %11209 = vrcp.f32 %v5705_v47 }
0x1f9e   :  { %v11206_v50 = vpop.eup %11205 }
0x1f9f   :  { %v11208_v61 = vpop.eup %11207  ;;  %v5535_v59 = vmul.f32 %v11206_v50, %v11198_v27 }
0x1fa0   :  { %v5537_v55 = vmul.f32 %v11208_v61, %v11200_v51  ;;  %v11210_v7 = vpop.eup %11209 }
0x1fa1   :  { %v5538_v5 = vmul.f32 %v5535_v59, %v12145_v37  ;;  %v5716_v1 = vmul.f32 %v11210_v7, %v5714_v54  ;;  %v5711_v0 = vmul.f32 %v11210_v7, %v5709_v42 }
0x1fa2   :  { %v5539_v13 = vmul.f32 %v5537_v55, %v12147_v33 }
0x1fa3   :  { %5543 = vperm.xlu0 %11029, %v5538_v5  }
0x1fa7   :  { %5546 = vperm.xlu0 %11029, %v5539_v13  }
0x1fab   :  { %5718 = vrot.lane.b32.xlu0 %v5716_v1, %s11410_s5 }
0x2022   :  { %v5544_v23 = vpop.permute.xlu0 %5543 }
0x2023   :  { %v5551_v28 = vrot.slane %v5544_v23, %v12116_v62 }
0x2026   :  { %v5547_v22 = vpop.permute.xlu0 %5546 }
0x2027   :  { %v5555_v57 = vrot.slane %v5547_v22, %v12116_v62 }
0x2029   :  { %v5556_v27 = vsel %vm4368_vm4, %v5555_v57, %v5551_v28 }
0x202a   :  { %v5719_v51 = vpop.permute.xlu0 %5718  ;;  %v5558_v15 = vsel %vm4371_vm5, %v5556_v27, 0.0 }
0x202b   :  { %v12558_v35 = vadd.f32 %v5719_v51, %v5711_v0  ;;  %5559 = vadd.xlane.f32.xlu0 %v5558_v15 }
0x202d   :  { %11211 = vtanh.f32 %v12558_v35  ;;  %v6105_v50 = vrot.slane %v12558_v35, 2 }
0x2037   :  { %v11212_v29 = vpop.eup %11211 }
0x2038   :  { %5724 = vrot.lane.b32.xlu1 %v11212_v29, %s11411_s21 }
0x20aa   :  { %v5725_v44 = vpop.permute.xlu1 %5724 }
0x20ab   :  { %v5727_v40 = vmul.f32 %v11210_v7, %v5725_v44 }
0x20ad   :  { %v5804_v47 = vrot.slane %v5727_v40, 2 }
0x20b8   :  { %v5560_v4 = vpop.xlane.xlu0 %5559 }
0x20b9   :  { %v5561_v49 = vadd.f32 1e-12, %v5560_v4 }
0x20bb   :  { %v5566_v31 = vrot.slane %v5561_v49, %v12091_v41  ;;  %v5570_v24 = vrot.slane %v5561_v49, %v12125_v36 }
0x20bd   :  { %11213 = vrcp.f32 %v5566_v31 }
0x20be   :  { %11215 = vrcp.f32 %v5570_v24 }
0x20c7   :  { %v11214_v45 = vpop.eup %11213 }
0x20c8   :  { %v11216_v63 = vpop.eup %11215  ;;  %v12564_v38 = vmul.f32 %v11214_v45, %v5538_v5  ;;  %v12615_v45 = vld [vmem:[%s11440_s9] sm:$0xff] }
0x20c9   :  { %v12566_v3 = vmul.f32 %v11216_v63, %v5539_v13  ;;  %v6181_v63 = vrot.slane %v12615_v45, 2 }
0x20ca   :  { %5579 = vperm.xlu0 %11029, %v12564_v38   ;;  %v12575_v61 = vadd.f32 %v12564_v38, %v12361_v6 }
0x20cb   :  { %5584 = vperm.xlu1 %11030, %v12566_v3   ;;  %v12580_v59 = vadd.f32 %v12566_v3, %v12365_v9 }
0x20cf   :  { %5805 = vrot.lane.b32.xlu1 %v5804_v47, %s11412_s25 }
0x20d3   :  { %6106 = vrot.lane.b32.xlu1 %v6105_v50, %s11414_s29 }
0x20d7   :  { %6525 = vperm.xlu1 %11030, %v12575_v61  }
0x20db   :  { %6530 = vperm.xlu1 %11030, %v12580_v59  }
0x2149   :  { %v12583_v5 = vpop.permute.xlu0 %5579 }
0x214a   :  { %v12585_v55 = vpop.permute.xlu1 %5584  ;;  %v5587_v13 = vmul.f32 %v12583_v5, %v12416_v25 }
0x214b   :  { %v5588_v54 = vmul.f32 %v12585_v55, %v12420_v26 }
0x214c   :  { %v5589_v7 = vsel %vm4351_vm3, %v5587_v13, 0.0 }
0x214d   :  { %v5596_v1 = vsel %vm4351_vm3, %v5588_v54, 0.0  ;;  %v5590_v23 = vrot.slane %v5589_v7, 4 }
0x214e   :  { %v5597_v22 = vrot.slane %v5596_v1, 4  ;;  %v12593_v28 = vpop.permute.xlu1 %5805 }
0x214f   :  { %v5591_v57 = vadd.f32 %v5590_v23, %v5589_v7  ;;  %10399 = vmatmul.mubr.msk.f32.vlgmr.msra.gmra.mrb[40].mxu1 %vm140_vm0, %v12593_v28 }
0x2150   :  { %v5598_v42 = vadd.f32 %v5597_v22, %v5596_v1  ;;  %10838 = vmatpush3.bf16.msra.mxu1 %v12479_v48  ;;  %10405 = vmatprep.mubr.msk.f32.mxu1 %vm11407_vm1, %v13315_v16 }
0x2151   :  { %v5592_v0 = vrot.slane %v5591_v57, 2  ;;  %10842 = vmatprep.subr.bf16.mxu1 %v13318_v14 }
0x2152   :  { %v5599_v27 = vrot.slane %v5598_v42, 2  ;;  %v6107_v44 = vpop.permute.xlu1 %6106 }
0x2153   :  { %v5593_v51 = vadd.f32 %v5592_v0, %v5591_v57 }
0x2154   :  { %v5600_v15 = vadd.f32 %v5599_v27, %v5598_v42 }
0x2155   :  { %v5594_v29 = vrot.slane %v5593_v51, 1 }
0x2156   :  { %v5601_v4 = vrot.slane %v5600_v15, 1 }
0x2157   :  { %v5595_v49 = vadd.f32 %v5594_v29, %v5593_v51 }
0x2158   :  { %v5602_v31 = vadd.f32 %v5601_v4, %v5600_v15 }
0x215a   :  { %v5730_v24 = vsel %vm4368_vm4, %v5602_v31, %v5595_v49 }
0x215b   :  { %10392 = vmatmul.mubr.msk.f32.vlgmr.msra.gmra.mrb[40].mxu0 %vm4351_vm3, %v5730_v24 }
0x215c   :  { %10841 = vmatpush3.bf16.msra.mxu0 %v12436_v43  ;;  %10412 = vmatprep.mubr.msk.f32.mxu0 %vm11407_vm1, %v13315_v16 }
0x215d   :  { %10848 = vmatprep.subr.bf16.mxu0 %v13318_v14 }
0x215f   :  { %10413 = vmatmul.mubr.msk.f32.vlgmr.msra.gmra.mrb[42].mxu0 %vm140_vm0, %v12593_v28 }
0x2160   :  { %10850 = vmatpush3.bf16.msra.mxu0 %v12445_v21  ;;  %10430 = vmatprep.mubr.msk.f32.mxu0 %vm11407_vm1, %v13315_v16 }
0x2161   :  { %10851 = vmatprep.subr.bf16.mxu0 %v13318_v14 }
0x2163   :  { %10431 = vmatmul.mubr.msk.f32.vlgmr.msra.gmra.mrb[44].mxu0 %vm140_vm0, %v6107_v44 }
0x2164   :  { %10853 = vmatpush3.bf16.msra.mxu0 %v12455_v12  ;;  %10437 = vmatprep.mubr.msk.f32.mxu0 %vm11407_vm1, %v13315_v16 }
0x2165   :  { %10857 = vmatprep.subr.bf16.mxu0 %v13318_v14 }
0x2167   :  { %10438 = vmatmul.mubr.msk.f32.vlgmr.msra.gmra.mrb[46].mxu0 %vm140_vm0, %v6181_v63 }
0x2168   :  { %10859 = vmatpush3.bf16.msra.mxu0 %v12038_v32  ;;  %10451 = vmatprep.mubr.msk.f32.mxu0 %vm11407_vm1, %v13315_v16 }
0x2169   :  { %10863 = vmatprep.subr.bf16.mxu0 %v13318_v14 }
0x216b   :  { %10452 = vmatmul.mubr.msk.f32.vlgmr.msra.gmra.mrb[48].mxu0 %vm140_vm0, %v12593_v28 }
0x216c   :  { %10865 = vmatpush3.bf16.msra.mxu0 %v12386_v2  ;;  %10469 = vmatprep.mubr.msk.f32.mxu0 %vm11407_vm1, %v13315_v16 }
0x216d   :  { %10866 = vmatprep.subr.bf16.mxu0 %v13318_v14 }
0x2170   :  { %10868 = vmatpush3.bf16.msra.mxu0 %v12395_v11 }
0x2171   :  { %10875 = vmatprep.subr.bf16.mxu0 %v13318_v14 }
0x2222   :  { %v5875_v40 = vpop.f32.mrb[40].mxu1 }
0x2223   :  { %v10400_v47 = vpop.f32.mrb[41].mxu1 }
0x2224   :  { %v12664_v47 = vld [vmem:[%s13341_s8] ss:$0 sm:$0xff] }
0x222e   :  { %v5799_v50 = vpop.f32.mrb[40].mxu0 }
0x222f   :  { %v5876_v13 = vadd.f32 %v5875_v40, %v5799_v50  ;;  %v10393_v54 = vpop.f32.mrb[41].mxu0 }
0x2231   :  { %v5879_v7 = vadd.f32 %v12486_v17, %v5876_v13  ;;  %v6526_v13 = vpop.permute.xlu1 %6525 }
0x2232   :  { %v6030_v1 = vpop.f32.mrb[42].mxu0 }
0x2233   :  { %10406 = vmatmul.mubr.msk.f32.vlgmr.msra.gmra.mrb[42].mxu1 %vm140_vm0, %v5879_v7  ;;  %v10414_v23 = vpop.f32.mrb[43].mxu0 }
0x2234   :  { %10844 = vmatpush3.bf16.msra.mxu1 %v12488_v8  ;;  %10423 = vmatprep.mubr.msk.f32.mxu1 %vm11407_vm1, %v13315_v16 }
0x2235   :  { %10845 = vmatprep.subr.bf16.mxu1 %v13318_v14 }
0x2236   :  { %v6176_v22 = vpop.f32.mrb[44].mxu0 }
0x2237   :  { %v10432_v57 = vpop.f32.mrb[45].mxu0 }
0x2238   :  { %10847 = vmatpush3.bf16.msra.mxu1 %v12495_v56 }
0x2239   :  { %10854 = vmatprep.subr.bf16.mxu1 %v13318_v14 }
0x223a   :  { %v6250_v42 = vpop.f32.mrb[46].mxu0 }
0x223b   :  { %10424 = vmatmul.mubr.msk.f32.vlgmr.msra.gmra.mrb[44].mxu1 %vm4351_vm3, %v5730_v24  ;;  %v10439_v0 = vpop.f32.mrb[47].mxu0 }
0x223c   :  { %10856 = vmatpush3.bf16.msra.mxu1 %v11972_v19  ;;  %10444 = vmatprep.mubr.msk.f32.mxu1 %vm11407_vm1, %v13315_v16  ;;  %v6531_v0 = vpop.permute.xlu1 %6530 }
0x223d   :  { %10860 = vmatprep.subr.bf16.mxu1 %v13318_v14 }
0x223e   :  { %v6483_v27 = vpop.f32.mrb[48].mxu0 }
0x223f   :  { %10445 = vmatmul.mubr.msk.f32.vlgmr.msra.gmra.mrb[46].mxu1 %vm140_vm0, %v6107_v44  ;;  %v10453_v51 = vpop.f32.mrb[49].mxu0 }
0x2240   :  { %10862 = vmatpush3.bf16.msra.mxu1 %v11980_v46  ;;  %10458 = vmatprep.mubr.msk.f32.mxu1 %vm11407_vm1, %v13315_v16 }
0x2241   :  { %10869 = vmatprep.subr.bf16.mxu1 %v13318_v14 }
0x2243   :  { %10459 = vmatmul.mubr.msk.f32.vlgmr.msra.gmra.mrb[48].mxu1 %vm140_vm0, %v12593_v28 }
0x2244   :  { %10871 = vmatpush3.bf16.msra.mxu1 %v12370_v60  ;;  %10476 = vmatprep.mubr.msk.f32.mxu1 %vm11407_vm1, %v13315_v16 }
0x2245   :  { %10872 = vmatprep.subr.bf16.mxu1 %v13318_v14 }
0x2306   :  { %v12659_v15 = vpop.f32.mrb[42].mxu1 }
0x2307   :  { %v10407_v29 = vpop.f32.mrb[43].mxu1 }
0x230e   :  { %v6100_v4 = vpop.f32.mrb[44].mxu1 }
0x230f   :  { %v6101_v49 = vadd.f32 %v6100_v4, %v6030_v1  ;;  %v10425_v31 = vpop.f32.mrb[45].mxu1  ;;  %v12676_v4 = vld [vmem:[#allocation3] sm:$0xff] }
0x2311   :  { %v6180_v24 = vadd.f32 %v6176_v22, %v6101_v49 }
0x2312   :  { %v6413_v44 = vpop.f32.mrb[46].mxu1 }
0x2313   :  { %v12661_v63 = vadd.f32 %v6250_v42, %v6180_v24  ;;  %v6484_v40 = vadd.f32 %v6483_v27, %v6413_v44  ;;  %v10446_v28 = vpop.f32.mrb[47].mxu1  ;;  %v12672_v27 = vld [vmem:[%s13342_s14] ss:$0 sm:$0xff]  ;;  %v12680_v24 = vld [vmem:[#allocation3 + $0x8] sm:$0xff] }
0x2314   :  { %v6533_v51 = vmul.f32 %v12672_v27, %v6526_v13  ;;  %v6534_v31 = vmul.f32 %v12672_v27, %v6531_v0 }
0x2315   :  { %v6487_v50 = vadd.f32 %v12664_v47, %v6484_v40 }
0x2316   :  { %v6771_v54 = vpop.f32.mrb[48].mxu1 }
0x2317   :  { %v6495_v7 = vrot.slane %v6487_v50, %v11923_v39  ;;  %v10460_v23 = vpop.f32.mrb[49].mxu1 }
0x2319   :  { %v6496_v57 = vcombine.high %v6495_v7, %v6495_v7  ;;  %v6503_v1 = vrot.slane %v6495_v7, %v11923_v39  ;;  %v12684_v7 = vld [vmem:[%s13343_s19] ss:$0 sm:$0xff] }
0x231b   :  { %v6510_v22 = vrot.slane %v6496_v57, %v11923_v39  ;;  %v6514_v42 = vrot.slane %v6503_v1, %v12091_v41 }
0x231d   :  { %v6518_v29 = vrot.slane %v6510_v22, %v12091_v41  ;;  %v6521_v49 = vadd.f32 %v12676_v4, %v6514_v42 }
0x231f   :  { %v6522_v44 = vadd.f32 %v12680_v24, %v6518_v29  ;;  %v6535_v40 = vadd.f32 %v6533_v51, %v6521_v49 }
0x2321   :  { %v6536_v28 = vadd.f32 %v6534_v31, %v6522_v44  ;;  %11217 = vtanh.f32 %v6535_v40 }
0x2323   :  { %11219 = vtanh.f32 %v6536_v28 }
0x232b   :  { %v11218_v50 = vpop.eup %11217 }
0x232c   :  { %v6539_v13 = vmul.f32 %v12684_v7, %v11218_v50  ;;  %v6776_v50 = vrot.slane %v6771_v54, 4 }
0x232d   :  { %v11220_v23 = vpop.eup %11219 }
0x232e   :  { %v6541_v57 = vsel %vm4351_vm3, %v6539_v13, 0.0  ;;  %v6540_v1 = vmul.f32 %v12684_v7, %v11220_v23 }
0x232f   :  { %6542 = vadd.xlane.f32.xlu0 %v6541_v57 }
0x2330   :  { %v6544_v22 = vsel %vm4351_vm3, %v6540_v1, 0.0 }
0x2331   :  { %6545 = vadd.xlane.f32.xlu1 %v6544_v22  ;;  %v6778_v22 = vadd.f32 %v6776_v50, %v12131_v53 }
0x23bc   :  { %v6543_v42 = vpop.xlane.xlu0 %6542 }
0x23bd   :  { %v6552_v51 = vrot.slane %v6543_v42, %v12116_v62 }
0x23be   :  { %v6546_v0 = vpop.xlane.xlu1 %6545 }
0x23bf   :  { %v6556_v29 = vrot.slane %v6546_v0, %v12116_v62 }
0x23c1   :  { %v6557_v49 = vsel %vm4368_vm4, %v6556_v29, %v6552_v51 }
0x23c2   :  { %v6559_v31 = vsel %vm4371_vm5, %v6557_v49, -inf }
0x23c3   :  { %6560 = vmax.xlane.f32.xlu0 %v6559_v31 }
0x2450   :  { %v6561_v44 = vpop.xlane.xlu0 %6560 }
0x2451   :  { %v6566_v40 = vrot.slane %v6561_v44, %v12091_v41  ;;  %v6570_v28 = vrot.slane %v6561_v44, %v12125_v36 }
0x2453   :  { %v6573_v13 = vsub.f32 %v6543_v42, %v6566_v40  ;;  %v6574_v23 = vsub.f32 %v6546_v0, %v6570_v28  ;;  %v9725_v40 = vmul.f32 -1.442695, %v6778_v22 }
0x2455   :  { %v6575_v57 = vmul.f32 1.442695, %v6573_v13  ;;  %v6577_v1 = vmul.f32 1.442695, %v6574_v23 }
0x2457   :  { %11221 = vpow2.f32 %v6575_v57 }
0x2458   :  { %11223 = vpow2.f32 %v6577_v1 }
0x2459   :  { %11225 = vtanh.f32 %v6778_v22 }
0x245a   :  { %11227 = vpow2.f32 %v9725_v40 }
0x2461   :  { %v11222_v30 = vpop.eup %11221 }
0x2462   :  { %v11224_v51 = vpop.eup %11223  ;;  %6582 = vperm.xlu0 %11029, %v11222_v30  }
0x2463   :  { %6585 = vperm.xlu1 %11030, %v11224_v51   ;;  %v11226_v29 = vpop.eup %11225 }
0x2464   :  { %v11228_v23 = vpop.eup %11227 }
0x2465   :  { %v6782_v57 = vadd.f32 1.0, %v11228_v23 }
0x2466   :  { %6790 = vrot.lane.b32.xlu0 %v11226_v29, %s11409_s0 }
0x24e1   :  { %v6583_v49 = vpop.permute.xlu0 %6582 }
0x24e2   :  { %v6586_v31 = vpop.permute.xlu1 %6585  ;;  %v6590_v54 = vrot.slane %v6583_v49, %v12116_v62 }
0x24e3   :  { %v6594_v42 = vrot.slane %v6586_v31, %v12116_v62 }
0x24e5   :  { %v6595_v0 = vsel %vm4368_vm4, %v6594_v42, %v6590_v54  ;;  %v6791_v42 = vpop.permute.xlu0 %6790 }
0x24e6   :  { %v6597_v44 = vsel %vm4371_vm5, %v6595_v0, 0.0 }
0x24e7   :  { %6598 = vadd.xlane.f32.xlu1 %v6597_v44 }
0x2574   :  { %v6599_v28 = vpop.xlane.xlu1 %6598 }
0x2575   :  { %v6604_v50 = vrot.slane %v6599_v28, %v12091_v41  ;;  %v6608_v13 = vrot.slane %v6599_v28, %v12125_v36 }
0x2577   :  { %11229 = vrcp.f32 %v6604_v50 }
0x2578   :  { %11231 = vrcp.f32 %v6608_v13 }
0x2579   :  { %11233 = vrcp.f32 %v6782_v57 }
0x2581   :  { %v11230_v1 = vpop.eup %11229 }
0x2582   :  { %v11232_v29 = vpop.eup %11231  ;;  %v6612_v49 = vmul.f32 %v11230_v1, %v11222_v30  ;;  %v6786_v30 = vrot.slane %v12558_v35, 6 }
0x2583   :  { %v6614_v54 = vmul.f32 %v11232_v29, %v11224_v51  ;;  %v11234_v0 = vpop.eup %11233 }
0x2584   :  { %v6615_v31 = vmul.f32 %v6612_v49, %v12145_v37  ;;  %v6793_v44 = vmul.f32 %v11234_v0, %v6791_v42  ;;  %v6788_v23 = vmul.f32 %v11234_v0, %v6786_v30 }
0x2585   :  { %v6616_v22 = vmul.f32 %v6614_v54, %v12147_v33 }
0x2586   :  { %6620 = vperm.xlu0 %11029, %v6615_v31  }
0x258a   :  { %6623 = vperm.xlu0 %11029, %v6616_v22  }
0x258e   :  { %6795 = vrot.lane.b32.xlu0 %v6793_v44, %s11410_s5 }
0x2605   :  { %v6621_v40 = vpop.permute.xlu0 %6620 }
0x2606   :  { %v6628_v50 = vrot.slane %v6621_v40, %v12116_v62 }
0x2609   :  { %v6624_v28 = vpop.permute.xlu0 %6623 }
0x260a   :  { %v6632_v13 = vrot.slane %v6624_v28, %v12116_v62 }
0x260c   :  { %v6633_v51 = vsel %vm4368_vm4, %v6632_v13, %v6628_v50 }
0x260d   :  { %v6796_v57 = vpop.permute.xlu0 %6795  ;;  %v6635_v1 = vsel %vm4371_vm5, %v6633_v51, 0.0 }
0x260e   :  { %v12712_v29 = vadd.f32 %v6796_v57, %v6788_v23  ;;  %6636 = vadd.xlane.f32.xlu0 %v6635_v1 }
0x2610   :  { %11235 = vtanh.f32 %v12712_v29  ;;  %v7182_v57 = vrot.slane %v12712_v29, 4 }
0x261a   :  { %v11236_v49 = vpop.eup %11235 }
0x261b   :  { %6801 = vrot.lane.b32.xlu1 %v11236_v49, %s11411_s21 }
0x268d   :  { %v6802_v40 = vpop.permute.xlu1 %6801 }
0x268e   :  { %v6804_v30 = vmul.f32 %v11234_v0, %v6802_v40 }
0x2690   :  { %v6881_v51 = vrot.slane %v6804_v30, 4 }
0x269b   :  { %v6637_v54 = vpop.xlane.xlu0 %6636 }
0x269c   :  { %v6638_v42 = vadd.f32 1e-12, %v6637_v54 }
0x269e   :  { %v6643_v44 = vrot.slane %v6638_v42, %v12091_v41  ;;  %v6647_v35 = vrot.slane %v6638_v42, %v12125_v36 }
0x26a0   :  { %11237 = vrcp.f32 %v6643_v44 }
0x26a1   :  { %11239 = vrcp.f32 %v6647_v35 }
0x26aa   :  { %v11238_v28 = vpop.eup %11237 }
0x26ab   :  { %v11240_v50 = vpop.eup %11239  ;;  %v12718_v13 = vmul.f32 %v11238_v28, %v6615_v31 }
0x26ac   :  { %v12720_v23 = vmul.f32 %v11240_v50, %v6616_v22 }
0x26ad   :  { %13351 = vst [vmem:[#allocation21_spill] sm:$0xff] %v12718_v13  ;;  %6656 = vperm.xlu0 %11029, %v12718_v13   ;;  %v12729_v1 = vadd.f32 %v12718_v13, %v12575_v61 }
0x26ae   :  { %13352 = vst [vmem:[#allocation22_spill] sm:$0xff] %v12720_v23  ;;  %6661 = vperm.xlu1 %11030, %v12720_v23   ;;  %v12734_v31 = vadd.f32 %v12720_v23, %v12580_v59 }
0x26b2   :  { %6882 = vrot.lane.b32.xlu1 %v6881_v51, %s11412_s25 }
0x26b6   :  { %7183 = vrot.lane.b32.xlu1 %v7182_v57, %s11414_s29 }
0x26ba   :  { %7602 = vperm.xlu1 %11030, %v12729_v1  }
0x26be   :  { %7607 = vperm.xlu1 %11030, %v12734_v31  }
0x272c   :  { %v12737_v22 = vpop.permute.xlu0 %6656 }
0x272d   :  { %13353 = vst [vmem:[#allocation23_spill] sm:$0xff] %v12737_v22  ;;  %v12739_v0 = vpop.permute.xlu1 %6661  ;;  %v6664_v49 = vmul.f32 %v12737_v22, %v12416_v25 }
0x272e   :  { %13354 = vst [vmem:[#allocation24_spill] sm:$0xff] %v12739_v0  ;;  %v6665_v54 = vmul.f32 %v12739_v0, %v12420_v26 }
0x272f   :  { %v6666_v42 = vsel %vm4351_vm3, %v6664_v49, 0.0 }
0x2730   :  { %v6673_v44 = vsel %vm4351_vm3, %v6665_v54, 0.0  ;;  %v6667_v35 = vrot.slane %v6666_v42, 4 }
0x2731   :  { %v6674_v40 = vrot.slane %v6673_v44, 4  ;;  %v12747_v28 = vpop.permute.xlu1 %6882 }
0x2732   :  { %v6668_v50 = vadd.f32 %v6667_v35, %v6666_v42  ;;  %10477 = vmatmul.mubr.msk.f32.vlgmr.msra.gmra.mrb[50].mxu1 %vm140_vm0, %v12747_v28 }
0x2733   :  { %v6675_v30 = vadd.f32 %v6674_v40, %v6673_v44  ;;  %10874 = vmatpush3.bf16.msra.mxu1 %v12479_v48  ;;  %10483 = vmatprep.mubr.msk.f32.mxu1 %vm11407_vm1, %v13315_v16 }
0x2734   :  { %v6669_v25 = vrot.slane %v6668_v50, 2  ;;  %10878 = vmatprep.subr.bf16.mxu1 %v13318_v14 }
0x2735   :  { %v6676_v26 = vrot.slane %v6675_v30, 2 }
0x2736   :  { %v6670_v51 = vadd.f32 %v6669_v25, %v6668_v50 }
0x2737   :  { %v6677_v57 = vadd.f32 %v6676_v26, %v6675_v30 }
0x2738   :  { %v6671_v49 = vrot.slane %v6670_v51, 1 }
0x2739   :  { %v6678_v54 = vrot.slane %v6677_v57, 1 }
0x273a   :  { %v6672_v22 = vadd.f32 %v6671_v49, %v6670_v51 }
0x273b   :  { %v6679_v0 = vadd.f32 %v6678_v54, %v6677_v57 }
0x273d   :  { %v6807_v42 = vsel %vm4368_vm4, %v6679_v0, %v6672_v22  ;;  %v7184_v22 = vpop.permute.xlu1 %7183  ;;  %v7258_v0 = vrot.slane %v12615_v45, 4 }
0x273e   :  { %10470 = vmatmul.mubr.msk.f32.vlgmr.msra.gmra.mrb[50].mxu0 %vm4351_vm3, %v6807_v42 }
0x273f   :  { %10877 = vmatpush3.bf16.msra.mxu0 %v12436_v43  ;;  %10490 = vmatprep.mubr.msk.f32.mxu0 %vm11407_vm1, %v13315_v16 }
0x2740   :  { %10884 = vmatprep.subr.bf16.mxu0 %v13318_v14 }
0x2742   :  { %10491 = vmatmul.mubr.msk.f32.vlgmr.msra.gmra.mrb[52].mxu0 %vm140_vm0, %v12747_v28 }
0x2743   :  { %10886 = vmatpush3.bf16.msra.mxu0 %v12445_v21  ;;  %10508 = vmatprep.mubr.msk.f32.mxu0 %vm11407_vm1, %v13315_v16 }
0x2744   :  { %10887 = vmatprep.subr.bf16.mxu0 %v13318_v14 }
0x2746   :  { %10509 = vmatmul.mubr.msk.f32.vlgmr.msra.gmra.mrb[54].mxu0 %vm140_vm0, %v7184_v22 }
0x2747   :  { %10889 = vmatpush3.bf16.msra.mxu0 %v12455_v12  ;;  %10515 = vmatprep.mubr.msk.f32.mxu0 %vm11407_vm1, %v13315_v16 }
0x2748   :  { %10893 = vmatprep.subr.bf16.mxu0 %v13318_v14 }
0x274a   :  { %10516 = vmatmul.mubr.msk.f32.vlgmr.msra.gmra.mrb[56].mxu0 %vm140_vm0, %v7258_v0 }
0x274b   :  { %10895 = vmatpush3.bf16.msra.mxu0 %v12038_v32  ;;  %10529 = vmatprep.mubr.msk.f32.mxu0 %vm11407_vm1, %v13315_v16 }
0x274c   :  { %10899 = vmatprep.subr.bf16.mxu0 %v13318_v14 }
0x274e   :  { %10530 = vmatmul.mubr.msk.f32.vlgmr.msra.gmra.mrb[58].mxu0 %vm140_vm0, %v12747_v28 }
0x274f   :  { %10901 = vmatpush3.bf16.msra.mxu0 %v12386_v2  ;;  %10547 = vmatprep.mubr.msk.f32.mxu0 %vm11407_vm1, %v13315_v16 }
0x2750   :  { %10902 = vmatprep.subr.bf16.mxu0 %v13318_v14 }
0x2753   :  { %10904 = vmatpush3.bf16.msra.mxu0 %v12395_v11 }
0x2754   :  { %10911 = vmatprep.subr.bf16.mxu0 %v13318_v14 }
0x2805   :  { %v6952_v44 = vpop.f32.mrb[50].mxu1 }
0x2806   :  { %v10478_v35 = vpop.f32.mrb[51].mxu1 }
0x2811   :  { %v6876_v40 = vpop.f32.mrb[50].mxu0 }
0x2812   :  { %v6953_v50 = vadd.f32 %v6952_v44, %v6876_v40  ;;  %v10471_v30 = vpop.f32.mrb[51].mxu0 }
0x2814   :  { %v6956_v25 = vadd.f32 %v12486_v17, %v6953_v50 }
0x2815   :  { %v7107_v26 = vpop.f32.mrb[52].mxu0 }
0x2816   :  { %10484 = vmatmul.mubr.msk.f32.vlgmr.msra.gmra.mrb[52].mxu1 %vm140_vm0, %v6956_v25  ;;  %v10492_v51 = vpop.f32.mrb[53].mxu0 }
0x2817   :  { %10880 = vmatpush3.bf16.msra.mxu1 %v12488_v8  ;;  %10501 = vmatprep.mubr.msk.f32.mxu1 %vm11407_vm1, %v13315_v16 }
0x2818   :  { %10881 = vmatprep.subr.bf16.mxu1 %v13318_v14 }
0x2819   :  { %v7253_v57 = vpop.f32.mrb[54].mxu0 }
0x281a   :  { %v10510_v49 = vpop.f32.mrb[55].mxu0 }
0x281b   :  { %10883 = vmatpush3.bf16.msra.mxu1 %v12495_v56 }
0x281c   :  { %10890 = vmatprep.subr.bf16.mxu1 %v13318_v14 }
0x281d   :  { %v7327_v54 = vpop.f32.mrb[56].mxu0 }
0x281e   :  { %10502 = vmatmul.mubr.msk.f32.vlgmr.msra.gmra.mrb[54].mxu1 %vm4351_vm3, %v6807_v42  ;;  %v10517_v17 = vpop.f32.mrb[57].mxu0 }
0x281f   :  { %10892 = vmatpush3.bf16.msra.mxu1 %v11972_v19  ;;  %10522 = vmatprep.mubr.msk.f32.mxu1 %vm11407_vm1, %v13315_v16 }
0x2820   :  { %10896 = vmatprep.subr.bf16.mxu1 %v13318_v14 }
0x2821   :  { %v7560_v0 = vpop.f32.mrb[58].mxu0 }
0x2822   :  { %10523 = vmatmul.mubr.msk.f32.vlgmr.msra.gmra.mrb[56].mxu1 %vm140_vm0, %v7184_v22  ;;  %v10531_v44 = vpop.f32.mrb[59].mxu0 }
0x2823   :  { %10898 = vmatpush3.bf16.msra.mxu1 %v11980_v46  ;;  %10536 = vmatprep.mubr.msk.f32.mxu1 %vm11407_vm1, %v13315_v16  ;;  %v7603_v44 = vpop.permute.xlu1 %7602 }
0x2824   :  { %10905 = vmatprep.subr.bf16.mxu1 %v13318_v14 }
0x2826   :  { %10537 = vmatmul.mubr.msk.f32.vlgmr.msra.gmra.mrb[58].mxu1 %vm140_vm0, %v12747_v28 }
0x2827   :  { %10907 = vmatpush3.bf16.msra.mxu1 %v12370_v60  ;;  %10554 = vmatprep.mubr.msk.f32.mxu1 %vm11407_vm1, %v13315_v16 }
0x2828   :  { %10908 = vmatprep.subr.bf16.mxu1 %v13318_v14 }
0x28e9   :  { %v12810_v42 = vpop.f32.mrb[52].mxu1 }
0x28ea   :  { %13355 = vst [vmem:[#allocation25_spill] sm:$0xff] %v12810_v42  ;;  %v10485_v22 = vpop.f32.mrb[53].mxu1 }
0x28f1   :  { %v7177_v35 = vpop.f32.mrb[54].mxu1 }
0x28f2   :  { %v7178_v40 = vadd.f32 %v7177_v35, %v7107_v26  ;;  %v10503_v50 = vpop.f32.mrb[55].mxu1 }
0x28f4   :  { %v7257_v30 = vadd.f32 %v7253_v57, %v7178_v40  ;;  %v7608_v57 = vpop.permute.xlu1 %7607 }
0x28f5   :  { %v7490_v25 = vpop.f32.mrb[56].mxu1  ;;  %v7611_v40 = vmul.f32 %v12672_v27, %v7608_v57 }
0x28f6   :  { %v12812_v51 = vadd.f32 %v7327_v54, %v7257_v30  ;;  %v7561_v49 = vadd.f32 %v7560_v0, %v7490_v25  ;;  %v10524_v17 = vpop.f32.mrb[57].mxu1  ;;  %v7610_v54 = vmul.f32 %v12672_v27, %v7603_v44 }
0x28f8   :  { %v7564_v28 = vadd.f32 %v12664_v47, %v7561_v49 }
0x28f9   :  { %v7848_v23 = vpop.f32.mrb[58].mxu1 }
0x28fa   :  { %v7572_v16 = vrot.slane %v7564_v28, %v11923_v39  ;;  %v10538_v13 = vpop.f32.mrb[59].mxu1 }
0x28fc   :  { %v7573_v14 = vcombine.high %v7572_v16, %v7572_v16  ;;  %v7580_v42 = vrot.slane %v7572_v16, %v11923_v39 }
0x28fe   :  { %v7587_v22 = vrot.slane %v7573_v14, %v11923_v39  ;;  %v7591_v26 = vrot.slane %v7580_v42, %v12091_v41 }
0x2900   :  { %v7595_v0 = vrot.slane %v7587_v22, %v12091_v41  ;;  %v7598_v35 = vadd.f32 %v12676_v4, %v7591_v26 }
0x2902   :  { %v7599_v50 = vadd.f32 %v12680_v24, %v7595_v0  ;;  %v7612_v30 = vadd.f32 %v7610_v54, %v7598_v35 }
0x2904   :  { %v7613_v13 = vadd.f32 %v7611_v40, %v7599_v50  ;;  %11241 = vtanh.f32 %v7612_v30  ;;  %v7853_v50 = vrot.slane %v7848_v23, 2 }
0x2906   :  { %11243 = vtanh.f32 %v7613_v13 }
0x290e   :  { %v11242_v16 = vpop.eup %11241 }
0x290f   :  { %v7616_v14 = vmul.f32 %v12684_v7, %v11242_v16 }
0x2910   :  { %v11244_v25 = vpop.eup %11243 }
0x2911   :  { %v7618_v42 = vsel %vm4351_vm3, %v7616_v14, 0.0  ;;  %v7617_v49 = vmul.f32 %v12684_v7, %v11244_v25  ;;  %v7855_v25 = vadd.f32 %v7853_v50, %v12131_v53 }
0x2912   :  { %7619 = vadd.xlane.f32.xlu0 %v7618_v42 }
0x2913   :  { %v7621_v17 = vsel %vm4351_vm3, %v7617_v49, 0.0 }
0x2914   :  { %7622 = vadd.xlane.f32.xlu1 %v7621_v17 }
0x299f   :  { %v7620_v28 = vpop.xlane.xlu0 %7619 }
0x29a0   :  { %v7629_v22 = vrot.slane %v7620_v28, %v12116_v62 }
0x29a1   :  { %v7623_v44 = vpop.xlane.xlu1 %7622 }
0x29a2   :  { %v7633_v26 = vrot.slane %v7623_v44, %v12116_v62 }
0x29a4   :  { %v7634_v57 = vsel %vm4368_vm4, %v7633_v26, %v7629_v22 }
0x29a5   :  { %v7636_v54 = vsel %vm4371_vm5, %v7634_v57, -inf  ;;  %v9738_v57 = vmul.f32 -1.442695, %v7855_v25 }
0x29a6   :  { %7637 = vmax.xlane.f32.xlu0 %v7636_v54 }
0x2a33   :  { %v7638_v0 = vpop.xlane.xlu0 %7637 }
0x2a34   :  { %v7643_v35 = vrot.slane %v7638_v0, %v12091_v41  ;;  %v7647_v40 = vrot.slane %v7638_v0, %v12125_v36 }
0x2a36   :  { %v7650_v30 = vsub.f32 %v7620_v28, %v7643_v35  ;;  %v7651_v13 = vsub.f32 %v7623_v44, %v7647_v40 }
0x2a38   :  { %v7652_v16 = vmul.f32 1.442695, %v7650_v30  ;;  %v7654_v14 = vmul.f32 1.442695, %v7651_v13 }
0x2a3a   :  { %11245 = vpow2.f32 %v7652_v16 }
0x2a3b   :  { %11247 = vpow2.f32 %v7654_v14 }
0x2a3c   :  { %11249 = vtanh.f32 %v7855_v25 }
0x2a3d   :  { %11251 = vpow2.f32 %v9738_v57 }
0x2a44   :  { %v11246_v42 = vpop.eup %11245 }
0x2a45   :  { %v11248_v49 = vpop.eup %11247  ;;  %7659 = vperm.xlu0 %11029, %v11246_v42  }
0x2a46   :  { %7662 = vperm.xlu1 %11030, %v11248_v49   ;;  %v11250_v17 = vpop.eup %11249 }
0x2a47   :  { %v11252_v40 = vpop.eup %11251 }
0x2a48   :  { %v7859_v50 = vadd.f32 1.0, %v11252_v40 }
0x2a49   :  { %7867 = vrot.lane.b32.xlu0 %v11250_v17, %s11409_s0 }
0x2ac4   :  { %v7660_v22 = vpop.permute.xlu0 %7659 }
0x2ac5   :  { %v7663_v26 = vpop.permute.xlu1 %7662  ;;  %v7667_v23 = vrot.slane %v7660_v22, %v12116_v62 }
0x2ac6   :  { %v7671_v28 = vrot.slane %v7663_v26, %v12116_v62 }
0x2ac8   :  { %v7672_v44 = vsel %vm4368_vm4, %v7671_v28, %v7667_v23  ;;  %v7868_v22 = vpop.permute.xlu0 %7867 }
0x2ac9   :  { %v7674_v53 = vsel %vm4371_vm5, %v7672_v44, 0.0 }
0x2aca   :  { %7675 = vadd.xlane.f32.xlu1 %v7674_v53 }
0x2b57   :  { %v7676_v54 = vpop.xlane.xlu1 %7675 }
0x2b58   :  { %v7681_v0 = vrot.slane %v7676_v54, %v12091_v41  ;;  %v7685_v35 = vrot.slane %v7676_v54, %v12125_v36 }
0x2b5a   :  { %11253 = vrcp.f32 %v7681_v0 }
0x2b5b   :  { %11255 = vrcp.f32 %v7685_v35 }
0x2b5c   :  { %11257 = vrcp.f32 %v7859_v50 }
0x2b64   :  { %v11254_v30 = vpop.eup %11253 }
0x2b65   :  { %v11256_v13 = vpop.eup %11255  ;;  %v7689_v16 = vmul.f32 %v11254_v30, %v11246_v42  ;;  %v7863_v42 = vrot.slane %v12712_v29, 6 }
0x2b66   :  { %v7691_v17 = vmul.f32 %v11256_v13, %v11248_v49  ;;  %v11258_v26 = vpop.eup %11257 }
0x2b67   :  { %v7692_v14 = vmul.f32 %v7689_v16, %v12145_v37  ;;  %v7870_v23 = vmul.f32 %v11258_v26, %v7868_v22  ;;  %v7865_v54 = vmul.f32 %v11258_v26, %v7863_v42 }
0x2b68   :  { %v7693_v25 = vmul.f32 %v7691_v17, %v12147_v33 }
0x2b69   :  { %7697 = vperm.xlu0 %11029, %v7692_v14  }
0x2b6d   :  { %7700 = vperm.xlu0 %11029, %v7693_v25  }
0x2b71   :  { %7872 = vrot.lane.b32.xlu0 %v7870_v23, %s11410_s5 }
0x2be8   :  { %v7698_v28 = vpop.permute.xlu0 %7697 }
0x2be9   :  { %v7705_v53 = vrot.slane %v7698_v28, %v12116_v62 }
0x2bec   :  { %v7701_v44 = vpop.permute.xlu0 %7700 }
0x2bed   :  { %v7709_v57 = vrot.slane %v7701_v44, %v12116_v62 }
0x2bef   :  { %v7710_v49 = vsel %vm4368_vm4, %v7709_v57, %v7705_v53 }
0x2bf0   :  { %v7873_v0 = vpop.permute.xlu0 %7872  ;;  %v7712_v35 = vsel %vm4371_vm5, %v7710_v49, 0.0  ;;  %v12881_v49 = vld [vmem:[#allocation2] sm:$0xff] }
0x2bf1   :  { %v12850_v40 = vadd.f32 %v7873_v0, %v7865_v54  ;;  %7713 = vadd.xlane.f32.xlu0 %v7712_v35  ;;  %v12885_v35 = vld [vmem:[#allocation2 + $0x8] sm:$0xff] }
0x2bf3   :  { %11259 = vtanh.f32 %v12850_v40  ;;  %v13320_v42 = vrot.slane %v12850_v40, 6 }
0x2bfd   :  { %v11260_v50 = vpop.eup %11259 }
0x2bfe   :  { %7878 = vrot.lane.b32.xlu1 %v11260_v50, %s11411_s21 }
0x2c70   :  { %v7879_v17 = vpop.permute.xlu1 %7878 }
0x2c71   :  { %v7881_v44 = vmul.f32 %v11258_v26, %v7879_v17 }
0x2c73   :  { %v7958_v57 = vrot.slane %v7881_v44, 6  ;;  %v13361_v44 = vmov 0.0  }
0x2c7e   :  { %v7714_v30 = vpop.xlane.xlu0 %7713 }
0x2c7f   :  { %v7715_v13 = vadd.f32 1e-12, %v7714_v30 }
0x2c81   :  { %v7720_v16 = vrot.slane %v7715_v13, %v12091_v41  ;;  %v7724_v29 = vrot.slane %v7715_v13, %v12125_v36 }
0x2c83   :  { %11261 = vrcp.f32 %v7720_v16 }
0x2c84   :  { %11263 = vrcp.f32 %v7724_v29 }
0x2c8d   :  { %v11262_v22 = vpop.eup %11261 }
0x2c8e   :  { %v11264_v23 = vpop.eup %11263  ;;  %v12856_v28 = vmul.f32 %v11262_v22, %v7692_v14 }
0x2c8f   :  { %v12858_v53 = vmul.f32 %v11264_v23, %v7693_v25 }
0x2c90   :  { %13356 = vst [vmem:[#allocation26_spill] sm:$0xff] %v12856_v28  ;;  %7733 = vperm.xlu0 %11029, %v12856_v28   ;;  %v12869_v14 = vadd.f32 %v12856_v28, %v12729_v1 }
0x2c91   :  { %13357 = vst [vmem:[#allocation27_spill] sm:$0xff] %v12858_v53  ;;  %7738 = vperm.xlu1 %11030, %v12858_v53   ;;  %v12874_v25 = vadd.f32 %v12858_v53, %v12734_v31 }
0x2c93   :  { %13358 = vst [vmem:[#allocation28_spill] sm:$0xff] %v12874_v25 }
0x2c95   :  { %7959 = vrot.lane.b32.xlu1 %v7958_v57, %s11412_s25 }
0x2c99   :  { %8260 = vrot.lane.b32.xlu1 %v13320_v42, %s11414_s29  ;;  %v13362_v42 = vmov 0.0|0.0  }
0x2c9d   :  { %8679 = vperm.xlu1 %11030, %v12869_v14  }
0x2ca1   :  { %8684 = vperm.xlu1 %11030, %v12874_v25  }
0x2d0f   :  { %v12877_v26 = vpop.permute.xlu0 %7733 }
0x2d10   :  { %13359 = vst [vmem:[#allocation29_spill] sm:$0xff] %v12877_v26  ;;  %v12879_v54 = vpop.permute.xlu1 %7738  ;;  %v7741_v0 = vmul.f32 %v12881_v49, %v12877_v26 }
0x2d11   :  { %13360 = vst [vmem:[#allocation30_spill] sm:$0xff] %v12879_v54  ;;  %v7742_v50 = vmul.f32 %v12885_v35, %v12879_v54 }
0x2d12   :  { %v7743_v30 = vsel %vm4351_vm3, %v7741_v0, 0.0 }
0x2d13   :  { %v7750_v13 = vsel %vm4351_vm3, %v7742_v50, 0.0  ;;  %v7744_v16 = vrot.slane %v7743_v30, 4 }
0x2d14   :  { %v7751_v29 = vrot.slane %v7750_v13, 4  ;;  %v12891_v17 = vpop.permute.xlu1 %7959 }
0x2d15   :  { %v7745_v22 = vadd.f32 %v7744_v16, %v7743_v30  ;;  %10555 = vmatmul.mubr.msk.f32.vlgmr.msra.gmra.mrb[60].mxu1 %vm140_vm0, %v12891_v17 }
0x2d16   :  { %v7752_v23 = vadd.f32 %v7751_v29, %v7750_v13  ;;  %10910 = vmatpush3.bf16.msra.mxu1 %v12479_v48  ;;  %10561 = vmatprep.mubr.msk.f32.mxu1 %vm11407_vm1, %v13361_v44  ;;  %v12931_v13 = vld [vmem:[%s13350_s27] ss:$0 sm:$0xff] }
0x2d17   :  { %v7746_v57 = vrot.slane %v7745_v22, 2  ;;  %10914 = vmatprep.subr.bf16.mxu1 %v13362_v42 }
0x2d18   :  { %v7753_v0 = vrot.slane %v7752_v23, 2 }
0x2d19   :  { %v7747_v26 = vadd.f32 %v7746_v57, %v7745_v22 }
0x2d1a   :  { %v7754_v50 = vadd.f32 %v7753_v0, %v7752_v23 }
0x2d1b   :  { %v7748_v54 = vrot.slane %v7747_v26, 1 }
0x2d1c   :  { %v7755_v53 = vrot.slane %v7754_v50, 1 }
0x2d1d   :  { %v7749_v25 = vadd.f32 %v7748_v54, %v7747_v26 }
0x2d1e   :  { %v7756_v28 = vadd.f32 %v7755_v53, %v7754_v50  ;;  %v8335_v53 = vrot.slane %v12615_v45, 6 }
0x2d20   :  { %v7884_v30 = vsel %vm4368_vm4, %v7756_v28, %v7749_v25  ;;  %v8261_v28 = vpop.permute.xlu1 %8260 }
0x2d21   :  { %10548 = vmatmul.mubr.msk.f32.vlgmr.msra.gmra.mrb[60].mxu0 %vm4351_vm3, %v7884_v30 }
0x2d22   :  { %10913 = vmatpush3.bf16.msra.mxu0 %v12436_v43  ;;  %10568 = vmatprep.mubr.msk.f32.mxu0 %vm11407_vm1, %v13361_v44 }
0x2d23   :  { %10920 = vmatprep.subr.bf16.mxu0 %v13362_v42 }
0x2d25   :  { %10569 = vmatmul.mubr.msk.f32.vlgmr.msra.gmra.mrb[62].mxu0 %vm140_vm0, %v12891_v17 }
0x2d26   :  { %10922 = vmatpush3.bf16.msra.mxu0 %v12445_v21  ;;  %10586 = vmatprep.mubr.msk.f32.mxu0 %vm11407_vm1, %v13361_v44 }
0x2d27   :  { %10923 = vmatprep.subr.bf16.mxu0 %v13362_v42 }
0x2d29   :  { %10587 = vmatmul.mubr.msk.f32.vlgmr.msra.gmra.mrb[64].mxu0 %vm140_vm0, %v8261_v28 }
0x2d2a   :  { %10925 = vmatpush3.bf16.msra.mxu0 %v12455_v12  ;;  %10593 = vmatprep.mubr.msk.f32.mxu0 %vm11407_vm1, %v13361_v44 }
0x2d2b   :  { %10929 = vmatprep.subr.bf16.mxu0 %v13362_v42 }
0x2d2d   :  { %10594 = vmatmul.mubr.msk.f32.vlgmr.msra.gmra.mrb[66].mxu0 %vm140_vm0, %v8335_v53 }
0x2d2e   :  { %10931 = vmatpush3.bf16.msra.mxu0 %v12038_v32  ;;  %10607 = vmatprep.mubr.msk.f32.mxu0 %vm11407_vm1, %v13361_v44 }
0x2d2f   :  { %10935 = vmatprep.subr.bf16.mxu0 %v13362_v42 }
0x2d31   :  { %10608 = vmatmul.mubr.msk.f32.vlgmr.msra.gmra.mrb[68].mxu0 %vm140_vm0, %v12891_v17 }
0x2d32   :  { %10937 = vmatpush3.bf16.msra.mxu0 %v12386_v2  ;;  %10625 = vmatprep.mubr.msk.f32.mxu0 %vm11407_vm1, %v13361_v44 }
0x2d33   :  { %10938 = vmatprep.subr.bf16.mxu0 %v13362_v42 }
0x2d36   :  { %10940 = vmatpush3.bf16.msra.mxu0 %v12395_v11 }
0x2d37   :  { %10947 = vmatprep.subr.bf16.mxu0 %v13362_v42 }
0x2de8   :  { %v8029_v32 = vpop.f32.mrb[60].mxu1 }
0x2de9   :  { %v10556_v45 = vpop.f32.mrb[61].mxu1 }
0x2df4   :  { %v7953_v25 = vpop.f32.mrb[60].mxu0 }
0x2df5   :  { %v8030_v26 = vadd.f32 %v8029_v32, %v7953_v25  ;;  %v10549_v54 = vpop.f32.mrb[61].mxu0 }
0x2df7   :  { %v8033_v16 = vadd.f32 %v12931_v13, %v8030_v26 }
0x2df8   :  { %v8184_v29 = vpop.f32.mrb[62].mxu0 }
0x2df9   :  { %10562 = vmatmul.mubr.msk.f32.vlgmr.msra.gmra.mrb[62].mxu1 %vm140_vm0, %v8033_v16  ;;  %v10570_v2 = vpop.f32.mrb[63].mxu0 }
0x2dfa   :  { %10916 = vmatpush3.bf16.msra.mxu1 %v12488_v8  ;;  %10579 = vmatprep.mubr.msk.f32.mxu1 %vm11407_vm1, %v13361_v44 }
0x2dfb   :  { %10917 = vmatprep.subr.bf16.mxu1 %v13362_v42 }
0x2dfc   :  { %v8330_v11 = vpop.f32.mrb[64].mxu0 }
0x2dfd   :  { %v10588_v22 = vpop.f32.mrb[65].mxu0 }
0x2dfe   :  { %10919 = vmatpush3.bf16.msra.mxu1 %v12495_v56 }
0x2dff   :  { %10926 = vmatprep.subr.bf16.mxu1 %v13362_v42 }
0x2e00   :  { %v8404_v23 = vpop.f32.mrb[66].mxu0 }
0x2e01   :  { %10580 = vmatmul.mubr.msk.f32.vlgmr.msra.gmra.mrb[64].mxu1 %vm4351_vm3, %v7884_v30  ;;  %v10595_v57 = vpop.f32.mrb[67].mxu0 }
0x2e02   :  { %10928 = vmatpush3.bf16.msra.mxu1 %v11972_v19  ;;  %10600 = vmatprep.mubr.msk.f32.mxu1 %vm11407_vm1, %v13361_v44 }
0x2e03   :  { %10932 = vmatprep.subr.bf16.mxu1 %v13362_v42 }
0x2e04   :  { %v8637_v0 = vpop.f32.mrb[68].mxu0 }
0x2e05   :  { %10601 = vmatmul.mubr.msk.f32.vlgmr.msra.gmra.mrb[66].mxu1 %vm140_vm0, %v8261_v28  ;;  %v10609_v50 = vpop.f32.mrb[69].mxu0 }
0x2e06   :  { %10934 = vmatpush3.bf16.msra.mxu1 %v11980_v46  ;;  %10614 = vmatprep.mubr.msk.f32.mxu1 %vm11407_vm1, %v13361_v44 }
0x2e07   :  { %10941 = vmatprep.subr.bf16.mxu1 %v13362_v42 }
0x2e09   :  { %10615 = vmatmul.mubr.msk.f32.vlgmr.msra.gmra.mrb[68].mxu1 %vm140_vm0, %v12891_v17 }
0x2e0a   :  { %10943 = vmatpush3.bf16.msra.mxu1 %v12370_v60  ;;  %10632 = vmatprep.mubr.msk.f32.mxu1 %vm11407_vm1, %v13361_v44  ;;  %v8680_v60 = vpop.permute.xlu1 %8679 }
0x2e0b   :  { %10944 = vmatprep.subr.bf16.mxu1 %v13362_v42 }
0x2ecc   :  { %v12957_v19 = vpop.f32.mrb[62].mxu1 }
0x2ecd   :  { %v10563_v30 = vpop.f32.mrb[63].mxu1 }
0x2ed4   :  { %v8254_v28 = vpop.f32.mrb[64].mxu1 }
0x2ed5   :  { %v8255_v46 = vadd.f32 %v8254_v28, %v8184_v29  ;;  %v10581_v53 = vpop.f32.mrb[65].mxu1 }
0x2ed7   :  { %v8334_v32 = vadd.f32 %v8330_v11, %v8255_v46 }
0x2ed8   :  { %v8567_v45 = vpop.f32.mrb[66].mxu1 }
0x2ed9   :  { %v12959_v25 = vadd.f32 %v8404_v23, %v8334_v32  ;;  %v8638_v26 = vadd.f32 %v8637_v0, %v8567_v45  ;;  %v10602_v54 = vpop.f32.mrb[67].mxu1  ;;  %v8685_v23 = vpop.permute.xlu1 %8684  ;;  %v8687_v0 = vmul.f32 %v12672_v27, %v8680_v60 }
0x2eda   :  { %v8688_v46 = vmul.f32 %v12672_v27, %v8685_v23 }
0x2edb   :  { %v8641_v17 = vadd.f32 %v12664_v47, %v8638_v26 }
0x2edc   :  { %v8925_v16 = vpop.f32.mrb[68].mxu1 }
0x2edd   :  { %v8649_v2 = vrot.slane %v8641_v17, %v11923_v39  ;;  %v8929_v22 = vadd.f32 %v8925_v16, %v12079_v20  ;;  %v10616_v57 = vpop.f32.mrb[69].mxu1 }
0x2edf   :  { %v8650_v50 = vcombine.high %v8649_v2, %v8649_v2  ;;  %v8657_v30 = vrot.slane %v8649_v2, %v11923_v39 }
0x2ee1   :  { %v8664_v29 = vrot.slane %v8650_v50, %v11923_v39  ;;  %v8668_v11 = vrot.slane %v8657_v30, %v12091_v41 }
0x2ee3   :  { %v8672_v28 = vrot.slane %v8664_v29, %v12091_v41  ;;  %v8675_v47 = vadd.f32 %v12676_v4, %v8668_v11 }
0x2ee5   :  { %v8676_v53 = vadd.f32 %v12680_v24, %v8672_v28  ;;  %v8689_v20 = vadd.f32 %v8687_v0, %v8675_v47 }
0x2ee7   :  { %v8690_v32 = vadd.f32 %v8688_v46, %v8676_v53  ;;  %11265 = vtanh.f32 %v8689_v20 }
0x2ee9   :  { %11267 = vtanh.f32 %v8690_v32 }
0x2ef1   :  { %v11266_v45 = vpop.eup %11265 }
0x2ef2   :  { %v8693_v39 = vmul.f32 %v12684_v7, %v11266_v45 }
0x2ef3   :  { %v11268_v26 = vpop.eup %11267 }
0x2ef4   :  { %v8695_v54 = vsel %vm4351_vm3, %v8693_v39, 0.0  ;;  %v8694_v17 = vmul.f32 %v12684_v7, %v11268_v26 }
0x2ef5   :  { %8696 = vadd.xlane.f32.xlu0 %v8695_v54  ;;  %v9751_v54 = vmul.f32 -1.442695, %v8929_v22 }
0x2ef6   :  { %v8698_v60 = vsel %vm4351_vm3, %v8694_v17, 0.0 }
0x2ef7   :  { %8699 = vadd.xlane.f32.xlu1 %v8698_v60 }
0x2f82   :  { %v8697_v4 = vpop.xlane.xlu0 %8696 }
0x2f83   :  { %v8706_v24 = vrot.slane %v8697_v4, %v12116_v62 }
0x2f84   :  { %v8700_v27 = vpop.xlane.xlu1 %8699 }
0x2f85   :  { %v8710_v16 = vrot.slane %v8700_v27, %v12116_v62 }
0x2f87   :  { %v8711_v2 = vsel %vm4368_vm4, %v8710_v16, %v8706_v24 }
0x2f88   :  { %v8713_v57 = vsel %vm4371_vm5, %v8711_v2, -inf }
0x2f89   :  { %8714 = vmax.xlane.f32.xlu0 %v8713_v57 }
0x3016   :  { %v8715_v50 = vpop.xlane.xlu0 %8714 }
0x3017   :  { %v8720_v30 = vrot.slane %v8715_v50, %v12091_v41  ;;  %v8724_v7 = vrot.slane %v8715_v50, %v12125_v36 }
0x3019   :  { %v8727_v29 = vsub.f32 %v8697_v4, %v8720_v30  ;;  %v8728_v11 = vsub.f32 %v8700_v27, %v8724_v7 }
0x301b   :  { %v8729_v23 = vmul.f32 1.442695, %v8727_v29  ;;  %v8731_v0 = vmul.f32 1.442695, %v8728_v11 }
0x301d   :  { %11269 = vpow2.f32 %v8729_v23 }
0x301e   :  { %11271 = vpow2.f32 %v8731_v0 }
0x301f   :  { %11273 = vtanh.f32 %v8929_v22 }
0x3020   :  { %11275 = vpow2.f32 %v9751_v54 }
0x3027   :  { %v11270_v28 = vpop.eup %11269 }
0x3028   :  { %v11272_v47 = vpop.eup %11271  ;;  %8736 = vperm.xlu0 %11029, %v11270_v28  }
0x3029   :  { %8739 = vperm.xlu1 %11030, %v11272_v47   ;;  %v11274_v46 = vpop.eup %11273 }
0x302a   :  { %v11276_v27 = vpop.eup %11275 }
0x302b   :  { %v8933_v24 = vadd.f32 1.0, %v11276_v27 }
0x302c   :  { %8940 = vrot.lane.b32.xlu0 %v11274_v46, %s11409_s0 }
0x30a7   :  { %v8737_v53 = vpop.permute.xlu0 %8736 }
0x30a8   :  { %v8740_v20 = vpop.permute.xlu1 %8739  ;;  %v8744_v32 = vrot.slane %v8737_v53, %v12116_v62 }
0x30a9   :  { %v8748_v45 = vrot.slane %v8740_v20, %v12116_v62 }
0x30ab   :  { %v8749_v39 = vsel %vm4368_vm4, %v8748_v45, %v8744_v32  ;;  %v8941_v7 = vpop.permute.xlu0 %8940 }
0x30ac   :  { %v8751_v26 = vsel %vm4371_vm5, %v8749_v39, 0.0 }
0x30ad   :  { %8752 = vadd.xlane.f32.xlu1 %v8751_v26 }
0x313a   :  { %v8753_v17 = vpop.xlane.xlu1 %8752 }
0x313b   :  { %v8758_v60 = vrot.slane %v8753_v17, %v12091_v41  ;;  %v8762_v4 = vrot.slane %v8753_v17, %v12125_v36 }
0x313d   :  { %11277 = vrcp.f32 %v8758_v60 }
0x313e   :  { %11279 = vrcp.f32 %v8762_v4 }
0x313f   :  { %11281 = vrcp.f32 %v8933_v24 }
0x3147   :  { %v11278_v16 = vpop.eup %11277 }
0x3148   :  { %v11280_v2 = vpop.eup %11279  ;;  %v8766_v57 = vmul.f32 %v11278_v16, %v11270_v28  ;;  %v13363_v28 = vrot.slane %v12850_v40, 6 }
0x3149   :  { %v8768_v30 = vmul.f32 %v11280_v2, %v11272_v47  ;;  %v11282_v29 = vpop.eup %11281  ;;  %v11350_v2 = vld [vmem:[%s13344_s24] sm:$0x3] }
0x314a   :  { %v8769_v50 = vmul.f32 %v8766_v57, %v12145_v37  ;;  %v8943_v11 = vmul.f32 %v11282_v29, %v8941_v7  ;;  %v8938_v20 = vmul.f32 %v11282_v29, %v13363_v28  ;;  %v4089_v57 = vrot.slane %v11350_v2, %v12091_v41 }
0x314b   :  { %v8770_v22 = vmul.f32 %v8768_v30, %v12147_v33  ;;  %v4096_v30 = vrot.slane %v11350_v2, %v12125_v36  ;;  %v11416_v7 = vmov 1  }
0x314c   :  { %8774 = vperm.xlu0 %11029, %v8769_v50  }
0x3150   :  { %8777 = vperm.xlu0 %11029, %v8770_v22  }
0x3154   :  { %8945 = vrot.lane.b32.xlu0 %v8943_v11, %s11410_s5 }
0x31cb   :  { %v8775_v23 = vpop.permute.xlu0 %8774 }
0x31cc   :  { %v8782_v46 = vrot.slane %v8775_v23, %v12116_v62 }
0x31cf   :  { %v8778_v0 = vpop.permute.xlu0 %8777 }
0x31d0   :  { %v8786_v53 = vrot.slane %v8778_v0, %v12116_v62 }
0x31d2   :  { %v8787_v37 = vsel %vm4368_vm4, %v8786_v53, %v8782_v46 }
0x31d3   :  { %v8946_v47 = vpop.permute.xlu0 %8945  ;;  %v8789_v33 = vsel %vm4371_vm5, %v8787_v37, 0.0 }
0x31d4   :  { %v12998_v32 = vadd.f32 %v8946_v47, %v8938_v20  ;;  %8790 = vadd.xlane.f32.xlu0 %v8789_v33 }
0x31d6   :  { %11283 = vtanh.f32 %v12998_v32 }
0x31e0   :  { %v11284_v45 = vpop.eup %11283 }
0x31e1   :  { %8951 = vrot.lane.b32.xlu1 %v11284_v45, %s11411_s21 }
0x3253   :  { %v8952_v24 = vpop.permute.xlu1 %8951 }
0x3254   :  { %v8954_v16 = vmul.f32 %v11282_v29, %v8952_v24  ;;  %v13025_v29 = vld [vmem:[#allocation4] ss:$0 sm:$0xff] }
0x3255   :  { %v5172_v11 = vadd.f32 %v13025_v29, %v12520_v52 }
0x3257   :  { %v9706_v23 = vmul.f32 -1.442695, %v5172_v11 }
0x3261   :  { %v8791_v39 = vpop.xlane.xlu0 %8790 }
0x3262   :  { %v8792_v26 = vadd.f32 1e-12, %v8791_v39 }
0x3264   :  { %v8797_v54 = vrot.slane %v8792_v26, %v12091_v41  ;;  %v8801_v40 = vrot.slane %v8792_v26, %v12125_v36 }
0x3266   :  { %11285 = vrcp.f32 %v8797_v54 }
0x3267   :  { %11287 = vrcp.f32 %v8801_v40 }
0x3268   :  { %11289 = vpow2.f32 %v9706_v23 }
0x3270   :  { %v11286_v17 = vpop.eup %11285 }
0x3271   :  { %v11288_v60 = vpop.eup %11287  ;;  %v13004_v4 = vmul.f32 %v11286_v17, %v8769_v50  ;;  %v13017_v50 = vld [vmem:[%s13364_s4] ss:$0 sm:$0xff] }
0x3272   :  { %v13006_v27 = vmul.f32 %v11288_v60, %v8770_v22  ;;  %v13021_v22 = vadd.f32 %v13017_v50, %v12518_v10  ;;  %v11290_v26 = vpop.eup %11289 }
0x3273   :  { %8810 = vperm.xlu0 %11029, %v13004_v4   ;;  %v5176_v24 = vadd.f32 1.0, %v11290_v26 }
0x3274   :  { %8815 = vperm.xlu1 %11030, %v13006_v27  }
0x3275   :  { %11291 = vrcp.f32 %v5176_v24 }
0x3277   :  { %4520 = vperm.xlu0 %11029, %v12365_v9   ;;  %v4868_v9 = vsel %vm4867_vm9, %v13021_v22, -inf }
0x3278   :  { %9031 = vrot.lane.b32.xlu1 %v8954_v16, %s11412_s25 }
0x327b   :  { %11031 = vset.pattern.permute.xlu0 %v11416_v7 }
0x327c   :  { %4091 = vbcast.lane.b32.xlu1 %v4089_v57, 256 }
0x3280   :  { %4098 = vbcast.lane.b32.xlu1 %v4096_v30, 256 }
0x3284   :  { %4517 = vperm.xlu1 %11030, %v12361_v6  }
0x3296   :  { %4869 = vmax.xlane.f32.xlu0 %v4868_v9 }
0x32f2   :  { %v8811_v6 = vpop.permute.xlu0 %8810 }
0x32f3   :  { %v8816_v0 = vpop.permute.xlu1 %8815  ;;  %v8818_v46 = vmul.f32 %v12881_v49, %v8811_v6  ;;  %v9495_v10 = vrot.slane %v8811_v6, %v12116_v62 }
0x32f4   :  { %v8819_v53 = vmul.f32 %v12885_v35, %v8816_v0  ;;  %v9499_v28 = vrot.slane %v8816_v0, %v12116_v62 }
0x32f5   :  { %v8820_v20 = vsel %vm4351_vm3, %v8818_v46, 0.0 }
0x32f6   :  { %v8827_v37 = vsel %vm4351_vm3, %v8819_v53, 0.0  ;;  %v8821_v47 = vrot.slane %v8820_v20, 4  ;;  %v13036_v33 = vsel %vm4368_vm4, %v9499_v28, %v9495_v10 }
0x32f7   :  { %v8828_v52 = vrot.slane %v8827_v37, 4  ;;  %v9032_v45 = vpop.permute.xlu1 %9031 }
0x32f8   :  { %v8822_v39 = vadd.f32 %v8821_v47, %v8820_v20  ;;  %10633 = vmatmul.mubr.msk.f32.vlgmr.msra.gmra.mrb[70].mxu1 %vm140_vm0, %v9032_v45 }
0x32f9   :  { %v8829_v49 = vadd.f32 %v8828_v52, %v8827_v37  ;;  %10946 = vmatpush3.bf16.msra.mxu1 %v12479_v48  ;;  %10639 = vmatprep.mubr.msk.f32.mxu1 %vm11407_vm1, %v13361_v44  ;;  %v4521_v48 = vpop.permute.xlu0 %4520 }
0x32fa   :  { %v8823_v35 = vrot.slane %v8822_v39, 2  ;;  %10950 = vmatprep.subr.bf16.mxu1 %v13362_v42  ;;  %v4529_v23 = vrot.slane %v4521_v48, %v12116_v62 }
0x32fb   :  { %v8830_v54 = vrot.slane %v8829_v49, 2  ;;  %v13043_v40 = vpop.permute.xlu1 %4091 }
0x32fc   :  { %v8824_v17 = vadd.f32 %v8823_v35, %v8822_v39  ;;  %v13366_v39 = vmov 0   ;;  %vm4102_vm11 = vcmp.eq.s32.totalorder %v13043_v40, %v12112_v18 }
0x32fd   :  { %v8831_v60 = vadd.f32 %v8830_v54, %v8829_v49  ;;  %v5190_v49 = vrot.slane %v12414_v34, %v12116_v62  ;;  %v11351_v34 = vld [vmem:[%s11440_s9 + $0x8] sm:$0x3]  ;;  %s11417_s9 = smov 127  }
0x32fe   :  { %v8825_v16 = vrot.slane %v8824_v17, 1 }
0x32ff   :  { %v8832_v2 = vrot.slane %v8831_v60, 1  ;;  %v13045_v57 = vpop.permute.xlu1 %4098 }
0x3300   :  { %v8826_v30 = vadd.f32 %v8825_v16, %v8824_v17  ;;  %vm4103_vm13 = vcmp.eq.s32.totalorder %v13045_v57, %v12112_v18 }
0x3301   :  { %v8833_v9 = vadd.f32 %v8832_v2, %v8831_v60 }
0x3303   :  { %v4518_v7 = vpop.permute.xlu1 %4517  ;;  %v13048_v11 = vsel %vm4368_vm4, %v8833_v9, %v8826_v30 }
0x3304   :  { %v4525_v6 = vrot.slane %v4518_v7, %v12116_v62  ;;  %10626 = vmatmul.mubr.msk.f32.vlgmr.msra.gmra.mrb[70].mxu0 %vm4351_vm3, %v13048_v11 }
0x3305   :  { %10949 = vmatpush3.bf16.msra.mxu0 %v12436_v43  ;;  %10646 = vmatprep.mubr.msk.f32.mxu0 %vm11407_vm1, %v13361_v44  ;;  %v11292_v43 = vpop.eup %11291 }
0x3306   :  { %v4530_v0 = vsel %vm4368_vm4, %v4529_v23, %v4525_v6  ;;  %10956 = vmatprep.subr.bf16.mxu0 %v13362_v42  ;;  %v5179_v10 = vmax.f32 %v11292_v43, 0.001 }
0x3307   :  { %v4532_v46 = vsel %vm4371_vm5, %v4530_v0, 0.0 }
0x3308   :  { %10647 = vmatmul.mubr.msk.f32.vlgmr.msra.gmra.mrb[72].mxu0 %vm140_vm0, %v9032_v45  ;;  %4533 = vadd.xlane.f32.xlu1 %v4532_v46  ;;  %v13065_v53 = vmin.f32 %v5179_v10, 0.999  ;;  %v13073_v45 = vld [vmem:[%s13365_s15] sm:$0x3] }
0x3309   :  { %10958 = vmatpush3.bf16.msra.mxu0 %v12445_v21  ;;  %10664 = vmatprep.mubr.msk.f32.mxu0 %vm11407_vm1, %v13361_v44  ;;  %vm5256_vm15 = vcmp.ne.s32.totalorder %v13073_v45, 0 }
0x330a   :  { %10959 = vmatprep.subr.bf16.mxu0 %v13362_v42  ;;  %v5181_v28 = vsub.f32 1.0, %v13065_v53 }
0x3319   :  { %5184 = vperm.xlu1 %11030, %v5181_v28  }
0x3323   :  { %v4870_v20 = vpop.xlane.xlu0 %4869 }
0x3324   :  { %v4871_v37 = vsub.f32 %v13021_v22, %v4870_v20  ;;  %v5194_v22 = vrot.slane %v12422_v58, %v12116_v62  ;;  %v5950_v20 = vadd.f32 %v13017_v50, %v12659_v15  ;;  %v13121_v15 = vsel %vm4103_vm13, 1.0, %v13361_v44 }
0x3326   :  { %v4872_v47 = vmul.f32 1.442695, %v4871_v37  ;;  %v5195_v26 = vsel %vm4368_vm4, %v5194_v22, %v5190_v49  ;;  %v5953_v37 = vsel %vm4867_vm9, %v5950_v20, -inf }
0x3328   :  { %11293 = vpow2.f32 %v4872_v47 }
0x3332   :  { %v11294_v52 = vpop.eup %11293 }
0x3333   :  { %v4874_v21 = vsel %vm4867_vm9, %v11294_v52, 0.0 }
0x3334   :  { %4875 = vadd.xlane.f32.xlu0 %v4874_v21 }
0x334a   :  { %9331 = vrot.lane.b32.xlu0 %v12998_v32, %s11414_s29 }
0x334e   :  { %5230 = vperm.xlu0 %11031, %v13073_v45  }
0x3352   :  { %11032 = vset.pattern.permute.xlu0 %v13366_v39 }
0x3395   :  { %v13081_v35 = vpop.xlane.xlu1 %4533 }
0x3399   :  { %v5185_v54 = vpop.permute.xlu1 %5184 }
0x339a   :  { %v5197_v17 = vmul.f32 %v5195_v26, %v5185_v54 }
0x339c   :  { %v5201_v32 = vrot.slane %v5197_v17, %v12091_v41  ;;  %v5208_v60 = vrot.slane %v5197_v17, %v12125_v36 }
0x339e   :  { %5203 = vbcast.lane.b32.xlu1 %v5201_v32, 256 }
0x33a2   :  { %5210 = vbcast.lane.b32.xlu1 %v5208_v60, 256 }
0x33c1   :  { %v4876_v24 = vpop.xlane.xlu0 %4875 }
0x33c2   :  { %11295 = vrcp.f32 %v4876_v24 }
0x33c5   :  { %v9332_v16 = vpop.permute.xlu0 %9331 }
0x33c6   :  { %10665 = vmatmul.mubr.msk.f32.vlgmr.msra.gmra.mrb[74].mxu0 %vm140_vm0, %v9332_v16 }
0x33c7   :  { %10961 = vmatpush3.bf16.msra.mxu0 %v12455_v12  ;;  %10671 = vmatprep.mubr.msk.f32.mxu0 %vm11407_vm1, %v13361_v44 }
0x33ca   :  { %10672 = vmatmul.mubr.msk.f32.vlgmr.msra.gmra.mrb[76].mxu0 %vm140_vm0, %v11351_v34 }
0x33cb   :  { %v9101_v58 = vpop.f32.mrb[70].mxu1 }
0x33cc   :  { %v11296_v2 = vpop.eup %11295  ;;  %v10634_v30 = vpop.f32.mrb[71].mxu1 }
0x33cd   :  { %v5231_v9 = vpop.permute.xlu0 %5230  ;;  %v4878_v48 = vmul.f32 %v11296_v2, %v11294_v52 }
0x33ce   :  { %vm5232_vm10 = vcmp.eq.s32.totalorder %v5231_v9, %v12112_v18 }
0x33cf   :  { %v9707_v7 = vsel %vm5232_vm10, 1.0, %v13361_v44 }
0x33d0   :  { %v5250_v23 = vmul.f32 %v9707_v7, %v4878_v48  ;;  %v5236_v60 = vrot.slane %v9707_v7, 1  ;;  %v13129_v48 = vsel %vm5256_vm15, 1.0, %v13361_v44 }
0x33d2   :  { %v5251_v6 = vsel %vm4867_vm9, %v5250_v23, 0.0  ;;  %v5606_v23 = vmin.f32 %v12566_v3, %v12580_v59 }
0x33d3   :  { %5252 = vadd.xlane.f32.xlu0 %v5251_v6 }
0x33d7   :  { %v9026_v12 = vpop.f32.mrb[70].mxu0 }
0x33d8   :  { %v9102_v0 = vadd.f32 %v9101_v58, %v9026_v12  ;;  %v10627_v46 = vpop.f32.mrb[71].mxu0 }
0x33da   :  { %v9105_v43 = vadd.f32 %v12931_v13, %v9102_v0  ;;  %v5605_v13 = vmin.f32 %v12564_v38, %v12575_v61 }
0x33db   :  { %v13096_v10 = vpop.f32.mrb[72].mxu0 }
0x33dc   :  { %10640 = vmatmul.mubr.msk.f32.vlgmr.msra.gmra.mrb[72].mxu1 %vm140_vm0, %v9105_v43  ;;  %v10648_v28 = vpop.f32.mrb[73].mxu0  ;;  %v6255_v43 = vadd.f32 %v13025_v29, %v12661_v63 }
0x33dd   :  { %10952 = vmatpush3.bf16.msra.mxu1 %v12488_v8  ;;  %10657 = vmatprep.mubr.msk.f32.mxu1 %vm11407_vm1, %v13361_v44  ;;  %v13114_v8 = vsel %vm4102_vm11, 1.0, %v13361_v44 }
0x33de   :  { %10953 = vmatprep.subr.bf16.mxu1 %v13362_v42 }
0x33e1   :  { %10955 = vmatpush3.bf16.msra.mxu1 %v12495_v56 }
0x33e4   :  { %10658 = vmatmul.mubr.msk.f32.vlgmr.msra.gmra.mrb[74].mxu1 %vm4351_vm3, %v13048_v11 }
0x33e9   :  { %5610 = vperm.xlu0 %11032, %v5605_v13   ;;  %v9720_v13 = vmul.f32 -1.442695, %v6255_v43 }
0x33eb   :  { %11297 = vpow2.f32 %v9720_v13 }
0x3408   :  { %5954 = vmax.xlane.f32.xlu0 %v5953_v37 }
0x3410   :  { %v5204_v56 = vpop.permute.xlu1 %5203 }
0x3411   :  { %v5212_v38 = vmul.f32 %v13114_v8, %v5204_v56 }
0x3413   :  { %v5215_v61 = vsel %vm5214_vm12, %v5212_v38, 0.0 }
0x3414   :  { %v5216_v42 = vrot.slane %v5215_v61, 4  ;;  %v5211_v11 = vpop.permute.xlu1 %5210 }
0x3415   :  { %v5213_v47 = vmul.f32 %v13121_v15, %v5211_v11 }
0x3416   :  { %v5217_v40 = vadd.f32 %v5216_v42, %v5215_v61 }
0x3417   :  { %v5222_v52 = vsel %vm5214_vm12, %v5213_v47, 0.0 }
0x3418   :  { %v5218_v21 = vrot.slane %v5217_v40, 2  ;;  %v5223_v49 = vrot.slane %v5222_v52, 4 }
0x341a   :  { %v5219_v22 = vadd.f32 %v5218_v21, %v5217_v40  ;;  %v5224_v26 = vadd.f32 %v5223_v49, %v5222_v52  ;;  %v11298_v49 = vpop.eup %11297 }
0x341c   :  { %v5225_v54 = vrot.slane %v5224_v26, 2  ;;  %v5220_v57 = vrot.slane %v5219_v22, 1 }
0x341e   :  { %v5226_v17 = vadd.f32 %v5225_v54, %v5224_v26  ;;  %v5221_v24 = vadd.f32 %v5220_v57, %v5219_v22  ;;  %v6259_v54 = vadd.f32 1.0, %v11298_v49 }
0x3420   :  { %v5227_v32 = vrot.slane %v5226_v17, 1  ;;  %v5239_v58 = vmul.f32 %v9707_v7, %v5221_v24 }
0x3422   :  { %v5228_v16 = vadd.f32 %v5227_v32, %v5226_v17 }
0x3424   :  { %v5240_v34 = vmul.f32 %v5236_v60, %v5228_v16 }
0x3426   :  { %v5243_v2 = vrot.slane %v5240_v34, 7 }
0x3428   :  { %v5244_v30 = vsel %vm4368_vm4, %v5243_v2, %v5239_v58 }
0x3429   :  { %v5247_v9 = vsel %vm5246_vm14, %v5244_v30, 0.0 }
0x342a   :  { %5248 = vadd.xlane.f32.xlu1 %v5247_v9 }
0x343b   :  { %5265 = vrot.lane.b32.xlu1 %v13129_v48, %s11417_s9 }
0x343f   :  { %5613 = vperm.xlu1 %11030, %v5606_v23  }
0x3460   :  { %v5253_v46 = vpop.xlane.xlu0 %5252 }
0x3461   :  { %v5254_v42 = vmul.f32 %v5253_v46, %v13065_v53  ;;  %v6273_v46 = vrot.slane %v12583_v5, %v12116_v62 }
0x3468   :  { %v5611_v28 = vpop.permute.xlu0 %5610 }
0x3495   :  { %v5955_v37 = vpop.xlane.xlu0 %5954 }
0x3496   :  { %v5956_v61 = vsub.f32 %v5950_v20, %v5955_v37  ;;  %v5618_v20 = vrot.slane %v5611_v28, %v12116_v62 }
0x3498   :  { %v5957_v3 = vmul.f32 1.442695, %v5956_v61 }
0x3499   :  { %v9401_v7 = vpop.f32.mrb[74].mxu0 }
0x349a   :  { %v10666_v6 = vpop.f32.mrb[75].mxu0  ;;  %11299 = vpow2.f32 %v5957_v3 }
0x349b   :  { %v11418_v6 = vmov 2  }
0x349d   :  { %v9472_v12 = vpop.f32.mrb[76].mxu0 }
0x349e   :  { %v10673_v0 = vpop.f32.mrb[77].mxu0 }
0x349f   :  { %v6277_v0 = vrot.slane %v12585_v55, %v12116_v62 }
0x34a1   :  { %v6278_v43 = vsel %vm4368_vm4, %v6277_v0, %v6273_v46  ;;  %v13367_v46 = vld [vmem:[#allocation21_spill] sm:$0xff] }
0x34a4   :  { %v11300_v32 = vpop.eup %11299 }
0x34a5   :  { %v5959_v16 = vsel %vm4867_vm9, %v11300_v32, 0.0 }
0x34af   :  { %v13136_v56 = vpop.f32.mrb[72].mxu1 }
0x34b0   :  { %v10641_v38 = vpop.f32.mrb[73].mxu1 }
0x34b7   :  { %v9326_v59 = vpop.f32.mrb[74].mxu1  ;;  %v5249_v11 = vpop.xlane.xlu1 %5248 }
0x34b8   :  { %v9327_v47 = vadd.f32 %v9326_v59, %v13096_v10  ;;  %v10659_v40 = vpop.f32.mrb[75].mxu1  ;;  %v5255_v52 = vadd.f32 %v5254_v42, %v5249_v11 }
0x34ba   :  { %v5259_v21 = vadd.f32 1e-12, %v5255_v52  ;;  %v9405_v63 = vadd.f32 %v9401_v7, %v9327_v47 }
0x34bb   :  { %v5266_v22 = vpop.permute.xlu1 %5265 }
0x34bc   :  { %11301 = vlog2.f32 %v5259_v21  ;;  %v13140_v26 = vadd.f32 %v9472_v12, %v9405_v63 }
0x34bd   :  { %11303 = vrcp.f32 %v6259_v54 }
0x34bf   :  { %v5614_v57 = vpop.permute.xlu1 %5613 }
0x34c0   :  { %v5622_v53 = vrot.slane %v5614_v57, %v12116_v62 }
0x34c2   :  { %v5623_v17 = vsel %vm4368_vm4, %v5622_v53, %v5618_v20 }
0x34c3   :  { %v5625_v10 = vsel %vm4371_vm5, %v5623_v17, 0.0 }
0x34c4   :  { %5626 = vadd.xlane.f32.xlu1 %v5625_v10 }
0x34c6   :  { %v11302_v60 = vpop.eup %11301 }
0x34c7   :  { %v5261_v24 = vmul.f32 0.6931472, %v11302_v60  ;;  %v11304_v2 = vpop.eup %11303 }
0x34c8   :  { %5960 = vadd.xlane.f32.xlu1 %v5959_v16  ;;  %v6262_v9 = vmax.f32 %v11304_v2, 0.001 }
0x34c9   :  { %v5262_v34 = vsub.f32 0.0, %v5261_v24 }
0x34ca   :  { %v13150_v23 = vmin.f32 %v6262_v9, 0.999 }
0x34cb   :  { %v5263_v58 = vadd.f32 %v5262_v34, %v13081_v35 }
0x34cc   :  { %v6264_v7 = vsub.f32 1.0, %v13150_v23 }
0x34cd   :  { %v13148_v30 = vmul.f32 %v5266_v22, %v5263_v58 }
0x34d9   :  { %6267 = vperm.xlu1 %11030, %v6264_v7  }
0x34dd   :  { %11033 = vset.pattern.permute.xlu1 %v11418_v6 }
0x3551   :  { %v13153_v12 = vpop.xlane.xlu1 %5626 }
0x3555   :  { %v5961_v35 = vpop.xlane.xlu1 %5960 }
0x3556   :  { %11305 = vrcp.f32 %v5961_v35  ;;  %v13368_v35 = vld [vmem:[#allocation22_spill] sm:$0xff] }
0x3559   :  { %v6268_v28 = vpop.permute.xlu1 %6267 }
0x355a   :  { %v6280_v13 = vmul.f32 %v6278_v43, %v6268_v28  ;;  %v6683_v43 = vmin.f32 %v13368_v35, %v12734_v31  ;;  %v7332_v28 = vadd.f32 %v13025_v29, %v12812_v51 }
0x355c   :  { %v6284_v37 = vrot.slane %v6280_v13, %v12091_v41  ;;  %v6291_v38 = vrot.slane %v6280_v13, %v12125_v36  ;;  %v9733_v13 = vmul.f32 -1.442695, %v7332_v28 }
0x355e   :  { %6293 = vbcast.lane.b32.xlu1 %v6291_v38, 256  ;;  %6286 = vbcast.lane.b32.xlu0 %v6284_v37, 256  ;;  %11307 = vpow2.f32 %v9733_v13  ;;  %v13369_v38 = vld [vmem:[#allocation25_spill] sm:$0xff] }
0x3560   :  { %v11306_v54 = vpop.eup %11305 }
0x3561   :  { %v5963_v17 = vmul.f32 %v11306_v54, %v11300_v32  ;;  %v6682_v32 = vmin.f32 %v13367_v46, %v12729_v1 }
0x3562   :  { %6312 = vperm.xlu1 %11033, %v13073_v45  }
0x3566   :  { %11034 = vset.pattern.permute.xlu1 %v13366_v39 }
0x3568   :  { %v11308_v37 = vpop.eup %11307 }
0x35d0   :  { %v6294_v61 = vpop.permute.xlu1 %6293  ;;  %v6287_v55 = vpop.permute.xlu0 %6286 }
0x35d1   :  { %v6296_v42 = vmul.f32 %v13121_v15, %v6294_v61  ;;  %v6295_v5 = vmul.f32 %v13114_v8, %v6287_v55  ;;  %v7027_v61 = vadd.f32 %v13017_v50, %v13369_v38  ;;  %v7336_v55 = vadd.f32 1.0, %v11308_v37 }
0x35d3   :  { %v6304_v3 = vsel %vm5214_vm12, %v6296_v42, 0.0  ;;  %v6297_v59 = vsel %vm5214_vm12, %v6295_v5, 0.0  ;;  %11309 = vrcp.f32 %v7336_v55  ;;  %v7030_v1 = vsel %vm4867_vm9, %v7027_v61, -inf }
0x35d4   :  { %v6305_v11 = vrot.slane %v6304_v3, 4  ;;  %v6298_v47 = vrot.slane %v6297_v59, 4 }
0x35d6   :  { %v6306_v40 = vadd.f32 %v6305_v11, %v6304_v3  ;;  %v6299_v52 = vadd.f32 %v6298_v47, %v6297_v59  ;;  %v11420_v59 = vmov 3  }
0x35d8   :  { %v6307_v21 = vrot.slane %v6306_v40, 2  ;;  %v6300_v63 = vrot.slane %v6299_v52, 2 }
0x35da   :  { %v6308_v49 = vadd.f32 %v6307_v21, %v6306_v40  ;;  %v6301_v22 = vadd.f32 %v6300_v63, %v6299_v52 }
0x35dc   :  { %v6309_v57 = vrot.slane %v6308_v49, 1  ;;  %v6302_v53 = vrot.slane %v6301_v22, 1 }
0x35dd   :  { %v11310_v42 = vpop.eup %11309 }
0x35de   :  { %v6310_v60 = vadd.f32 %v6309_v57, %v6308_v49  ;;  %v6303_v34 = vadd.f32 %v6302_v53, %v6301_v22  ;;  %v7339_v5 = vmax.f32 %v11310_v42, 0.001 }
0x35e0   :  { %v13183_v3 = vmin.f32 %v7339_v5, 0.999 }
0x35e1   :  { %v6313_v20 = vpop.permute.xlu1 %6312 }
0x35e2   :  { %vm6314_vm0 = vcmp.eq.s32.totalorder %v6313_v20, %v12112_v18  ;;  %v7341_v31 = vsub.f32 1.0, %v13183_v3 }
0x35e3   :  { %v9721_v10 = vsel %vm6314_vm0, 1.0, %v13361_v44 }
0x35e4   :  { %v6318_v24 = vrot.slane %v9721_v10, 1  ;;  %v6331_v16 = vmul.f32 %v9721_v10, %v5963_v17  ;;  %v6321_v9 = vmul.f32 %v9721_v10, %v6303_v34 }
0x35e6   :  { %v6322_v58 = vmul.f32 %v6318_v24, %v6310_v60  ;;  %v6332_v2 = vsel %vm4867_vm9, %v6331_v16, 0.0 }
0x35e7   :  { %6333 = vadd.xlane.f32.xlu0 %v6332_v2 }
0x35e8   :  { %v6325_v7 = vrot.slane %v6322_v58, 7 }
0x35ea   :  { %v6326_v6 = vsel %vm4368_vm4, %v6325_v7, %v6321_v9  ;;  %v13370_v7 = vld [vmem:[#allocation24_spill] sm:$0xff] }
0x35eb   :  { %v6328_v0 = vsel %vm5246_vm14, %v6326_v6, 0.0  ;;  %v7354_v6 = vrot.slane %v13370_v7, %v12116_v62 }
0x35ec   :  { %6329 = vadd.xlane.f32.xlu1 %v6328_v0  ;;  %v13371_v0 = vld [vmem:[#allocation23_spill] sm:$0xff] }
0x35ed   :  { %v7350_v46 = vrot.slane %v13371_v0, %v12116_v62  ;;  %v13374_v0 = vld [vmem:[#allocation27_spill] sm:$0xff] }
0x35fd   :  { %6687 = vperm.xlu0 %11032, %v6682_v32   ;;  %6342 = vrot.lane.b32.xlu1 %v13129_v48, %s11419_s16 }
0x3601   :  { %6690 = vperm.xlu1 %11034, %v6683_v43  }
0x361c   :  { %7031 = vmax.xlane.f32.xlu0 %v7030_v1 }
0x3632   :  { %7344 = vperm.xlu0 %11032, %v7341_v31  }
0x3636   :  { %11035 = vset.pattern.permute.xlu0 %v11420_v59 }
0x3637   :  { %7389 = vperm.xlu0 %11035, %v13073_v45  }
0x363b   :  { %11036 = vset.pattern.permute.xlu0 %v13366_v39 }
0x3674   :  { %v6334_v51 = vpop.xlane.xlu0 %6333 }
0x3675   :  { %v6335_v11 = vmul.f32 %v6334_v51, %v13150_v23 }
0x3679   :  { %v6330_v47 = vpop.xlane.xlu1 %6329 }
0x367a   :  { %v6336_v40 = vadd.f32 %v6335_v11, %v6330_v47 }
0x367c   :  { %v6337_v52 = vadd.f32 1e-12, %v6336_v40  ;;  %v6688_v63 = vpop.permute.xlu0 %6687 }
0x367d   :  { %v6343_v21 = vpop.permute.xlu1 %6342  ;;  %v6695_v22 = vrot.slane %v6688_v63, %v12116_v62 }
0x367e   :  { %11311 = vlog2.f32 %v6337_v52 }
0x3681   :  { %v6691_v49 = vpop.permute.xlu1 %6690 }
0x3682   :  { %v6699_v54 = vrot.slane %v6691_v49, %v12116_v62 }
0x3684   :  { %v6700_v57 = vsel %vm4368_vm4, %v6699_v54, %v6695_v22 }
0x3685   :  { %v6702_v20 = vsel %vm4371_vm5, %v6700_v57, 0.0 }
0x3686   :  { %6703 = vadd.xlane.f32.xlu1 %v6702_v20 }
0x3688   :  { %v11312_v53 = vpop.eup %11311 }
0x3689   :  { %v6339_v17 = vmul.f32 0.6931472, %v11312_v53 }
0x368b   :  { %v6340_v10 = vsub.f32 0.0, %v6339_v17 }
0x368d   :  { %v6341_v23 = vadd.f32 %v6340_v10, %v13153_v12  ;;  %v7355_v12 = vsel %vm4368_vm4, %v7354_v6, %v7350_v46  ;;  %v13373_v6 = vld [vmem:[#allocation28_spill] sm:$0xff] }
0x368e   :  { %v7760_v46 = vmin.f32 %v13374_v0, %v13373_v6 }
0x368f   :  { %v6345_v60 = vmul.f32 %v6343_v21, %v6341_v23 }
0x3691   :  { %v13195_v24 = vadd.f32 %v6345_v60, %v13148_v30 }
0x36a9   :  { %v7032_v16 = vpop.xlane.xlu0 %7031 }
0x36aa   :  { %v7033_v34 = vsub.f32 %v7027_v61, %v7032_v16 }
0x36ac   :  { %v7034_v58 = vmul.f32 1.442695, %v7033_v34 }
0x36ae   :  { %11313 = vpow2.f32 %v7034_v58 }
0x36b1   :  { %v7345_v32 = vpop.permute.xlu0 %7344 }
0x36b2   :  { %v7357_v35 = vmul.f32 %v7355_v12, %v7345_v32  ;;  %v8104_v32 = vadd.f32 %v13017_v50, %v12957_v19 }
0x36b4   :  { %v7361_v30 = vrot.slane %v7357_v35, %v12091_v41  ;;  %v7368_v43 = vrot.slane %v7357_v35, %v12125_v36  ;;  %v8107_v12 = vsel %vm4867_vm9, %v8104_v32, -inf }
0x36b6   :  { %v7390_v61 = vpop.permute.xlu0 %7389 }
0x36b7   :  { %vm7391_vm1 = vcmp.eq.s32.totalorder %v7390_v61, %v12112_v18 }
0x36b8   :  { %v11314_v2 = vpop.eup %11313  ;;  %v9734_v11 = vsel %vm7391_vm1, 1.0, %v13361_v44 }
0x36b9   :  { %v7036_v9 = vsel %vm4867_vm9, %v11314_v2, 0.0  ;;  %v7395_v23 = vrot.slane %v9734_v11, 1 }
0x36ba   :  { %7037 = vadd.xlane.f32.xlu1 %v7036_v9  ;;  %v13372_v9 = vld [vmem:[#allocation26_spill] sm:$0xff] }
0x36bb   :  { %v7759_v7 = vmin.f32 %v13372_v9, %v12869_v14  ;;  %v13376_v9 = vld [vmem:[#allocation29_spill] sm:$0xff] }
0x36cb   :  { %7363 = vbcast.lane.b32.xlu1 %v7361_v30, 256 }
0x36cf   :  { %7370 = vbcast.lane.b32.xlu1 %v7368_v43, 256 }
0x3713   :  { %v6704_v28 = vpop.xlane.xlu1 %6703 }
0x3747   :  { %v7038_v13 = vpop.xlane.xlu1 %7037 }
0x3748   :  { %11315 = vrcp.f32 %v7038_v13 }
0x374b   :  { %v7364_v37 = vpop.permute.xlu1 %7363 }
0x374c   :  { %v7372_v38 = vmul.f32 %v13114_v8, %v7364_v37 }
0x374e   :  { %v7374_v55 = vsel %vm5214_vm12, %v7372_v38, 0.0 }
0x374f   :  { %v7375_v1 = vrot.slane %v7374_v55, 4  ;;  %v7371_v42 = vpop.permute.xlu1 %7370 }
0x3750   :  { %v7373_v5 = vmul.f32 %v13121_v15, %v7371_v42 }
0x3751   :  { %v7376_v31 = vadd.f32 %v7375_v1, %v7374_v55 }
0x3752   :  { %v11316_v59 = vpop.eup %11315  ;;  %v7381_v51 = vsel %vm5214_vm12, %v7373_v5, 0.0 }
0x3753   :  { %v7377_v47 = vrot.slane %v7376_v31, 2  ;;  %v7382_v40 = vrot.slane %v7381_v51, 4  ;;  %v7040_v52 = vmul.f32 %v11316_v59, %v11314_v2 }
0x3755   :  { %v7378_v21 = vadd.f32 %v7377_v47, %v7376_v31  ;;  %v7383_v63 = vadd.f32 %v7382_v40, %v7381_v51  ;;  %v7408_v49 = vmul.f32 %v9734_v11, %v7040_v52  ;;  %v8409_v40 = vadd.f32 %v13025_v29, %v12959_v25 }
0x3756   :  { %v11422_v25 = vmov 4  }
0x3757   :  { %v7384_v22 = vrot.slane %v7383_v63, 2  ;;  %v7409_v54 = vsel %vm4867_vm9, %v7408_v49, 0.0  ;;  %v7379_v57 = vrot.slane %v7378_v21, 1  ;;  %v9746_v52 = vmul.f32 -1.442695, %v8409_v40 }
0x3758   :  { %7410 = vadd.xlane.f32.xlu0 %v7409_v54 }
0x3759   :  { %v7385_v20 = vadd.f32 %v7384_v22, %v7383_v63  ;;  %v7380_v10 = vadd.f32 %v7379_v57, %v7378_v21 }
0x375b   :  { %v7386_v53 = vrot.slane %v7385_v20, 1  ;;  %v7398_v16 = vmul.f32 %v9734_v11, %v7380_v10  ;;  %v9477_v10 = vadd.f32 %v13025_v29, %v13140_v26 }
0x375d   :  { %v7387_v17 = vadd.f32 %v7386_v53, %v7385_v20 }
0x375f   :  { %v7399_v60 = vmul.f32 %v7395_v23, %v7387_v17  ;;  %v9759_v23 = vmul.f32 -1.442695, %v9477_v10 }
0x3761   :  { %v7402_v34 = vrot.slane %v7399_v60, 7 }
0x3763   :  { %v7403_v58 = vsel %vm4368_vm4, %v7402_v34, %v7398_v16 }
0x3764   :  { %v7405_v2 = vsel %vm5246_vm14, %v7403_v58, 0.0  ;;  %v13375_v58 = vld [vmem:[#allocation30_spill] sm:$0xff] }
0x3765   :  { %7406 = vadd.xlane.f32.xlu1 %v7405_v2  ;;  %v8431_v2 = vrot.slane %v13375_v58, %v12116_v62 }
0x376e   :  { %7764 = vperm.xlu0 %11036, %v7759_v7   ;;  %v8427_v7 = vrot.slane %v13376_v9, %v12116_v62 }
0x3776   :  { %7419 = vrot.lane.b32.xlu1 %v13129_v48, %s11421_s18 }
0x377a   :  { %7767 = vperm.xlu1 %11034, %v7760_v46   ;;  %v8432_v46 = vsel %vm4368_vm4, %v8431_v2, %v8427_v7  ;;  %v8835_v2 = vadd.f32 %v13006_v27, %v13373_v6 }
0x377c   :  { %v8837_v9 = vmin.f32 %v13006_v27, %v8835_v2 }
0x378d   :  { %8108 = vmax.xlane.f32.xlu0 %v8107_v12 }
0x37e5   :  { %v7411_v35 = vpop.xlane.xlu0 %7410 }
0x37e6   :  { %v7412_v30 = vmul.f32 %v7411_v35, %v13183_v3 }
0x37ed   :  { %v7765_v61 = vpop.permute.xlu0 %7764 }
0x37ee   :  { %v7772_v1 = vrot.slane %v7765_v61, %v12116_v62 }
0x37f2   :  { %v7407_v43 = vpop.xlane.xlu1 %7406 }
0x37f3   :  { %v7413_v13 = vadd.f32 %v7412_v30, %v7407_v43 }
0x37f5   :  { %v7414_v37 = vadd.f32 1e-12, %v7413_v13 }
0x37f6   :  { %v7420_v38 = vpop.permute.xlu1 %7419 }
0x37f7   :  { %11317 = vlog2.f32 %v7414_v37  ;;  %v9176_v37 = vadd.f32 %v13017_v50, %v13136_v56 }
0x37f8   :  { %11319 = vpow2.f32 %v9746_v52 }
0x37fa   :  { %v7768_v55 = vpop.permute.xlu1 %7767 }
0x37fb   :  { %v7776_v42 = vrot.slane %v7768_v55, %v12116_v62 }
0x37fd   :  { %v7777_v5 = vsel %vm4368_vm4, %v7776_v42, %v7772_v1 }
0x37fe   :  { %v7779_v19 = vsel %vm4371_vm5, %v7777_v5, 0.0 }
0x37ff   :  { %7780 = vadd.xlane.f32.xlu1 %v7779_v19 }
0x3801   :  { %v11318_v31 = vpop.eup %11317 }
0x3802   :  { %v7416_v59 = vmul.f32 0.6931472, %v11318_v31  ;;  %v11320_v22 = vpop.eup %11319 }
0x3803   :  { %v8413_v54 = vadd.f32 1.0, %v11320_v22 }
0x3804   :  { %v7417_v51 = vsub.f32 0.0, %v7416_v59 }
0x3806   :  { %v7418_v3 = vadd.f32 %v7417_v51, %v6704_v28 }
0x3808   :  { %v7422_v11 = vmul.f32 %v7420_v38, %v7418_v3  ;;  %v9179_v38 = vsel %vm4867_vm9, %v9176_v37, -inf }
0x380a   :  { %v13228_v47 = vadd.f32 %v7422_v11, %v13195_v24 }
0x381a   :  { %v8109_v21 = vpop.xlane.xlu0 %8108 }
0x381b   :  { %v8110_v63 = vsub.f32 %v8104_v32, %v8109_v21 }
0x381d   :  { %v8111_v49 = vmul.f32 1.442695, %v8110_v63 }
0x381f   :  { %11321 = vpow2.f32 %v8111_v49 }
0x3820   :  { %11323 = vrcp.f32 %v8413_v54 }
0x3821   :  { %11325 = vpow2.f32 %v9759_v23 }
0x3829   :  { %v11322_v57 = vpop.eup %11321 }
0x382a   :  { %v8113_v20 = vsel %vm4867_vm9, %v11322_v57, 0.0  ;;  %v11324_v28 = vpop.eup %11323 }
0x382b   :  { %8114 = vadd.xlane.f32.xlu1 %v8113_v20  ;;  %v8416_v53 = vmax.f32 %v11324_v28, 0.001  ;;  %v11326_v60 = vpop.eup %11325 }
0x382c   :  { %v9481_v16 = vadd.f32 1.0, %v11326_v60 }
0x382d   :  { %v13233_v24 = vmin.f32 %v8416_v53, 0.999 }
0x382e   :  { %11327 = vrcp.f32 %v9481_v16 }
0x382f   :  { %v8418_v17 = vsub.f32 1.0, %v13233_v24 }
0x3838   :  { %v11328_v12 = vpop.eup %11327 }
0x3839   :  { %v9484_v30 = vmax.f32 %v11328_v12, 0.001 }
0x383b   :  { %v13247_v43 = vmin.f32 %v9484_v30, 0.999 }
0x383c   :  { %8421 = vperm.xlu1 %11034, %v8418_v17  }
0x383d   :  { %v9486_v13 = vsub.f32 1.0, %v13247_v43 }
0x3840   :  { %11037 = vset.pattern.permute.xlu1 %v11422_v25 }
0x388c   :  { %v13238_v34 = vpop.xlane.xlu1 %7780 }
0x38b8   :  { %v8115_v0 = vpop.xlane.xlu1 %8114 }
0x38b9   :  { %11329 = vrcp.f32 %v8115_v0 }
0x38bc   :  { %v8422_v32 = vpop.permute.xlu1 %8421 }
0x38bd   :  { %v8434_v35 = vmul.f32 %v8432_v46, %v8422_v32  ;;  %v11424_v32 = vmov 5  }
0x38bf   :  { %v8438_v29 = vrot.slane %v8434_v35, %v12091_v41  ;;  %v8445_v26 = vrot.slane %v8434_v35, %v12125_v36 }
0x38c1   :  { %8447 = vbcast.lane.b32.xlu0 %v8445_v26, 256  ;;  %8440 = vbcast.lane.b32.xlu1 %v8438_v29, 256 }
0x38c3   :  { %v11330_v40 = vpop.eup %11329 }
0x38c4   :  { %v8117_v49 = vmul.f32 %v11330_v40, %v11322_v57  ;;  %v8834_v57 = vadd.f32 %v13004_v4, %v12869_v14 }
0x38c5   :  { %8466 = vperm.xlu1 %11037, %v13073_v45  }
0x38c6   :  { %v8836_v58 = vmin.f32 %v13004_v4, %v8834_v57 }
0x38c9   :  { %11038 = vset.pattern.permute.xlu1 %v13366_v39 }
0x38ca   :  { %9489 = vperm.xlu1 %11038, %v9486_v13  }
0x38e0   :  { %9180 = vmax.xlane.f32.xlu0 %v9179_v38 }
0x3933   :  { %v8448_v61 = vpop.permute.xlu0 %8447  ;;  %v8441_v55 = vpop.permute.xlu1 %8440 }
0x3934   :  { %v8450_v1 = vmul.f32 %v13121_v15, %v8448_v61  ;;  %v8449_v42 = vmul.f32 %v13114_v8, %v8441_v55 }
0x3936   :  { %v8458_v5 = vsel %vm5214_vm12, %v8450_v1, 0.0  ;;  %v8451_v19 = vsel %vm5214_vm12, %v8449_v42, 0.0 }
0x3937   :  { %v8459_v31 = vrot.slane %v8458_v5, 4  ;;  %v8452_v59 = vrot.slane %v8451_v19, 4 }
0x3939   :  { %v8460_v39 = vadd.f32 %v8459_v31, %v8458_v5  ;;  %v8453_v51 = vadd.f32 %v8452_v59, %v8451_v19 }
0x393b   :  { %v8461_v3 = vrot.slane %v8460_v39, 2  ;;  %v8454_v50 = vrot.slane %v8453_v51, 2 }
0x393d   :  { %v8462_v56 = vadd.f32 %v8461_v3, %v8460_v39  ;;  %v8455_v11 = vadd.f32 %v8454_v50, %v8453_v51 }
0x393f   :  { %v8463_v52 = vrot.slane %v8462_v56, 1  ;;  %v8456_v63 = vrot.slane %v8455_v11, 1 }
0x3941   :  { %v8464_v54 = vadd.f32 %v8463_v52, %v8462_v56  ;;  %v8457_v53 = vadd.f32 %v8456_v63, %v8455_v11 }
0x3944   :  { %v8467_v21 = vpop.permute.xlu1 %8466 }
0x3945   :  { %vm8468_vm2 = vcmp.eq.s32.totalorder %v8467_v21, %v12112_v18 }
0x3946   :  { %v9747_v22 = vsel %vm8468_vm2, 1.0, %v13361_v44 }
0x3947   :  { %v8472_v20 = vrot.slane %v9747_v22, 1  ;;  %v8485_v28 = vmul.f32 %v9747_v22, %v8117_v49  ;;  %v8475_v10 = vmul.f32 %v9747_v22, %v8457_v53 }
0x3949   :  { %v8476_v17 = vmul.f32 %v8472_v20, %v8464_v54  ;;  %v8486_v25 = vsel %vm4867_vm9, %v8485_v28, 0.0  ;;  %v9490_v12 = vpop.permute.xlu1 %9489 }
0x394a   :  { %8487 = vadd.xlane.f32.xlu0 %v8486_v25  ;;  %v9502_v6 = vmul.f32 %v13036_v33, %v9490_v12 }
0x394b   :  { %v8479_v23 = vrot.slane %v8476_v17, 7 }
0x394c   :  { %v9513_v35 = vrot.slane %v9502_v6, %v12125_v36  ;;  %v9506_v39 = vrot.slane %v9502_v6, %v12091_v41 }
0x394d   :  { %v8480_v60 = vsel %vm4368_vm4, %v8479_v23, %v8475_v10 }
0x394e   :  { %v8482_v16 = vsel %vm5246_vm14, %v8480_v60, 0.0 }
0x394f   :  { %8483 = vadd.xlane.f32.xlu1 %v8482_v16 }
0x3960   :  { %8841 = vperm.xlu0 %11036, %v8836_v58   ;;  %8496 = vrot.lane.b32.xlu1 %v13129_v48, %s11423_s22 }
0x3964   :  { %8844 = vperm.xlu1 %11038, %v8837_v9   ;;  %11040 = vset.pattern.permute.xlu0 %v11424_v32 }
0x3968   :  { %11039 = vset.pattern.permute.xlu1 %v11424_v32 }
0x396d   :  { %v9181_v7 = vpop.xlane.xlu0 %9180 }
0x396e   :  { %v9182_v0 = vsub.f32 %v9176_v37, %v9181_v7 }
0x3970   :  { %v9183_v46 = vmul.f32 1.442695, %v9182_v0 }
0x3972   :  { %11331 = vpow2.f32 %v9183_v46 }
0x397c   :  { %v11332_v14 = vpop.eup %11331 }
0x397d   :  { %v9185_v4 = vsel %vm4867_vm9, %v11332_v14, 0.0 }
0x397f   :  { %9186 = vadd.xlane.f32.xlu0 %v9185_v4 }
0x3995   :  { %9515 = vbcast.lane.b32.xlu0 %v9513_v35, 256 }
0x39d7   :  { %v8488_v29 = vpop.xlane.xlu0 %8487 }
0x39d8   :  { %v8489_v27 = vmul.f32 %v8488_v29, %v13233_v24 }
0x39dc   :  { %v8484_v26 = vpop.xlane.xlu1 %8483 }
0x39dd   :  { %v8490_v30 = vadd.f32 %v8489_v27, %v8484_v26 }
0x39df   :  { %v8491_v13 = vadd.f32 1e-12, %v8490_v30  ;;  %v8842_v38 = vpop.permute.xlu0 %8841 }
0x39e0   :  { %v8497_v37 = vpop.permute.xlu1 %8496  ;;  %v8849_v55 = vrot.slane %v8842_v38, %v12116_v62 }
0x39e1   :  { %11333 = vlog2.f32 %v8491_v13 }
0x39e4   :  { %v8845_v61 = vpop.permute.xlu1 %8844 }
0x39e5   :  { %v8853_v1 = vrot.slane %v8845_v61, %v12116_v62 }
0x39e7   :  { %v8854_v42 = vsel %vm4368_vm4, %v8853_v1, %v8849_v55 }
0x39e8   :  { %v8856_v33 = vsel %vm4371_vm5, %v8854_v42, 0.0  ;;  %vm9569_vm5 = vcmask 41984  }
0x39e9   :  { %8857 = vadd.xlane.f32.xlu1 %v8856_v33  ;;  %v9570_v23 = vsel %vm9569_vm5, %v13129_v48, 0.0 }
0x39eb   :  { %v11334_v36 = vpop.eup %11333 }
0x39ec   :  { %v8493_v5 = vmul.f32 0.6931472, %v11334_v36 }
0x39ee   :  { %v8494_v19 = vsub.f32 0.0, %v8493_v5 }
0x39f0   :  { %v8495_v24 = vadd.f32 %v8494_v19, %v13238_v34 }
0x39f2   :  { %v8499_v31 = vmul.f32 %v8497_v37, %v8495_v24 }
0x39f4   :  { %v8500_v59 = vadd.f32 %v8499_v31, %v13228_v47 }
0x39fa   :  { %9508 = vbcast.lane.b32.xlu1 %v9506_v39, 256 }
0x39fe   :  { %9534 = vperm.xlu1 %11039, %v13073_v45  }
0x3a0c   :  { %v9187_v51 = vpop.xlane.xlu0 %9186 }
0x3a0d   :  { %11335 = vrcp.f32 %v9187_v51 }
0x3a10   :  { %v9516_v62 = vpop.permute.xlu0 %9515 }
0x3a11   :  { %v9518_v3 = vmul.f32 %v13121_v15, %v9516_v62 }
0x3a13   :  { %v9526_v50 = vsel %vm5214_vm12, %v9518_v3, 0.0 }
0x3a14   :  { %v9527_v56 = vrot.slane %v9526_v50, 4 }
0x3a16   :  { %v9528_v11 = vadd.f32 %v9527_v56, %v9526_v50 }
0x3a17   :  { %v11336_v47 = vpop.eup %11335 }
0x3a18   :  { %v9529_v52 = vrot.slane %v9528_v11, 2  ;;  %v9189_v22 = vmul.f32 %v11336_v47, %v11332_v14 }
0x3a1a   :  { %v9530_v63 = vadd.f32 %v9529_v52, %v9528_v11 }
0x3a1c   :  { %v9531_v15 = vrot.slane %v9530_v63, 1 }
0x3a76   :  { %v8858_v40 = vpop.xlane.xlu1 %8857 }
0x3a7a   :  { %v9509_v34 = vpop.permute.xlu1 %9508 }
0x3a7b   :  { %v9517_v21 = vmul.f32 %v13114_v8, %v9509_v34  ;;  %v9532_v8 = vadd.f32 %v9531_v15, %v9530_v63 }
0x3a7d   :  { %v9519_v41 = vsel %vm5214_vm12, %v9517_v21, 0.0 }
0x3a7e   :  { %v9520_v49 = vrot.slane %v9519_v41, 4  ;;  %v9535_v45 = vpop.permute.xlu1 %9534 }
0x3a7f   :  { %vm9536_vm3 = vcmp.eq.s32.totalorder %v9535_v45, %v12112_v18 }
0x3a80   :  { %v9521_v54 = vadd.f32 %v9520_v49, %v9519_v41  ;;  %v9760_v20 = vsel %vm9536_vm3, 1.0, %v13361_v44 }
0x3a81   :  { %v9553_v28 = vmul.f32 %v9760_v20, %v9189_v22  ;;  %v9540_v17 = vrot.slane %v9760_v20, 1 }
0x3a82   :  { %v9522_v53 = vrot.slane %v9521_v54, 2 }
0x3a83   :  { %v9554_v25 = vsel %vm4867_vm9, %v9553_v28, 0.0  ;;  %v9544_v16 = vmul.f32 %v9540_v17, %v9532_v8 }
0x3a84   :  { %v9523_v10 = vadd.f32 %v9522_v53, %v9521_v54  ;;  %9555 = vadd.xlane.f32.xlu0 %v9554_v25 }
0x3a85   :  { %v9547_v58 = vrot.slane %v9544_v16, 7 }
0x3a86   :  { %v9524_v60 = vrot.slane %v9523_v10, 1 }
0x3a88   :  { %v9525_v57 = vadd.f32 %v9524_v60, %v9523_v10  ;;  %9571 = vadd.xlane.f32.xlu0 %v9570_v23 }
0x3a8a   :  { %v9543_v18 = vmul.f32 %v9760_v20, %v9525_v57 }
0x3a8c   :  { %v9548_v2 = vsel %vm4368_vm4, %v9547_v58, %v9543_v18  ;;  %vm9575_vm4 = vcmask 1024  }
0x3a8d   :  { %v9550_v44 = vsel %vm5246_vm14, %v9548_v2, 0.0 }
0x3a8e   :  { %9551 = vadd.xlane.f32.xlu1 %v9550_v44 }
0x3a9f   :  { %9564 = vrot.lane.b32.xlu1 %v13129_v48, %s11425_s23 }
0x3b11   :  { %v9556_v9 = vpop.xlane.xlu0 %9555 }
0x3b12   :  { %v9557_v7 = vmul.f32 %v9556_v9, %v13247_v43 }
0x3b15   :  { %v9572_v14 = vpop.xlane.xlu0 %9571 }
0x3b1b   :  { %v9552_v0 = vpop.xlane.xlu1 %9551 }
0x3b1c   :  { %v9558_v46 = vadd.f32 %v9557_v7, %v9552_v0 }
0x3b1e   :  { %v9559_v32 = vadd.f32 1e-12, %v9558_v46 }
0x3b1f   :  { %v9565_v35 = vpop.permute.xlu1 %9564 }
0x3b20   :  { %11337 = vlog2.f32 %v9559_v32 }
0x3b21   :  { %11339 = vrcp.f32 %v9572_v14 }
0x3b2a   :  { %v11338_v4 = vpop.eup %11337 }
0x3b2b   :  { %v9561_v12 = vmul.f32 0.6931472, %v11338_v4  ;;  %v11340_v26 = vpop.eup %11339 }
0x3b2d   :  { %v9562_v6 = vsub.f32 0.0, %v9561_v12 }
0x3b2f   :  { %v9563_v29 = vadd.f32 %v9562_v6, %v8858_v40 }
0x3b31   :  { %v9567_v27 = vmul.f32 %v9565_v35, %v9563_v29 }
0x3b33   :  { %v9568_v30 = vadd.f32 %v9567_v27, %v8500_v59 }
0x3b35   :  { %v9574_v13 = vmul.f32 %v11340_v26, %v9568_v30 }
0x3b37   :  { %v9576_v48 = vsel %vm9575_vm4, %v9574_v13, 0.0 }
0x3b38   :  { %v9577_v37 = vrot.slane %v9576_v48, 4 }
0x3b3a   :  { %v9578_v38 = vadd.f32 %v9577_v37, %v9576_v48 }
0x3b3c   :  { %v9579_v43 = vrot.slane %v9578_v38, 2 }
0x3b3e   :  { %v9580_v61 = vadd.f32 %v9579_v43, %v9578_v38 }
0x3b40   :  { %v9581_v55 = vrot.slane %v9580_v61, 1 }
0x3b42   :  { %v9582_v1 = vadd.f32 %v9581_v55, %v9580_v61 }
0x3b44   :  { %v9584_v42 = vmul.f32 0.5, %v9582_v1 }
0x3b46   :  { %9586 = vst.msk [vmem:[#allocation5] sm:$0x1] %vm9585_vm6, %v9584_v42 }
0x3b47   :  { %11363 = shalt.err (!%p11360_p4)
}
0x3b48   :  { %s11364_s10 = scalar_lea.hbm %s11583_s17, 16 }
0x3b49   :  { %p11365_p5 = scmp.ne.s32.totalorder %s11583_s17, %s11364_s10  ;;  %p11368_p6 = scmp.lt.u32.totalorder %s11364_s10, %s11583_s17 }
0x3b4b   :  { %p11370_p7 = pnand %p11368_p6, %p11365_p5 }
0x3b4d   :  { %11373 = shalt.err (!%p11370_p7)
}
0x3b4e   :  { %9596 = dma.vmem_to_hbm [thread:$0]  %s9594_s28, 16, %s11583_s17, [#allocation6]  }
0x3b4f   :  { %11374 = dma.done.wait [#allocation6], 16  }
0x3b50   :  { %11375 = vsyncadd [#allocation6], 4294967280 }
0x3b51   :  { %9600 = vsyncpa [#allocation6], 1 }

</bundles_post_ra>
